<compile_context>
chip_gen: v5e
topology: v5e:2x2
jax: 0.10.0
libtpu: 0.0.40
codegen_flags: <defaults>
</compile_context>

<pallas_src>
import functools

import jax
import jax.numpy as jnp
from jax.experimental import pallas as pl
from jax.experimental.pallas import tpu as pltpu


_W_ALIGN = 16          # output-width alignment: keeps bf16 reshapes tile-exact
_M_TARGET = 256        # target M (= rows * padded width) per MXU dot


def _round_up(v, m):
    return ((v + m - 1) // m) * m


def _conv_out(size, k, stride, pad):
    return (size + 2 * pad - k) // stride + 1


def _pick_rows(ho, w8, target=_M_TARGET):
    """Largest divisor R of `ho` such that R * w8 <= target (always >= 1)."""
    best = 1
    for r in range(1, ho + 1):
        if ho % r == 0 and r * w8 <= max(w8, target):
            best = r
    return best


def _space_to_depth2(x, pad):
    """Pad spatially by `pad`, then fold the 2x2 stride phases into channels.

    out[n, i, j, (2*dh + dw)*C + c] = x_padded[n, 2*i + dh, 2*j + dw, c]   (zero when OOB)
    """
    n, h, w, c = x.shape
    x = jnp.pad(x, ((0, 0), (pad, pad), (pad, pad), (0, 0)))
    hp, wp = h + 2 * pad, w + 2 * pad
    hs, ws = (hp + 1) // 2, (wp + 1) // 2
    x = jnp.pad(x, ((0, 0), (0, 2 * hs - hp), (0, 2 * ws - wp), (0, 0)))
    x = x.reshape(n, hs, 2, ws, 2, c)
    x = jnp.transpose(x, (0, 1, 3, 2, 4, 5))
    return x.reshape(n, hs, ws, 4 * c)


# ----------------------------------------------------------------------------
# Pallas kernels
# ----------------------------------------------------------------------------
def _conv_body(x_ref, w_ref, b_ref, r_ref, o_ref, acc_ref, *, rows, relu):
    # x_ref  : (1, Hin, Win, Cin)   bf16, whole (padded / s2d) image, resident per image
    # w_ref  : (th, tw, Cin, Cout)  bf16, BN scale folded, resident
    # b_ref  : (1, Cout)            f32 folded BN bias, resident
    # r_ref  : (1, rows, W8, Cout)  bf16 residual (optional)
    # o_ref  : (1, rows, W8, Cout)  bf16, `rows` output rows per grid step
    # acc_ref: (rows*W8, Cout)      f32 VMEM accumulator
    th, tw = w_ref.shape[0], w_ref.shape[1]
    cin = x_ref.shape[3]
    _, _, w8, cout = o_ref.shape
    m = rows * w8
    r0 = pl.program_id(1) * rows

    first = True
    for ki in range(th):
        for kj in range(tw):
            patch = x_ref[0, pl.ds(r0 + ki, rows), pl.ds(kj, w8), :]   # (rows, W8, Cin)
            patch = patch.reshape(m, cin)                              # tile-exact (W8 % 16 == 0)
            d = jnp.dot(patch, w_ref[ki, kj], preferred_element_type=jnp.float32)
            if first:
                acc_ref[...] = d
                first = False
            else:
                acc_ref[...] += d

    y = acc_ref[...] + b_ref[...]
    if r_ref is not None:
        y = y + r_ref[...].astype(jnp.float32).reshape(m, cout)
    if relu:
        y = jnp.maximum(y, 0.0)
    o_ref[...] = y.reshape(1, rows, w8, cout).astype(o_ref.dtype)


def _conv_kernel(x_ref, w_ref, b_ref, o_ref, acc_ref, *, rows, relu):
    _conv_body(x_ref, w_ref, b_ref, None, o_ref, acc_ref, rows=rows, relu=relu)


def _conv_res_kernel(x_ref, w_ref, b_ref, r_ref, o_ref, acc_ref, *, rows, relu):
    _conv_body(x_ref, w_ref, b_ref, r_ref, o_ref, acc_ref, rows=rows, relu=relu)


def _maxpool_kernel(p00_ref, p01_ref, p10_ref, p11_ref, o_ref, *, rows):
    # 3x3 / stride-2 / pad-1 max pool expressed over the four 2x2 stride phases.
    w8 = o_ref.shape[2]
    r0 = pl.program_id(1) * rows
    m = None
    for dh, dw, ref in ((0, 0, p00_ref), (0, 1, p01_ref), (1, 0, p10_ref), (1, 1, p11_ref)):
        for qi in range(2 - dh):
            for qj in range(2 - dw):
                v = ref[0, pl.ds(r0 + qi, rows), pl.ds(qj, w8), :]
                m = v if m is None else jnp.maximum(m, v)
    o_ref[...] = m.reshape((1,) + m.shape)


# ----------------------------------------------------------------------------
# Wrappers
# ----------------------------------------------------------------------------
def _compiler_params():
    # With s2d the largest resident block is a few MiB, so the default scoped VMEM would
    # suffice; the raised limit only adds headroom for larger inputs (review #9).
    return pltpu.CompilerParams(
        dimension_semantics=("parallel", "parallel"),
        vmem_limit_bytes=48 * 1024 * 1024,
    )


def _direct_conv(x_in, p, ho, wo, relu, residual=None):
    """Stride-1 direct conv on an already padded / space-to-depth'd NHWC bf16 input."""
    n, hin, win, cin = x_in.shape
    w, b = p["w"], p["b"]
    th, tw, wcin, cout = w.shape
    assert cin == wcin, (cin, wcin)
    assert hin >= ho + th - 1, (hin, ho, th)

    w8 = _round_up(wo, _W_ALIGN)
    need_w = w8 + tw - 1
    if win < need_w:
        x_in = jnp.pad(x_in, ((0, 0), (0, 0), (0, need_w - win), (0, 0)))
        win = need_w

    rows = _pick_rows(ho, w8)
    grid = (n, ho // rows)

    in_specs = [
        pl.BlockSpec((1, hin, win, cin), lambda ni, ri: (ni, 0, 0, 0)),   # image, resident
        pl.BlockSpec((th, tw, cin, cout), lambda ni, ri: (0, 0, 0, 0)),   # folded weights
        pl.BlockSpec((1, cout), lambda ni, ri: (0, 0)),                   # folded BN bias
    ]
    args = [x_in, w, b]
    if residual is None:
        kernel = functools.partial(_conv_kernel, rows=rows, relu=relu)
    else:
        res = residual.astype(jnp.bfloat16)
        if res.shape[2] != w8:
            res = jnp.pad(res, ((0, 0), (0, 0), (0, w8 - res.shape[2]), (0, 0)))
        in_specs.append(pl.BlockSpec((1, rows, w8, cout), lambda ni, ri: (ni, ri, 0, 0)))
        args.append(res)
        kernel = functools.partial(_conv_res_kernel, rows=rows, relu=relu)

    out = pl.pallas_call(
        kernel,
        out_shape=jax.ShapeDtypeStruct((n, ho, w8, cout), jnp.bfloat16),
        grid=grid,
        in_specs=in_specs,
        out_specs=pl.BlockSpec((1, rows, w8, cout), lambda ni, ri: (ni, ri, 0, 0)),
        scratch_shapes=[pltpu.VMEM((rows * w8, cout), jnp.float32)],
        compiler_params=_compiler_params(),
    )(*args)
    if w8 != wo:
        out = out[:, :, :wo, :]     # drop the width-alignment columns (fused with next pad)
    return out


def maxpool_3x3_s2_p1(x):
    """nn.MaxPool2d(kernel_size=3, stride=2, padding=1) on NHWC bf16 (post-ReLU) input."""
    n, h, w, c = x.shape
    ho, wo = _conv_out(h, 3, 2, 1), _conv_out(w, 3, 2, 1)
    w8 = _round_up(wo, _W_ALIGN)
    # Input is post-ReLU (>= 0) so zero padding is equivalent to -inf padding for the max.
    xp = jnp.pad(x, ((0, 0), (1, 1), (1, 1), (0, 0)))
    hp, wp = h + 2, w + 2
    xp = jnp.pad(xp, ((0, 0), (0, hp % 2), (0, wp % 2), (0, 0)))
    phases = [xp[:, dh::2, dw::2, :] for dh in (0, 1) for dw in (0, 1)]
    ph = max(phases[0].shape[1], ho + 1)
    pw = max(phases[0].shape[2], w8 + 1)
    phases = [
        jnp.pad(pz, ((0, 0), (0, ph - pz.shape[1]), (0, pw - pz.shape[2]), (0, 0)))
        for pz in phases
    ]
    rows = _pick_rows(ho, w8)
    out = pl.pallas_call(
        functools.partial(_maxpool_kernel, rows=rows),
        out_shape=jax.ShapeDtypeStruct((n, ho, w8, c), x.dtype),
        grid=(n, ho // rows),
        in_specs=[pl.BlockSpec((1, ph, pw, c), lambda ni, ri: (ni, 0, 0, 0))] * 4,
        out_specs=pl.BlockSpec((1, rows, w8, c), lambda ni, ri: (ni, ri, 0, 0)),
        compiler_params=_compiler_params(),
    )(*phases)
    if w8 != wo:
        out = out[:, :, :wo, :]
    return out


# ----------------------------------------------------------------------------
# ResNet-18 trunk parameters (deterministic synthetic init, eval-mode BN folded)
# ----------------------------------------------------------------------------
def _init_conv_bn(key, kh, kw, cin, cout, kind):
    """Conv weight + eval-mode BN, folded.  kind: 's1' (stride 1), 's2' (stride 2 via
    space-to-depth), 'ds' (1x1 stride-2 downsample reusing the pad-1 s2d input)."""
    kconv, k2, k3, k4, k5 = jax.random.split(key, 5)
    fan_in = kh * kw * cin
    w = jax.random.normal(kconv, (kh, kw, cin, cout), jnp.float32) * jnp.sqrt(2.0 / fan_in)
    gamma = 1.0 + 0.1 * jax.random.normal(k2, (cout,), jnp.float32)
    beta = 0.05 * jax.random.normal(k3, (cout,), jnp.float32)
    mean = 0.05 * jax.random.normal(k4, (cout,), jnp.float32)
    var = 1.0 + 0.1 * jax.random.uniform(k5, (cout,), jnp.float32)
    scale = gamma / jnp.sqrt(var + 1e-5)          # eval-mode BN folding
    bias = beta - mean * scale
    w = w * scale                                 # fold BN scale into the weights

    if kind == "s1":
        wt = w                                    # (kh, kw, cin, cout)
    elif kind == "s2":
        th, tw = (kh + 1) // 2, (kw + 1) // 2
        wt = jnp.zeros((th, tw, 2, 2, cin, cout), jnp.float32)
        for dh in (0, 1):
            for dw in (0, 1):
                sub = w[dh::2, dw::2]
                wt = wt.at[: sub.shape[0], : sub.shape[1], dh, dw].set(sub)
        wt = wt.reshape(th, tw, 4 * cin, cout)
    else:  # "ds": x[2i, 2j] lives in phase (1,1) of the pad-1 space-to-depth tensor
        assert kh == kw == 1
        wt = jnp.zeros((1, 1, 4 * cin, cout), jnp.float32)
        wt = wt.at[0, 0, 3 * cin:, :].set(w[0, 0])
    return {"w": wt.astype(jnp.bfloat16), "b": bias.reshape(1, cout)}


def init_resnet18_params(key):
    keys = iter(jax.random.split(key, 32))
    params = {"conv1": _init_conv_bn(next(keys), 7, 7, 3, 64, kind="s2")}
    channels = [64, 64, 128, 256, 512]
    layers = []
    for li in range(4):
        cin, cout = channels[li], channels[li + 1]
        blocks = []
        for bi in range(2):
            stride = (1 if li == 0 else 2) if bi == 0 else 1
            bcin = cin if bi == 0 else cout
            block = {
                "stride": stride,
                "conv1": _init_conv_bn(next(keys), 3, 3, bcin, cout,
                                       kind="s2" if stride == 2 else "s1"),
                "conv2": _init_conv_bn(next(keys), 3, 3, cout, cout, kind="s1"),
            }
            if stride == 2:
                block["downsample"] = _init_conv_bn(next(keys), 1, 1, bcin, cout, kind="ds")
            blocks.append(block)
        layers.append(blocks)
    params["layers"] = layers
    return params


# ----------------------------------------------------------------------------
# Forward pass (matches ResNetConv.forward with n_blocks)
# ----------------------------------------------------------------------------
def basic_block(x, block):
    n, h, w, c = x.shape
    if block["stride"] == 1:
        ho, wo = h, w
        x_in = jnp.pad(x, ((0, 0), (1, 1), (1, 1), (0, 0)))
        out = _direct_conv(x_in, block["conv1"], ho, wo, relu=True)
        identity = x
    else:
        ho, wo = _conv_out(h, 3, 2, 1), _conv_out(w, 3, 2, 1)
        xs = _space_to_depth2(x, pad=1)
        out = _direct_conv(xs, block["conv1"], ho, wo, relu=True)
        # 1x1/s2 downsample reuses the same s2d tensor (phase (1,1) channel group).
        identity = _direct_conv(xs, block["downsample"], ho, wo, relu=False)
    # conv2 + bn2 + residual add + relu fused in one kernel call
    out_in = jnp.pad(out, ((0, 0), (1, 1), (1, 1), (0, 0)))
    return _direct_conv(out_in, block["conv2"], ho, wo, relu=True, residual=identity)


def resnet_conv_forward(x_nchw, params, n_blocks=4):
    x = jnp.transpose(x_nchw, (0, 2, 3, 1)).astype(jnp.bfloat16)   # NCHW -> NHWC, bf16
    n, h, w, _ = x.shape
    # conv1: 7x7 / stride 2 / pad 3  ->  4x4 stride-1 conv on the space-to-depth input.
    ho, wo = _conv_out(h, 7, 2, 3), _conv_out(w, 7, 2, 3)
    x = _direct_conv(_space_to_depth2(x, pad=3), params["conv1"], ho, wo, relu=True)
    x = maxpool_3x3_s2_p1(x)
    for li in range(min(n_blocks, 4)):
        for block in params["layers"][li]:
            x = basic_block(x, block)
    return jnp.transpose(x, (0, 3, 1, 2)).astype(jnp.float32)      # NHWC -> NCHW, f32


if __name__ == "__main__":
    key = jax.random.PRNGKey(0)
    kp, kx = jax.random.split(key)
    params = init_resnet18_params(kp)
    # PyTorch NCHW convention; ResNet conv1 requires 3 input channels.
    x = jax.random.normal(kx, (2, 3, 32, 32), jnp.float32)

    out = resnet_conv_forward(x, params, n_blocks=4)
    out = jax.block_until_ready(out)

    assert out.shape == (2, 512, 1, 1), out.shape
    assert out.dtype == jnp.float32
    assert bool(jnp.all(jnp.isfinite(out)))
    print("KERNEL_OK")
</pallas_src>

<mosaic_0001>
module attributes {stable_mosaic.version = 11 : i64} {
  func.func @_conv_kernel(%arg0: i32, %arg1: i32, %arg2: memref<1x19x19x12xbf16, #tpu.memory_space<vmem>>, %arg3: memref<4x4x12x64xbf16, #tpu.memory_space<vmem>>, %arg4: memref<1x64xf32, #tpu.memory_space<vmem>>, %arg5: memref<1x16x16x64xbf16, #tpu.memory_space<vmem>>, %arg6: memref<256x64xf32, #tpu.memory_space<vmem>>) attributes {dimension_semantics = [#tpu.dimension_semantics<parallel>, #tpu.dimension_semantics<parallel>], iteration_bounds = array<i64: 2, 1>, scalar_prefetch = 0 : i64, scratch_operands = 1 : i64, tpu.core_type = #tpu.core_type<tc>, window_params = [{transform_indices = @transform_0, window_bounds = array<i64: 1, 19, 19, 12>}, {pipeline_mode = #tpu.pipeline_mode<synchronous>, transform_indices = @transform_1, window_bounds = array<i64: 4, 4, 12, 64>}, {pipeline_mode = #tpu.pipeline_mode<synchronous>, transform_indices = @transform_2, window_bounds = array<i64: 1, 64>}, {transform_indices = @transform_3, window_bounds = array<i64: 1, 16, 16, 64>}]} {
    %c16_i32 = arith.constant 16 : i32
    %0 = arith.muli %arg1, %c16_i32 : i32
    %c0_i32 = arith.constant 0 : i32
    %1 = arith.addi %0, %c0_i32 : i32
    %c0 = arith.constant 0 : index
    %2 = arith.index_cast %1 : i32 to index
    %c0_0 = arith.constant 0 : index
    %c0_1 = arith.constant 0 : index
    %3 = vector.load %arg2[%c0, %2, %c0_0, %c0_1] : memref<1x19x19x12xbf16, #tpu.memory_space<vmem>>, vector<1x16x16x12xbf16>
    %4 = vector.shape_cast %3 : vector<1x16x16x12xbf16> to vector<16x16x12xbf16>
    %5 = vector.shape_cast %4 : vector<16x16x12xbf16> to vector<256x12xbf16>
    %c0_2 = arith.constant 0 : index
    %c0_3 = arith.constant 0 : index
    %c0_4 = arith.constant 0 : index
    %c0_5 = arith.constant 0 : index
    %6 = vector.load %arg3[%c0_2, %c0_3, %c0_4, %c0_5] : memref<4x4x12x64xbf16, #tpu.memory_space<vmem>>, vector<1x1x12x64xbf16>
    %7 = vector.shape_cast %6 : vector<1x1x12x64xbf16> to vector<12x64xbf16>
    %cst = arith.constant dense<0.000000e+00> : vector<256x64xf32>
    %8 = tpu.matmul %5, %7, %cst {dimension_numbers = #tpu.dot_dimension_numbers<[1], [0], [0], [1], [0, 0, 1, 1], [], []>} : vector<256x12xbf16>, vector<12x64xbf16>, vector<256x64xf32> -> vector<256x64xf32>
    %c0_6 = arith.constant 0 : index
    %c0_7 = arith.constant 0 : index
    %9 = vector.load %arg6[%c0_6, %c0_7] : memref<256x64xf32, #tpu.memory_space<vmem>>, vector<256x64xf32>
    tpu.vector_store %arg6[%c0_6, %c0_7], %8 {strides = array<i32>} : memref<256x64xf32, #tpu.memory_space<vmem>>, vector<256x64xf32>,
    %c0_i32_8 = arith.constant 0 : i32
    %10 = arith.addi %0, %c0_i32_8 : i32
    %c0_9 = arith.constant 0 : index
    %11 = arith.index_cast %10 : i32 to index
    %c1 = arith.constant 1 : index
    %c0_10 = arith.constant 0 : index
    %12 = vector.load %arg2[%c0_9, %11, %c1, %c0_10] : memref<1x19x19x12xbf16, #tpu.memory_space<vmem>>, vector<1x16x16x12xbf16>
    %13 = vector.shape_cast %12 : vector<1x16x16x12xbf16> to vector<16x16x12xbf16>
    %14 = vector.shape_cast %13 : vector<16x16x12xbf16> to vector<256x12xbf16>
    %c0_11 = arith.constant 0 : index
    %c1_12 = arith.constant 1 : index
    %c0_13 = arith.constant 0 : index
    %c0_14 = arith.constant 0 : index
    %15 = vector.load %arg3[%c0_11, %c1_12, %c0_13, %c0_14] : memref<4x4x12x64xbf16, #tpu.memory_space<vmem>>, vector<1x1x12x64xbf16>
    %16 = vector.shape_cast %15 : vector<1x1x12x64xbf16> to vector<12x64xbf16>
    %cst_15 = arith.constant dense<0.000000e+00> : vector<256x64xf32>
    %17 = tpu.matmul %14, %16, %cst_15 {dimension_numbers = #tpu.dot_dimension_numbers<[1], [0], [0], [1], [0, 0, 1, 1], [], []>} : vector<256x12xbf16>, vector<12x64xbf16>, vector<256x64xf32> -> vector<256x64xf32>
    %c0_16 = arith.constant 0 : index
    %c0_17 = arith.constant 0 : index
    %18 = vector.load %arg6[%c0_16, %c0_17] : memref<256x64xf32, #tpu.memory_space<vmem>>, vector<256x64xf32>
    %19 = arith.addf %18, %17 : vector<256x64xf32>
    %c0_18 = arith.constant 0 : index
    %c0_19 = arith.constant 0 : index
    %20 = vector.load %arg6[%c0_18, %c0_19] : memref<256x64xf32, #tpu.memory_space<vmem>>, vector<256x64xf32>
    tpu.vector_store %arg6[%c0_18, %c0_19], %19 {strides = array<i32>} : memref<256x64xf32, #tpu.memory_space<vmem>>, vector<256x64xf32>,
    %c0_i32_20 = arith.constant 0 : i32
    %21 = arith.addi %0, %c0_i32_20 : i32
    %c0_21 = arith.constant 0 : index
    %22 = arith.index_cast %21 : i32 to index
    %c2 = arith.constant 2 : index
    %c0_22 = arith.constant 0 : index
    %23 = vector.load %arg2[%c0_21, %22, %c2, %c0_22] : memref<1x19x19x12xbf16, #tpu.memory_space<vmem>>, vector<1x16x16x12xbf16>
    %24 = vector.shape_cast %23 : vector<1x16x16x12xbf16> to vector<16x16x12xbf16>
    %25 = vector.shape_cast %24 : vector<16x16x12xbf16> to vector<256x12xbf16>
    %c0_23 = arith.constant 0 : index
    %c2_24 = arith.constant 2 : index
    %c0_25 = arith.constant 0 : index
    %c0_26 = arith.constant 0 : index
    %26 = vector.load %arg3[%c0_23, %c2_24, %c0_25, %c0_26] : memref<4x4x12x64xbf16, #tpu.memory_space<vmem>>, vector<1x1x12x64xbf16>
    %27 = vector.shape_cast %26 : vector<1x1x12x64xbf16> to vector<12x64xbf16>
    %cst_27 = arith.constant dense<0.000000e+00> : vector<256x64xf32>
    %28 = tpu.matmul %25, %27, %cst_27 {dimension_numbers = #tpu.dot_dimension_numbers<[1], [0], [0], [1], [0, 0, 1, 1], [], []>} : vector<256x12xbf16>, vector<12x64xbf16>, vector<256x64xf32> -> vector<256x64xf32>
    %c0_28 = arith.constant 0 : index
    %c0_29 = arith.constant 0 : index
    %29 = vector.load %arg6[%c0_28, %c0_29] : memref<256x64xf32, #tpu.memory_space<vmem>>, vector<256x64xf32>
    %30 = arith.addf %29, %28 : vector<256x64xf32>
    %c0_30 = arith.constant 0 : index
    %c0_31 = arith.constant 0 : index
    %31 = vector.load %arg6[%c0_30, %c0_31] : memref<256x64xf32, #tpu.memory_space<vmem>>, vector<256x64xf32>
    tpu.vector_store %arg6[%c0_30, %c0_31], %30 {strides = array<i32>} : memref<256x64xf32, #tpu.memory_space<vmem>>, vector<256x64xf32>,
    %c0_i32_32 = arith.constant 0 : i32
    %32 = arith.addi %0, %c0_i32_32 : i32
    %c0_33 = arith.constant 0 : index
    %33 = arith.index_cast %32 : i32 to index
    %c3 = arith.constant 3 : index
    %c0_34 = arith.constant 0 : index
    %34 = vector.load %arg2[%c0_33, %33, %c3, %c0_34] : memref<1x19x19x12xbf16, #tpu.memory_space<vmem>>, vector<1x16x16x12xbf16>
    %35 = vector.shape_cast %34 : vector<1x16x16x12xbf16> to vector<16x16x12xbf16>
    %36 = vector.shape_cast %35 : vector<16x16x12xbf16> to vector<256x12xbf16>
    %c0_35 = arith.constant 0 : index
    %c3_36 = arith.constant 3 : index
    %c0_37 = arith.constant 0 : index
    %c0_38 = arith.constant 0 : index
    %37 = vector.load %arg3[%c0_35, %c3_36, %c0_37, %c0_38] : memref<4x4x12x64xbf16, #tpu.memory_space<vmem>>, vector<1x1x12x64xbf16>
    %38 = vector.shape_cast %37 : vector<1x1x12x64xbf16> to vector<12x64xbf16>
    %cst_39 = arith.constant dense<0.000000e+00> : vector<256x64xf32>
    %39 = tpu.matmul %36, %38, %cst_39 {dimension_numbers = #tpu.dot_dimension_numbers<[1], [0], [0], [1], [0, 0, 1, 1], [], []>} : vector<256x12xbf16>, vector<12x64xbf16>, vector<256x64xf32> -> vector<256x64xf32>
    %c0_40 = arith.constant 0 : index
    %c0_41 = arith.constant 0 : index
    %40 = vector.load %arg6[%c0_40, %c0_41] : memref<256x64xf32, #tpu.memory_space<vmem>>, vector<256x64xf32>
    %41 = arith.addf %40, %39 : vector<256x64xf32>
    %c0_42 = arith.constant 0 : index
    %c0_43 = arith.constant 0 : index
    %42 = vector.load %arg6[%c0_42, %c0_43] : memref<256x64xf32, #tpu.memory_space<vmem>>, vector<256x64xf32>
    tpu.vector_store %arg6[%c0_42, %c0_43], %41 {strides = array<i32>} : memref<256x64xf32, #tpu.memory_space<vmem>>, vector<256x64xf32>,
    %c1_i32 = arith.constant 1 : i32
    %43 = arith.addi %0, %c1_i32 : i32
    %c0_44 = arith.constant 0 : index
    %44 = arith.index_cast %43 : i32 to index
    %c0_45 = arith.constant 0 : index
    %c0_46 = arith.constant 0 : index
    %45 = vector.load %arg2[%c0_44, %44, %c0_45, %c0_46] : memref<1x19x19x12xbf16, #tpu.memory_space<vmem>>, vector<1x16x16x12xbf16>
    %46 = vector.shape_cast %45 : vector<1x16x16x12xbf16> to vector<16x16x12xbf16>
    %47 = vector.shape_cast %46 : vector<16x16x12xbf16> to vector<256x12xbf16>
    %c1_47 = arith.constant 1 : index
    %c0_48 = arith.constant 0 : index
    %c0_49 = arith.constant 0 : index
    %c0_50 = arith.constant 0 : index
    %48 = vector.load %arg3[%c1_47, %c0_48, %c0_49, %c0_50] : memref<4x4x12x64xbf16, #tpu.memory_space<vmem>>, vector<1x1x12x64xbf16>
    %49 = vector.shape_cast %48 : vector<1x1x12x64xbf16> to vector<12x64xbf16>
    %cst_51 = arith.constant dense<0.000000e+00> : vector<256x64xf32>
    %50 = tpu.matmul %47, %49, %cst_51 {dimension_numbers = #tpu.dot_dimension_numbers<[1], [0], [0], [1], [0, 0, 1, 1], [], []>} : vector<256x12xbf16>, vector<12x64xbf16>, vector<256x64xf32> -> vector<256x64xf32>
    %c0_52 = arith.constant 0 : index
    %c0_53 = arith.constant 0 : index
    %51 = vector.load %arg6[%c0_52, %c0_53] : memref<256x64xf32, #tpu.memory_space<vmem>>, vector<256x64xf32>
    %52 = arith.addf %51, %50 : vector<256x64xf32>
    %c0_54 = arith.constant 0 : index
    %c0_55 = arith.constant 0 : index
    %53 = vector.load %arg6[%c0_54, %c0_55] : memref<256x64xf32, #tpu.memory_space<vmem>>, vector<256x64xf32>
    tpu.vector_store %arg6[%c0_54, %c0_55], %52 {strides = array<i32>} : memref<256x64xf32, #tpu.memory_space<vmem>>, vector<256x64xf32>,
    %c1_i32_56 = arith.constant 1 : i32
    %54 = arith.addi %0, %c1_i32_56 : i32
    %c0_57 = arith.constant 0 : index
    %55 = arith.index_cast %54 : i32 to index
    %c1_58 = arith.constant 1 : index
    %c0_59 = arith.constant 0 : index
    %56 = vector.load %arg2[%c0_57, %55, %c1_58, %c0_59] : memref<1x19x19x12xbf16, #tpu.memory_space<vmem>>, vector<1x16x16x12xbf16>
    %57 = vector.shape_cast %56 : vector<1x16x16x12xbf16> to vector<16x16x12xbf16>
    %58 = vector.shape_cast %57 : vector<16x16x12xbf16> to vector<256x12xbf16>
    %c1_60 = arith.constant 1 : index
    %c1_61 = arith.constant 1 : index
    %c0_62 = arith.constant 0 : index
    %c0_63 = arith.constant 0 : index
    %59 = vector.load %arg3[%c1_60, %c1_61, %c0_62, %c0_63] : memref<4x4x12x64xbf16, #tpu.memory_space<vmem>>, vector<1x1x12x64xbf16>
    %60 = vector.shape_cast %59 : vector<1x1x12x64xbf16> to vector<12x64xbf16>
    %cst_64 = arith.constant dense<0.000000e+00> : vector<256x64xf32>
    %61 = tpu.matmul %58, %60, %cst_64 {dimension_numbers = #tpu.dot_dimension_numbers<[1], [0], [0], [1], [0, 0, 1, 1], [], []>} : vector<256x12xbf16>, vector<12x64xbf16>, vector<256x64xf32> -> vector<256x64xf32>
    %c0_65 = arith.constant 0 : index
    %c0_66 = arith.constant 0 : index
    %62 = vector.load %arg6[%c0_65, %c0_66] : memref<256x64xf32, #tpu.memory_space<vmem>>, vector<256x64xf32>
    %63 = arith.addf %62, %61 : vector<256x64xf32>
    %c0_67 = arith.constant 0 : index
    %c0_68 = arith.constant 0 : index
    %64 = vector.load %arg6[%c0_67, %c0_68] : memref<256x64xf32, #tpu.memory_space<vmem>>, vector<256x64xf32>
    tpu.vector_store %arg6[%c0_67, %c0_68], %63 {strides = array<i32>} : memref<256x64xf32, #tpu.memory_space<vmem>>, vector<256x64xf32>,
    %c1_i32_69 = arith.constant 1 : i32
    %65 = arith.addi %0, %c1_i32_69 : i32
    %c0_70 = arith.constant 0 : index
    %66 = arith.index_cast %65 : i32 to index
    %c2_71 = arith.constant 2 : index
    %c0_72 = arith.constant 0 : index
    %67 = vector.load %arg2[%c0_70, %66, %c2_71, %c0_72] : memref<1x19x19x12xbf16, #tpu.memory_space<vmem>>, vector<1x16x16x12xbf16>
    %68 = vector.shape_cast %67 : vector<1x16x16x12xbf16> to vector<16x16x12xbf16>
    %69 = vector.shape_cast %68 : vector<16x16x12xbf16> to vector<256x12xbf16>
    %c1_73 = arith.constant 1 : index
    %c2_74 = arith.constant 2 : index
    %c0_75 = arith.constant 0 : index
    %c0_76 = arith.constant 0 : index
    %70 = vector.load %arg3[%c1_73, %c2_74, %c0_75, %c0_76] : memref<4x4x12x64xbf16, #tpu.memory_space<vmem>>, vector<1x1x12x64xbf16>
    %71 = vector.shape_cast %70 : vector<1x1x12x64xbf16> to vector<12x64xbf16>
    %cst_77 = arith.constant dense<0.000000e+00> : vector<256x64xf32>
    %72 = tpu.matmul %69, %71, %cst_77 {dimension_numbers = #tpu.dot_dimension_numbers<[1], [0], [0], [1], [0, 0, 1, 1], [], []>} : vector<256x12xbf16>, vector<12x64xbf16>, vector<256x64xf32> -> vector<256x64xf32>
    %c0_78 = arith.constant 0 : index
    %c0_79 = arith.constant 0 : index
    %73 = vector.load %arg6[%c0_78, %c0_79] : memref<256x64xf32, #tpu.memory_space<vmem>>, vector<256x64xf32>
    %74 = arith.addf %73, %72 : vector<256x64xf32>
    %c0_80 = arith.constant 0 : index
    %c0_81 = arith.constant 0 : index
    %75 = vector.load %arg6[%c0_80, %c0_81] : memref<256x64xf32, #tpu.memory_space<vmem>>, vector<256x64xf32>
    tpu.vector_store %arg6[%c0_80, %c0_81], %74 {strides = array<i32>} : memref<256x64xf32, #tpu.memory_space<vmem>>, vector<256x64xf32>,
    %c1_i32_82 = arith.constant 1 : i32
    %76 = arith.addi %0, %c1_i32_82 : i32
    %c0_83 = arith.constant 0 : index
    %77 = arith.index_cast %76 : i32 to index
    %c3_84 = arith.constant 3 : index
    %c0_85 = arith.constant 0 : index
    %78 = vector.load %arg2[%c0_83, %77, %c3_84, %c0_85] : memref<1x19x19x12xbf16, #tpu.memory_space<vmem>>, vector<1x16x16x12xbf16>
    %79 = vector.shape_cast %78 : vector<1x16x16x12xbf16> to vector<16x16x12xbf16>
    %80 = vector.shape_cast %79 : vector<16x16x12xbf16> to vector<256x12xbf16>
    %c1_86 = arith.constant 1 : index
    %c3_87 = arith.constant 3 : index
    %c0_88 = arith.constant 0 : index
    %c0_89 = arith.constant 0 : index
    %81 = vector.load %arg3[%c1_86, %c3_87, %c0_88, %c0_89] : memref<4x4x12x64xbf16, #tpu.memory_space<vmem>>, vector<1x1x12x64xbf16>
    %82 = vector.shape_cast %81 : vector<1x1x12x64xbf16> to vector<12x64xbf16>
    %cst_90 = arith.constant dense<0.000000e+00> : vector<256x64xf32>
    %83 = tpu.matmul %80, %82, %cst_90 {dimension_numbers = #tpu.dot_dimension_numbers<[1], [0], [0], [1], [0, 0, 1, 1], [], []>} : vector<256x12xbf16>, vector<12x64xbf16>, vector<256x64xf32> -> vector<256x64xf32>
    %c0_91 = arith.constant 0 : index
    %c0_92 = arith.constant 0 : index
    %84 = vector.load %arg6[%c0_91, %c0_92] : memref<256x64xf32, #tpu.memory_space<vmem>>, vector<256x64xf32>
    %85 = arith.addf %84, %83 : vector<256x64xf32>
    %c0_93 = arith.constant 0 : index
    %c0_94 = arith.constant 0 : index
    %86 = vector.load %arg6[%c0_93, %c0_94] : memref<256x64xf32, #tpu.memory_space<vmem>>, vector<256x64xf32>
    tpu.vector_store %arg6[%c0_93, %c0_94], %85 {strides = array<i32>} : memref<256x64xf32, #tpu.memory_space<vmem>>, vector<256x64xf32>,
    %c2_i32 = arith.constant 2 : i32
    %87 = arith.addi %0, %c2_i32 : i32
    %c0_95 = arith.constant 0 : index
    %88 = arith.index_cast %87 : i32 to index
    %c0_96 = arith.constant 0 : index
    %c0_97 = arith.constant 0 : index
    %89 = vector.load %arg2[%c0_95, %88, %c0_96, %c0_97] : memref<1x19x19x12xbf16, #tpu.memory_space<vmem>>, vector<1x16x16x12xbf16>
    %90 = vector.shape_cast %89 : vector<1x16x16x12xbf16> to vector<16x16x12xbf16>
    %91 = vector.shape_cast %90 : vector<16x16x12xbf16> to vector<256x12xbf16>
    %c2_98 = arith.constant 2 : index
    %c0_99 = arith.constant 0 : index
    %c0_100 = arith.constant 0 : index
    %c0_101 = arith.constant 0 : index
    %92 = vector.load %arg3[%c2_98, %c0_99, %c0_100, %c0_101] : memref<4x4x12x64xbf16, #tpu.memory_space<vmem>>, vector<1x1x12x64xbf16>
    %93 = vector.shape_cast %92 : vector<1x1x12x64xbf16> to vector<12x64xbf16>
    %cst_102 = arith.constant dense<0.000000e+00> : vector<256x64xf32>
    %94 = tpu.matmul %91, %93, %cst_102 {dimension_numbers = #tpu.dot_dimension_numbers<[1], [0], [0], [1], [0, 0, 1, 1], [], []>} : vector<256x12xbf16>, vector<12x64xbf16>, vector<256x64xf32> -> vector<256x64xf32>
    %c0_103 = arith.constant 0 : index
    %c0_104 = arith.constant 0 : index
    %95 = vector.load %arg6[%c0_103, %c0_104] : memref<256x64xf32, #tpu.memory_space<vmem>>, vector<256x64xf32>
    %96 = arith.addf %95, %94 : vector<256x64xf32>
    %c0_105 = arith.constant 0 : index
    %c0_106 = arith.constant 0 : index
    %97 = vector.load %arg6[%c0_105, %c0_106] : memref<256x64xf32, #tpu.memory_space<vmem>>, vector<256x64xf32>
    tpu.vector_store %arg6[%c0_105, %c0_106], %96 {strides = array<i32>} : memref<256x64xf32, #tpu.memory_space<vmem>>, vector<256x64xf32>,
    %c2_i32_107 = arith.constant 2 : i32
    %98 = arith.addi %0, %c2_i32_107 : i32
    %c0_108 = arith.constant 0 : index
    %99 = arith.index_cast %98 : i32 to index
    %c1_109 = arith.constant 1 : index
    %c0_110 = arith.constant 0 : index
    %100 = vector.load %arg2[%c0_108, %99, %c1_109, %c0_110] : memref<1x19x19x12xbf16, #tpu.memory_space<vmem>>, vector<1x16x16x12xbf16>
    %101 = vector.shape_cast %100 : vector<1x16x16x12xbf16> to vector<16x16x12xbf16>
    %102 = vector.shape_cast %101 : vector<16x16x12xbf16> to vector<256x12xbf16>
    %c2_111 = arith.constant 2 : index
    %c1_112 = arith.constant 1 : index
    %c0_113 = arith.constant 0 : index
    %c0_114 = arith.constant 0 : index
    %103 = vector.load %arg3[%c2_111, %c1_112, %c0_113, %c0_114] : memref<4x4x12x64xbf16, #tpu.memory_space<vmem>>, vector<1x1x12x64xbf16>
    %104 = vector.shape_cast %103 : vector<1x1x12x64xbf16> to vector<12x64xbf16>
    %cst_115 = arith.constant dense<0.000000e+00> : vector<256x64xf32>
    %105 = tpu.matmul %102, %104, %cst_115 {dimension_numbers = #tpu.dot_dimension_numbers<[1], [0], [0], [1], [0, 0, 1, 1], [], []>} : vector<256x12xbf16>, vector<12x64xbf16>, vector<256x64xf32> -> vector<256x64xf32>
    %c0_116 = arith.constant 0 : index
    %c0_117 = arith.constant 0 : index
    %106 = vector.load %arg6[%c0_116, %c0_117] : memref<256x64xf32, #tpu.memory_space<vmem>>, vector<256x64xf32>
    %107 = arith.addf %106, %105 : vector<256x64xf32>
    %c0_118 = arith.constant 0 : index
    %c0_119 = arith.constant 0 : index
    %108 = vector.load %arg6[%c0_118, %c0_119] : memref<256x64xf32, #tpu.memory_space<vmem>>, vector<256x64xf32>
    tpu.vector_store %arg6[%c0_118, %c0_119], %107 {strides = array<i32>} : memref<256x64xf32, #tpu.memory_space<vmem>>, vector<256x64xf32>,
    %c2_i32_120 = arith.constant 2 : i32
    %109 = arith.addi %0, %c2_i32_120 : i32
    %c0_121 = arith.constant 0 : index
    %110 = arith.index_cast %109 : i32 to index
    %c2_122 = arith.constant 2 : index
    %c0_123 = arith.constant 0 : index
    %111 = vector.load %arg2[%c0_121, %110, %c2_122, %c0_123] : memref<1x19x19x12xbf16, #tpu.memory_space<vmem>>, vector<1x16x16x12xbf16>
    %112 = vector.shape_cast %111 : vector<1x16x16x12xbf16> to vector<16x16x12xbf16>
    %113 = vector.shape_cast %112 : vector<16x16x12xbf16> to vector<256x12xbf16>
    %c2_124 = arith.constant 2 : index
    %c2_125 = arith.constant 2 : index
    %c0_126 = arith.constant 0 : index
    %c0_127 = arith.constant 0 : index
    %114 = vector.load %arg3[%c2_124, %c2_125, %c0_126, %c0_127] : memref<4x4x12x64xbf16, #tpu.memory_space<vmem>>, vector<1x1x12x64xbf16>
    %115 = vector.shape_cast %114 : vector<1x1x12x64xbf16> to vector<12x64xbf16>
    %cst_128 = arith.constant dense<0.000000e+00> : vector<256x64xf32>
    %116 = tpu.matmul %113, %115, %cst_128 {dimension_numbers = #tpu.dot_dimension_numbers<[1], [0], [0], [1], [0, 0, 1, 1], [], []>} : vector<256x12xbf16>, vector<12x64xbf16>, vector<256x64xf32> -> vector<256x64xf32>
    %c0_129 = arith.constant 0 : index
    %c0_130 = arith.constant 0 : index
    %117 = vector.load %arg6[%c0_129, %c0_130] : memref<256x64xf32, #tpu.memory_space<vmem>>, vector<256x64xf32>
    %118 = arith.addf %117, %116 : vector<256x64xf32>
    %c0_131 = arith.constant 0 : index
    %c0_132 = arith.constant 0 : index
    %119 = vector.load %arg6[%c0_131, %c0_132] : memref<256x64xf32, #tpu.memory_space<vmem>>, vector<256x64xf32>
    tpu.vector_store %arg6[%c0_131, %c0_132], %118 {strides = array<i32>} : memref<256x64xf32, #tpu.memory_space<vmem>>, vector<256x64xf32>,
    %c2_i32_133 = arith.constant 2 : i32
    %120 = arith.addi %0, %c2_i32_133 : i32
    %c0_134 = arith.constant 0 : index
    %121 = arith.index_cast %120 : i32 to index
    %c3_135 = arith.constant 3 : index
    %c0_136 = arith.constant 0 : index
    %122 = vector.load %arg2[%c0_134, %121, %c3_135, %c0_136] : memref<1x19x19x12xbf16, #tpu.memory_space<vmem>>, vector<1x16x16x12xbf16>
    %123 = vector.shape_cast %122 : vector<1x16x16x12xbf16> to vector<16x16x12xbf16>
    %124 = vector.shape_cast %123 : vector<16x16x12xbf16> to vector<256x12xbf16>
    %c2_137 = arith.constant 2 : index
    %c3_138 = arith.constant 3 : index
    %c0_139 = arith.constant 0 : index
    %c0_140 = arith.constant 0 : index
    %125 = vector.load %arg3[%c2_137, %c3_138, %c0_139, %c0_140] : memref<4x4x12x64xbf16, #tpu.memory_space<vmem>>, vector<1x1x12x64xbf16>
    %126 = vector.shape_cast %125 : vector<1x1x12x64xbf16> to vector<12x64xbf16>
    %cst_141 = arith.constant dense<0.000000e+00> : vector<256x64xf32>
    %127 = tpu.matmul %124, %126, %cst_141 {dimension_numbers = #tpu.dot_dimension_numbers<[1], [0], [0], [1], [0, 0, 1, 1], [], []>} : vector<256x12xbf16>, vector<12x64xbf16>, vector<256x64xf32> -> vector<256x64xf32>
    %c0_142 = arith.constant 0 : index
    %c0_143 = arith.constant 0 : index
    %128 = vector.load %arg6[%c0_142, %c0_143] : memref<256x64xf32, #tpu.memory_space<vmem>>, vector<256x64xf32>
    %129 = arith.addf %128, %127 : vector<256x64xf32>
    %c0_144 = arith.constant 0 : index
    %c0_145 = arith.constant 0 : index
    %130 = vector.load %arg6[%c0_144, %c0_145] : memref<256x64xf32, #tpu.memory_space<vmem>>, vector<256x64xf32>
    tpu.vector_store %arg6[%c0_144, %c0_145], %129 {strides = array<i32>} : memref<256x64xf32, #tpu.memory_space<vmem>>, vector<256x64xf32>,
    %c3_i32 = arith.constant 3 : i32
    %131 = arith.addi %0, %c3_i32 : i32
    %c0_146 = arith.constant 0 : index
    %132 = arith.index_cast %131 : i32 to index
    %c0_147 = arith.constant 0 : index
    %c0_148 = arith.constant 0 : index
    %133 = vector.load %arg2[%c0_146, %132, %c0_147, %c0_148] : memref<1x19x19x12xbf16, #tpu.memory_space<vmem>>, vector<1x16x16x12xbf16>
    %134 = vector.shape_cast %133 : vector<1x16x16x12xbf16> to vector<16x16x12xbf16>
    %135 = vector.shape_cast %134 : vector<16x16x12xbf16> to vector<256x12xbf16>
    %c3_149 = arith.constant 3 : index
    %c0_150 = arith.constant 0 : index
    %c0_151 = arith.constant 0 : index
    %c0_152 = arith.constant 0 : index
    %136 = vector.load %arg3[%c3_149, %c0_150, %c0_151, %c0_152] : memref<4x4x12x64xbf16, #tpu.memory_space<vmem>>, vector<1x1x12x64xbf16>
    %137 = vector.shape_cast %136 : vector<1x1x12x64xbf16> to vector<12x64xbf16>
    %cst_153 = arith.constant dense<0.000000e+00> : vector<256x64xf32>
    %138 = tpu.matmul %135, %137, %cst_153 {dimension_numbers = #tpu.dot_dimension_numbers<[1], [0], [0], [1], [0, 0, 1, 1], [], []>} : vector<256x12xbf16>, vector<12x64xbf16>, vector<256x64xf32> -> vector<256x64xf32>
    %c0_154 = arith.constant 0 : index
    %c0_155 = arith.constant 0 : index
    %139 = vector.load %arg6[%c0_154, %c0_155] : memref<256x64xf32, #tpu.memory_space<vmem>>, vector<256x64xf32>
    %140 = arith.addf %139, %138 : vector<256x64xf32>
    %c0_156 = arith.constant 0 : index
    %c0_157 = arith.constant 0 : index
    %141 = vector.load %arg6[%c0_156, %c0_157] : memref<256x64xf32, #tpu.memory_space<vmem>>, vector<256x64xf32>
    tpu.vector_store %arg6[%c0_156, %c0_157], %140 {strides = array<i32>} : memref<256x64xf32, #tpu.memory_space<vmem>>, vector<256x64xf32>,
    %c3_i32_158 = arith.constant 3 : i32
    %142 = arith.addi %0, %c3_i32_158 : i32
    %c0_159 = arith.constant 0 : index
    %143 = arith.index_cast %142 : i32 to index
    %c1_160 = arith.constant 1 : index
    %c0_161 = arith.constant 0 : index
    %144 = vector.load %arg2[%c0_159, %143, %c1_160, %c0_161] : memref<1x19x19x12xbf16, #tpu.memory_space<vmem>>, vector<1x16x16x12xbf16>
    %145 = vector.shape_cast %144 : vector<1x16x16x12xbf16> to vector<16x16x12xbf16>
    %146 = vector.shape_cast %145 : vector<16x16x12xbf16> to vector<256x12xbf16>
    %c3_162 = arith.constant 3 : index
    %c1_163 = arith.constant 1 : index
    %c0_164 = arith.constant 0 : index
    %c0_165 = arith.constant 0 : index
    %147 = vector.load %arg3[%c3_162, %c1_163, %c0_164, %c0_165] : memref<4x4x12x64xbf16, #tpu.memory_space<vmem>>, vector<1x1x12x64xbf16>
    %148 = vector.shape_cast %147 : vector<1x1x12x64xbf16> to vector<12x64xbf16>
    %cst_166 = arith.constant dense<0.000000e+00> : vector<256x64xf32>
    %149 = tpu.matmul %146, %148, %cst_166 {dimension_numbers = #tpu.dot_dimension_numbers<[1], [0], [0], [1], [0, 0, 1, 1], [], []>} : vector<256x12xbf16>, vector<12x64xbf16>, vector<256x64xf32> -> vector<256x64xf32>
    %c0_167 = arith.constant 0 : index
    %c0_168 = arith.constant 0 : index
    %150 = vector.load %arg6[%c0_167, %c0_168] : memref<256x64xf32, #tpu.memory_space<vmem>>, vector<256x64xf32>
    %151 = arith.addf %150, %149 : vector<256x64xf32>
    %c0_169 = arith.constant 0 : index
    %c0_170 = arith.constant 0 : index
    %152 = vector.load %arg6[%c0_169, %c0_170] : memref<256x64xf32, #tpu.memory_space<vmem>>, vector<256x64xf32>
    tpu.vector_store %arg6[%c0_169, %c0_170], %151 {strides = array<i32>} : memref<256x64xf32, #tpu.memory_space<vmem>>, vector<256x64xf32>,
    %c3_i32_171 = arith.constant 3 : i32
    %153 = arith.addi %0, %c3_i32_171 : i32
    %c0_172 = arith.constant 0 : index
    %154 = arith.index_cast %153 : i32 to index
    %c2_173 = arith.constant 2 : index
    %c0_174 = arith.constant 0 : index
    %155 = vector.load %arg2[%c0_172, %154, %c2_173, %c0_174] : memref<1x19x19x12xbf16, #tpu.memory_space<vmem>>, vector<1x16x16x12xbf16>
    %156 = vector.shape_cast %155 : vector<1x16x16x12xbf16> to vector<16x16x12xbf16>
    %157 = vector.shape_cast %156 : vector<16x16x12xbf16> to vector<256x12xbf16>
    %c3_175 = arith.constant 3 : index
    %c2_176 = arith.constant 2 : index
    %c0_177 = arith.constant 0 : index
    %c0_178 = arith.constant 0 : index
    %158 = vector.load %arg3[%c3_175, %c2_176, %c0_177, %c0_178] : memref<4x4x12x64xbf16, #tpu.memory_space<vmem>>, vector<1x1x12x64xbf16>
    %159 = vector.shape_cast %158 : vector<1x1x12x64xbf16> to vector<12x64xbf16>
    %cst_179 = arith.constant dense<0.000000e+00> : vector<256x64xf32>
    %160 = tpu.matmul %157, %159, %cst_179 {dimension_numbers = #tpu.dot_dimension_numbers<[1], [0], [0], [1], [0, 0, 1, 1], [], []>} : vector<256x12xbf16>, vector<12x64xbf16>, vector<256x64xf32> -> vector<256x64xf32>
    %c0_180 = arith.constant 0 : index
    %c0_181 = arith.constant 0 : index
    %161 = vector.load %arg6[%c0_180, %c0_181] : memref<256x64xf32, #tpu.memory_space<vmem>>, vector<256x64xf32>
    %162 = arith.addf %161, %160 : vector<256x64xf32>
    %c0_182 = arith.constant 0 : index
    %c0_183 = arith.constant 0 : index
    %163 = vector.load %arg6[%c0_182, %c0_183] : memref<256x64xf32, #tpu.memory_space<vmem>>, vector<256x64xf32>
    tpu.vector_store %arg6[%c0_182, %c0_183], %162 {strides = array<i32>} : memref<256x64xf32, #tpu.memory_space<vmem>>, vector<256x64xf32>,
    %c3_i32_184 = arith.constant 3 : i32
    %164 = arith.addi %0, %c3_i32_184 : i32
    %c0_185 = arith.constant 0 : index
    %165 = arith.index_cast %164 : i32 to index
    %c3_186 = arith.constant 3 : index
    %c0_187 = arith.constant 0 : index
    %166 = vector.load %arg2[%c0_185, %165, %c3_186, %c0_187] : memref<1x19x19x12xbf16, #tpu.memory_space<vmem>>, vector<1x16x16x12xbf16>
    %167 = vector.shape_cast %166 : vector<1x16x16x12xbf16> to vector<16x16x12xbf16>
    %168 = vector.shape_cast %167 : vector<16x16x12xbf16> to vector<256x12xbf16>
    %c3_188 = arith.constant 3 : index
    %c3_189 = arith.constant 3 : index
    %c0_190 = arith.constant 0 : index
    %c0_191 = arith.constant 0 : index
    %169 = vector.load %arg3[%c3_188, %c3_189, %c0_190, %c0_191] : memref<4x4x12x64xbf16, #tpu.memory_space<vmem>>, vector<1x1x12x64xbf16>
    %170 = vector.shape_cast %169 : vector<1x1x12x64xbf16> to vector<12x64xbf16>
    %cst_192 = arith.constant dense<0.000000e+00> : vector<256x64xf32>
    %171 = tpu.matmul %168, %170, %cst_192 {dimension_numbers = #tpu.dot_dimension_numbers<[1], [0], [0], [1], [0, 0, 1, 1], [], []>} : vector<256x12xbf16>, vector<12x64xbf16>, vector<256x64xf32> -> vector<256x64xf32>
    %c0_193 = arith.constant 0 : index
    %c0_194 = arith.constant 0 : index
    %172 = vector.load %arg6[%c0_193, %c0_194] : memref<256x64xf32, #tpu.memory_space<vmem>>, vector<256x64xf32>
    %173 = arith.addf %172, %171 : vector<256x64xf32>
    %c0_195 = arith.constant 0 : index
    %c0_196 = arith.constant 0 : index
    %174 = vector.load %arg6[%c0_195, %c0_196] : memref<256x64xf32, #tpu.memory_space<vmem>>, vector<256x64xf32>
    tpu.vector_store %arg6[%c0_195, %c0_196], %173 {strides = array<i32>} : memref<256x64xf32, #tpu.memory_space<vmem>>, vector<256x64xf32>,
    %c0_197 = arith.constant 0 : index
    %c0_198 = arith.constant 0 : index
    %175 = vector.load %arg6[%c0_197, %c0_198] : memref<256x64xf32, #tpu.memory_space<vmem>>, vector<256x64xf32>
    %c0_199 = arith.constant 0 : index
    %c0_200 = arith.constant 0 : index
    %176 = vector.load %arg4[%c0_199, %c0_200] : memref<1x64xf32, #tpu.memory_space<vmem>>, vector<1x64xf32>
    %177 = vector.broadcast %176 : vector<1x64xf32> to vector<256x64xf32>
    %178 = arith.addf %175, %177 : vector<256x64xf32>
    %cst_201 = arith.constant 0.000000e+00 : f32
    %179 = vector.broadcast %cst_201 : f32 to vector<256x64xf32>
    %180 = arith.maximumf %178, %179 : vector<256x64xf32>
    %181 = vector.shape_cast %180 : vector<256x64xf32> to vector<1x16x16x64xf32>
    %182 = arith.truncf %181 : vector<1x16x16x64xf32> to vector<1x16x16x64xbf16>
    %c0_202 = arith.constant 0 : index
    %c0_203 = arith.constant 0 : index
    %c0_204 = arith.constant 0 : index
    %c0_205 = arith.constant 0 : index
    %183 = vector.load %arg5[%c0_202, %c0_203, %c0_204, %c0_205] : memref<1x16x16x64xbf16, #tpu.memory_space<vmem>>, vector<1x16x16x64xbf16>
    tpu.vector_store %arg5[%c0_202, %c0_203, %c0_204, %c0_205], %182 {strides = array<i32>} : memref<1x16x16x64xbf16, #tpu.memory_space<vmem>>, vector<1x16x16x64xbf16>,
    return
  }
  func.func @transform_0(%arg0: i32, %arg1: i32) -> (i32, i32, i32, i32) {
    %c0_i32 = arith.constant 0 : i32
    %c0_i32_0 = arith.constant 0 : i32
    %c0_i32_1 = arith.constant 0 : i32
    %c0_i32_2 = arith.constant 0 : i32
    return %arg0, %c0_i32, %c0_i32_0, %c0_i32_1 : i32, i32, i32, i32
  }
  func.func @transform_1(%arg0: i32, %arg1: i32) -> (i32, i32, i32, i32) {
    %c0_i32 = arith.constant 0 : i32
    %c0_i32_0 = arith.constant 0 : i32
    %c0_i32_1 = arith.constant 0 : i32
    %c0_i32_2 = arith.constant 0 : i32
    %c0_i32_3 = arith.constant 0 : i32
    return %c0_i32, %c0_i32_0, %c0_i32_1, %c0_i32_2 : i32, i32, i32, i32
  }
  func.func @transform_2(%arg0: i32, %arg1: i32) -> (i32, i32) {
    %c0_i32 = arith.constant 0 : i32
    %c0_i32_0 = arith.constant 0 : i32
    %c0_i32_1 = arith.constant 0 : i32
    return %c0_i32, %c0_i32_0 : i32, i32
  }
  func.func @transform_3(%arg0: i32, %arg1: i32) -> (i32, i32, i32, i32) {
    %c0_i32 = arith.constant 0 : i32
    %c0_i32_0 = arith.constant 0 : i32
    %c0_i32_1 = arith.constant 0 : i32
    return %arg0, %arg1, %c0_i32, %c0_i32_0 : i32, i32, i32, i32
  }
}

</mosaic_0001>

<bundles_post_ra>
// kernel: tpu_custom_call.1
= control target key start
LH: loop header
LB: loop body
LE: loop exit
PB: predicated region body
PF: predicated region fallthrough
CT: control target
= control target key end

     0   :  { %8 = vsyncpa [#allocation4], 0  ;;  %s15062_s0 = inlined_call_operand.vmem [shape: bf16[2,19,19,12], index: 0, kind: input, shape index: {}]   ;;  %s15063_s1 = inlined_call_operand.vmem [shape: bf16[4,4,12,64], index: 1, kind: input, shape index: {}]   ;;  %s15064_s2 = inlined_call_operand.vmem [shape: f32[1,64], index: 2, kind: input, shape index: {}]   ;;  %s15065_s3 = inlined_call_operand.hbm [shape: bf16[2,16,16,64], index: 3, kind: output, shape index: {}]  }
   0x1   :  { %10 = vsyncpa [#allocation4 + $0x1], 0  ;;  %s11344_s12 = smov 0   ;;  %s11346_s13 = smov 0  }
   0x2   :  { %s11348_s14 = smov 0   ;;  %s11350_s15 = smov 0  }
   0x3   :  { %s11352_s16 = smov 0   ;;  %s11354_s17 = smov 0  }
   0x4 LB: > { %s9891_s18 = sadd.s32 4294967295, %s11320_s17   ;;  %s9892_s19 = sadd.s32 4294967294, %s11320_s17   ;;  %s11320_s17 = sphi %s11354_s17, %s16_s17   ;;  %s11316_s16 = sphi %s11352_s16, %s15078_s16   ;;  %s11312_s15 = sphi %s11350_s15, %s15077_s15   ;;  %s11308_s14 = sphi %s11348_s14, %s15076_s14   ;;  %s11304_s13 = sphi %s11346_s13, %s15075_s13   ;;  %s11300_s12 = sphi %s11344_s12, %s15074_s12  }
   0x5   : > { %s28_s20 = sadd.s32 1, %s11316_s16  ;;  %s105_s21 = sadd.s32 1, %s11308_s14 }
   0x6   : > { %p30_p0 = scmp.ge.s32.totalorder %s28_s20, 2  ;;  %p115_p1 = scmp.ne.s32.totalorder %s11308_s14, %s11304_s13 }
   0x7   : > { %p116_p2 = scmp.eq.s32.totalorder %s9891_s18, 1  ;;  %p121_p3 = scmp.ne.s32.totalorder %s11304_s13, %s11300_s12 }
   0x8   : > { %s15080_s20 = smov (%p30_p0, %s28_s20), 0  ;;  %p122_p5 = scmp.eq.s32.totalorder %s9892_s19, 1 }
   0x9   : > { %p11384_p4 = por %p116_p2, %p115_p1  ;;  %s100_s23 = ssub.s32 %s11316_s16, %s15080_s20 }
   0xa   : > { %p9895_p6 = scmp.ge.s32.totalorder %s11320_s17, 1  ;;  %p103_p7 = scmp.eq.s32.totalorder %s100_s23, 0 }
   0xb   : > { %p11391_p8 = por %p122_p5, %p121_p3  ;;  %p154_p9 = scmp.lt.s32.totalorder %s11320_s17, 3 }
   0xc   : > { %s11397_s25 = scalar_select %p103_p7, %s11308_s14, %s105_s21  }
   0xd   : > { %p155_p10 = pnand %p9895_p6, %p154_p9 }
   0xe   : > { %p178_p11 = scmp.lt.s32.totalorder (!%p155_p10), %s11312_s15, 1  ;;  %s175_s4 = sand.u32 (!%p155_p10), 1, %s11304_s13  }
   0xf   : > { %158 = sbr.rel (%p155_p10) target bundleno = 1225 (0x4c9), region = 32  ;;  %s14552_s5 = sshll.u32 (!%p155_p10), %s175_s4, 7 }
  0x10   : > { %s11181_s9 = sshll.u32 (!%p155_p10), %s11312_s15, 7  ;;  %s11262_s29 = scalar_lea.hbm (!%p155_p10), %s15065_s3, 256 }
  0x11   : > { %s9800_s18 = scalar_lea.hbm (!%p155_p10), %s15065_s3, %s11181_s9 }
  0x12   : > { %s9803_s21 = sshll.u32 (!%p155_p10), %s9800_s18, 4  ;;  %s9804_s21 = int_to_ptr.hbm [resolvable:$true] %s9803_s21 }
  0x13   : > { %s11256_s23 = sshra.s32 (!%p155_p10), %s9804_s21, 4  ;;  %s11257_s23 = int_to_ptr.hbm [resolvable:$true] %s11256_s23 }
  0x14   : > { %v9964_v0 = vld [vmem:[%s15063_s1] sm:$0xf]  ;;  %v11117_v1 = vld [vmem:[%s15063_s1] sm:$0x30]  ;;  %vm357_vm0 = vcmask 1045504   ;;  %s179_s7 = scalar_select %p178_p11, %s11312_s15, 1 }
  0x15   : > { %v9965_v2 = vor.u32 %v11117_v1, %v9964_v0  ;;  %v10164_v3 = vld [vmem:[%s15063_s1 + $0x20] sm:$0xf]  ;;  %v11137_v4 = vld [vmem:[%s15063_s1 + $0x20] sm:$0x30]  ;;  %v10024_v6 = vld [vmem:[%s15063_s1 + $0x10] sm:$0xf]  ;;  %p11263_p1 = scmp.lt.s32.totalorder %s11257_s23, %s15065_s3 }
  0x16   : > { %v10165_v5 = vor.u32 %v11137_v4, %v10164_v3  ;;  %v11119_v7 = vld [vmem:[%s15063_s1 + $0x10] sm:$0x30]  ;;  %vm1306_vm1 = vcmask 1042432   ;;  %vm1307_vm2 = vcmask 1046532   ;;  %v9986_v10 = vld [vmem:[%s15063_s1 + $0x8] sm:$0xf] }
  0x17   : > { %v359_v8 = vsel %vm357_vm0, %v9965_v2, 0  ;;  %v10025_v9 = vor.u32 %v11119_v7, %v10024_v6  ;;  %v11118_v11 = vld [vmem:[%s15063_s1 + $0x8] sm:$0x30]  ;;  %s11182_s26 = smul.u32 228, %s179_s7  ;;  %vm531_vm3 = vsmask.f32 3328  ;;  %vm11441_vm6 = vmor %vm1306_vm1, %vm1307_vm2 }
  0x18   : > { %368 = vmatpush.bf16.msra.mxu0 %v359_v8  ;;  %v2677_v12 = vsel %vm357_vm0, %v10165_v5, 0  ;;  %v9987_v13 = vor.u32 %v11118_v11, %v9986_v10  ;;  %vm532_vm4 = vsmask.f32 7440  ;;  %v10234_v15 = vld [vmem:[%s15063_s1 + $0x28] sm:$0xf]  ;;  %vm308_vm5 = vcmask 97280  }
  0x19   : > { %v1526_v14 = vsel %vm357_vm0, %v10025_v9, 0  ;;  %v11138_v16 = vld [vmem:[%s15063_s1 + $0x28] sm:$0x30]  ;;  %s11437_s6 = scalar_lea.vmem %s15062_s0, %s11182_s26  ;;  %v10046_v19 = vld [vmem:[%s15063_s1 + $0x18] sm:$0xf]  ;;  %vm11477_vm9 = vmor %vm531_vm3, %vm532_vm4  ;;  %vm450_vm11 = vcmask 523264  }
  0x1a   : > { %1535 = vmatpush.bf16.msra.mxu2 %v1526_v14  ;;  %v1023_v18 = vsel %vm357_vm0, %v9987_v13, 0  ;;  %v11120_v20 = vld [vmem:[%s15063_s1 + $0x18] sm:$0x30]  ;;  %v11101_v21 = vld [vmem:[%s11437_s6] sm:$0xff]  ;;  %v1212_v24 = vld [vmem:[%s11437_s6 + $0x8] sm:$0x1]  ;;  %v10235_v28 = vor.u32 %v11138_v16, %v10234_v15 }
  0x1b   : > { %v1210_v22 = vld [vmem:[%s11437_s6] sm:$0xe]  ;;  %v1211_v23 = vld [vmem:[%s11437_s6 + $0x4] sm:$0xf]  ;;  %1032 = vmatpush.bf16.msra.mxu1 %v1023_v18  ;;  %9966 = vmatmul.msk.bf16.vlgmr.msra.gmra.mxu0 %vm308_vm5, %v11101_v21  ;;  %v1314_v29 = vrot.slane %v1212_v24, 5  ;;  %v10047_v33 = vor.u32 %v11120_v20, %v10046_v19  ;;  %vm9752_vm12 = vcmask 519168  }
  0x1c   : > { %2686 = vmatpush.bf16.msrb.mxu0 %v2677_v12  ;;  %v10004_v25 = vrot.slane %v1210_v22, 9  ;;  %v1311_v26 = vrot.slane %v1211_v23, 5  ;;  %v483_v27 = vld [vmem:[%s11437_s6] sm:$0xf]  ;;  %v484_v30 = vld [vmem:[%s11437_s6 + $0x4] sm:$0xf] }
  0x1d   : > { %v485_v31 = vld [vmem:[%s11437_s6 + $0x8] sm:$0x1]  ;;  %v535_v32 = vshrl.u32 %v483_v27, 16  ;;  %v538_v36 = vshll.u32 %v483_v27, 16  ;;  %v544_v37 = vshll.u32 %v484_v30, 16  ;;  %v548_v41 = vshrl.u32 %v484_v30, 16 }
  0x1e   : > { %v1312_v34 = vsel %vm11441_vm6, %v10004_v25, %v1311_v26  ;;  %v1313_v35 = vrot.slane %v1311_v26, 4  ;;  %v10320_v38 = vld [vmem:[%s15063_s1 + $0x30] sm:$0xf]  ;;  %v554_v42 = vshll.u32 %v485_v31, 16  ;;  %v11139_v43 = vld [vmem:[%s15063_s1 + $0x30] sm:$0x30] }
  0x1f   : > { %v1424_v39 = vunpack.c.l.b16 %v1312_v34  ;;  %v537_v40 = vrot.slane %v535_v32, 4  ;;  %v540_v45 = vrot.slane %v538_v36, 5  ;;  %v546_v46 = vrot.slane %v544_v37, 5  ;;  %v1713_v48 = vld [vmem:[%s11437_s6] sm:$0xe]  ;;  %v11102_v26 = vld [vmem:[%s11437_s6 + $0xc] sm:$0xff] }
  0x20   : > { %v1315_v44 = vsel %vm11441_vm6, %v1313_v35, %v1314_v29  ;;  %v3401_v47 = vsel %vm357_vm0, %v10235_v28, 0  ;;  %v550_v50 = vrot.slane %v548_v41, 4  ;;  %v556_v51 = vrot.slane %v554_v42, 5  ;;  %v1714_v53 = vld [vmem:[%s11437_s6 + $0x4] sm:$0xf]  ;;  %s14580_s7 = scalar_lea.vmem [#allocation3], %s14552_s5 }
  0x21   : > { %v1425_v49 = vunpack.c.l.b16 %v1315_v44  ;;  %3410 = vmatpush.bf16.msrb.mxu1 %v3401_v47  ;;  %v2317_v52 = vsel %vm357_vm0, %v10047_v33, 0  ;;  %v541_v54 = vor.u32 %v540_v45, %v537_v40  ;;  %v10321_v55 = vor.u32 %v11139_v43, %v10320_v38  ;;  %v1715_v56 = vld [vmem:[%s11437_s6 + $0x8] sm:$0x3]  ;;  %v1213_v62 = vld [vmem:[%s11437_s6 + $0xc] sm:$0xe]  ;;  %s9801_s19 = sshll.u32 %s14580_s7, 4  ;;  %s9802_s19 = int_to_ptr.vmem [resolvable:$true] %s9801_s19 }
  0x22   : > { %2326 = vmatpush.bf16.msra.mxu3 %v2317_v52  ;;  %vm1761_vm7 = vsmask.f32 2304  ;;  %vm1762_vm8 = vsmask.f32 6416  ;;  %v551_v59 = vor.u32 %v550_v50, %v546_v46  ;;  %v1765_v60 = vshrl.u32 %v1713_v48, 16  ;;  %s9786_s15 = scalar_lea.sflag [#allocation4], %s175_s4 }
  0x23   : > { %v1456_v57 = vpack.c.b16 %v1425_v49, %v1424_v39  ;;  %v1768_v61 = vshll.u32 %v1713_v48, 16  ;;  %v542_v63 = vrot.slane %v541_v54, 4  ;;  %v3901_v0 = vsel %vm357_vm0, %v10321_v55, 0  ;;  %v1214_v3 = vld [vmem:[%s11437_s6 + $0x10] sm:$0xf]  ;;  %vm11499_vm10 = vmor %vm1761_vm7, %vm1762_vm8  ;;  %s11258_s26 = scalar_lea.hbm %s11257_s23, 128 }
  0x24   : > { %v1774_v1 = vshrl.u32 %v1714_v53, 16  ;;  %v1777_v2 = vshll.u32 %v1714_v53, 16  ;;  %v1215_v4 = vld [vmem:[%s11437_s6 + $0x14] sm:$0x1]  ;;  %v552_v5 = vrot.slane %v551_v59, 4  ;;  %v1767_v6 = vrot.slane %v1765_v60, 5  ;;  %3910 = vmatpush.bf16.msrb.mxu2 %v3901_v0  ;;  %p11259_p12 = scmp.ne.s32.totalorder %s11257_s23, %s11258_s26  ;;  %p11264_p2 = scmp.lt.s32.totalorder %s11262_s29, %s11258_s26 }
  0x25   : > { %10026 = vmatmul.msk.bf16.vlgmr.msra.gmra.mxu2 %vm308_vm5, %v1456_v57  ;;  %v1770_v7 = vrot.slane %v1768_v61, 6  ;;  %v1784_v8 = vshrl.u32 %v1715_v56, 16  ;;  %v10390_v9 = vld [vmem:[%s15063_s1 + $0x38] sm:$0xf]  ;;  %v547_v10 = vsel %vm11477_vm9, %v542_v63, %v546_v46  ;;  %v1787_v13 = vshll.u32 %v1715_v56, 16 }
  0x26   : > { %v1776_v11 = vrot.slane %v1774_v1, 5  ;;  %v1779_v12 = vrot.slane %v1777_v2, 6  ;;  %v11140_v14 = vld [vmem:[%s15063_s1 + $0x38] sm:$0x30]  ;;  %v557_v15 = vsel %vm11477_vm9, %v552_v5, %v556_v51  ;;  %v921_v16 = vunpack.c.l.b16 %v547_v10  ;;  %v486_v20 = vld [vmem:[%s11437_s6 + $0xc] sm:$0xf]  ;;  %p11260_p13 = pnand %p11259_p12, %p11384_p4  ;;  %p11265_p3 = por %p11264_p2, %p11263_p1 }
  0x27   : > { %v1771_v18 = vor.u32 %v1770_v7, %v1767_v6  ;;  %v1786_v19 = vrot.slane %v1784_v8, 5  ;;  %v922_v21 = vunpack.c.l.b16 %v557_v15  ;;  %v1789_v24 = vrot.slane %v1787_v13, 6  ;;  %v487_v34 = vld [vmem:[%s11437_s6 + $0x10] sm:$0xf]  ;;  %v488_v40 = vld [vmem:[%s11437_s6 + $0x14] sm:$0x1] }
  0x28   : > { %v1780_v23 = vor.u32 %v1779_v12, %v1776_v11  ;;  %v10005_v25 = vrot.slane %v1213_v62, 9  ;;  %v1318_v28 = vrot.slane %v1214_v3, 5  ;;  %v1321_v29 = vrot.slane %v1215_v4, 5  ;;  %v1716_v41 = vld [vmem:[%s11437_s6 + $0xc] sm:$0xe]  ;;  %p11261_p0 = pneg %p11260_p13 }
  0x29   : > { %v1772_v27 = vrot.slane %v1771_v18, 4  ;;  %v10391_v30 = vor.u32 %v11140_v14, %v10390_v9  ;;  %v953_v31 = vpack.c.b16 %v922_v21, %v921_v16  ;;  %v1790_v33 = vor.u32 %v1789_v24, %v1786_v19  ;;  %v1717_v50 = vld [vmem:[%s11437_s6 + $0x10] sm:$0xf]  ;;  %v1718_v54 = vld [vmem:[%s11437_s6 + $0x14] sm:$0x3] }
  0x2a   : > { %v1782_v32 = vrot.slane %v1780_v23, 4  ;;  %v559_v35 = vshrl.u32 %v486_v20, 16  ;;  %v1319_v37 = vsel %vm11441_vm6, %v10005_v25, %v1318_v28  ;;  %v1320_v38 = vrot.slane %v1318_v28, 4  ;;  %v1216_v61 = vld [vmem:[%s11437_s6 + $0x18] sm:$0xe]  ;;  %p11266_p5 = pnand %p11265_p3, %p11261_p0 }
  0x2b   : > { %v1781_v36 = vsel %vm11499_vm10, %v1772_v27, %v1780_v23  ;;  %v4689_v39 = vsel %vm357_vm0, %v10391_v30, 0  ;;  %9988 = vmatmul.msk.bf16.vlgmr.msra.gmra.mxu1 %vm308_vm5, %v953_v31  ;;  %v1426_v44 = vunpack.c.l.b16 %v1319_v37  ;;  %9967 = vmatmul.msk.bf16.gmra.mxu0 %vm308_vm5, %v11102_v26  ;;  %v562_v48 = vshll.u32 %v486_v20, 16  ;;  %v1217_v6 = vld [vmem:[%s11437_s6 + $0x1c] sm:$0xf]  ;;  %v1218_v10 = vld [vmem:[%s11437_s6 + $0x20] sm:$0x1] }
  0x2c   : > { %v1791_v42 = vsel %vm11499_vm10, %v1782_v32, %v1790_v33  ;;  %v2215_v43 = vunpack.c.l.b16 %v1781_v36  ;;  %4698 = vmatpush.bf16.msrb.mxu3 %v4689_v39  ;;  %v561_v45 = vrot.slane %v559_v35, 4  ;;  %v1322_v47 = vsel %vm11441_vm6, %v1320_v38, %v1321_v29  ;;  %v489_v26 = vld [vmem:[%s11437_s6 + $0x18] sm:$0xf]  ;;  %v490_v31 = vld [vmem:[%s11437_s6 + $0x1c] sm:$0xf] }
  0x2d   : > { %v2216_v46 = vunpack.c.l.b16 %v1791_v42  ;;  %v568_v49 = vshll.u32 %v487_v34, 16  ;;  %v1427_v51 = vunpack.c.l.b16 %v1322_v47  ;;  %v572_v52 = vshrl.u32 %v487_v34, 16  ;;  %v491_v37 = vld [vmem:[%s11437_s6 + $0x20] sm:$0x1]  ;;  %v11103_v42 = vld [vmem:[%s11437_s6 + $0x18] sm:$0xff] }
  0x2e   : > { %v578_v53 = vshll.u32 %v488_v40, 16  ;;  %v1793_v55 = vshrl.u32 %v1716_v41, 16  ;;  %v564_v57 = vrot.slane %v562_v48, 5  ;;  %v1796_v60 = vshll.u32 %v1716_v41, 16  ;;  %v1719_v40 = vld [vmem:[%s11437_s6 + $0x18] sm:$0xe] }
  0x2f   : > { %v2247_v56 = vpack.c.b16 %v2216_v46, %v2215_v43  ;;  %v570_v59 = vrot.slane %v568_v49, 5  ;;  %v1457_v62 = vpack.c.b16 %v1427_v51, %v1426_v44  ;;  %v574_v63 = vrot.slane %v572_v52, 4 }
  0x30   : > { %v580_v0 = vrot.slane %v578_v53, 5  ;;  %v1795_v1 = vrot.slane %v1793_v55, 5  ;;  %v565_v2 = vor.u32 %v564_v57, %v561_v45  ;;  %v1798_v3 = vrot.slane %v1796_v60, 6 }
  0x31   : > { %10048 = vmatmul.msk.bf16.vlgmr.msra.gmra.mxu3 %vm308_vm5, %v2247_v56  ;;  %v1802_v4 = vshrl.u32 %v1717_v50, 16  ;;  %v1805_v5 = vshll.u32 %v1717_v50, 16  ;;  %v575_v7 = vor.u32 %v574_v63, %v570_v59  ;;  %v1812_v8 = vshrl.u32 %v1718_v54, 16  ;;  %v1720_v50 = vld [vmem:[%s11437_s6 + $0x1c] sm:$0xf] }
  0x32   : > { %v1815_v9 = vshll.u32 %v1718_v54, 16  ;;  %v10006_v11 = vrot.slane %v1216_v61, 9  ;;  %v566_v12 = vrot.slane %v565_v2, 4  ;;  %v1799_v13 = vor.u32 %v1798_v3, %v1795_v1  ;;  %v1721_v54 = vld [vmem:[%s11437_s6 + $0x20] sm:$0x3] }
  0x33   : > { %v1804_v14 = vrot.slane %v1802_v4, 5  ;;  %v1807_v15 = vrot.slane %v1805_v5, 6  ;;  %v576_v16 = vrot.slane %v575_v7, 4  ;;  %v1814_v18 = vrot.slane %v1812_v8, 5  ;;  %v1219_v61 = vld [vmem:[%s11437_s6 + $0x24] sm:$0xe] }
  0x34   : > { %v1817_v19 = vrot.slane %v1815_v9, 6  ;;  %v1325_v20 = vrot.slane %v1217_v6, 5  ;;  %v571_v21 = vsel %vm11477_vm9, %v566_v12, %v570_v59  ;;  %v1800_v23 = vrot.slane %v1799_v13, 4  ;;  %v1220_v2 = vld [vmem:[%s11437_s6 + $0x28] sm:$0xf] }
  0x35   : > { %10027 = vmatmul.msk.bf16.gmra.mxu2 %vm308_vm5, %v1457_v62  ;;  %v1808_v24 = vor.u32 %v1807_v15, %v1804_v14  ;;  %v1328_v25 = vrot.slane %v1218_v10, 5  ;;  %v581_v27 = vsel %vm11477_vm9, %v576_v16, %v580_v0  ;;  %v923_v28 = vunpack.c.l.b16 %v571_v21  ;;  %v1221_v7 = vld [vmem:[%s11437_s6 + $0x2c] sm:$0x1]  ;;  %v492_v12 = vld [vmem:[%s11437_s6 + $0x24] sm:$0xf] }
  0x36   : > { %v1818_v29 = vor.u32 %v1817_v19, %v1814_v18  ;;  %v1326_v30 = vsel %vm11441_vm6, %v10006_v11, %v1325_v20  ;;  %v924_v32 = vunpack.c.l.b16 %v581_v27  ;;  %v1327_v35 = vrot.slane %v1325_v20, 4 }
  0x37   : > { %v1809_v33 = vsel %vm11499_vm10, %v1800_v23, %v1808_v24  ;;  %v1810_v34 = vrot.slane %v1808_v24, 4  ;;  %v583_v38 = vshrl.u32 %v489_v26, 16  ;;  %v586_v39 = vshll.u32 %v489_v26, 16 }
  0x38   : > { %v2217_v36 = vunpack.c.l.b16 %v1809_v33  ;;  %v954_v41 = vpack.c.b16 %v924_v32, %v923_v28  ;;  %v1329_v44 = vsel %vm11441_vm6, %v1327_v35, %v1328_v25  ;;  %v592_v45 = vshll.u32 %v490_v31, 16 }
  0x39   : > { %v1819_v43 = vsel %vm11499_vm10, %v1810_v34, %v1818_v29  ;;  %v1428_v47 = vunpack.c.l.b16 %v1326_v30  ;;  %v585_v48 = vrot.slane %v583_v38, 4  ;;  %v588_v49 = vrot.slane %v586_v39, 5  ;;  %v1722_v39 = vld [vmem:[%s11437_s6 + $0x24] sm:$0xe] }
  0x3a   : > { %v2218_v46 = vunpack.c.l.b16 %v1819_v43  ;;  %v594_v51 = vrot.slane %v592_v45, 5  ;;  %v596_v52 = vshrl.u32 %v490_v31, 16  ;;  %v602_v53 = vshll.u32 %v491_v37, 16  ;;  %v493_v31 = vld [vmem:[%s11437_s6 + $0x28] sm:$0xf] }
  0x3b   : > { %v1821_v55 = vshrl.u32 %v1719_v40, 16  ;;  %9989 = vmatmul.msk.bf16.gmra.mxu1 %vm308_vm5, %v954_v41  ;;  %v1429_v57 = vunpack.c.l.b16 %v1329_v44  ;;  %v589_v59 = vor.u32 %v588_v49, %v585_v48  ;;  %v1824_v60 = vshll.u32 %v1719_v40, 16  ;;  %9968 = vmatmul.msk.bf16.gmra.mxu0 %vm308_vm5, %v11103_v42  ;;  %v1723_v48 = vld [vmem:[%s11437_s6 + $0x28] sm:$0xf] }
  0x3c   : > { %v2248_v56 = vpack.c.b16 %v2218_v46, %v2217_v36  ;;  %v598_v62 = vrot.slane %v596_v52, 4  ;;  %v604_v63 = vrot.slane %v602_v53, 5  ;;  %v1830_v1 = vshrl.u32 %v1720_v50, 16  ;;  %v494_v36 = vld [vmem:[%s11437_s6 + $0x2c] sm:$0x1] }
  0x3d   : > { %v1823_v0 = vrot.slane %v1821_v55, 5  ;;  %v590_v3 = vrot.slane %v589_v59, 4  ;;  %v1826_v4 = vrot.slane %v1824_v60, 6  ;;  %v1833_v5 = vshll.u32 %v1720_v50, 16 }
  0x3e   : > { %v1840_v6 = vshrl.u32 %v1721_v54, 16  ;;  %v599_v8 = vor.u32 %v598_v62, %v594_v51  ;;  %v1832_v9 = vrot.slane %v1830_v1, 5  ;;  %v1843_v10 = vshll.u32 %v1721_v54, 16  ;;  %v11104_v54 = vld [vmem:[%s11437_s6 + $0x24] sm:$0xff] }
  0x3f   : > { %v10007_v11 = vrot.slane %v1219_v61, 9  ;;  %v1458_v13 = vpack.c.b16 %v1429_v57, %v1428_v47  ;;  %v1827_v14 = vor.u32 %v1826_v4, %v1823_v0  ;;  %v1835_v15 = vrot.slane %v1833_v5, 6 }
  0x40   : > { %v1842_v16 = vrot.slane %v1840_v6, 5  ;;  %v595_v18 = vsel %vm11477_vm9, %v590_v3, %v594_v51  ;;  %v600_v19 = vrot.slane %v599_v8, 4  ;;  %v1845_v20 = vrot.slane %v1843_v10, 6  ;;  %v1724_v51 = vld [vmem:[%s11437_s6 + $0x2c] sm:$0x3] }
  0x41   : > { %10049 = vmatmul.msk.bf16.gmra.mxu3 %vm308_vm5, %v2248_v56  ;;  %v1332_v21 = vrot.slane %v1220_v2, 5  ;;  %v1828_v23 = vrot.slane %v1827_v14, 4  ;;  %v1836_v24 = vor.u32 %v1835_v15, %v1832_v9  ;;  %v1335_v25 = vrot.slane %v1221_v7, 5  ;;  %v1223_v8 = vld [vmem:[%s11437_s6 + $0x34] sm:$0xf] }
  0x42   : > { %v607_v26 = vshrl.u32 %v492_v12, 16  ;;  %v605_v27 = vsel %vm11477_vm9, %v600_v19, %v604_v63  ;;  %v1846_v28 = vor.u32 %v1845_v20, %v1842_v16  ;;  %v925_v32 = vunpack.c.l.b16 %v595_v18  ;;  %v495_v9 = vld [vmem:[%s11437_s6 + $0x30] sm:$0xf]  ;;  %v1224_v18 = vld [vmem:[%s11437_s6 + $0x38] sm:$0x1] }
  0x43   : > { %v11557_v29 = vsel %vm11441_vm6, %v10007_v11, %v1332_v21  ;;  %v1334_v30 = vrot.slane %v1332_v21, 4  ;;  %v926_v33 = vunpack.c.l.b16 %v605_v27  ;;  %v1837_v34 = vsel %vm11499_vm10, %v1828_v23, %v1836_v24  ;;  %v1222_v16 = vld [vmem:[%s11437_s6 + $0x30] sm:$0xe]  ;;  %v496_v23 = vld [vmem:[%s11437_s6 + $0x34] sm:$0xf] }
  0x44   : > { %v1838_v35 = vrot.slane %v1836_v24, 4  ;;  %v609_v37 = vrot.slane %v607_v26, 4  ;;  %v610_v38 = vshll.u32 %v492_v12, 16  ;;  %v2219_v41 = vunpack.c.l.b16 %v1837_v34 }
  0x45   : > { %10028 = vmatmul.msk.bf16.gmra.mxu2 %vm308_vm5, %v1458_v13  ;;  %v1430_v42 = vunpack.c.l.b16 %v11557_v29  ;;  %v616_v43 = vshll.u32 %v493_v31, 16  ;;  %v1336_v44 = vsel %vm11441_vm6, %v1334_v30, %v1335_v25  ;;  %v620_v46 = vshrl.u32 %v493_v31, 16  ;;  %v1725_v30 = vld [vmem:[%s11437_s6 + $0x30] sm:$0xe] }
  0x46   : > { %v1847_v40 = vsel %vm11499_vm10, %v1838_v35, %v1846_v28  ;;  %v612_v45 = vrot.slane %v610_v38, 5  ;;  %v626_v47 = vshll.u32 %v494_v36, 16  ;;  %v955_v49 = vpack.c.b16 %v926_v33, %v925_v32 }
  0x47   : > { %v618_v50 = vrot.slane %v616_v43, 5  ;;  %v1849_v52 = vshrl.u32 %v1722_v39, 16  ;;  %v1852_v53 = vshll.u32 %v1722_v39, 16  ;;  %v2220_v55 = vunpack.c.l.b16 %v1847_v40  ;;  %v1726_v39 = vld [vmem:[%s11437_s6 + $0x34] sm:$0xf] }
  0x48   : > { %v613_v56 = vor.u32 %v612_v45, %v609_v37  ;;  %v622_v57 = vrot.slane %v620_v46, 4  ;;  %v628_v59 = vrot.slane %v626_v47, 5  ;;  %v1858_v62 = vshrl.u32 %v1723_v48, 16 }
  0x49   : > { %v1851_v60 = vrot.slane %v1849_v52, 5  ;;  %v1854_v61 = vrot.slane %v1852_v53, 6  ;;  %v1861_v63 = vshll.u32 %v1723_v48, 16  ;;  %v1868_v2 = vshrl.u32 %v1724_v51, 16 }
  0x4a   : > { %v614_v0 = vrot.slane %v613_v56, 4  ;;  %v623_v1 = vor.u32 %v622_v57, %v618_v50  ;;  %v1871_v3 = vshll.u32 %v1724_v51, 16  ;;  %v1431_v4 = vunpack.c.l.b16 %v1336_v44  ;;  %v497_v44 = vld [vmem:[%s11437_s6 + $0x38] sm:$0x1] }
  0x4b   : > { %9990 = vmatmul.msk.bf16.gmra.mxu1 %vm308_vm5, %v955_v49  ;;  %v1855_v5 = vor.u32 %v1854_v61, %v1851_v60  ;;  %v1860_v6 = vrot.slane %v1858_v62, 5  ;;  %v1863_v7 = vrot.slane %v1861_v63, 6  ;;  %9969 = vmatmul.msk.bf16.gmra.mxu0 %vm308_vm5, %v11104_v54  ;;  %v2249_v10 = vpack.c.b16 %v2220_v55, %v2219_v41  ;;  %v11105_v61 = vld [vmem:[%s11437_s6 + $0x30] sm:$0xff] }
  0x4c   : > { %v624_v11 = vrot.slane %v623_v1, 4  ;;  %v1870_v12 = vrot.slane %v1868_v2, 5  ;;  %v1873_v13 = vrot.slane %v1871_v3, 6  ;;  %v619_v14 = vsel %vm11477_vm9, %v614_v0, %v618_v50  ;;  %v1727_v50 = vld [vmem:[%s11437_s6 + $0x38] sm:$0x3] }
  0x4d   : > { %v1864_v15 = vor.u32 %v1863_v7, %v1860_v6  ;;  %v1856_v20 = vrot.slane %v1855_v5, 4  ;;  %v1339_v21 = vrot.slane %v1223_v8, 5  ;;  %v631_v24 = vshrl.u32 %v495_v9, 16  ;;  %v498_v2 = vld [vmem:[%s11437_s6 + $0x3c] sm:$0xf] }
  0x4e   : > { %v629_v19 = vsel %vm11477_vm9, %v624_v11, %v628_v59  ;;  %v1874_v26 = vor.u32 %v1873_v13, %v1870_v12  ;;  %v1459_v27 = vpack.c.b16 %v1431_v4, %v1430_v42  ;;  %v927_v28 = vunpack.c.l.b16 %v619_v14  ;;  %v1226_v14 = vld [vmem:[%s11437_s6 + $0x40] sm:$0xf] }
  0x4f   : > { %v1866_v25 = vrot.slane %v1864_v15, 4  ;;  %v10008_v29 = vrot.slane %v1222_v16, 9  ;;  %v928_v31 = vunpack.c.l.b16 %v629_v19  ;;  %v1342_v32 = vrot.slane %v1224_v18, 5 }
  0x50   : > { %v634_v33 = vshll.u32 %v495_v9, 16  ;;  %v640_v34 = vshll.u32 %v496_v23, 16  ;;  %v1865_v35 = vsel %vm11499_vm10, %v1856_v20, %v1864_v15  ;;  %v1341_v36 = vrot.slane %v1339_v21, 4  ;;  %v1225_v20 = vld [vmem:[%s11437_s6 + $0x3c] sm:$0xe] }
  0x51   : > { %10050 = vmatmul.msk.bf16.gmra.mxu3 %vm308_vm5, %v2249_v10  ;;  %v633_v37 = vrot.slane %v631_v24, 4  ;;  %v644_v38 = vshrl.u32 %v496_v23, 16  ;;  %v1875_v40 = vsel %vm11499_vm10, %v1866_v25, %v1874_v26  ;;  %v1877_v43 = vshrl.u32 %v1725_v30, 16  ;;  %v499_v10 = vld [vmem:[%s11437_s6 + $0x40] sm:$0xf] }
  0x52   : > { %v636_v41 = vrot.slane %v634_v33, 5  ;;  %v11591_v42 = vrot.slane %v640_v34, 5  ;;  %v1880_v46 = vshll.u32 %v1725_v30, 16  ;;  %v956_v47 = vpack.c.b16 %v928_v31, %v927_v28  ;;  %v1728_v23 = vld [vmem:[%s11437_s6 + $0x3c] sm:$0xe] }
  0x53   : > { %v646_v45 = vrot.slane %v644_v38, 4  ;;  %v2221_v48 = vunpack.c.l.b16 %v1865_v35  ;;  %v1340_v49 = vsel %vm11441_vm6, %v10008_v29, %v1339_v21  ;;  %v1886_v51 = vshrl.u32 %v1726_v39, 16  ;;  %v1729_v28 = vld [vmem:[%s11437_s6 + $0x40] sm:$0xf]  ;;  %v1227_v31 = vld [vmem:[%s11437_s6 + $0x44] sm:$0x1] }
  0x54   : > { %v2222_v52 = vunpack.c.l.b16 %v1875_v40  ;;  %v1343_v53 = vsel %vm11441_vm6, %v1341_v36, %v1342_v32  ;;  %v637_v54 = vor.u32 %v636_v41, %v633_v37  ;;  %v1889_v55 = vshll.u32 %v1726_v39, 16  ;;  %v500_v34 = vld [vmem:[%s11437_s6 + $0x44] sm:$0x1] }
  0x55   : > { %10029 = vmatmul.msk.bf16.gmra.mxu2 %vm308_vm5, %v1459_v27  ;;  %v647_v56 = vor.u32 %v646_v45, %v11591_v42  ;;  %v650_v57 = vshll.u32 %v497_v44, 16  ;;  %v1879_v59 = vrot.slane %v1877_v43, 5  ;;  %v1882_v60 = vrot.slane %v1880_v46, 6  ;;  %v1730_v45 = vld [vmem:[%s11437_s6 + $0x44] sm:$0x3] }
  0x56   : > { %v1888_v62 = vrot.slane %v1886_v51, 5  ;;  %v1891_v63 = vrot.slane %v1889_v55, 6  ;;  %v1896_v0 = vshrl.u32 %v1727_v50, 16  ;;  %v1899_v1 = vshll.u32 %v1727_v50, 16 }
  0x57   : > { %v1432_v3 = vunpack.c.l.b16 %v1340_v49  ;;  %v1433_v4 = vunpack.c.l.b16 %v1343_v53  ;;  %v638_v5 = vrot.slane %v637_v54, 4  ;;  %v2250_v6 = vpack.c.b16 %v2222_v52, %v2221_v48 }
  0x58   : > { %v648_v7 = vrot.slane %v647_v56, 4  ;;  %v652_v8 = vrot.slane %v650_v57, 5  ;;  %v1883_v9 = vor.u32 %v1882_v60, %v1879_v59  ;;  %v1892_v11 = vor.u32 %v1891_v63, %v1888_v62  ;;  %v11106_v60 = vld [vmem:[%s11437_s6 + $0x3c] sm:$0xff] }
  0x59   : > { %v1898_v12 = vrot.slane %v1896_v0, 5  ;;  %v1901_v13 = vrot.slane %v1899_v1, 6  ;;  %v655_v15 = vshrl.u32 %v498_v2, 16  ;;  %v658_v16 = vshll.u32 %v498_v2, 16 }
  0x5a   : > { %v1460_v18 = vpack.c.b16 %v1433_v4, %v1432_v3  ;;  %v643_v19 = vsel %vm11477_vm9, %v638_v5, %v11591_v42  ;;  %v664_v21 = vshll.u32 %v499_v10, 16  ;;  %v653_v24 = vsel %vm11477_vm9, %v648_v7, %v652_v8  ;;  %v1229_v8 = vld [vmem:[%s11437_s6 + $0x4c] sm:$0xf] }
  0x5b   : > { %9991 = vmatmul.msk.bf16.gmra.mxu1 %vm308_vm5, %v956_v47  ;;  %9970 = vmatmul.msk.bf16.gmra.mxu0 %vm308_vm5, %v11105_v61  ;;  %v1884_v25 = vrot.slane %v1883_v9, 4  ;;  %v1346_v26 = vrot.slane %v1226_v14, 5  ;;  %v668_v27 = vshrl.u32 %v499_v10, 16  ;;  %v1894_v29 = vrot.slane %v1892_v11, 4  ;;  %v501_v9 = vld [vmem:[%s11437_s6 + $0x48] sm:$0xf] }
  0x5c   : > { %v1902_v30 = vor.u32 %v1901_v13, %v1898_v12  ;;  %v657_v32 = vrot.slane %v655_v15, 4  ;;  %v660_v33 = vrot.slane %v658_v16, 5  ;;  %v666_v35 = vrot.slane %v664_v21, 5  ;;  %v502_v13 = vld [vmem:[%s11437_s6 + $0x4c] sm:$0xf] }
  0x5d   : > { %v670_v36 = vrot.slane %v668_v27, 4  ;;  %v1905_v37 = vshrl.u32 %v1728_v23, 16  ;;  %v1908_v38 = vshll.u32 %v1728_v23, 16  ;;  %v1914_v39 = vshrl.u32 %v1729_v28, 16  ;;  %v1230_v23 = vld [vmem:[%s11437_s6 + $0x50] sm:$0x1] }
  0x5e   : > { %v1917_v40 = vshll.u32 %v1729_v28, 16  ;;  %v929_v41 = vunpack.c.l.b16 %v643_v19  ;;  %v930_v42 = vunpack.c.l.b16 %v653_v24  ;;  %v10009_v43 = vrot.slane %v1225_v20, 9 }
  0x5f   : > { %v1349_v44 = vrot.slane %v1227_v31, 5  ;;  %v1893_v46 = vsel %vm11499_vm10, %v1884_v25, %v1892_v11  ;;  %v1903_v47 = vsel %vm11499_vm10, %v1894_v29, %v1902_v30  ;;  %v1348_v48 = vrot.slane %v1346_v26, 4  ;;  %v1731_v30 = vld [vmem:[%s11437_s6 + $0x48] sm:$0xe] }
  0x60   : > { %v674_v49 = vshll.u32 %v500_v34, 16  ;;  %v661_v50 = vor.u32 %v660_v33, %v657_v32  ;;  %v671_v51 = vor.u32 %v670_v36, %v666_v35  ;;  %v1907_v52 = vrot.slane %v1905_v37, 5 }
  0x61   : > { %10051 = vmatmul.msk.bf16.gmra.mxu3 %vm308_vm5, %v2250_v6  ;;  %v1910_v53 = vrot.slane %v1908_v38, 6  ;;  %v1916_v54 = vrot.slane %v1914_v39, 5  ;;  %v1919_v55 = vrot.slane %v1917_v40, 6  ;;  %v1924_v56 = vshrl.u32 %v1730_v45, 16  ;;  %v503_v40 = vld [vmem:[%s11437_s6 + $0x50] sm:$0x1] }
  0x62   : > { %v1927_v57 = vshll.u32 %v1730_v45, 16  ;;  %v957_v59 = vpack.c.b16 %v930_v42, %v929_v41  ;;  %v2223_v61 = vunpack.c.l.b16 %v1893_v46  ;;  %v2224_v62 = vunpack.c.l.b16 %v1903_v47 }
  0x63   : > { %v1347_v63 = vsel %vm11441_vm6, %v10009_v43, %v1346_v26  ;;  %v1350_v0 = vsel %vm11441_vm6, %v1348_v48, %v1349_v44  ;;  %v662_v1 = vrot.slane %v661_v50, 4  ;;  %v672_v2 = vrot.slane %v671_v51, 4 }
  0x64   : > { %v676_v3 = vrot.slane %v674_v49, 5  ;;  %v1911_v4 = vor.u32 %v1910_v53, %v1907_v52  ;;  %v1920_v5 = vor.u32 %v1919_v55, %v1916_v54  ;;  %v1926_v6 = vrot.slane %v1924_v56, 5  ;;  %v1733_v49 = vld [vmem:[%s11437_s6 + $0x50] sm:$0x3] }
  0x65   : > { %10030 = vmatmul.msk.bf16.gmra.mxu2 %vm308_vm5, %v1460_v18  ;;  %v1929_v7 = vrot.slane %v1927_v57, 6  ;;  %v2251_v10 = vpack.c.b16 %v2224_v62, %v2223_v61  ;;  %v1434_v11 = vunpack.c.l.b16 %v1347_v63  ;;  %v1435_v12 = vunpack.c.l.b16 %v1350_v0  ;;  %v1228_v18 = vld [vmem:[%s11437_s6 + $0x48] sm:$0xe] }
  0x66   : > { %v667_v14 = vsel %vm11477_vm9, %v662_v1, %v666_v35  ;;  %v677_v15 = vsel %vm11477_vm9, %v672_v2, %v676_v3  ;;  %v1912_v16 = vrot.slane %v1911_v4, 4  ;;  %v1353_v19 = vrot.slane %v1229_v8, 5  ;;  %v1732_v35 = vld [vmem:[%s11437_s6 + $0x4c] sm:$0xf]  ;;  %v504_v2 = vld [vmem:[%s11437_s6 + $0x54] sm:$0xf] }
  0x67   : > { %v1922_v20 = vrot.slane %v1920_v5, 4  ;;  %v1930_v21 = vor.u32 %v1929_v7, %v1926_v6  ;;  %v679_v24 = vshrl.u32 %v501_v9, 16  ;;  %v682_v25 = vshll.u32 %v501_v9, 16  ;;  %v505_v7 = vld [vmem:[%s11437_s6 + $0x58] sm:$0xf] }
  0x68   : > { %v688_v26 = vshll.u32 %v502_v13, 16  ;;  %v692_v27 = vshrl.u32 %v502_v13, 16  ;;  %v1461_v28 = vpack.c.b16 %v1435_v12, %v1434_v11  ;;  %v10010_v29 = vrot.slane %v1228_v18, 9  ;;  %v1232_v12 = vld [vmem:[%s11437_s6 + $0x58] sm:$0xf] }
  0x69   : > { %v931_v31 = vunpack.c.l.b16 %v667_v14  ;;  %v932_v32 = vunpack.c.l.b16 %v677_v15  ;;  %v1921_v33 = vsel %vm11499_vm10, %v1912_v16, %v1920_v5  ;;  %v1356_v34 = vrot.slane %v1230_v23, 5  ;;  %v1231_v15 = vld [vmem:[%s11437_s6 + $0x54] sm:$0xe] }
  0x6a   : > { %v1931_v36 = vsel %vm11499_vm10, %v1922_v20, %v1930_v21  ;;  %v1355_v37 = vrot.slane %v1353_v19, 4  ;;  %v681_v38 = vrot.slane %v679_v24, 4  ;;  %v684_v39 = vrot.slane %v682_v25, 5  ;;  %v1734_v23 = vld [vmem:[%s11437_s6 + $0x54] sm:$0xe] }
  0x6b   : > { %9992 = vmatmul.msk.bf16.gmra.mxu1 %vm308_vm5, %v957_v59  ;;  %9971 = vmatmul.msk.bf16.gmra.mxu0 %vm308_vm5, %v11106_v60  ;;  %v690_v41 = vrot.slane %v688_v26, 5  ;;  %v694_v42 = vrot.slane %v692_v27, 4  ;;  %v1933_v43 = vshrl.u32 %v1731_v30, 16  ;;  %v1936_v44 = vshll.u32 %v1731_v30, 16  ;;  %v11107_v59 = vld [vmem:[%s11437_s6 + $0x48] sm:$0xff] }
  0x6c   : > { %v1942_v45 = vshrl.u32 %v1732_v35, 16  ;;  %v1945_v46 = vshll.u32 %v1732_v35, 16  ;;  %v2225_v47 = vunpack.c.l.b16 %v1921_v33  ;;  %v1354_v48 = vsel %vm11441_vm6, %v10010_v29, %v1353_v19  ;;  %v506_v33 = vld [vmem:[%s11437_s6 + $0x5c] sm:$0x1] }
  0x6d   : > { %v958_v50 = vpack.c.b16 %v932_v32, %v931_v31  ;;  %v2226_v51 = vunpack.c.l.b16 %v1931_v36  ;;  %v1357_v52 = vsel %vm11441_vm6, %v1355_v37, %v1356_v34  ;;  %v698_v53 = vshll.u32 %v503_v40, 16  ;;  %v1735_v32 = vld [vmem:[%s11437_s6 + $0x58] sm:$0xf] }
  0x6e   : > { %v685_v54 = vor.u32 %v684_v39, %v681_v38  ;;  %v695_v55 = vor.u32 %v694_v42, %v690_v41  ;;  %v1935_v56 = vrot.slane %v1933_v43, 5  ;;  %v1938_v57 = vrot.slane %v1936_v44, 6 }
  0x6f   : > { %v1944_v60 = vrot.slane %v1942_v45, 5  ;;  %v1947_v61 = vrot.slane %v1945_v46, 6  ;;  %v1952_v62 = vshrl.u32 %v1733_v49, 16  ;;  %v1955_v63 = vshll.u32 %v1733_v49, 16 }
  0x70   : > { %v1436_v0 = vunpack.c.l.b16 %v1354_v48  ;;  %v1437_v1 = vunpack.c.l.b16 %v1357_v52  ;;  %v2252_v3 = vpack.c.b16 %v2226_v51, %v2225_v47  ;;  %v686_v4 = vrot.slane %v685_v54, 4  ;;  %v1736_v48 = vld [vmem:[%s11437_s6 + $0x5c] sm:$0x3] }
  0x71   : > { %10052 = vmatmul.msk.bf16.gmra.mxu3 %vm308_vm5, %v2251_v10  ;;  %v696_v5 = vrot.slane %v695_v55, 4  ;;  %v700_v6 = vrot.slane %v698_v53, 5  ;;  %v1939_v8 = vor.u32 %v1938_v57, %v1935_v56  ;;  %v1948_v9 = vor.u32 %v1947_v61, %v1944_v60  ;;  %v11108_v57 = vld [vmem:[%s11437_s6 + $0x54] sm:$0xff] }
  0x72   : > { %v1954_v10 = vrot.slane %v1952_v62, 5  ;;  %v1957_v11 = vrot.slane %v1955_v63, 6  ;;  %v703_v13 = vshrl.u32 %v504_v2, 16  ;;  %v706_v14 = vshll.u32 %v504_v2, 16 }
  0x73   : > { %v712_v16 = vshll.u32 %v505_v7, 16  ;;  %v716_v18 = vshrl.u32 %v505_v7, 16  ;;  %v1462_v19 = vpack.c.b16 %v1437_v1, %v1436_v0  ;;  %v691_v20 = vsel %vm11477_vm9, %v686_v4, %v690_v41 }
  0x74   : > { %v1360_v21 = vrot.slane %v1232_v12, 5  ;;  %v701_v24 = vsel %vm11477_vm9, %v696_v5, %v700_v6  ;;  %v1940_v25 = vrot.slane %v1939_v8, 4  ;;  %v1950_v26 = vrot.slane %v1948_v9, 4  ;;  %v1235_v5 = vld [vmem:[%s11437_s6 + $0x64] sm:$0xf] }
  0x75   : > { %10031 = vmatmul.msk.bf16.gmra.mxu2 %vm308_vm5, %v1461_v28  ;;  %v1958_v27 = vor.u32 %v1957_v11, %v1954_v10  ;;  %v1233_v28 = vld [vmem:[%s11437_s6 + $0x5c] sm:$0x1]  ;;  %v10011_v29 = vrot.slane %v1231_v15, 9  ;;  %v705_v30 = vrot.slane %v703_v13, 4  ;;  %v708_v31 = vrot.slane %v706_v14, 5 }
  0x76   : > { %v714_v34 = vrot.slane %v712_v16, 5  ;;  %v718_v35 = vrot.slane %v716_v18, 4  ;;  %v1961_v36 = vshrl.u32 %v1734_v23, 16  ;;  %v1964_v37 = vshll.u32 %v1734_v23, 16  ;;  %v507_v10 = vld [vmem:[%s11437_s6 + $0x60] sm:$0xf] }
  0x77   : > { %v933_v38 = vunpack.c.l.b16 %v691_v20  ;;  %v934_v39 = vunpack.c.l.b16 %v701_v24  ;;  %v1362_v40 = vrot.slane %v1360_v21, 4  ;;  %v1363_v41 = vrot.slane %v1233_v28, 5  ;;  %v508_v11 = vld [vmem:[%s11437_s6 + $0x64] sm:$0xf]  ;;  %v1234_v15 = vld [vmem:[%s11437_s6 + $0x60] sm:$0xe] }
  0x78   : > { %v1949_v42 = vsel %vm11499_vm10, %v1940_v25, %v1948_v9  ;;  %v1959_v43 = vsel %vm11499_vm10, %v1950_v26, %v1958_v27  ;;  %v1970_v44 = vshrl.u32 %v1735_v32, 16  ;;  %v1973_v45 = vshll.u32 %v1735_v32, 16  ;;  %v1236_v16 = vld [vmem:[%s11437_s6 + $0x68] sm:$0x1]  ;;  %v1737_v24 = vld [vmem:[%s11437_s6 + $0x60] sm:$0xe] }
  0x79   : > { %v1361_v46 = vsel %vm11441_vm6, %v10011_v29, %v1360_v21  ;;  %v722_v47 = vshll.u32 %v506_v33, 16  ;;  %v709_v49 = vor.u32 %v708_v31, %v705_v30  ;;  %v1963_v51 = vrot.slane %v1961_v36, 5  ;;  %v1738_v32 = vld [vmem:[%s11437_s6 + $0x64] sm:$0xf] }
  0x7a   : > { %v1966_v52 = vrot.slane %v1964_v37, 6  ;;  %v959_v53 = vpack.c.b16 %v934_v39, %v933_v38  ;;  %v2227_v54 = vunpack.c.l.b16 %v1949_v42  ;;  %v2228_v55 = vunpack.c.l.b16 %v1959_v43  ;;  %v509_v42 = vld [vmem:[%s11437_s6 + $0x68] sm:$0x1] }
  0x7b   : > { %9993 = vmatmul.msk.bf16.gmra.mxu1 %vm308_vm5, %v958_v50  ;;  %9972 = vmatmul.msk.bf16.gmra.mxu0 %vm308_vm5, %v11107_v59  ;;  %v719_v50 = vor.u32 %v718_v35, %v714_v34  ;;  %v1364_v56 = vsel %vm11441_vm6, %v1362_v40, %v1363_v41  ;;  %v1972_v59 = vrot.slane %v1970_v44, 5  ;;  %v1975_v60 = vrot.slane %v1973_v45, 6 }
  0x7c   : > { %v1980_v61 = vshrl.u32 %v1736_v48, 16  ;;  %v1983_v62 = vshll.u32 %v1736_v48, 16  ;;  %v710_v63 = vrot.slane %v709_v49, 4  ;;  %v724_v1 = vrot.slane %v722_v47, 5  ;;  %v1739_v47 = vld [vmem:[%s11437_s6 + $0x68] sm:$0x3] }
  0x7d   : > { %v720_v0 = vrot.slane %v719_v50, 4  ;;  %v1967_v2 = vor.u32 %v1966_v52, %v1963_v51  ;;  %v1439_v4 = vunpack.c.l.b16 %v1364_v56  ;;  %v2253_v6 = vpack.c.b16 %v2228_v55, %v2227_v54  ;;  %v11109_v56 = vld [vmem:[%s11437_s6 + $0x60] sm:$0xff] }
  0x7e   : > { %v1976_v7 = vor.u32 %v1975_v60, %v1972_v59  ;;  %v1982_v8 = vrot.slane %v1980_v61, 5  ;;  %v1985_v9 = vrot.slane %v1983_v62, 6  ;;  %v715_v12 = vsel %vm11477_vm9, %v710_v63, %v714_v34 }
  0x7f   : > { %v725_v13 = vsel %vm11477_vm9, %v720_v0, %v724_v1  ;;  %v1968_v14 = vrot.slane %v1967_v2, 4  ;;  %v1367_v18 = vrot.slane %v1235_v5, 5  ;;  %v730_v20 = vshll.u32 %v507_v10, 16  ;;  %v1238_v1 = vld [vmem:[%s11437_s6 + $0x70] sm:$0xf] }
  0x80   : > { %v736_v21 = vshll.u32 %v508_v11, 16  ;;  %v740_v23 = vshrl.u32 %v508_v11, 16  ;;  %v1978_v26 = vrot.slane %v1976_v7, 4  ;;  %v1986_v27 = vor.u32 %v1985_v9, %v1982_v8  ;;  %v510_v2 = vld [vmem:[%s11437_s6 + $0x6c] sm:$0xf] }
  0x81   : > { %10053 = vmatmul.msk.bf16.gmra.mxu3 %vm308_vm5, %v2252_v3  ;;  %v1438_v3 = vunpack.c.l.b16 %v1361_v46  ;;  %v935_v28 = vunpack.c.l.b16 %v715_v12  ;;  %v936_v29 = vunpack.c.l.b16 %v725_v13  ;;  %v10012_v30 = vrot.slane %v1234_v15, 9  ;;  %v511_v11 = vld [vmem:[%s11437_s6 + $0x70] sm:$0xf]  ;;  %v1237_v12 = vld [vmem:[%s11437_s6 + $0x6c] sm:$0xe] }
  0x82   : > { %v1370_v31 = vrot.slane %v1236_v16, 5  ;;  %v1977_v33 = vsel %vm11499_vm10, %v1968_v14, %v1976_v7  ;;  %v1369_v34 = vrot.slane %v1367_v18, 4  ;;  %v1989_v35 = vshrl.u32 %v1737_v24, 16 }
  0x83   : > { %v1463_v25 = vpack.c.b16 %v1439_v4, %v1438_v3  ;;  %v1992_v36 = vshll.u32 %v1737_v24, 16  ;;  %v732_v38 = vrot.slane %v730_v20, 5  ;;  %v11697_v39 = vrot.slane %v736_v21, 5  ;;  %v1740_v24 = vld [vmem:[%s11437_s6 + $0x6c] sm:$0xe] }
  0x84   : > { %v742_v40 = vrot.slane %v740_v23, 4  ;;  %v1987_v41 = vsel %vm11499_vm10, %v1978_v26, %v1986_v27  ;;  %v1998_v43 = vshrl.u32 %v1738_v32, 16  ;;  %v2001_v44 = vshll.u32 %v1738_v32, 16 }
  0x85   : > { %10032 = vmatmul.msk.bf16.gmra.mxu2 %vm308_vm5, %v1462_v19  ;;  %v727_v19 = vshrl.u32 %v507_v10, 16  ;;  %v960_v45 = vpack.c.b16 %v936_v29, %v935_v28  ;;  %v1368_v46 = vsel %vm11441_vm6, %v10012_v30, %v1367_v18  ;;  %v2229_v48 = vunpack.c.l.b16 %v1977_v33  ;;  %v1239_v18 = vld [vmem:[%s11437_s6 + $0x74] sm:$0x1] }
  0x86   : > { %v1371_v49 = vsel %vm11441_vm6, %v1369_v34, %v1370_v31  ;;  %v1991_v50 = vrot.slane %v1989_v35, 5  ;;  %v1994_v51 = vrot.slane %v1992_v36, 6  ;;  %v2230_v52 = vunpack.c.l.b16 %v1987_v41  ;;  %v512_v33 = vld [vmem:[%s11437_s6 + $0x74] sm:$0x1] }
  0x87   : > { %v729_v37 = vrot.slane %v727_v19, 4  ;;  %v743_v54 = vor.u32 %v742_v40, %v11697_v39  ;;  %v746_v55 = vshll.u32 %v509_v42, 16  ;;  %v2003_v59 = vrot.slane %v2001_v44, 6 }
  0x88   : > { %v2008_v60 = vshrl.u32 %v1739_v47, 16  ;;  %v2011_v61 = vshll.u32 %v1739_v47, 16  ;;  %v1440_v63 = vunpack.c.l.b16 %v1368_v46  ;;  %v1995_v0 = vor.u32 %v1994_v51, %v1991_v50  ;;  %v1742_v46 = vld [vmem:[%s11437_s6 + $0x74] sm:$0x3] }
  0x89   : > { %v2254_v3 = vpack.c.b16 %v2230_v52, %v2229_v48  ;;  %v1441_v4 = vunpack.c.l.b16 %v1371_v49  ;;  %v744_v7 = vrot.slane %v743_v54, 4  ;;  %v1374_v13 = vrot.slane %v1238_v1, 5 }
  0x8a   : > { %v2010_v9 = vrot.slane %v2008_v60, 5  ;;  %v2013_v10 = vrot.slane %v2011_v61, 6  ;;  %v751_v14 = vshrl.u32 %v510_v2, 16  ;;  %v754_v15 = vshll.u32 %v510_v2, 16  ;;  %v513_v2 = vld [vmem:[%s11437_s6 + $0x78] sm:$0xf] }
  0x8b   : > { %9994 = vmatmul.msk.bf16.gmra.mxu1 %vm308_vm5, %v959_v53  ;;  %9973 = vmatmul.msk.bf16.gmra.mxu0 %vm308_vm5, %v11108_v57  ;;  %v733_v53 = vor.u32 %v732_v38, %v729_v37  ;;  %v2000_v57 = vrot.slane %v1998_v43, 5  ;;  %v1996_v16 = vrot.slane %v1995_v0, 4  ;;  %v1464_v19 = vpack.c.b16 %v1441_v4, %v1440_v63  ;;  %v11110_v63 = vld [vmem:[%s11437_s6 + $0x6c] sm:$0xff] }
  0x8c   : > { %v760_v21 = vshll.u32 %v511_v11, 16  ;;  %v764_v23 = vshrl.u32 %v511_v11, 16  ;;  %v2014_v28 = vor.u32 %v2013_v10, %v2010_v9  ;;  %v10013_v29 = vrot.slane %v1237_v12, 9 }
  0x8d   : > { %v734_v5 = vrot.slane %v733_v53, 4  ;;  %v2004_v8 = vor.u32 %v2003_v59, %v2000_v57  ;;  %v1376_v31 = vrot.slane %v1374_v13, 4  ;;  %v1377_v32 = vrot.slane %v1239_v18, 5  ;;  %v1241_v18 = vld [vmem:[%s11437_s6 + $0x7c] sm:$0xf] }
  0x8e   : > { %v753_v34 = vrot.slane %v751_v14, 4  ;;  %v756_v35 = vrot.slane %v754_v15, 5  ;;  %v2017_v36 = vshrl.u32 %v1740_v24, 16  ;;  %v2020_v37 = vshll.u32 %v1740_v24, 16 }
  0x8f   : > { %v739_v20 = vsel %vm11477_vm9, %v734_v5, %v11697_v39  ;;  %v2006_v27 = vrot.slane %v2004_v8, 4  ;;  %v11728_v42 = vrot.slane %v760_v21, 5  ;;  %v766_v43 = vrot.slane %v764_v23, 4  ;;  %v1743_v23 = vld [vmem:[%s11437_s6 + $0x78] sm:$0xe] }
  0x90   : > { %v937_v40 = vunpack.c.l.b16 %v739_v20  ;;  %v2005_v44 = vsel %vm11499_vm10, %v1996_v16, %v2004_v8  ;;  %v1375_v47 = vsel %vm11441_vm6, %v10013_v29, %v1374_v13  ;;  %v1378_v48 = vsel %vm11441_vm6, %v1376_v31, %v1377_v32  ;;  %v1240_v32 = vld [vmem:[%s11437_s6 + $0x78] sm:$0xe] }
  0x91   : > { %10054 = vmatmul.msk.bf16.gmra.mxu3 %vm308_vm5, %v2253_v6  ;;  %v748_v6 = vrot.slane %v746_v55, 5  ;;  %v757_v49 = vor.u32 %v756_v35, %v753_v34  ;;  %v770_v50 = vshll.u32 %v512_v33, 16  ;;  %v2019_v51 = vrot.slane %v2017_v36, 5  ;;  %v1242_v33 = vld [vmem:[%s11437_s6 + $0x80] sm:$0x1] }
  0x92   : > { %v2022_v52 = vrot.slane %v2020_v37, 6  ;;  %v767_v57 = vor.u32 %v766_v43, %v11728_v42  ;;  %v2036_v59 = vshrl.u32 %v1742_v46, 16  ;;  %v2039_v60 = vshll.u32 %v1742_v46, 16 }
  0x93   : > { %v749_v26 = vsel %vm11477_vm9, %v744_v7, %v748_v6  ;;  %v2231_v0 = vunpack.c.l.b16 %v2005_v44  ;;  %v1442_v5 = vunpack.c.l.b16 %v1375_v47  ;;  %v1443_v6 = vunpack.c.l.b16 %v1378_v48  ;;  %v514_v7 = vld [vmem:[%s11437_s6 + $0x7c] sm:$0xf]  ;;  %v515_v44 = vld [vmem:[%s11437_s6 + $0x80] sm:$0x1] }
  0x94   : > { %v938_v41 = vunpack.c.l.b16 %v749_v26  ;;  %v758_v8 = vrot.slane %v757_v49, 4  ;;  %v772_v9 = vrot.slane %v770_v50, 5  ;;  %v2023_v10 = vor.u32 %v2022_v52, %v2019_v51 }
  0x95   : > { %10033 = vmatmul.msk.bf16.gmra.mxu2 %vm308_vm5, %v1463_v25  ;;  %v1741_v25 = vld [vmem:[%s11437_s6 + $0x70] sm:$0xf]  ;;  %v768_v12 = vrot.slane %v767_v57, 4  ;;  %v2038_v13 = vrot.slane %v2036_v59, 5  ;;  %v2041_v14 = vrot.slane %v2039_v60, 6  ;;  %v775_v15 = vshrl.u32 %v513_v2, 16 }
  0x96   : > { %v2026_v38 = vshrl.u32 %v1741_v25, 16  ;;  %v2029_v39 = vshll.u32 %v1741_v25, 16  ;;  %v784_v20 = vshll.u32 %v514_v7, 16  ;;  %v788_v21 = vshrl.u32 %v514_v7, 16  ;;  %v1745_v59 = vld [vmem:[%s11437_s6 + $0x80] sm:$0x3] }
  0x97   : > { %v1465_v24 = vpack.c.b16 %v1443_v6, %v1442_v5  ;;  %v763_v25 = vsel %vm11477_vm9, %v758_v8, %v11728_v42  ;;  %v2024_v26 = vrot.slane %v2023_v10, 4  ;;  %v2042_v31 = vor.u32 %v2041_v14, %v2038_v13 }
  0x98   : > { %v370_v62 = vpop.f32.mrf.mxu0  ;;  %v2028_v53 = vrot.slane %v2026_v38, 5  ;;  %v2031_v54 = vrot.slane %v2029_v39, 6  ;;  %v1381_v34 = vrot.slane %v1241_v18, 5  ;;  %v777_v35 = vrot.slane %v775_v15, 4 }
  0x99   : > { %451 = vst.msk [vmem:[#allocation2] sm:$0xff] %vm450_vm11, %v370_v62  ;;  %v11766_v39 = vrot.slane %v784_v20, 5  ;;  %v939_v49 = vunpack.c.l.b16 %v763_v25  ;;  %v1384_v60 = vrot.slane %v1242_v33, 5 }
  0x9a   : > { %v11747_v11 = vor.u32 %v2031_v54, %v2028_v53  ;;  %v1383_v57 = vrot.slane %v1381_v34, 4 }
  0x9b   : > { %9995 = vmatmul.msk.bf16.gmra.mxu1 %vm308_vm5, %v960_v45  ;;  %9974 = vmatmul.msk.bf16.gmra.mxu0 %vm308_vm5, %v11109_v56  ;;  %v2015_v45 = vsel %vm11499_vm10, %v2006_v27, %v2014_v28  ;;  %v961_v56 = vpack.c.b16 %v938_v41, %v937_v40  ;;  %v1744_v28 = vld [vmem:[%s11437_s6 + $0x7c] sm:$0xf]  ;;  %v790_v40 = vrot.slane %v788_v21, 4  ;;  %v2045_v41 = vshrl.u32 %v1743_v23, 16 }
  0x9c   : > { %v2232_v1 = vunpack.c.l.b16 %v2015_v45  ;;  %v2034_v27 = vrot.slane %v11747_v11, 4  ;;  %v2048_v45 = vshll.u32 %v1743_v23, 16  ;;  %v2054_v46 = vshrl.u32 %v1744_v28, 16 }
  0x9d   : > { %v2057_v47 = vshll.u32 %v1744_v28, 16  ;;  %v2033_v51 = vsel %vm11499_vm10, %v2024_v26, %v11747_v11  ;;  %v11111_v11 = vld [vmem:[%s11437_s6 + $0x78] sm:$0xff]  ;;  %v1385_v13 = vsel %vm11441_vm6, %v1383_v57, %v1384_v60 }
  0x9e   : > { %v2255_v16 = vpack.c.b16 %v2232_v1, %v2231_v0  ;;  %v2043_v54 = vsel %vm11499_vm10, %v2034_v27, %v2042_v31  ;;  %v2050_v0 = vrot.slane %v2048_v45, 6  ;;  %v2056_v1 = vrot.slane %v2054_v46, 5  ;;  %v1746_v45 = vld [vmem:[%s11437_s6 + $0x84] sm:$0xe] }
  0x9f   : > { %v2233_v7 = vunpack.c.l.b16 %v2033_v51  ;;  %v1445_v33 = vunpack.c.l.b16 %v1385_v13 }
  0xa0   : > { %v372_v30 = vpop.f32.mrf.mxu0  ;;  %v1114_v62 = vld [vmem:[#allocation2] sm:$0xff] }
  0xa1   : > { %10055 = vmatmul.msk.bf16.gmra.mxu3 %vm308_vm5, %v2254_v3  ;;  %452 = vst.msk [vmem:[#allocation2 + $0x8] sm:$0xff] %vm450_vm11, %v372_v30  ;;  %v773_v30 = vsel %vm11477_vm9, %v768_v12, %v772_v9  ;;  %v2234_v12 = vunpack.c.l.b16 %v2043_v54 }
  0xa2   : > { %v940_v50 = vunpack.c.l.b16 %v773_v30  ;;  %v11794_v30 = vld [vmem:[%s11437_s6 + $0x88] sm:$0xf] }
  0xa4   : > { %v962_v6 = vpack.c.b16 %v940_v50, %v939_v49  ;;  %v1245_v49 = vld [vmem:[%s11437_s6 + $0x8c] sm:$0x1]  ;;  %v1747_v50 = vld [vmem:[%s11437_s6 + $0x88] sm:$0xf] }
  0xa5   : > { %10034 = vmatmul.msk.bf16.gmra.mxu2 %vm308_vm5, %v1464_v19  ;;  %v778_v19 = vshll.u32 %v513_v2, 16  ;;  %v2059_v2 = vrot.slane %v2057_v47, 6  ;;  %v1391_v13 = vrot.slane %v1245_v49, 5 }
  0xa7   : > { %v780_v38 = vrot.slane %v778_v19, 5  ;;  %v11789_v23 = vor.u32 %v2059_v2, %v2056_v1  ;;  %v1748_v2 = vld [vmem:[%s11437_s6 + $0x8c] sm:$0x3] }
  0xa8   : > { %v11740_v55 = vpop.f32.mrf.mxu2  ;;  %v1034_v61 = vpop.f32.mrf.mxu1  ;;  %v1115_v37 = vld [vmem:[#allocation2 + $0x8] sm:$0xff] }
  0xa9   : > { %v1146_v3 = vadd.f32 %v1114_v62, %v1034_v61  ;;  %v375_v4 = vpop.f32.mrf.mxu0  ;;  %v781_v61 = vor.u32 %v780_v38, %v777_v35  ;;  %v791_v62 = vor.u32 %v790_v40, %v11766_v39 }
  0xaa   : > { %453 = vst.msk [vmem:[#allocation2 + $0x10] sm:$0xff] %vm450_vm11, %v375_v4  ;;  %v2067_v4 = vshll.u32 %v1745_v59, 16 }
  0xab   : > { %1178 = vst.msk [vmem:[#allocation2] sm:$0xff] %vm450_vm11, %v1146_v3  ;;  %9996 = vmatmul.msk.bf16.gmra.mxu1 %vm308_vm5, %v961_v56  ;;  %9975 = vmatmul.msk.bf16.gmra.mxu0 %vm308_vm5, %v11110_v63  ;;  %v10014_v56 = vrot.slane %v1240_v32, 9  ;;  %v794_v63 = vshll.u32 %v515_v44, 16  ;;  %v2064_v3 = vshrl.u32 %v1745_v59, 16  ;;  %v782_v14 = vrot.slane %v781_v61, 4 }
  0xac   : > { %v792_v20 = vrot.slane %v791_v62, 4  ;;  %v2069_v28 = vrot.slane %v2067_v4, 6  ;;  %v1388_v44 = vrot.slane %v11794_v30, 5  ;;  %v2073_v62 = vshrl.u32 %v1746_v45, 16 }
  0xad   : > { %v1382_v8 = vsel %vm11441_vm6, %v10014_v56, %v1381_v34  ;;  %v796_v15 = vrot.slane %v794_v63, 5  ;;  %v2066_v27 = vrot.slane %v2064_v3, 5  ;;  %v2076_v63 = vshll.u32 %v1746_v45, 16 }
  0xae   : > { %v1444_v26 = vunpack.c.l.b16 %v1382_v8  ;;  %v2082_v3 = vshrl.u32 %v1747_v50, 16  ;;  %v2085_v4 = vshll.u32 %v1747_v50, 16 }
  0xaf   : > { %v797_v46 = vsel %vm11477_vm9, %v792_v20, %v796_v15  ;;  %v2070_v47 = vor.u32 %v2069_v28, %v2066_v27  ;;  %v2078_v20 = vrot.slane %v2076_v63, 6 }
  0xb0   : > { %v11759_v29 = vpop.f32.mrf.mxu2  ;;  %v1036_v36 = vpop.f32.mrf.mxu1  ;;  %v1466_v51 = vpack.c.b16 %v1445_v33, %v1444_v26  ;;  %v942_v1 = vunpack.c.l.b16 %v797_v46 }
  0xb1   : > { %10056 = vmatmul.msk.bf16.gmra.mxu3 %vm308_vm5, %v2255_v16  ;;  %v1147_v42 = vadd.f32 %v1115_v37, %v1036_v36  ;;  %v377_v43 = vpop.f32.mrf.mxu0  ;;  %v1116_v10 = vld [vmem:[#allocation2 + $0x10] sm:$0xff]  ;;  %v516_v16 = vld [vmem:[%s11437_s6 + $0x84] sm:$0xf]  ;;  %v2256_v37 = vpack.c.b16 %v2234_v12, %v2233_v7 }
  0xb2   : > { %v1617_v48 = vld [vmem:[#allocation2] sm:$0xff]  ;;  %454 = vst.msk [vmem:[#allocation2 + $0x18] sm:$0xff] %vm450_vm11, %v377_v43  ;;  %v799_v34 = vshrl.u32 %v516_v16, 16  ;;  %v802_v35 = vshll.u32 %v516_v16, 16  ;;  %v2062_v43 = vrot.slane %v11789_v23, 4 }
  0xb3   : > { %v1649_v52 = vadd.f32 %v1617_v48, %v11740_v55  ;;  %1179 = vst.msk [vmem:[#allocation2 + $0x8] sm:$0xff] %vm450_vm11, %v1147_v42  ;;  %v2047_v55 = vrot.slane %v2045_v41, 5  ;;  %v1243_v48 = vld [vmem:[%s11437_s6 + $0x84] sm:$0xe] }
  0xb4   : > { %v2328_v53 = vpop.f32.mrf.mxu3  ;;  %v801_v54 = vrot.slane %v799_v34, 4  ;;  %v804_v56 = vrot.slane %v802_v35, 5  ;;  %v2071_v8 = vsel %vm11499_vm10, %v2062_v43, %v2070_v47  ;;  %v519_v34 = vld [vmem:[%s11437_s6 + $0x90] sm:$0xf] }
  0xb5   : > { %10035 = vmatmul.msk.bf16.gmra.mxu2 %vm308_vm5, %v1465_v24  ;;  %1681 = vst.msk [vmem:[#allocation2] sm:$0xff] %vm450_vm11, %v1649_v52  ;;  %v2051_v21 = vor.u32 %v2050_v0, %v2047_v55  ;;  %v517_v24 = vld [vmem:[%s11437_s6 + $0x88] sm:$0xf]  ;;  %v2236_v30 = vunpack.c.l.b16 %v2071_v8  ;;  %v823_v47 = vshrl.u32 %v519_v34, 16 }
  0xb6   : > { %v808_v38 = vshll.u32 %v517_v24, 16  ;;  %v812_v40 = vshrl.u32 %v517_v24, 16  ;;  %v2087_v24 = vrot.slane %v2085_v4, 6 }
  0xb7   : > { %v2052_v42 = vrot.slane %v2051_v21, 4  ;;  %v2092_v21 = vshrl.u32 %v1748_v2, 16 }
  0xb8   : > { %v11781_v5 = vpop.f32.mrf.mxu2  ;;  %v1039_v9 = vpop.f32.mrf.mxu1  ;;  %v11819_v60 = vrot.slane %v808_v38, 5  ;;  %v814_v61 = vrot.slane %v812_v40, 4 }
  0xb9   : > { %v1148_v18 = vadd.f32 %v1116_v10, %v1039_v9  ;;  %v380_v19 = vpop.f32.mrf.mxu0  ;;  %v1117_v59 = vld [vmem:[#allocation2 + $0x18] sm:$0xff]  ;;  %v2061_v7 = vsel %vm11499_vm10, %v2052_v42, %v11789_v23  ;;  %v10015_v9 = vrot.slane %v1243_v48, 9  ;;  %v1390_v10 = vrot.slane %v1388_v44, 4 }
  0xba   : > { %v1618_v25 = vld [vmem:[#allocation2 + $0x8] sm:$0xff]  ;;  %455 = vst.msk [vmem:[#allocation2 + $0x20] sm:$0xff] %vm450_vm11, %v380_v19  ;;  %v2075_v19 = vrot.slane %v2073_v62, 5  ;;  %v2235_v28 = vunpack.c.l.b16 %v2061_v7  ;;  %v2094_v45 = vrot.slane %v2092_v21, 5  ;;  %v826_v48 = vshll.u32 %v519_v34, 16 }
  0xbb   : > { %v1650_v31 = vadd.f32 %v1618_v25, %v11759_v29  ;;  %1180 = vst.msk [vmem:[#allocation2 + $0x10] sm:$0xff] %vm450_vm11, %v1148_v18  ;;  %9997 = vmatmul.msk.bf16.gmra.mxu1 %vm308_vm5, %v962_v6  ;;  %9976 = vmatmul.msk.bf16.gmra.mxu0 %vm308_vm5, %v11111_v11  ;;  %v787_v29 = vsel %vm11477_vm9, %v782_v14, %v11766_v39  ;;  %v2095_v25 = vshll.u32 %v1748_v2, 16  ;;  %v825_v2 = vrot.slane %v823_v47, 4 }
  0xbc   : > { %v2330_v32 = vpop.f32.mrf.mxu3  ;;  %v2408_v36 = vld [vmem:[#allocation2] sm:$0xff]  ;;  %v11815_v52 = vunpack.c.l.b16 %v787_v29  ;;  %v805_v14 = vor.u32 %v804_v56, %v801_v54  ;;  %v815_v18 = vor.u32 %v814_v61, %v11819_v60  ;;  %v1392_v33 = vsel %vm11441_vm6, %v1390_v10, %v1391_v13  ;;  %v1749_v13 = vld [vmem:[%s11437_s6 + $0x90] sm:$0xe] }
  0xbd   : > { %1682 = vst.msk [vmem:[#allocation2 + $0x8] sm:$0xff] %vm450_vm11, %v1650_v31  ;;  %v2440_v41 = vadd.f32 %v2408_v36, %v2328_v53  ;;  %v518_v53 = vld [vmem:[%s11437_s6 + $0x8c] sm:$0x1]  ;;  %v1389_v31 = vsel %vm11441_vm6, %v10015_v9, %v1388_v44  ;;  %v11112_v36 = vld [vmem:[%s11437_s6 + $0x84] sm:$0xff]  ;;  %v2079_v40 = vor.u32 %v2078_v20, %v2075_v19  ;;  %v2097_v46 = vrot.slane %v2095_v25, 6 }
  0xbe   : > { %v818_v15 = vshll.u32 %v518_v53, 16  ;;  %v963_v26 = vpack.c.b16 %v942_v1, %v11815_v52  ;;  %v816_v29 = vrot.slane %v815_v18, 4  ;;  %v1247_v52 = vld [vmem:[%s11437_s6 + $0x94] sm:$0xf]  ;;  %v1446_v56 = vunpack.c.l.b16 %v1389_v31 }
  0xbf   : > { %2472 = vst.msk [vmem:[#allocation2] sm:$0xff] %vm450_vm11, %v2440_v41  ;;  %v520_v53 = vld [vmem:[%s11437_s6 + $0x94] sm:$0xf]  ;;  %v2080_v62 = vrot.slane %v2079_v40, 4  ;;  %v1395_v1 = vrot.slane %v1247_v52, 5  ;;  %v2104_v34 = vshll.u32 %v1749_v13, 16 }
  0xc0   : > { %v11813_v39 = vpop.f32.mrf.mxu2  ;;  %v1041_v57 = vpop.f32.mrf.mxu1  ;;  %v820_v38 = vrot.slane %v818_v15, 5  ;;  %v832_v4 = vshll.u32 %v520_v53, 16  ;;  %v836_v7 = vshrl.u32 %v520_v53, 16  ;;  %v1750_v20 = vld [vmem:[%s11437_s6 + $0x94] sm:$0xf] }
  0xc1   : > { %10057 = vmatmul.msk.bf16.gmra.mxu3 %vm308_vm5, %v2256_v37  ;;  %v1149_v55 = vadd.f32 %v1117_v59, %v1041_v57  ;;  %v382_v0 = vpop.f32.mrf.mxu0  ;;  %v806_v37 = vrot.slane %v805_v14, 4  ;;  %v1447_v57 = vunpack.c.l.b16 %v1392_v33  ;;  %v2101_v33 = vshrl.u32 %v1749_v13, 16  ;;  %v1751_v40 = vld [vmem:[%s11437_s6 + $0x98] sm:$0x3] }
  0xc2   : > { %v1619_v6 = vld [vmem:[#allocation2 + $0x10] sm:$0xff]  ;;  %456 = vst.msk [vmem:[#allocation2 + $0x28] sm:$0xff] %vm450_vm11, %v382_v0  ;;  %v11873_v25 = vrot.slane %v832_v4, 5  ;;  %v838_v31 = vrot.slane %v836_v7, 4 }
  0xc3   : > { %v1651_v11 = vadd.f32 %v1619_v6, %v11781_v5  ;;  %1181 = vst.msk [vmem:[#allocation2 + $0x18] sm:$0xff] %vm450_vm11, %v1149_v55  ;;  %v2084_v5 = vrot.slane %v2082_v3, 5  ;;  %v811_v59 = vsel %vm11477_vm9, %v806_v37, %v11819_v60  ;;  %v2098_v55 = vor.u32 %v2097_v46, %v2094_v45  ;;  %v1246_v0 = vld [vmem:[%s11437_s6 + $0x90] sm:$0xe]  ;;  %v1248_v6 = vld [vmem:[%s11437_s6 + $0x98] sm:$0x1] }
  0xc4   : > { %v2333_v12 = vpop.f32.mrf.mxu3  ;;  %v2409_v16 = vld [vmem:[#allocation2 + $0x8] sm:$0xff]  ;;  %v828_v3 = vrot.slane %v826_v48, 5  ;;  %v1467_v10 = vpack.c.b16 %v1447_v57, %v1446_v56  ;;  %v10016_v19 = vrot.slane %v1246_v0, 9  ;;  %v2103_v47 = vrot.slane %v2101_v33, 5 }
  0xc5   : > { %10036 = vmatmul.msk.bf16.gmra.mxu2 %vm308_vm5, %v1466_v51  ;;  %1683 = vst.msk [vmem:[#allocation2 + $0x10] sm:$0xff] %vm450_vm11, %v1651_v11  ;;  %v2441_v23 = vadd.f32 %v2409_v16, %v2330_v32  ;;  %v1118_v32 = vld [vmem:[#allocation2 + $0x20] sm:$0xff]  ;;  %v11843_v43 = vor.u32 %v2087_v24, %v2084_v5  ;;  %v2257_v51 = vpack.c.b16 %v2236_v30, %v2235_v28  ;;  %v943_v11 = vunpack.c.l.b16 %v811_v59  ;;  %v521_v30 = vld [vmem:[%s11437_s6 + $0x98] sm:$0x1] }
  0xc6   : > { %v1398_v5 = vrot.slane %v1248_v6, 5  ;;  %v829_v24 = vor.u32 %v828_v3, %v825_v2  ;;  %v2106_v48 = vrot.slane %v2104_v34, 6  ;;  %v2123_v56 = vshll.u32 %v1751_v40, 16 }
  0xc7   : > { %2473 = vst.msk [vmem:[#allocation2 + $0x8] sm:$0xff] %vm450_vm11, %v2441_v23  ;;  %v2090_v63 = vrot.slane %v11843_v43, 4  ;;  %v2089_v16 = vsel %vm11499_vm10, %v2080_v62, %v11843_v43  ;;  %v1397_v23 = vrot.slane %v1395_v1, 4  ;;  %v842_v43 = vshll.u32 %v521_v30, 16 }
  0xc8   : > { %v11835_v27 = vpop.f32.mrf.mxu2  ;;  %v1044_v35 = vpop.f32.mrf.mxu1  ;;  %v830_v46 = vrot.slane %v829_v24, 4  ;;  %v2107_v7 = vor.u32 %v2106_v48, %v2103_v47 }
  0xc9   : > { %v1150_v41 = vadd.f32 %v1118_v32, %v1044_v35  ;;  %v385_v42 = vpop.f32.mrf.mxu0  ;;  %v1119_v9 = vld [vmem:[#allocation2 + $0x28] sm:$0xff]  ;;  %v2099_v18 = vsel %vm11499_vm10, %v2090_v63, %v2098_v55  ;;  %v2110_v32 = vshrl.u32 %v1750_v20, 16  ;;  %v844_v0 = vrot.slane %v842_v43, 5 }
  0xca   : > { %v1620_v44 = vld [vmem:[#allocation2 + $0x18] sm:$0xff]  ;;  %457 = vst.msk [vmem:[#allocation2 + $0x30] sm:$0xff] %vm450_vm11, %v385_v42  ;;  %v1399_v42 = vsel %vm11441_vm6, %v1397_v23, %v1398_v5  ;;  %v835_v4 = vsel %vm11477_vm9, %v830_v46, %v11873_v25 }
  0xcb   : > { %v1652_v49 = vadd.f32 %v1620_v44, %v11813_v39  ;;  %1182 = vst.msk [vmem:[#allocation2 + $0x20] sm:$0xff] %vm450_vm11, %v1150_v41  ;;  %9998 = vmatmul.msk.bf16.gmra.mxu1 %vm308_vm5, %v963_v26  ;;  %9977 = vmatmul.msk.bf16.gmra.mxu0 %vm308_vm5, %v11112_v36  ;;  %v821_v39 = vsel %vm11477_vm9, %v816_v29, %v820_v38  ;;  %v2113_v36 = vshll.u32 %v1750_v20, 16  ;;  %v2237_v38 = vunpack.c.l.b16 %v2089_v16 }
  0xcc   : > { %v2335_v50 = vpop.f32.mrf.mxu3  ;;  %v2410_v54 = vld [vmem:[#allocation2 + $0x10] sm:$0xff]  ;;  %v1396_v41 = vsel %vm11441_vm6, %v10016_v19, %v1395_v1  ;;  %v839_v44 = vor.u32 %v838_v31, %v11873_v25  ;;  %v2112_v52 = vrot.slane %v2110_v32, 5  ;;  %v1449_v55 = vunpack.c.l.b16 %v1399_v42  ;;  %v522_v1 = vld [vmem:[%s11437_s6 + $0x9c] sm:$0xf]  ;;  %v1753_v32 = vld [vmem:[%s11437_s6 + $0xa0] sm:$0xf] }
  0xcd   : > { %1684 = vst.msk [vmem:[#allocation2 + $0x18] sm:$0xff] %vm450_vm11, %v1652_v49  ;;  %v2442_v61 = vadd.f32 %v2410_v54, %v2333_v12  ;;  %v944_v12 = vunpack.c.l.b16 %v821_v39  ;;  %v2115_v53 = vrot.slane %v2113_v36, 6  ;;  %v2120_v54 = vshrl.u32 %v1751_v40, 16  ;;  %v11891_v39 = vld [vmem:[%s11437_s6 + $0xa0] sm:$0xf] }
  0xce   : > { %v1448_v63 = vunpack.c.l.b16 %v1396_v41  ;;  %v840_v6 = vrot.slane %v839_v44, 4  ;;  %v850_v16 = vshll.u32 %v522_v1, 16  ;;  %v11914_v24 = vunpack.c.l.b16 %v835_v4 }
  0xcf   : > { %2474 = vst.msk [vmem:[#allocation2 + $0x10] sm:$0xff] %vm450_vm11, %v2442_v61  ;;  %v964_v29 = vpack.c.b16 %v944_v12, %v943_v11  ;;  %v2125_v11 = vrot.slane %v2123_v56, 6  ;;  %v1402_v12 = vrot.slane %v11891_v39, 5  ;;  %v2108_v25 = vrot.slane %v2107_v7, 4 }
  0xd0   : > { %v11861_v60 = vpop.f32.mrf.mxu2  ;;  %v1046_v8 = vpop.f32.mrf.mxu1  ;;  %v1468_v23 = vpack.c.b16 %v1449_v55, %v1448_v63  ;;  %v845_v5 = vsel %vm11477_vm9, %v840_v6, %v844_v0 }
  0xd1   : > { %10058 = vmatmul.msk.bf16.gmra.mxu3 %vm308_vm5, %v2257_v51  ;;  %v1151_v14 = vadd.f32 %v1119_v9, %v1046_v8  ;;  %v387_v15 = vpop.f32.mrf.mxu0  ;;  %v11113_v51 = vld [vmem:[%s11437_s6 + $0x90] sm:$0xff]  ;;  %v523_v8 = vld [vmem:[%s11437_s6 + $0xa0] sm:$0xf] }
  0xd2   : > { %v1621_v21 = vld [vmem:[#allocation2 + $0x20] sm:$0xff]  ;;  %458 = vst.msk [vmem:[#allocation2 + $0x38] sm:$0xff] %vm450_vm11, %v387_v15  ;;  %v847_v15 = vshrl.u32 %v522_v1, 16  ;;  %v856_v19 = vshll.u32 %v523_v8, 16  ;;  %v860_v20 = vshrl.u32 %v523_v8, 16 }
  0xd3   : > { %v1653_v26 = vadd.f32 %v1621_v21, %v11835_v27  ;;  %1183 = vst.msk [vmem:[#allocation2 + $0x28] sm:$0xff] %vm450_vm11, %v1151_v14  ;;  %v2238_v27 = vunpack.c.l.b16 %v2099_v18  ;;  %v1249_v14 = vld [vmem:[%s11437_s6 + $0x9c] sm:$0xe]  ;;  %v1251_v18 = vld [vmem:[%s11437_s6 + $0xa4] sm:$0x1] }
  0xd4   : > { %v2338_v28 = vpop.f32.mrf.mxu3  ;;  %v2411_v35 = vld [vmem:[#allocation2 + $0x18] sm:$0xff]  ;;  %v10017_v34 = vrot.slane %v1249_v14, 9  ;;  %v849_v40 = vrot.slane %v847_v15, 4  ;;  %v11922_v42 = vrot.slane %v856_v19, 5  ;;  %v862_v43 = vrot.slane %v860_v20, 4 }
  0xd5   : > { %10037 = vmatmul.msk.bf16.gmra.mxu2 %vm308_vm5, %v1467_v10  ;;  %1685 = vst.msk [vmem:[#allocation2 + $0x20] sm:$0xff] %vm450_vm11, %v1653_v26  ;;  %v2443_v37 = vadd.f32 %v2411_v35, %v2335_v50  ;;  %v1120_v50 = vld [vmem:[#allocation2 + $0x30] sm:$0xff]  ;;  %v2258_v62 = vpack.c.b16 %v2238_v27, %v2237_v38  ;;  %v11903_v10 = vor.u32 %v2115_v53, %v2112_v52  ;;  %v1752_v26 = vld [vmem:[%s11437_s6 + $0x9c] sm:$0xe]  ;;  %v1404_v35 = vrot.slane %v1402_v12, 4 }
  0xd6   : > { %v524_v38 = vld [vmem:[%s11437_s6 + $0xa4] sm:$0x1]  ;;  %v852_v27 = vrot.slane %v850_v16, 5  ;;  %v2129_v46 = vshrl.u32 %v1752_v26, 16  ;;  %v2132_v44 = vshll.u32 %v1752_v26, 16  ;;  %v2141_v52 = vshll.u32 %v1753_v32, 16 }
  0xd7   : > { %2475 = vst.msk [vmem:[#allocation2 + $0x18] sm:$0xff] %vm450_vm11, %v2443_v37  ;;  %v2118_v31 = vrot.slane %v11903_v10, 4  ;;  %v526_v19 = vld [vmem:[%s11437_s6 + $0xac] sm:$0xf] }
  0xd8   : > { %v11886_v45 = vpop.f32.mrf.mxu2  ;;  %v1049_v49 = vpop.f32.mrf.mxu1  ;;  %v853_v39 = vor.u32 %v852_v27, %v849_v40  ;;  %v2131_v63 = vrot.slane %v2129_v46, 5  ;;  %v2134_v55 = vrot.slane %v2132_v44, 6  ;;  %v2143_v4 = vrot.slane %v2141_v52, 6  ;;  %v1755_v44 = vld [vmem:[%s11437_s6 + $0xa8] sm:$0xe] }
  0xd9   : > { %v1152_v57 = vadd.f32 %v1120_v50, %v1049_v49  ;;  %v390_v59 = vpop.f32.mrf.mxu0  ;;  %v1121_v30 = vld [vmem:[#allocation2 + $0x38] sm:$0xff]  ;;  %v946_v49 = vunpack.c.l.b16 %v845_v5  ;;  %v1754_v50 = vld [vmem:[%s11437_s6 + $0xa4] sm:$0x3]  ;;  %v884_v40 = vshrl.u32 %v526_v19, 16  ;;  %v1756_v52 = vld [vmem:[%s11437_s6 + $0xac] sm:$0xf] }
  0xda   : > { %v1622_v61 = vld [vmem:[#allocation2 + $0x28] sm:$0xff]  ;;  %459 = vst.msk [vmem:[#allocation2 + $0x40] sm:$0xff] %vm450_vm11, %v390_v59  ;;  %v2148_v0 = vshrl.u32 %v1754_v50, 16  ;;  %v2151_v6 = vshll.u32 %v1754_v50, 16 }
  0xdb   : > { %v1654_v2 = vadd.f32 %v1622_v61, %v11861_v60  ;;  %1184 = vst.msk [vmem:[#allocation2 + $0x30] sm:$0xff] %vm450_vm11, %v1152_v57  ;;  %9999 = vmatmul.msk.bf16.gmra.mxu1 %vm308_vm5, %v964_v29  ;;  %9978 = vmatmul.msk.bf16.gmra.mxu0 %vm308_vm5, %v11113_v51  ;;  %v2122_v60 = vrot.slane %v2120_v54, 5  ;;  %v1405_v29 = vrot.slane %v1251_v18, 5  ;;  %v2138_v51 = vshrl.u32 %v1753_v32, 16  ;;  %v525_v18 = vld [vmem:[%s11437_s6 + $0xa8] sm:$0xf] }
  0xdc   : > { %v2340_v3 = vpop.f32.mrf.mxu3  ;;  %v2412_v9 = vld [vmem:[#allocation2 + $0x20] sm:$0xff]  ;;  %v2117_v54 = vsel %vm11499_vm10, %v2108_v25, %v11903_v10  ;;  %v866_v61 = vshll.u32 %v524_v38, 16  ;;  %v2150_v25 = vrot.slane %v2148_v0, 5  ;;  %v1252_v32 = vld [vmem:[%s11437_s6 + $0xa8] sm:$0xe] }
  0xdd   : > { %1686 = vst.msk [vmem:[#allocation2 + $0x28] sm:$0xff] %vm450_vm11, %v1654_v2  ;;  %v2444_v13 = vadd.f32 %v2412_v9, %v2338_v28  ;;  %v2126_v33 = vor.u32 %v2125_v11, %v2122_v60  ;;  %v1406_v59 = vsel %vm11441_vm6, %v1404_v35, %v1405_v29  ;;  %v965_v2 = vpack.c.b16 %v946_v49, %v11914_v24  ;;  %v11114_v9 = vld [vmem:[%s11437_s6 + $0x9c] sm:$0xff]  ;;  %v11945_v11 = vld [vmem:[%s11437_s6 + $0xac] sm:$0xf]  ;;  %v1254_v38 = vld [vmem:[%s11437_s6 + $0xb0] sm:$0x1] }
  0xde   : > { %v2239_v10 = vunpack.c.l.b16 %v2117_v54  ;;  %v1451_v15 = vunpack.c.l.b16 %v1406_v59  ;;  %v868_v16 = vrot.slane %v866_v61, 5  ;;  %v2135_v24 = vor.u32 %v2134_v55, %v2131_v63  ;;  %v527_v61 = vld [vmem:[%s11437_s6 + $0xb0] sm:$0x1] }
  0xdf   : > { %2476 = vst.msk [vmem:[#allocation2 + $0x20] sm:$0xff] %vm450_vm11, %v2444_v13  ;;  %v2127_v56 = vsel %vm11499_vm10, %v2118_v31, %v2126_v33  ;;  %v2153_v31 = vrot.slane %v2151_v6, 6  ;;  %v1409_v33 = vrot.slane %v11945_v11, 5  ;;  %v10018_v50 = vrot.slane %v1252_v32, 9 }
  0xe0   : > { %v11910_v21 = vpop.f32.mrf.mxu2  ;;  %v1051_v28 = vpop.f32.mrf.mxu1  ;;  %v2240_v60 = vunpack.c.l.b16 %v2127_v56  ;;  %v2136_v46 = vrot.slane %v2135_v24, 4  ;;  %v2157_v63 = vshrl.u32 %v1755_v44, 16  ;;  %v2160_v55 = vshll.u32 %v1755_v44, 16 }
  0xe1   : > { %10059 = vmatmul.msk.bf16.gmra.mxu3 %vm308_vm5, %v2258_v62  ;;  %v1153_v36 = vadd.f32 %v1121_v30, %v1051_v28  ;;  %v392_v37 = vpop.f32.mrf.mxu0  ;;  %v863_v62 = vor.u32 %v862_v43, %v11922_v42  ;;  %v1122_v8 = vld [vmem:[#allocation2 + $0x40] sm:$0xff] }
  0xe2   : > { %v1623_v41 = vld [vmem:[#allocation2 + $0x30] sm:$0xff]  ;;  %460 = vst.msk [vmem:[#allocation2 + $0x48] sm:$0xff] %vm450_vm11, %v392_v37  ;;  %v2259_v35 = vpack.c.b16 %v2240_v60, %v2239_v10  ;;  %v874_v37 = vshll.u32 %v525_v18, 16 }
  0xe3   : > { %v1655_v47 = vadd.f32 %v1623_v41, %v11886_v45  ;;  %1185 = vst.msk [vmem:[#allocation2 + $0x38] sm:$0xff] %vm450_vm11, %v1153_v36  ;;  %v1403_v45 = vsel %vm11441_vm6, %v10017_v34, %v1402_v12  ;;  %v864_v5 = vrot.slane %v863_v62, 4  ;;  %v871_v36 = vshrl.u32 %v525_v18, 16  ;;  %v1757_v60 = vld [vmem:[%s11437_s6 + $0xb0] sm:$0x3] }
  0xe4   : > { %v2343_v48 = vpop.f32.mrf.mxu3  ;;  %v2413_v53 = vld [vmem:[#allocation2 + $0x28] sm:$0xff]  ;;  %v1450_v14 = vunpack.c.l.b16 %v1403_v45  ;;  %v876_v45 = vrot.slane %v874_v37, 5  ;;  %v886_v62 = vrot.slane %v884_v40, 4  ;;  %v2159_v18 = vrot.slane %v2157_v63, 5  ;;  %v529_v37 = vld [vmem:[%s11437_s6 + $0xb8] sm:$0xf] }
  0xe5   : > { %10038 = vmatmul.msk.bf16.gmra.mxu2 %vm308_vm5, %v1468_v23  ;;  %1687 = vst.msk [vmem:[#allocation2 + $0x30] sm:$0xff] %vm450_vm11, %v1655_v47  ;;  %v2445_v57 = vadd.f32 %v2413_v53, %v2340_v3  ;;  %v2140_v3 = vrot.slane %v2138_v51, 5  ;;  %v854_v23 = vrot.slane %v853_v39, 4  ;;  %v869_v43 = vsel %vm11477_vm9, %v864_v5, %v868_v16 }
  0xe6   : > { %v1469_v27 = vpack.c.b16 %v1451_v15, %v1450_v14  ;;  %v1411_v51 = vrot.slane %v1409_v33, 4  ;;  %v873_v56 = vrot.slane %v871_v36, 4  ;;  %v890_v14 = vshll.u32 %v527_v61, 16  ;;  %v528_v36 = vld [vmem:[%s11437_s6 + $0xb4] sm:$0xf] }
  0xe7   : > { %2477 = vst.msk [vmem:[#allocation2 + $0x28] sm:$0xff] %vm450_vm11, %v2445_v57  ;;  %v11953_v30 = vor.u32 %v2143_v4, %v2140_v3  ;;  %v859_v41 = vsel %vm11477_vm9, %v854_v23, %v11922_v42  ;;  %v1412_v42 = vrot.slane %v1254_v38, 5  ;;  %v2166_v3 = vshrl.u32 %v1756_v52, 16  ;;  %v1758_v61 = vld [vmem:[%s11437_s6 + $0xb4] sm:$0xe] }
  0xe8   : > { %v11940_v1 = vpop.f32.mrf.mxu2  ;;  %v1054_v7 = vpop.f32.mrf.mxu1  ;;  %v2169_v4 = vshll.u32 %v1756_v52, 16  ;;  %v2176_v5 = vshrl.u32 %v1757_v60, 16  ;;  %v2179_v24 = vshll.u32 %v1757_v60, 16  ;;  %v892_v40 = vrot.slane %v890_v14, 5 }
  0xe9   : > { %v1154_v12 = vadd.f32 %v1122_v8, %v1054_v7  ;;  %v395_v13 = vpop.f32.mrf.mxu0  ;;  %v2146_v49 = vrot.slane %v11953_v30, 4  ;;  %v1123_v54 = vld [vmem:[#allocation2 + $0x48] sm:$0xff]  ;;  %v948_v8 = vunpack.c.l.b16 %v869_v43  ;;  %v895_v52 = vshrl.u32 %v528_v36, 16 }
  0xea   : > { %v1624_v20 = vld [vmem:[#allocation2 + $0x38] sm:$0xff]  ;;  %461 = vst.msk [vmem:[#allocation2 + $0x50] sm:$0xff] %vm450_vm11, %v395_v13  ;;  %v877_v13 = vor.u32 %v876_v45, %v873_v56  ;;  %v2171_v23 = vrot.slane %v2169_v4, 6  ;;  %v2178_v44 = vrot.slane %v2176_v5, 5  ;;  %v908_v45 = vshrl.u32 %v529_v37, 16 }
  0xeb   : > { %v1656_v26 = vadd.f32 %v1624_v20, %v11910_v21  ;;  %1186 = vst.msk [vmem:[#allocation2 + $0x40] sm:$0xff] %vm450_vm11, %v1154_v12  ;;  %10000 = vmatmul.msk.bf16.gmra.mxu1 %vm308_vm5, %v965_v2  ;;  %9979 = vmatmul.msk.bf16.gmra.mxu0 %vm308_vm5, %v11114_v9  ;;  %v880_v21 = vshll.u32 %v526_v19, 16  ;;  %v947_v2 = vunpack.c.l.b16 %v859_v41  ;;  %v2145_v9 = vsel %vm11499_vm10, %v2136_v46, %v11953_v30  ;;  %v11115_v30 = vld [vmem:[%s11437_s6 + $0xa8] sm:$0xff] }
  0xec   : > { %v2345_v28 = vpop.f32.mrf.mxu3  ;;  %v2414_v34 = vld [vmem:[#allocation2 + $0x30] sm:$0xff]  ;;  %v11987_v12 = vsel %vm11441_vm6, %v10018_v50, %v1409_v33  ;;  %v2162_v19 = vrot.slane %v2160_v55, 6  ;;  %v2168_v20 = vrot.slane %v2166_v3, 5  ;;  %v878_v38 = vrot.slane %v877_v13, 4  ;;  %v1257_v3 = vld [vmem:[%s11437_s6 + $0xbc] sm:$0x1] }
  0xed   : > { %1688 = vst.msk [vmem:[#allocation2 + $0x38] sm:$0xff] %vm450_vm11, %v1656_v26  ;;  %v2446_v29 = vadd.f32 %v2414_v34, %v2343_v48  ;;  %v2154_v48 = vor.u32 %v2153_v31, %v2150_v25  ;;  %v11972_v57 = vrot.slane %v880_v21, 5  ;;  %v966_v26 = vpack.c.b16 %v948_v8, %v947_v2  ;;  %v1255_v2 = vld [vmem:[%s11437_s6 + $0xb4] sm:$0xe]  ;;  %v530_v8 = vld [vmem:[%s11437_s6 + $0xbc] sm:$0x1] }
  0xee   : > { %v2241_v34 = vunpack.c.l.b16 %v2145_v9  ;;  %v12001_v46 = vor.u32 %v2171_v23, %v2168_v20  ;;  %v2188_v13 = vshll.u32 %v1758_v61, 16 }
  0xef   : > { %2478 = vst.msk [vmem:[#allocation2 + $0x30] sm:$0xff] %vm450_vm11, %v2446_v29  ;;  %v2155_v10 = vsel %vm11499_vm10, %v2146_v49, %v2154_v48  ;;  %v887_v16 = vor.u32 %v886_v62, %v11972_v57  ;;  %v2181_v49 = vrot.slane %v2179_v24, 6  ;;  %v1759_v62 = vld [vmem:[%s11437_s6 + $0xb8] sm:$0xf] }
  0xf0   : > { %v11967_v47 = vpop.f32.mrf.mxu2  ;;  %v1056_v53 = vpop.f32.mrf.mxu1  ;;  %v2174_v55 = vrot.slane %v12001_v46, 4  ;;  %v2194_v14 = vshrl.u32 %v1759_v62, 16  ;;  %v2197_v20 = vshll.u32 %v1759_v62, 16 }
  0xf1   : > { %10060 = vmatmul.msk.bf16.gmra.mxu3 %vm308_vm5, %v2259_v35  ;;  %v1155_v59 = vadd.f32 %v1123_v54, %v1056_v53  ;;  %v397_v39 = vpop.f32.mrf.mxu0  ;;  %v1124_v33 = vld [vmem:[#allocation2 + $0x50] sm:$0xff]  ;;  %v1452_v35 = vunpack.c.l.b16 %v11987_v12  ;;  %v888_v43 = vrot.slane %v887_v16, 4  ;;  %v898_v53 = vshll.u32 %v528_v36, 16 }
  0xf2   : > { %v1625_v0 = vld [vmem:[#allocation2 + $0x40] sm:$0xff]  ;;  %462 = vst.msk [vmem:[#allocation2 + $0x58] sm:$0xff] %vm450_vm11, %v397_v39  ;;  %v904_v54 = vshll.u32 %v529_v37, 16  ;;  %v910_v12 = vrot.slane %v908_v45, 4 }
  0xf3   : > { %v1657_v6 = vadd.f32 %v1625_v0, %v11940_v1  ;;  %1187 = vst.msk [vmem:[#allocation2 + $0x48] sm:$0xff] %vm450_vm11, %v1155_v59  ;;  %v1413_v1 = vsel %vm11441_vm6, %v1411_v51, %v1412_v42  ;;  %v12007_v51 = vld [vmem:[%s11437_s6 + $0xb8] sm:$0xf]  ;;  %v883_v59 = vsel %vm11477_vm9, %v878_v38, %v11972_v57  ;;  %v893_v63 = vsel %vm11477_vm9, %v888_v43, %v892_v40 }
  0xf4   : > { %v2348_v7 = vpop.f32.mrf.mxu3  ;;  %v2415_v11 = vld [vmem:[#allocation2 + $0x38] sm:$0xff]  ;;  %v1453_v32 = vunpack.c.l.b16 %v1413_v1  ;;  %v2182_v0 = vor.u32 %v2181_v49, %v2178_v44  ;;  %v1416_v4 = vrot.slane %v12007_v51, 5  ;;  %v897_v57 = vrot.slane %v895_v52, 4 }
  0xf5   : > { %10039 = vmatmul.msk.bf16.gmra.mxu2 %vm308_vm5, %v1469_v27  ;;  %1689 = vst.msk [vmem:[#allocation2 + $0x40] sm:$0xff] %vm450_vm11, %v1657_v6  ;;  %v2447_v15 = vadd.f32 %v2415_v11, %v2345_v28  ;;  %v2242_v28 = vunpack.c.l.b16 %v2155_v10  ;;  %v2163_v27 = vor.u32 %v2162_v19, %v2159_v18  ;;  %v900_v9 = vrot.slane %v898_v53, 5  ;;  %v11157_v53 = vld [vmem:[%s15063_s1 + $0x40] sm:$0x30] }
  0xf6   : > { %v12026_v10 = vrot.slane %v904_v54, 5  ;;  %v2185_v1 = vshrl.u32 %v1758_v61, 16  ;;  %v949_v18 = vunpack.c.l.b16 %v883_v59  ;;  %v950_v19 = vunpack.c.l.b16 %v893_v63 }
  0xf7   : > { %2479 = vst.msk [vmem:[#allocation2 + $0x38] sm:$0xff] %vm450_vm11, %v2447_v15  ;;  %v2260_v56 = vpack.c.b16 %v2242_v28, %v2241_v34  ;;  %v2164_v39 = vrot.slane %v2163_v27, 4  ;;  %v2183_v24 = vsel %vm11499_vm10, %v2174_v55, %v2182_v0  ;;  %v1419_v28 = vrot.slane %v1257_v3, 5 }
  0xf8   : > { %v11994_v25 = vpop.f32.mrf.mxu2  ;;  %v1059_v31 = vpop.f32.mrf.mxu1  ;;  %v911_v37 = vor.u32 %v910_v12, %v12026_v10  ;;  %v2196_v38 = vrot.slane %v2194_v14, 5  ;;  %v2199_v27 = vrot.slane %v2197_v20, 6  ;;  %v967_v49 = vpack.c.b16 %v950_v19, %v949_v18 }
  0xf9   : > { %v1156_v21 = vadd.f32 %v1124_v33, %v1059_v31  ;;  %v400_v29 = vpop.f32.mrf.mxu0  ;;  %v1125_v11 = vld [vmem:[#allocation2 + $0x58] sm:$0xff]  ;;  %v2173_v5 = vsel %vm11499_vm10, %v2164_v39, %v12001_v46  ;;  %v2244_v46 = vunpack.c.l.b16 %v2183_v24 }
  0xfa   : > { %v1626_v41 = vld [vmem:[#allocation2 + $0x48] sm:$0xff]  ;;  %463 = vst.msk [vmem:[#allocation2 + $0x60] sm:$0xff] %vm450_vm11, %v400_v29  ;;  %v1760_v31 = vld [vmem:[%s11437_s6 + $0xbc] sm:$0x3]  ;;  %v2190_v29 = vrot.slane %v2188_v13, 6  ;;  %v2243_v43 = vunpack.c.l.b16 %v2173_v5  ;;  %v912_v45 = vrot.slane %v911_v37, 4  ;;  %v12055_v63 = vor.u32 %v2199_v27, %v2196_v38 }
  0xfb   : > { %v1658_v48 = vadd.f32 %v1626_v41, %v11967_v47  ;;  %1188 = vst.msk [vmem:[#allocation2 + $0x50] sm:$0xff] %vm450_vm11, %v1156_v21  ;;  %10001 = vmatmul.msk.bf16.gmra.mxu1 %vm308_vm5, %v966_v26  ;;  %9980 = vmatmul.msk.bf16.gmra.mxu0 %vm308_vm5, %v11115_v30  ;;  %v10019_v26 = vrot.slane %v1255_v2, 9  ;;  %v1418_v30 = vrot.slane %v1416_v4, 4  ;;  %v2187_v21 = vrot.slane %v2185_v1, 5  ;;  %v10182_v2 = vld [vmem:[%s11437_s6 + $0xc] sm:$0xf] }
  0xfc   : > { %v2350_v50 = vpop.f32.mrf.mxu3  ;;  %v2416_v42 = vld [vmem:[#allocation2 + $0x40] sm:$0xff]  ;;  %v2207_v41 = vshll.u32 %v1760_v31, 16  ;;  %v10183_v1 = vld [vmem:[%s11437_s6 + $0x10] sm:$0xf]  ;;  %v2202_v19 = vrot.slane %v12055_v63, 4 }
  0xfd   : > { %1690 = vst.msk [vmem:[#allocation2 + $0x48] sm:$0xff] %vm450_vm11, %v1658_v48  ;;  %v2448_v47 = vadd.f32 %v2416_v42, %v2348_v7  ;;  %v1470_v7 = vpack.c.b16 %v1453_v32, %v1452_v35  ;;  %v901_v35 = vor.u32 %v900_v9, %v897_v57  ;;  %v914_v32 = vshll.u32 %v530_v8, 16  ;;  %v12061_v8 = vld [vmem:[%s11437_s6 + $0x10] sm:$0xf]  ;;  %v10254_v5 = vld [vmem:[%s11437_s6 + $0x14] sm:$0x1] }
  0xfe   : > { %v1417_v48 = vsel %vm11441_vm6, %v10019_v26, %v1416_v4  ;;  %v1420_v51 = vsel %vm11441_vm6, %v1418_v30, %v1419_v28  ;;  %v2191_v59 = vor.u32 %v2190_v29, %v2187_v21  ;;  %v2209_v0 = vrot.slane %v2207_v41, 6  ;;  %v10338_v28 = vld [vmem:[%s11437_s6 + $0xc] sm:$0xe] }
  0xff   : > { %2480 = vst.msk [vmem:[#allocation2 + $0x40] sm:$0xff] %vm450_vm11, %v2448_v47  ;;  %v902_v52 = vrot.slane %v901_v35, 4  ;;  %v916_v47 = vrot.slane %v914_v32, 5  ;;  %v2261_v4 = vpack.c.b16 %v2244_v46, %v2243_v43  ;;  %v2922_v24 = vshll.u32 %v10183_v1, 16  ;;  %v10339_v35 = vld [vmem:[%s11437_s6 + $0x10] sm:$0xf] }
 0x100   : > { %v12023_v6 = vpop.f32.mrf.mxu2  ;;  %v1061_v60 = vpop.f32.mrf.mxu1  ;;  %v2192_v14 = vrot.slane %v2191_v59, 4  ;;  %v10184_v43 = vld [vmem:[%s11437_s6 + $0x14] sm:$0x1] }
 0x101   : > { %10061 = vmatmul.msk.bf16.gmra.mxu3 %vm308_vm5, %v2260_v56  ;;  %v1157_v15 = vadd.f32 %v1125_v11, %v1061_v60  ;;  %v402_v16 = vpop.f32.mrf.mxu0  ;;  %v1126_v42 = vld [vmem:[#allocation2 + $0x60] sm:$0xff]  ;;  %v11116_v56 = vld [vmem:[%s11437_s6 + $0xb4] sm:$0xff]  ;;  %v1454_v60 = vunpack.c.l.b16 %v1417_v48  ;;  %v1455_v11 = vunpack.c.l.b16 %v1420_v51  ;;  %v907_v12 = vsel %vm11477_vm9, %v902_v52, %v12026_v10 }
 0x102   : > { %v1627_v23 = vld [vmem:[#allocation2 + $0x50] sm:$0xff]  ;;  %464 = vst.msk [vmem:[#allocation2 + $0x68] sm:$0xff] %vm450_vm11, %v402_v16  ;;  %v2916_v16 = vshll.u32 %v10182_v2, 16  ;;  %v3686_v10 = vrot.slane %v12061_v8, 5  ;;  %v2201_v37 = vsel %vm11499_vm10, %v2192_v14, %v12055_v63  ;;  %v4137_v48 = vshrl.u32 %v10338_v28, 16 }
 0x103   : > { %v1659_v33 = vadd.f32 %v1627_v23, %v11994_v25  ;;  %1189 = vst.msk [vmem:[#allocation2 + $0x58] sm:$0xff] %vm450_vm11, %v1157_v15  ;;  %v2204_v25 = vshrl.u32 %v1760_v31, 16  ;;  %v2913_v15 = vshrl.u32 %v10182_v2, 16  ;;  %v10252_v23 = vld [vmem:[%s11437_s6 + $0xc] sm:$0xe]  ;;  %v1471_v30 = vpack.c.b16 %v1455_v11, %v1454_v60 }
 0x104   : > { %v2353_v34 = vpop.f32.mrf.mxu3  ;;  %v2417_v36 = vld [vmem:[#allocation2 + $0x48] sm:$0xff]  ;;  %v12081_v31 = vunpack.c.l.b16 %v907_v12  ;;  %v2918_v29 = vrot.slane %v2916_v16, 5  ;;  %v3688_v41 = vrot.slane %v3686_v10, 4  ;;  %v4140_v51 = vshll.u32 %v10338_v28, 16  ;;  %v10664_v11 = vld [vmem:[%s15063_s1 + $0x50] sm:$0xf] }
 0x105   : > { %10040 = vmatmul.msk.bf16.gmra.mxu2 %vm308_vm5, %v1470_v7  ;;  %1691 = vst.msk [vmem:[#allocation2 + $0x50] sm:$0xff] %vm450_vm11, %v1659_v33  ;;  %v2449_v40 = vadd.f32 %v2417_v36, %v2350_v50  ;;  %v10508_v50 = vld [vmem:[%s15063_s1 + $0x40] sm:$0xf]  ;;  %v2206_v55 = vrot.slane %v2204_v25, 5  ;;  %v2926_v33 = vshrl.u32 %v10183_v1, 16  ;;  %v2915_v21 = vrot.slane %v2913_v15, 4 }
 0x106   : > { %v10509_v39 = vor.u32 %v11157_v53, %v10508_v50  ;;  %v10300_v25 = vrot.slane %v10252_v23, 9  ;;  %v4146_v52 = vshrl.u32 %v10339_v35, 16  ;;  %v2932_v63 = vshll.u32 %v10184_v43, 16  ;;  %v11159_v12 = vld [vmem:[%s15063_s1 + $0x50] sm:$0x30]  ;;  %v11121_v14 = vld [vmem:[%s11437_s6 + $0xc] sm:$0xff] }
 0x107   : > { %2481 = vst.msk [vmem:[#allocation2 + $0x48] sm:$0xff] %vm450_vm11, %v2449_v40  ;;  %v2210_v20 = vor.u32 %v2209_v0, %v2206_v55  ;;  %v2919_v59 = vor.u32 %v2918_v29, %v2915_v21  ;;  %v10578_v55 = vld [vmem:[%s15063_s1 + $0x48] sm:$0xf]  ;;  %v11158_v0 = vld [vmem:[%s15063_s1 + $0x48] sm:$0x30] }
 0x108   : > { %v12042_v44 = vpop.f32.mrf.mxu2  ;;  %v1064_v54 = vpop.f32.mrf.mxu1  ;;  %v5049_v7 = vsel %vm357_vm0, %v10509_v39, 0  ;;  %v10340_v39 = vld [vmem:[%s11437_s6 + $0x14] sm:$0x3]  ;;  %v10579_v2 = vor.u32 %v11158_v0, %v10578_v55  ;;  %v2934_v21 = vrot.slane %v2932_v63, 5  ;;  %v10342_v0 = vld [vmem:[%s11437_s6 + $0x1c] sm:$0xf] }
 0x109   : > { %v1158_v61 = vadd.f32 %v1126_v42, %v1064_v54  ;;  %v405_v62 = vpop.f32.mrf.mxu0  ;;  %5058 = vmatpush.bf16.msra.mxu0 %v5049_v7  ;;  %v1127_v32 = vld [vmem:[#allocation2 + $0x68] sm:$0xff]  ;;  %v2211_v27 = vsel %vm11499_vm10, %v2202_v19, %v2210_v20  ;;  %v12099_v54 = vrot.slane %v2922_v24, 5  ;;  %v2928_v42 = vrot.slane %v2926_v33, 4  ;;  %v10185_v24 = vld [vmem:[%s11437_s6 + $0x18] sm:$0xf] }
 0x10a   : > { %v1628_v3 = vld [vmem:[#allocation2 + $0x58] sm:$0xff]  ;;  %465 = vst.msk [vmem:[#allocation2 + $0x70] sm:$0xff] %vm450_vm11, %v405_v62  ;;  %v2246_v62 = vunpack.c.l.b16 %v2211_v27  ;;  %v4148_v7 = vrot.slane %v4146_v52, 5  ;;  %v2920_v15 = vrot.slane %v2919_v59, 4  ;;  %v5773_v16 = vsel %vm357_vm0, %v10579_v2, 0 }
 0x10b   : > { %v1660_v57 = vadd.f32 %v1628_v3, %v12023_v6  ;;  %1190 = vst.msk [vmem:[#allocation2 + $0x60] sm:$0xff] %vm450_vm11, %v1158_v61  ;;  %10002 = vmatmul.msk.bf16.gmra.mxu1 %vm308_vm5, %v967_v49  ;;  %9981 = vmatmul.msk.bf16.gmra.mxu0 %vm308_vm5, %v11116_v56  ;;  %v917_v6 = vsel %vm11477_vm9, %v912_v45, %v916_v47  ;;  %v3689_v49 = vrot.slane %v10254_v5, 5  ;;  %v4149_v56 = vshll.u32 %v10339_v35, 16  ;;  %v10255_v52 = vld [vmem:[%s11437_s6 + $0x18] sm:$0xe] }
 0x10c   : > { %v2355_v9 = vpop.f32.mrf.mxu3  ;;  %v2418_v13 = vld [vmem:[#allocation2 + $0x50] sm:$0xff]  ;;  %v12086_v36 = vunpack.c.l.b16 %v917_v6  ;;  %v4139_v3 = vrot.slane %v4137_v48, 5  ;;  %v2929_v60 = vor.u32 %v2928_v42, %v12099_v54  ;;  %v4156_v19 = vshrl.u32 %v10340_v39, 16  ;;  %5782 = vmatpush.bf16.msra.mxu1 %v5773_v16  ;;  %v11160_v59 = vld [vmem:[%s15063_s1 + $0x58] sm:$0x30] }
 0x10d   : > { %1692 = vst.msk [vmem:[#allocation2 + $0x58] sm:$0xff] %vm450_vm11, %v1660_v57  ;;  %v2450_v18 = vadd.f32 %v2418_v13, %v2353_v34  ;;  %v3687_v57 = vsel %vm11441_vm6, %v10300_v25, %v3686_v10  ;;  %v4151_v1 = vrot.slane %v4149_v56, 6  ;;  %v4159_v5 = vshll.u32 %v10340_v39, 16 }
 0x10e   : > { %v968_v47 = vpack.c.b16 %v12086_v36, %v12081_v31  ;;  %v3799_v31 = vunpack.c.l.b16 %v3687_v57  ;;  %v2937_v27 = vshrl.u32 %v10185_v24, 16  ;;  %v2940_v25 = vshll.u32 %v10185_v24, 16  ;;  %v10187_v57 = vld [vmem:[%s11437_s6 + $0x20] sm:$0x1] }
 0x10f   : > { %2482 = vst.msk [vmem:[#allocation2 + $0x50] sm:$0xff] %vm450_vm11, %v2450_v18  ;;  %v10665_v18 = vor.u32 %v11159_v12, %v10664_v11  ;;  %v12137_v29 = vor.u32 %v4151_v1, %v4148_v7  ;;  %v4161_v43 = vrot.slane %v4159_v5, 6  ;;  %v10257_v7 = vld [vmem:[%s11437_s6 + $0x20] sm:$0x1]  ;;  %v10301_v16 = vrot.slane %v10255_v52, 9 }
 0x110   : > { %v12079_v26 = vpop.f32.mrf.mxu2  ;;  %v1066_v34 = vpop.f32.mrf.mxu1  ;;  %v2939_v63 = vrot.slane %v2937_v27, 4  ;;  %v2942_v55 = vrot.slane %v2940_v25, 5  ;;  %v3696_v24 = vrot.slane %v10257_v7, 5  ;;  %v11122_v25 = vld [vmem:[%s11437_s6 + $0x18] sm:$0xff] }
 0x111   : > { %10062 = vmatmul.msk.bf16.gmra.mxu3 %vm308_vm5, %v2261_v4  ;;  %v1159_v38 = vadd.f32 %v1127_v32, %v1066_v34  ;;  %v407_v40 = vpop.f32.mrf.mxu0  ;;  %v4142_v4 = vrot.slane %v4140_v51, 6  ;;  %v1128_v6 = vld [vmem:[#allocation2 + $0x70] sm:$0xff]  ;;  %v6273_v28 = vsel %vm357_vm0, %v10665_v18, 0  ;;  %v10186_v34 = vld [vmem:[%s11437_s6 + $0x1c] sm:$0xf] }
 0x112   : > { %v1629_v46 = vld [vmem:[#allocation2 + $0x60] sm:$0xff]  ;;  %466 = vst.msk [vmem:[#allocation2 + $0x78] sm:$0xff] %vm450_vm11, %v407_v40  ;;  %6282 = vmatpush.bf16.msra.mxu2 %v6273_v28  ;;  %v4158_v40 = vrot.slane %v4156_v19, 5  ;;  %v2950_v48 = vshrl.u32 %v10186_v34, 16  ;;  %v4174_v19 = vshrl.u32 %v10342_v0, 16  ;;  %v2956_v28 = vshll.u32 %v10187_v57, 16 }
 0x113   : > { %v1661_v50 = vadd.f32 %v1629_v46, %v12042_v44  ;;  %1191 = vst.msk [vmem:[#allocation2 + $0x68] sm:$0xff] %vm450_vm11, %v1159_v38  ;;  %v2245_v44 = vunpack.c.l.b16 %v2201_v37  ;;  %v4143_v35 = vor.u32 %v4142_v4, %v4139_v3  ;;  %v2930_v37 = vrot.slane %v2929_v60, 4  ;;  %v10256_v46 = vld [vmem:[%s11437_s6 + $0x1c] sm:$0xf]  ;;  %v10343_v18 = vld [vmem:[%s11437_s6 + $0x20] sm:$0x3] }
 0x114   : > { %v12097_v53 = vpop.f32.mrf.mxu3  ;;  %v2419_v45 = vld [vmem:[#allocation2 + $0x58] sm:$0xff]  ;;  %v4162_v4 = vor.u32 %v4161_v43, %v4158_v40  ;;  %v2952_v60 = vrot.slane %v2950_v48, 4 }
 0x115   : > { %10041 = vmatmul.msk.bf16.gmra.mxu2 %vm308_vm5, %v1471_v30  ;;  %1693 = vst.msk [vmem:[#allocation2 + $0x60] sm:$0xff] %vm450_vm11, %v1661_v50  ;;  %v2451_v61 = vadd.f32 %v2419_v45, %v2355_v9  ;;  %v3690_v9 = vsel %vm11441_vm6, %v3688_v41, %v3689_v49  ;;  %v2262_v23 = vpack.c.b16 %v2246_v62, %v2245_v44  ;;  %v2946_v49 = vshll.u32 %v10186_v34, 16  ;;  %v10341_v50 = vld [vmem:[%s11437_s6 + $0x18] sm:$0xe] }
 0x116   : > { %v3800_v33 = vunpack.c.l.b16 %v3690_v9  ;;  %v12146_v51 = vrot.slane %v4143_v35, 4  ;;  %v2935_v56 = vsel %vm11477_vm9, %v2930_v37, %v2934_v21  ;;  %v3693_v44 = vrot.slane %v10256_v46, 5 }
 0x117   : > { %2483 = vst.msk [vmem:[#allocation2 + $0x58] sm:$0xff] %vm450_vm11, %v2451_v61  ;;  %v12168_v9 = vrot.slane %v2946_v49, 5  ;;  %v3300_v12 = vunpack.c.l.b16 %v2935_v56  ;;  %v4184_v37 = vshrl.u32 %v10343_v18, 16 }
 0x118   : > { %v12113_v8 = vpop.f32.mrf.mxu2  ;;  %v1069_v13 = vpop.f32.mrf.mxu1  ;;  %v3695_v5 = vrot.slane %v3693_v44, 4 }
 0x119   : > { %v1160_v20 = vadd.f32 %v1128_v6, %v1069_v13  ;;  %v410_v10 = vpop.f32.mrf.mxu0  ;;  %v1129_v61 = vld [vmem:[#allocation2 + $0x78] sm:$0xff]  ;;  %v4165_v13 = vshrl.u32 %v10341_v50, 16  ;;  %v4168_v6 = vshll.u32 %v10341_v50, 16  ;;  %v2958_v50 = vrot.slane %v2956_v28, 5 }
 0x11a   : > { %v1630_v30 = vld [vmem:[#allocation2 + $0x68] sm:$0xff]  ;;  %467 = vst.msk [vmem:[#allocation2 + $0x80] sm:$0xff] %vm450_vm11, %v410_v10  ;;  %v3697_v46 = vsel %vm11441_vm6, %v3695_v5, %v3696_v24 }
 0x11b   : > { %v1662_v32 = vadd.f32 %v1630_v30, %v12079_v26  ;;  %1192 = vst.msk [vmem:[#allocation2 + $0x70] sm:$0xff] %vm450_vm11, %v1160_v20  ;;  %10003 = vmatmul.msk.bf16.gmra.mxu1 %vm308_vm5, %v968_v47  ;;  %10166 = vmatmul.msk.bf16.vlgmr.msrb.gmra.mxu0 %vm308_vm5, %v11121_v14  ;;  %v2925_v26 = vsel %vm11477_vm9, %v2920_v15, %v12099_v54  ;;  %v10734_v47 = vld [vmem:[%s15063_s1 + $0x58] sm:$0xf]  ;;  %v4177_v20 = vshll.u32 %v10342_v0, 16  ;;  %v4167_v34 = vrot.slane %v4165_v13, 5 }
 0x11c   : > { %v12135_v36 = vpop.f32.mrf.mxu3  ;;  %v2420_v38 = vld [vmem:[#allocation2 + $0x60] sm:$0xff]  ;;  %v3831_v54 = vpack.c.b16 %v3800_v33, %v3799_v31  ;;  %v12155_v45 = vunpack.c.l.b16 %v2925_v26  ;;  %v10735_v62 = vor.u32 %v11160_v59, %v10734_v47  ;;  %v2943_v30 = vor.u32 %v2942_v55, %v2939_v63  ;;  %v12202_v63 = vld [vmem:[%s11437_s6 + $0x28] sm:$0xf] }
 0x11d   : > { %1694 = vst.msk [vmem:[#allocation2 + $0x68] sm:$0xff] %vm450_vm11, %v1662_v32  ;;  %v2452_v41 = vadd.f32 %v2420_v38, %v12097_v53  ;;  %v4154_v53 = vrot.slane %v12137_v29, 4  ;;  %v2953_v33 = vor.u32 %v2952_v60, %v12168_v9  ;;  %v4170_v32 = vrot.slane %v4168_v6, 6  ;;  %v10189_v55 = vld [vmem:[%s11437_s6 + $0x28] sm:$0xf] }
 0x11e   : > { %v7061_v1 = vsel %vm357_vm0, %v10735_v62, 0  ;;  %v3331_v35 = vpack.c.b16 %v3300_v12, %v12155_v45  ;;  %v4179_v38 = vrot.slane %v4177_v20, 6  ;;  %v4187_v26 = vshll.u32 %v10343_v18, 16  ;;  %v10344_v60 = vld [vmem:[%s11437_s6 + $0x24] sm:$0xe] }
 0x11f   : > { %2484 = vst.msk [vmem:[#allocation2 + $0x60] sm:$0xff] %vm450_vm11, %v2452_v41  ;;  %7070 = vmatpush.bf16.msra.mxu3 %v7061_v1  ;;  %v4163_v31 = vsel %vm11499_vm10, %v4154_v53, %v4162_v4  ;;  %v2944_v49 = vrot.slane %v2943_v30, 4  ;;  %v2954_v52 = vrot.slane %v2953_v33, 4  ;;  %v4171_v53 = vor.u32 %v4170_v32, %v4167_v34  ;;  %v10345_v6 = vld [vmem:[%s11437_s6 + $0x28] sm:$0xf] }
 0x120   : > { %v12151_v42 = vpop.f32.mrf.mxu2  ;;  %v1071_v39 = vpop.f32.mrf.mxu1  ;;  %v4588_v43 = vunpack.c.l.b16 %v4163_v31  ;;  %v4186_v47 = vrot.slane %v4184_v37, 5  ;;  %v4189_v62 = vrot.slane %v4187_v26, 6  ;;  %v3700_v12 = vrot.slane %v12202_v63, 5  ;;  %v10260_v20 = vld [vmem:[%s11437_s6 + $0x2c] sm:$0x1] }
 0x121   : > { %10063 = vmatmul.msk.bf16.gmra.mxu3 %vm308_vm5, %v2262_v23  ;;  %v1161_v2 = vadd.f32 %v1129_v61, %v1071_v39  ;;  %v412_v3 = vpop.f32.mrf.mxu0  ;;  %v4153_v23 = vsel %vm11499_vm10, %v12146_v51, %v12137_v29  ;;  %v4176_v29 = vrot.slane %v4174_v19, 5  ;;  %v1130_v27 = vld [vmem:[#allocation2 + $0x80] sm:$0xff]  ;;  %v3802_v61 = vunpack.c.l.b16 %v3697_v46  ;;  %v10190_v46 = vld [vmem:[%s11437_s6 + $0x2c] sm:$0x1] }
 0x122   : > { %v1631_v11 = vld [vmem:[#allocation2 + $0x70] sm:$0xff]  ;;  %468 = vst.msk [vmem:[#allocation2 + $0x88] sm:$0xff] %vm450_vm11, %v412_v3  ;;  %v4587_v41 = vunpack.c.l.b16 %v4153_v23  ;;  %v2959_v57 = vsel %vm11477_vm9, %v2954_v52, %v2958_v50  ;;  %v2970_v1 = vshll.u32 %v10189_v55, 16  ;;  %v2974_v13 = vshrl.u32 %v10189_v55, 16  ;;  %v10258_v19 = vld [vmem:[%s11437_s6 + $0x24] sm:$0xe] }
 0x123   : > { %v1663_v14 = vadd.f32 %v1631_v11, %v12113_v8  ;;  %1193 = vst.msk [vmem:[#allocation2 + $0x78] sm:$0xff] %vm450_vm11, %v1161_v2  ;;  %v4172_v11 = vrot.slane %v4171_v53, 4  ;;  %v4190_v18 = vor.u32 %v4189_v62, %v4186_v47  ;;  %v4193_v30 = vshrl.u32 %v10344_v60, 16  ;;  %v11123_v55 = vld [vmem:[%s11437_s6 + $0x24] sm:$0xff] }
 0x124   : > { %v2363_v15 = vpop.f32.mrf.mxu3  ;;  %v2421_v10 = vld [vmem:[#allocation2 + $0x68] sm:$0xff]  ;;  %v4619_v2 = vpack.c.b16 %v4588_v43, %v4587_v41  ;;  %v3302_v28 = vunpack.c.l.b16 %v2959_v57  ;;  %v4202_v34 = vshrl.u32 %v10345_v6, 16  ;;  %v4205_v32 = vshll.u32 %v10345_v6, 16 }
 0x125   : > { %10322 = vmatmul.msk.bf16.vlgmr.msrb.gmra.mxu2 %vm308_vm5, %v3831_v54  ;;  %1695 = vst.msk [vmem:[#allocation2 + $0x70] sm:$0xff] %vm450_vm11, %v1663_v14  ;;  %v2453_v8 = vadd.f32 %v2421_v10, %v12135_v36  ;;  %v3694_v36 = vsel %vm11441_vm6, %v10301_v16, %v3693_v44  ;;  %v10188_v54 = vld [vmem:[%s11437_s6 + $0x24] sm:$0xf]  ;;  %v12199_v44 = vor.u32 %v4179_v38, %v4176_v29  ;;  %v3702_v29 = vrot.slane %v3700_v12, 4 }
 0x126   : > { %v3801_v45 = vunpack.c.l.b16 %v3694_v36  ;;  %v2961_v3 = vshrl.u32 %v10188_v54, 16  ;;  %v2964_v4 = vshll.u32 %v10188_v54, 16  ;;  %v12229_v38 = vrot.slane %v2970_v1, 5 }
 0x127   : > { %2485 = vst.msk [vmem:[#allocation2 + $0x68] sm:$0xff] %vm450_vm11, %v2453_v8  ;;  %v4196_v8 = vshll.u32 %v10344_v60, 16  ;;  %v4181_v36 = vsel %vm11499_vm10, %v4172_v11, %v12199_v44  ;;  %v2976_v26 = vrot.slane %v2974_v13, 4  ;;  %v10302_v41 = vrot.slane %v10258_v19, 9  ;;  %v10192_v13 = vld [vmem:[%s11437_s6 + $0x34] sm:$0xf] }
 0x128   : > { %v12187_v21 = vpop.f32.mrf.mxu2  ;;  %v1074_v40 = vpop.f32.mrf.mxu1  ;;  %v3832_v14 = vpack.c.b16 %v3802_v61, %v3801_v45  ;;  %v2963_v5 = vrot.slane %v2961_v3, 4  ;;  %v2966_v24 = vrot.slane %v2964_v4, 5  ;;  %v3703_v43 = vrot.slane %v10260_v20, 5  ;;  %v10191_v4 = vld [vmem:[%s11437_s6 + $0x30] sm:$0xf] }
 0x129   : > { %v1162_v48 = vadd.f32 %v1130_v27, %v1074_v40  ;;  %v415_v51 = vpop.f32.mrf.mxu0  ;;  %v1131_v23 = vld [vmem:[#allocation2 + $0x88] sm:$0xff]  ;;  %v4198_v52 = vrot.slane %v4196_v8, 6  ;;  %v4204_v54 = vrot.slane %v4202_v34, 5  ;;  %v2977_v53 = vor.u32 %v2976_v26, %v12229_v38  ;;  %v10262_v20 = vld [vmem:[%s11437_s6 + $0x34] sm:$0xf] }
 0x12a   : > { %v1632_v56 = vld [vmem:[#allocation2 + $0x78] sm:$0xff]  ;;  %469 = vst.msk [vmem:[#allocation2 + $0x90] sm:$0xff] %vm450_vm11, %v415_v51  ;;  %v4195_v51 = vrot.slane %v4193_v30, 5  ;;  %v2980_v47 = vshll.u32 %v10190_v46, 16  ;;  %v3701_v62 = vsel %vm11441_vm6, %v10302_v41, %v3700_v12  ;;  %v2994_v30 = vshll.u32 %v10192_v13, 16 }
 0x12b   : > { %v1664_v59 = vadd.f32 %v1632_v56, %v12151_v42  ;;  %1194 = vst.msk [vmem:[#allocation2 + $0x80] sm:$0xff] %vm450_vm11, %v1162_v48  ;;  %10236 = vmatmul.msk.bf16.vlgmr.msrb.gmra.mxu1 %vm308_vm5, %v3331_v35  ;;  %10167 = vmatmul.msk.bf16.gmra.mxu0 %vm308_vm5, %v11122_v25  ;;  %v2949_v42 = vsel %vm11477_vm9, %v2944_v49, %v12168_v9  ;;  %v10346_v35 = vld [vmem:[%s11437_s6 + $0x2c] sm:$0x3]  ;;  %v4207_v56 = vrot.slane %v4205_v32, 6  ;;  %v3803_v12 = vunpack.c.l.b16 %v3701_v62  ;;  %v10261_v32 = vld [vmem:[%s11437_s6 + $0x30] sm:$0xe] }
 0x12c   : > { %v2365_v39 = vpop.f32.mrf.mxu3  ;;  %v2422_v0 = vld [vmem:[#allocation2 + $0x70] sm:$0xff]  ;;  %v12218_v16 = vunpack.c.l.b16 %v2949_v42  ;;  %v2967_v48 = vor.u32 %v2966_v24, %v2963_v5  ;;  %v4212_v50 = vshrl.u32 %v10346_v35, 16  ;;  %v4215_v45 = vshll.u32 %v10346_v35, 16 }
 0x12d   : > { %1696 = vst.msk [vmem:[#allocation2 + $0x78] sm:$0xff] %vm450_vm11, %v1664_v59  ;;  %v2454_v7 = vadd.f32 %v2422_v0, %v2363_v15  ;;  %v4182_v15 = vrot.slane %v12199_v44, 4  ;;  %v4589_v44 = vunpack.c.l.b16 %v4181_v36  ;;  %v4199_v60 = vor.u32 %v4198_v52, %v4195_v51 }
 0x12e   : > { %v3332_v61 = vpack.c.b16 %v3302_v28, %v12218_v16  ;;  %v2968_v42 = vrot.slane %v2967_v48, 4  ;;  %v4214_v3 = vrot.slane %v4212_v50, 5  ;;  %v12249_v11 = vor.u32 %v4207_v56, %v4204_v54  ;;  %v10347_v48 = vld [vmem:[%s11437_s6 + $0x30] sm:$0xe]  ;;  %v10348_v56 = vld [vmem:[%s11437_s6 + $0x34] sm:$0xf] }
 0x12f   : > { %2486 = vst.msk [vmem:[#allocation2 + $0x70] sm:$0xff] %vm450_vm11, %v2454_v7  ;;  %v4191_v25 = vsel %vm11499_vm10, %v4182_v15, %v4190_v18  ;;  %v4217_v1 = vrot.slane %v4215_v45, 6  ;;  %v2982_v16 = vrot.slane %v2980_v47, 5  ;;  %v2998_v8 = vshrl.u32 %v10192_v13, 16 }
 0x130   : > { %v12216_v9 = vpop.f32.mrf.mxu2  ;;  %v1076_v10 = vpop.f32.mrf.mxu1  ;;  %v4590_v0 = vunpack.c.l.b16 %v4191_v25  ;;  %v4210_v28 = vrot.slane %v12249_v11, 4  ;;  %v3707_v36 = vrot.slane %v10262_v20, 5  ;;  %v12272_v46 = vrot.slane %v2994_v30, 5 }
 0x131   : > { %10392 = vmatmul.msk.bf16.vlgmr.msrb.gmra.mxu3 %vm308_vm5, %v4619_v2  ;;  %v1163_v31 = vadd.f32 %v1131_v23, %v1076_v10  ;;  %v417_v33 = vpop.f32.mrf.mxu0  ;;  %v3704_v2 = vsel %vm11441_vm6, %v3702_v29, %v3703_v43  ;;  %v2985_v10 = vshrl.u32 %v10191_v4, 16  ;;  %v2988_v23 = vshll.u32 %v10191_v4, 16 }
 0x132   : > { %v1633_v37 = vld [vmem:[#allocation2 + $0x80] sm:$0xff]  ;;  %470 = vst.msk [vmem:[#allocation2 + $0x98] sm:$0xff] %vm450_vm11, %v417_v33  ;;  %v3804_v19 = vunpack.c.l.b16 %v3704_v2  ;;  %v4620_v24 = vpack.c.b16 %v4590_v0, %v4589_v44  ;;  %v4200_v33 = vrot.slane %v4199_v60, 4  ;;  %v4218_v35 = vor.u32 %v4217_v1, %v4214_v3  ;;  %v10349_v3 = vld [vmem:[%s11437_s6 + $0x38] sm:$0x3] }
 0x133   : > { %v1665_v40 = vadd.f32 %v1633_v37, %v12187_v21  ;;  %1195 = vst.msk [vmem:[#allocation2 + $0x88] sm:$0xff] %vm450_vm11, %v1163_v31  ;;  %v10263_v37 = vld [vmem:[%s11437_s6 + $0x38] sm:$0x1]  ;;  %v2987_v26 = vrot.slane %v2985_v10, 4  ;;  %v3709_v47 = vrot.slane %v3707_v36, 4  ;;  %v4224_v0 = vshll.u32 %v10347_v48, 16 }
 0x134   : > { %v2368_v27 = vpop.f32.mrf.mxu3  ;;  %v2423_v49 = vld [vmem:[#allocation2 + $0x78] sm:$0xff]  ;;  %v3833_v41 = vpack.c.b16 %v3804_v19, %v3803_v12  ;;  %v4219_v54 = vsel %vm11499_vm10, %v4210_v28, %v4218_v35  ;;  %v4230_v4 = vshrl.u32 %v10348_v56, 16  ;;  %v4240_v19 = vshrl.u32 %v10349_v3, 16  ;;  %v11124_v10 = vld [vmem:[%s11437_s6 + $0x30] sm:$0xff] }
 0x135   : > { %10323 = vmatmul.msk.bf16.gmra.mxu2 %vm308_vm5, %v3832_v14  ;;  %1697 = vst.msk [vmem:[#allocation2 + $0x80] sm:$0xff] %vm450_vm11, %v1665_v40  ;;  %v2455_v21 = vadd.f32 %v2423_v49, %v2365_v39  ;;  %v1132_v39 = vld [vmem:[#allocation2 + $0x90] sm:$0xff]  ;;  %v2978_v14 = vrot.slane %v2977_v53, 4  ;;  %v2990_v40 = vrot.slane %v2988_v23, 5  ;;  %v3000_v49 = vrot.slane %v2998_v8, 4 }
 0x136   : > { %v10303_v53 = vrot.slane %v10261_v32, 9  ;;  %v10194_v32 = vld [vmem:[%s11437_s6 + $0x3c] sm:$0xf] }
 0x137   : > { %2487 = vst.msk [vmem:[#allocation2 + $0x78] sm:$0xff] %vm450_vm11, %v2455_v21  ;;  %v2983_v34 = vsel %vm11477_vm9, %v2978_v14, %v2982_v16  ;;  %v4209_v21 = vsel %vm11499_vm10, %v4200_v33, %v12249_v11  ;;  %v4592_v11 = vunpack.c.l.b16 %v4219_v54 }
 0x138   : > { %v12240_v59 = vpop.f32.mrf.mxu2  ;;  %v1079_v63 = vpop.f32.mrf.mxu1  ;;  %v3304_v50 = vunpack.c.l.b16 %v2983_v34  ;;  %v3708_v1 = vsel %vm11441_vm6, %v10303_v53, %v3707_v36 }
 0x139   : > { %v1164_v7 = vadd.f32 %v1132_v39, %v1079_v63  ;;  %v420_v57 = vpop.f32.mrf.mxu0  ;;  %v1133_v25 = vld [vmem:[#allocation2 + $0x98] sm:$0xff]  ;;  %v2991_v39 = vor.u32 %v2990_v40, %v2987_v26  ;;  %v3805_v35 = vunpack.c.l.b16 %v3708_v1  ;;  %v4242_v40 = vrot.slane %v4240_v19, 5 }
 0x13a   : > { %v1634_v6 = vld [vmem:[#allocation2 + $0x88] sm:$0xff]  ;;  %471 = vst.msk [vmem:[#allocation2 + $0xa0] sm:$0xff] %vm450_vm11, %v420_v57 }
 0x13b   : > { %v1666_v15 = vadd.f32 %v1634_v6, %v12216_v9  ;;  %1196 = vst.msk [vmem:[#allocation2 + $0x90] sm:$0xff] %vm450_vm11, %v1164_v7  ;;  %10237 = vmatmul.msk.bf16.gmra.mxu1 %vm308_vm5, %v3332_v61  ;;  %10168 = vmatmul.msk.bf16.gmra.mxu0 %vm308_vm5, %v11123_v55  ;;  %v2973_v9 = vsel %vm11477_vm9, %v2968_v42, %v12229_v38  ;;  %v10193_v38 = vld [vmem:[%s11437_s6 + $0x38] sm:$0x1]  ;;  %v3710_v61 = vrot.slane %v10263_v37, 5  ;;  %v4221_v55 = vshrl.u32 %v10347_v48, 16 }
 0x13c   : > { %v2370_v18 = vpop.f32.mrf.mxu3  ;;  %v2424_v5 = vld [vmem:[#allocation2 + $0x80] sm:$0xff]  ;;  %v3303_v43 = vunpack.c.l.b16 %v2973_v9  ;;  %v3004_v44 = vshll.u32 %v10193_v38, 16  ;;  %v3001_v42 = vor.u32 %v3000_v49, %v12272_v46  ;;  %v4233_v7 = vshll.u32 %v10348_v56, 16 }
 0x13d   : > { %1698 = vst.msk [vmem:[#allocation2 + $0x88] sm:$0xff] %vm450_vm11, %v1666_v15  ;;  %v2456_v31 = vadd.f32 %v2424_v5, %v2368_v27  ;;  %v3711_v13 = vsel %vm11441_vm6, %v3709_v47, %v3710_v61  ;;  %v2992_v14 = vrot.slane %v2991_v39, 4  ;;  %v4223_v16 = vrot.slane %v4221_v55, 5 }
 0x13e   : > { %v3333_v60 = vpack.c.b16 %v3304_v50, %v3303_v43  ;;  %v3006_v6 = vrot.slane %v3004_v44, 5  ;;  %v4226_v15 = vrot.slane %v4224_v0, 6  ;;  %v3002_v23 = vrot.slane %v3001_v42, 4  ;;  %v10266_v50 = vld [vmem:[%s11437_s6 + $0x44] sm:$0x1] }
 0x13f   : > { %2488 = vst.msk [vmem:[#allocation2 + $0x80] sm:$0xff] %vm450_vm11, %v2456_v31  ;;  %v4232_v5 = vrot.slane %v4230_v4, 5  ;;  %v4243_v9 = vshll.u32 %v10349_v3, 16  ;;  %v12297_v31 = vld [vmem:[%s11437_s6 + $0x40] sm:$0xf]  ;;  %v3806_v34 = vunpack.c.l.b16 %v3711_v13  ;;  %v2997_v38 = vsel %vm11477_vm9, %v2992_v14, %v12272_v46 }
 0x140   : > { %v12268_v29 = vpop.f32.mrf.mxu2  ;;  %v1081_v27 = vpop.f32.mrf.mxu1  ;;  %v4227_v26 = vor.u32 %v4226_v15, %v4223_v16  ;;  %v3714_v49 = vrot.slane %v12297_v31, 5  ;;  %v3009_v46 = vshrl.u32 %v10194_v32, 16  ;;  %v12320_v53 = vunpack.c.l.b16 %v2997_v38  ;;  %v10350_v44 = vld [vmem:[%s11437_s6 + $0x3c] sm:$0xe]  ;;  %v10351_v42 = vld [vmem:[%s11437_s6 + $0x40] sm:$0xf] }
 0x141   : > { %10393 = vmatmul.msk.bf16.gmra.mxu3 %vm308_vm5, %v4620_v24  ;;  %v1165_v51 = vadd.f32 %v1133_v25, %v1081_v27  ;;  %v422_v52 = vpop.f32.mrf.mxu0  ;;  %v1134_v20 = vld [vmem:[#allocation2 + $0xa0] sm:$0xff]  ;;  %v4235_v24 = vrot.slane %v4233_v7, 6  ;;  %v4245_v43 = vrot.slane %v4243_v9, 6  ;;  %v3717_v7 = vrot.slane %v10266_v50, 5 }
 0x142   : > { %v1635_v45 = vld [vmem:[#allocation2 + $0x90] sm:$0xff]  ;;  %472 = vst.msk [vmem:[#allocation2 + $0xa8] sm:$0xff] %vm450_vm11, %v422_v52  ;;  %v10195_v27 = vld [vmem:[%s11437_s6 + $0x40] sm:$0xf]  ;;  %v3012_v52 = vshll.u32 %v10194_v32, 16  ;;  %v4228_v61 = vrot.slane %v4227_v26, 4 }
 0x143   : > { %v1667_v62 = vadd.f32 %v1635_v45, %v12240_v59  ;;  %1197 = vst.msk [vmem:[#allocation2 + $0x98] sm:$0xff] %vm450_vm11, %v1165_v51  ;;  %v4591_v59 = vunpack.c.l.b16 %v4209_v21  ;;  %v10264_v51 = vld [vmem:[%s11437_s6 + $0x3c] sm:$0xe]  ;;  %v3018_v21 = vshll.u32 %v10195_v27, 16  ;;  %v3022_v54 = vshrl.u32 %v10195_v27, 16 }
 0x144   : > { %v2373_v63 = vpop.f32.mrf.mxu3  ;;  %v2425_v2 = vld [vmem:[#allocation2 + $0x88] sm:$0xff]  ;;  %v3834_v45 = vpack.c.b16 %v3806_v34, %v3805_v35  ;;  %v4246_v55 = vor.u32 %v4245_v43, %v4242_v40  ;;  %v10304_v0 = vrot.slane %v10264_v51, 9  ;;  %v4252_v14 = vshll.u32 %v10350_v44, 16  ;;  %v11125_v27 = vld [vmem:[%s11437_s6 + $0x3c] sm:$0xff] }
 0x145   : > { %10324 = vmatmul.msk.bf16.gmra.mxu2 %vm308_vm5, %v3833_v41  ;;  %1699 = vst.msk [vmem:[#allocation2 + $0x90] sm:$0xff] %vm450_vm11, %v1667_v62  ;;  %v2457_v57 = vadd.f32 %v2425_v2, %v2370_v18  ;;  %v4621_v28 = vpack.c.b16 %v4592_v11, %v4591_v59  ;;  %v12311_v41 = vor.u32 %v4235_v24, %v4232_v5  ;;  %v3716_v2 = vrot.slane %v3714_v49, 4  ;;  %v10352_v24 = vld [vmem:[%s11437_s6 + $0x44] sm:$0x3]  ;;  %v12354_v51 = vld [vmem:[%s11437_s6 + $0x4c] sm:$0xf] }
 0x146   : > { %v3014_v59 = vrot.slane %v3012_v52, 5  ;;  %v12330_v1 = vrot.slane %v3018_v21, 5  ;;  %v3024_v13 = vrot.slane %v3022_v54, 4  ;;  %v4258_v19 = vshrl.u32 %v10351_v42, 16 }
 0x147   : > { %2489 = vst.msk [vmem:[#allocation2 + $0x88] sm:$0xff] %vm450_vm11, %v2457_v57  ;;  %v4238_v39 = vrot.slane %v12311_v41, 4  ;;  %v10196_v57 = vld [vmem:[%s11437_s6 + $0x44] sm:$0x1]  ;;  %v3715_v9 = vsel %vm11441_vm6, %v10304_v0, %v3714_v49  ;;  %v4254_v35 = vrot.slane %v4252_v14, 6  ;;  %v4271_v38 = vshll.u32 %v10352_v24, 16 }
 0x148   : > { %v12293_v12 = vpop.f32.mrf.mxu2  ;;  %v1084_v18 = vpop.f32.mrf.mxu1  ;;  %v4260_v32 = vrot.slane %v4258_v19, 5  ;;  %v3807_v49 = vunpack.c.l.b16 %v3715_v9  ;;  %v10198_v0 = vld [vmem:[%s11437_s6 + $0x4c] sm:$0xf] }
 0x149   : > { %v1166_v30 = vadd.f32 %v1134_v20, %v1084_v18  ;;  %v425_v8 = vpop.f32.mrf.mxu0  ;;  %v4261_v18 = vshll.u32 %v10351_v42, 16  ;;  %v4247_v5 = vsel %vm11499_vm10, %v4238_v39, %v4246_v55  ;;  %v3721_v55 = vrot.slane %v12354_v51, 5  ;;  %v10267_v42 = vld [vmem:[%s11437_s6 + $0x48] sm:$0xe]  ;;  %v10354_v19 = vld [vmem:[%s11437_s6 + $0x4c] sm:$0xf] }
 0x14a   : > { %v1636_v33 = vld [vmem:[#allocation2 + $0x98] sm:$0xff]  ;;  %473 = vst.msk [vmem:[#allocation2 + $0xb0] sm:$0xff] %vm450_vm11, %v425_v8  ;;  %v3028_v8 = vshll.u32 %v10196_v57, 16 }
 0x14b   : > { %v1668_v37 = vadd.f32 %v1636_v33, %v12268_v29  ;;  %1198 = vst.msk [vmem:[#allocation2 + $0xa0] sm:$0xff] %vm450_vm11, %v1166_v30  ;;  %10238 = vmatmul.msk.bf16.gmra.mxu1 %vm308_vm5, %v3333_v60  ;;  %10169 = vmatmul.msk.bf16.gmra.mxu0 %vm308_vm5, %v11124_v10  ;;  %v3007_v29 = vsel %vm11477_vm9, %v3002_v23, %v3006_v6  ;;  %v3011_v60 = vrot.slane %v3009_v46, 4  ;;  %v4249_v6 = vshrl.u32 %v10350_v44, 16  ;;  %v10197_v46 = vld [vmem:[%s11437_s6 + $0x48] sm:$0xf] }
 0x14c   : > { %v2375_v36 = vpop.f32.mrf.mxu3  ;;  %v2426_v25 = vld [vmem:[#allocation2 + $0x90] sm:$0xff]  ;;  %v12322_v47 = vunpack.c.l.b16 %v3007_v29  ;;  %v4237_v23 = vsel %vm11499_vm10, %v4228_v61, %v12311_v41  ;;  %v3718_v30 = vsel %vm11441_vm6, %v3716_v2, %v3717_v7  ;;  %v3025_v33 = vor.u32 %v3024_v13, %v12330_v1 }
 0x14d   : > { %1700 = vst.msk [vmem:[#allocation2 + $0x98] sm:$0xff] %vm450_vm11, %v1668_v37  ;;  %v2458_v48 = vadd.f32 %v2426_v25, %v2373_v63  ;;  %v1135_v63 = vld [vmem:[#allocation2 + $0xa8] sm:$0xff]  ;;  %v3015_v31 = vor.u32 %v3014_v59, %v3011_v60  ;;  %v4263_v37 = vrot.slane %v4261_v18, 6  ;;  %v4593_v25 = vunpack.c.l.b16 %v4237_v23 }
 0x14e   : > { %v3334_v10 = vpack.c.b16 %v12322_v47, %v12320_v53  ;;  %v4594_v29 = vunpack.c.l.b16 %v4247_v5  ;;  %v3026_v21 = vrot.slane %v3025_v33, 4  ;;  %v3030_v54 = vrot.slane %v3028_v8, 5 }
 0x14f   : > { %2490 = vst.msk [vmem:[#allocation2 + $0x90] sm:$0xff] %vm450_vm11, %v2458_v48  ;;  %v3808_v48 = vunpack.c.l.b16 %v3718_v30  ;;  %v3016_v50 = vrot.slane %v3015_v31, 4  ;;  %v12361_v61 = vor.u32 %v4263_v37, %v4260_v32  ;;  %v3033_v2 = vshrl.u32 %v10197_v46, 16 }
 0x150   : > { %v12318_v56 = vpop.f32.mrf.mxu2  ;;  %v1086_v62 = vpop.f32.mrf.mxu1  ;;  %v4622_v39 = vpack.c.b16 %v4594_v29, %v4593_v25  ;;  %v3031_v60 = vsel %vm11477_vm9, %v3026_v21, %v3030_v54 }
 0x151   : > { %10394 = vmatmul.msk.bf16.gmra.mxu3 %vm308_vm5, %v4621_v28  ;;  %v1167_v3 = vadd.f32 %v1135_v63, %v1086_v62  ;;  %v427_v4 = vpop.f32.mrf.mxu0  ;;  %v4251_v28 = vrot.slane %v4249_v6, 5  ;;  %v1136_v40 = vld [vmem:[#allocation2 + $0xb0] sm:$0xff]  ;;  %v4273_v62 = vrot.slane %v4271_v38, 6  ;;  %v3835_v7 = vpack.c.b16 %v3808_v48, %v3807_v49 }
 0x152   : > { %v1637_v11 = vld [vmem:[#allocation2 + $0xa0] sm:$0xff]  ;;  %474 = vst.msk [vmem:[#allocation2 + $0xb8] sm:$0xff] %vm450_vm11, %v427_v4  ;;  %v3036_v4 = vshll.u32 %v10197_v46, 16  ;;  %v3021_v57 = vsel %vm11477_vm9, %v3016_v50, %v12330_v1  ;;  %v4266_v6 = vrot.slane %v12361_v61, 4  ;;  %v10305_v1 = vrot.slane %v10267_v42, 9 }
 0x153   : > { %v1669_v16 = vadd.f32 %v1637_v11, %v12293_v12  ;;  %1199 = vst.msk [vmem:[#allocation2 + $0xa8] sm:$0xff] %vm450_vm11, %v1167_v3  ;;  %v10269_v3 = vld [vmem:[%s11437_s6 + $0x50] sm:$0x1]  ;;  %v10353_v11 = vld [vmem:[%s11437_s6 + $0x48] sm:$0xe]  ;;  %v3035_v5 = vrot.slane %v3033_v2, 4  ;;  %v3307_v33 = vunpack.c.l.b16 %v3021_v57 }
 0x154   : > { %v2378_v15 = vpop.f32.mrf.mxu3  ;;  %v2427_v20 = vld [vmem:[#allocation2 + $0x98] sm:$0xff]  ;;  %v3724_v23 = vrot.slane %v10269_v3, 5  ;;  %v3038_v9 = vrot.slane %v3036_v4, 5  ;;  %v4277_v30 = vshrl.u32 %v10353_v11, 16  ;;  %v4280_v8 = vshll.u32 %v10353_v11, 16 }
 0x155   : > { %10325 = vmatmul.msk.bf16.gmra.mxu2 %vm308_vm5, %v3834_v45  ;;  %1701 = vst.msk [vmem:[#allocation2 + $0xa0] sm:$0xff] %vm450_vm11, %v1669_v16  ;;  %v2459_v12 = vadd.f32 %v2427_v20, %v2375_v36  ;;  %v4268_v36 = vshrl.u32 %v10352_v24, 16  ;;  %v4255_v45 = vor.u32 %v4254_v35, %v4251_v28  ;;  %v3042_v16 = vshll.u32 %v10198_v0, 16 }
 0x156   : > { %v4286_v28 = vshrl.u32 %v10354_v19, 16  ;;  %v4289_v35 = vshll.u32 %v10354_v19, 16  ;;  %v3039_v48 = vor.u32 %v3038_v9, %v3035_v5  ;;  %v4279_v51 = vrot.slane %v4277_v30, 5 }
 0x157   : > { %2491 = vst.msk [vmem:[#allocation2 + $0x98] sm:$0xff] %vm450_vm11, %v2459_v12  ;;  %v4270_v44 = vrot.slane %v4268_v36, 5  ;;  %v4256_v59 = vrot.slane %v4255_v45, 4  ;;  %v3308_v36 = vunpack.c.l.b16 %v3031_v60  ;;  %v12384_v38 = vrot.slane %v3042_v16, 5 }
 0x158   : > { %v12350_v34 = vpop.f32.mrf.mxu2  ;;  %v1089_v26 = vpop.f32.mrf.mxu1  ;;  %v4282_v46 = vrot.slane %v4280_v8, 6  ;;  %v4291_v50 = vrot.slane %v4289_v35, 6  ;;  %v3040_v4 = vrot.slane %v3039_v48, 4 }
 0x159   : > { %v1168_v41 = vadd.f32 %v1136_v40, %v1089_v26  ;;  %v430_v43 = vpop.f32.mrf.mxu0  ;;  %v4274_v14 = vor.u32 %v4273_v62, %v4270_v44  ;;  %v1137_v20 = vld [vmem:[#allocation2 + $0xb8] sm:$0xff]  ;;  %v10355_v40 = vld [vmem:[%s11437_s6 + $0x50] sm:$0x3]  ;;  %v4265_v25 = vsel %vm11499_vm10, %v4256_v59, %v12361_v61 }
 0x15a   : > { %v1638_v52 = vld [vmem:[#allocation2 + $0xa8] sm:$0xff]  ;;  %475 = vst.msk [vmem:[#allocation2 + $0xc0] sm:$0xff] %vm450_vm11, %v430_v43  ;;  %v10199_v43 = vld [vmem:[%s11437_s6 + $0x50] sm:$0x1]  ;;  %v4296_v21 = vshrl.u32 %v10355_v40, 16  ;;  %v4299_v54 = vshll.u32 %v10355_v40, 16  ;;  %v4283_v60 = vor.u32 %v4282_v46, %v4279_v51 }
 0x15b   : > { %v1670_v53 = vadd.f32 %v1638_v52, %v12318_v56  ;;  %1200 = vst.msk [vmem:[#allocation2 + $0xb0] sm:$0xff] %vm450_vm11, %v1168_v41  ;;  %10239 = vmatmul.msk.bf16.gmra.mxu1 %vm308_vm5, %v3334_v10  ;;  %10170 = vmatmul.msk.bf16.gmra.mxu0 %vm308_vm5, %v11125_v27  ;;  %v3723_v10 = vrot.slane %v3721_v55, 4  ;;  %v4275_v29 = vsel %vm11499_vm10, %v4266_v6, %v4274_v14  ;;  %v4288_v52 = vrot.slane %v4286_v28, 5  ;;  %v10202_v51 = vld [vmem:[%s11437_s6 + $0x5c] sm:$0x1] }
 0x15c   : > { %v2380_v47 = vpop.f32.mrf.mxu3  ;;  %v2428_v63 = vld [vmem:[#allocation2 + $0xa0] sm:$0xff]  ;;  %v3052_v44 = vshll.u32 %v10199_v43, 16  ;;  %v4298_v11 = vrot.slane %v4296_v21, 5  ;;  %v4301_v6 = vrot.slane %v4299_v54, 6  ;;  %v4284_v9 = vrot.slane %v4283_v60, 4 }
 0x15d   : > { %1702 = vst.msk [vmem:[#allocation2 + $0xa8] sm:$0xff] %vm450_vm11, %v1670_v53  ;;  %v2460_v56 = vadd.f32 %v2428_v63, %v2378_v15  ;;  %v3046_v15 = vshrl.u32 %v10198_v0, 16  ;;  %v3725_v41 = vsel %vm11441_vm6, %v3723_v10, %v3724_v23  ;;  %v3335_v53 = vpack.c.b16 %v3308_v36, %v3307_v33  ;;  %v10200_v0 = vld [vmem:[%s11437_s6 + $0x54] sm:$0xf]  ;;  %v10357_v33 = vld [vmem:[%s11437_s6 + $0x58] sm:$0xf] }
 0x15e   : > { %v3810_v3 = vunpack.c.l.b16 %v3725_v41  ;;  %v12407_v59 = vor.u32 %v4291_v50, %v4288_v52  ;;  %v3054_v19 = vrot.slane %v3052_v44, 5  ;;  %v3060_v23 = vshll.u32 %v10200_v0, 16  ;;  %v10270_v36 = vld [vmem:[%s11437_s6 + $0x54] sm:$0xe] }
 0x15f   : > { %2492 = vst.msk [vmem:[#allocation2 + $0xa0] sm:$0xff] %vm450_vm11, %v2460_v56  ;;  %v3048_v26 = vrot.slane %v3046_v15, 4  ;;  %v4302_v8 = vor.u32 %v4301_v6, %v4298_v11  ;;  %v4314_v46 = vshrl.u32 %v10357_v33, 16  ;;  %v4317_v52 = vshll.u32 %v10357_v33, 16 }
 0x160   : > { %v12376_v13 = vpop.f32.mrf.mxu2  ;;  %v1091_v18 = vpop.f32.mrf.mxu1  ;;  %v4294_v30 = vrot.slane %v12407_v59, 4 }
 0x161   : > { %10395 = vmatmul.msk.bf16.gmra.mxu3 %vm308_vm5, %v4622_v39  ;;  %v1169_v24 = vadd.f32 %v1137_v20, %v1091_v18  ;;  %v432_v12 = vpop.f32.mrf.mxu0  ;;  %v3049_v61 = vor.u32 %v3048_v26, %v12384_v38  ;;  %v1138_v63 = vld [vmem:[#allocation2 + $0xc0] sm:$0xff]  ;;  %v4595_v39 = vunpack.c.l.b16 %v4265_v25  ;;  %v12413_v18 = vld [vmem:[%s11437_s6 + $0x58] sm:$0xf]  ;;  %v3057_v20 = vshrl.u32 %v10200_v0, 16  ;;  %v10272_v26 = vld [vmem:[%s11437_s6 + $0x5c] sm:$0x1] }
 0x162   : > { %v1639_v31 = vld [vmem:[#allocation2 + $0xb0] sm:$0xff]  ;;  %476 = vst.msk [vmem:[#allocation2 + $0xc8] sm:$0xff] %vm450_vm11, %v432_v12 }
 0x163   : > { %v1671_v32 = vadd.f32 %v1639_v31, %v12350_v34  ;;  %1201 = vst.msk [vmem:[#allocation2 + $0xb8] sm:$0xff] %vm450_vm11, %v1169_v24  ;;  %v3722_v34 = vsel %vm11441_vm6, %v10305_v1, %v3721_v55  ;;  %v4596_v55 = vunpack.c.l.b16 %v4275_v29  ;;  %v3050_v15 = vrot.slane %v3049_v61, 4  ;;  %v10356_v12 = vld [vmem:[%s11437_s6 + $0x54] sm:$0xe] }
 0x164   : > { %v2383_v37 = vpop.f32.mrf.mxu3  ;;  %v2429_v27 = vld [vmem:[#allocation2 + $0xa8] sm:$0xff]  ;;  %v3809_v42 = vunpack.c.l.b16 %v3722_v34  ;;  %v3728_v31 = vrot.slane %v12413_v18, 5  ;;  %v3059_v40 = vrot.slane %v3057_v20, 4  ;;  %v3062_v29 = vrot.slane %v3060_v23, 5  ;;  %v11127_v20 = vld [vmem:[%s11437_s6 + $0x54] sm:$0xff] }
 0x165   : > { %10326 = vmatmul.msk.bf16.gmra.mxu2 %vm308_vm5, %v3835_v7  ;;  %1703 = vst.msk [vmem:[#allocation2 + $0xb0] sm:$0xff] %vm450_vm11, %v1671_v32  ;;  %v2461_v49 = vadd.f32 %v2429_v27, %v2380_v47  ;;  %v11126_v47 = vld [vmem:[%s11437_s6 + $0x48] sm:$0xff]  ;;  %v10201_v7 = vld [vmem:[%s11437_s6 + $0x58] sm:$0xf]  ;;  %v4623_v10 = vpack.c.b16 %v4596_v55, %v4595_v39  ;;  %v3045_v32 = vsel %vm11477_vm9, %v3040_v4, %v12384_v38  ;;  %v4305_v43 = vshrl.u32 %v10356_v12, 16 }
 0x166   : > { %v3066_v5 = vshll.u32 %v10201_v7, 16  ;;  %v3836_v35 = vpack.c.b16 %v3810_v3, %v3809_v42  ;;  %v4308_v38 = vshll.u32 %v10356_v12, 16  ;;  %v3309_v21 = vunpack.c.l.b16 %v3045_v32  ;;  %v10358_v55 = vld [vmem:[%s11437_s6 + $0x5c] sm:$0x3] }
 0x167   : > { %2493 = vst.msk [vmem:[#allocation2 + $0xa8] sm:$0xff] %vm450_vm11, %v2461_v49  ;;  %v4303_v61 = vsel %vm11499_vm10, %v4294_v30, %v4302_v8  ;;  %v3731_v39 = vrot.slane %v10272_v26, 5  ;;  %v3076_v42 = vshll.u32 %v10202_v51, 16  ;;  %v4307_v3 = vrot.slane %v4305_v43, 5  ;;  %v10204_v8 = vld [vmem:[%s11437_s6 + $0x64] sm:$0xf] }
 0x168   : > { %v12400_v45 = vpop.f32.mrf.mxu2  ;;  %v1094_v62 = vpop.f32.mrf.mxu1  ;;  %v12432_v34 = vrot.slane %v3066_v5, 5  ;;  %v4324_v60 = vshrl.u32 %v10358_v55, 16  ;;  %v10203_v5 = vld [vmem:[%s11437_s6 + $0x60] sm:$0xf]  ;;  %v3090_v43 = vshll.u32 %v10204_v8, 16 }
 0x169   : > { %v1170_v2 = vadd.f32 %v1138_v63, %v1094_v62  ;;  %v435_v56 = vpop.f32.mrf.mxu0  ;;  %v1139_v25 = vld [vmem:[#allocation2 + $0xc8] sm:$0xff]  ;;  %v10306_v63 = vrot.slane %v10270_v36, 9  ;;  %v3078_v23 = vrot.slane %v3076_v42, 5 }
 0x16a   : > { %v1640_v57 = vld [vmem:[#allocation2 + $0xb8] sm:$0xff]  ;;  %477 = vst.msk [vmem:[#allocation2 + $0xd0] sm:$0xff] %vm450_vm11, %v435_v56 }
 0x16b   : > { %v1672_v14 = vadd.f32 %v1640_v57, %v12376_v13  ;;  %1202 = vst.msk [vmem:[#allocation2 + $0xc0] sm:$0xff] %vm450_vm11, %v1170_v2  ;;  %10240 = vmatmul.msk.bf16.gmra.mxu1 %vm308_vm5, %v3335_v53  ;;  %10171 = vmatmul.msk.bf16.gmra.mxu0 %vm308_vm5, %v11126_v47  ;;  %v3070_v13 = vshrl.u32 %v10201_v7, 16  ;;  %v4293_v53 = vsel %vm11499_vm10, %v4284_v9, %v12407_v59  ;;  %v3730_v47 = vrot.slane %v3728_v31, 4 }
 0x16c   : > { %v2385_v16 = vpop.f32.mrf.mxu3  ;;  %v2430_v1 = vld [vmem:[#allocation2 + $0xb0] sm:$0xff]  ;;  %v3063_v2 = vor.u32 %v3062_v29, %v3059_v40  ;;  %v4316_v7 = vrot.slane %v4314_v46, 5  ;;  %v4319_v57 = vrot.slane %v4317_v52, 6  ;;  %v4327_v59 = vshll.u32 %v10358_v55, 16  ;;  %v10359_v52 = vld [vmem:[%s11437_s6 + $0x60] sm:$0xe] }
 0x16d   : > { %1704 = vst.msk [vmem:[#allocation2 + $0xb8] sm:$0xff] %vm450_vm11, %v1672_v14  ;;  %v2462_v24 = vadd.f32 %v2430_v1, %v2383_v37  ;;  %v3055_v37 = vsel %vm11477_vm9, %v3050_v15, %v3054_v19  ;;  %v3072_v41 = vrot.slane %v3070_v13, 4  ;;  %v4597_v14 = vunpack.c.l.b16 %v4293_v53  ;;  %v10275_v53 = vld [vmem:[%s11437_s6 + $0x68] sm:$0x1] }
 0x16e   : > { %v3310_v54 = vunpack.c.l.b16 %v3055_v37  ;;  %v3729_v15 = vsel %vm11441_vm6, %v10306_v63, %v3728_v31  ;;  %v3732_v1 = vsel %vm11441_vm6, %v3730_v47, %v3731_v39  ;;  %v12456_v30 = vor.u32 %v4319_v57, %v4316_v7  ;;  %v12461_v37 = vld [vmem:[%s11437_s6 + $0x64] sm:$0xf]  ;;  %v10205_v63 = vld [vmem:[%s11437_s6 + $0x68] sm:$0x1] }
 0x16f   : > { %2494 = vst.msk [vmem:[#allocation2 + $0xb0] sm:$0xff] %vm450_vm11, %v2462_v24  ;;  %v3073_v56 = vor.u32 %v3072_v41, %v12432_v34  ;;  %v3811_v31 = vunpack.c.l.b16 %v3729_v15  ;;  %v4329_v32 = vrot.slane %v4327_v59, 6  ;;  %v3812_v40 = vunpack.c.l.b16 %v3732_v1  ;;  %v10361_v57 = vld [vmem:[%s11437_s6 + $0x68] sm:$0x3] }
 0x170   : > { %v12422_v28 = vpop.f32.mrf.mxu2  ;;  %v1096_v27 = vpop.f32.mrf.mxu1  ;;  %v3336_v6 = vpack.c.b16 %v3310_v54, %v3309_v21  ;;  %v3735_v46 = vrot.slane %v12461_v37, 5  ;;  %v10273_v54 = vld [vmem:[%s11437_s6 + $0x60] sm:$0xe]  ;;  %v4333_v42 = vshrl.u32 %v10359_v52, 16  ;;  %v3738_v1 = vrot.slane %v10275_v53, 5 }
 0x171   : > { %10396 = vmatmul.msk.bf16.gmra.mxu3 %vm308_vm5, %v4623_v10  ;;  %v1171_v49 = vadd.f32 %v1139_v25, %v1096_v27  ;;  %v437_v48 = vpop.f32.mrf.mxu0  ;;  %v1140_v18 = vld [vmem:[#allocation2 + $0xd0] sm:$0xff]  ;;  %v3064_v10 = vrot.slane %v3063_v2, 4  ;;  %v3074_v12 = vrot.slane %v3073_v56, 4  ;;  %v3081_v27 = vshrl.u32 %v10203_v5, 16 }
 0x172   : > { %v1641_v50 = vld [vmem:[#allocation2 + $0xc0] sm:$0xff]  ;;  %478 = vst.msk [vmem:[#allocation2 + $0xd8] sm:$0xff] %vm450_vm11, %v437_v48  ;;  %v3084_v25 = vshll.u32 %v10203_v5, 16  ;;  %v12486_v2 = vrot.slane %v3090_v43, 5  ;;  %v12514_v53 = vld [vmem:[%s11437_s6 + $0x70] sm:$0xf] }
 0x173   : > { %v1673_v44 = vadd.f32 %v1641_v50, %v12400_v45  ;;  %1203 = vst.msk [vmem:[#allocation2 + $0xc8] sm:$0xff] %vm450_vm11, %v1171_v49  ;;  %v4310_v45 = vrot.slane %v4308_v38, 6  ;;  %v3094_v49 = vshrl.u32 %v10204_v8, 16  ;;  %v4322_v38 = vrot.slane %v12456_v30, 4 }
 0x174   : > { %v2388_v62 = vpop.f32.mrf.mxu3  ;;  %v2431_v0 = vld [vmem:[#allocation2 + $0xb8] sm:$0xff]  ;;  %v3079_v50 = vsel %vm11477_vm9, %v3074_v12, %v3078_v23  ;;  %v3083_v47 = vrot.slane %v3081_v27, 4  ;;  %v3086_v39 = vrot.slane %v3084_v25, 5  ;;  %v3100_v23 = vshll.u32 %v10205_v63, 16 }
 0x175   : > { %10327 = vmatmul.msk.bf16.gmra.mxu2 %vm308_vm5, %v3836_v35  ;;  %1705 = vst.msk [vmem:[#allocation2 + $0xc0] sm:$0xff] %vm450_vm11, %v1673_v44  ;;  %v2463_v4 = vadd.f32 %v2431_v0, %v2385_v16  ;;  %v4598_v16 = vunpack.c.l.b16 %v4303_v61  ;;  %v4311_v9 = vor.u32 %v4310_v45, %v4307_v3  ;;  %v4326_v35 = vrot.slane %v4324_v60, 5  ;;  %v10360_v61 = vld [vmem:[%s11437_s6 + $0x64] sm:$0xf] }
 0x176   : > { %v3837_v44 = vpack.c.b16 %v3812_v40, %v3811_v31  ;;  %v3096_v56 = vrot.slane %v3094_v49, 4  ;;  %v4336_v3 = vshll.u32 %v10359_v52, 16  ;;  %v3312_v7 = vunpack.c.l.b16 %v3079_v50  ;;  %v10206_v49 = vld [vmem:[%s11437_s6 + $0x6c] sm:$0xf] }
 0x177   : > { %2495 = vst.msk [vmem:[#allocation2 + $0xb8] sm:$0xff] %vm450_vm11, %v2463_v4  ;;  %v4624_v41 = vpack.c.b16 %v4598_v16, %v4597_v14  ;;  %v4312_v51 = vrot.slane %v4311_v9, 4  ;;  %v4330_v21 = vor.u32 %v4329_v32, %v4326_v35  ;;  %v4342_v60 = vshrl.u32 %v10360_v61, 16  ;;  %v11128_v32 = vld [vmem:[%s11437_s6 + $0x60] sm:$0xff] }
 0x178   : > { %v12448_v11 = vpop.f32.mrf.mxu2  ;;  %v1099_v19 = vpop.f32.mrf.mxu1  ;;  %v4345_v59 = vshll.u32 %v10360_v61, 16  ;;  %v4338_v12 = vrot.slane %v4336_v3, 6  ;;  %v4352_v9 = vshrl.u32 %v10361_v57, 16  ;;  %v3105_v63 = vshrl.u32 %v10206_v49, 16 }
 0x179   : > { %v1172_v13 = vadd.f32 %v1140_v18, %v1099_v19  ;;  %v440_v24 = vpop.f32.mrf.mxu0  ;;  %v1141_v0 = vld [vmem:[#allocation2 + $0xd8] sm:$0xff]  ;;  %v4321_v14 = vsel %vm11499_vm10, %v4312_v51, %v12456_v30  ;;  %v4331_v15 = vsel %vm11499_vm10, %v4322_v38, %v4330_v21  ;;  %v10307_v19 = vrot.slane %v10273_v54, 9 }
 0x17a   : > { %v1642_v33 = vld [vmem:[#allocation2 + $0xc8] sm:$0xff]  ;;  %479 = vst.msk [vmem:[#allocation2 + $0xe0] sm:$0xff] %vm450_vm11, %v440_v24  ;;  %v3737_v18 = vrot.slane %v3735_v46, 4  ;;  %v4335_v24 = vrot.slane %v4333_v42, 5  ;;  %v4344_v8 = vrot.slane %v4342_v60, 5  ;;  %v4599_v37 = vunpack.c.l.b16 %v4321_v14 }
 0x17b   : > { %v1674_v36 = vadd.f32 %v1642_v33, %v12422_v28  ;;  %1204 = vst.msk [vmem:[#allocation2 + $0xd0] sm:$0xff] %vm450_vm11, %v1172_v13  ;;  %10241 = vmatmul.msk.bf16.gmra.mxu1 %vm308_vm5, %v3336_v6  ;;  %10172 = vmatmul.msk.bf16.gmra.mxu0 %vm308_vm5, %v11127_v20  ;;  %v3069_v28 = vsel %vm11477_vm9, %v3064_v10, %v12432_v34  ;;  %v4355_v33 = vshll.u32 %v10361_v57, 16  ;;  %v4354_v52 = vrot.slane %v4352_v9, 5  ;;  %v10362_v42 = vld [vmem:[%s11437_s6 + $0x6c] sm:$0xe] }
 0x17c   : > { %v2390_v26 = vpop.f32.mrf.mxu3  ;;  %v2432_v29 = vld [vmem:[#allocation2 + $0xc0] sm:$0xff]  ;;  %v3087_v10 = vor.u32 %v3086_v39, %v3083_v47  ;;  %v3097_v13 = vor.u32 %v3096_v56, %v12486_v2  ;;  %v3736_v40 = vsel %vm11441_vm6, %v10307_v19, %v3735_v46  ;;  %v3739_v27 = vsel %vm11441_vm6, %v3737_v18, %v3738_v1  ;;  %v10363_v57 = vld [vmem:[%s11437_s6 + $0x70] sm:$0xf] }
 0x17d   : > { %1706 = vst.msk [vmem:[#allocation2 + $0xc8] sm:$0xff] %vm450_vm11, %v1674_v36  ;;  %v2464_v48 = vadd.f32 %v2432_v29, %v2388_v62  ;;  %v12482_v62 = vunpack.c.l.b16 %v3069_v28  ;;  %v4600_v36 = vunpack.c.l.b16 %v4331_v15  ;;  %v3102_v28 = vrot.slane %v3100_v23, 5 }
 0x17e   : > { %v3088_v29 = vrot.slane %v3087_v10, 4  ;;  %v4339_v43 = vor.u32 %v4338_v12, %v4335_v24  ;;  %v4357_v50 = vrot.slane %v4355_v33, 6  ;;  %v3813_v46 = vunpack.c.l.b16 %v3736_v40  ;;  %v10364_v33 = vld [vmem:[%s11437_s6 + $0x74] sm:$0x3] }
 0x17f   : > { %2496 = vst.msk [vmem:[#allocation2 + $0xc0] sm:$0xff] %vm450_vm11, %v2464_v48  ;;  %v3337_v31 = vpack.c.b16 %v3312_v7, %v12482_v62  ;;  %v3814_v54 = vunpack.c.l.b16 %v3739_v27  ;;  %v10207_v62 = vld [vmem:[%s11437_s6 + $0x70] sm:$0xf]  ;;  %v3108_v47 = vshll.u32 %v10206_v49, 16  ;;  %v3742_v7 = vrot.slane %v12514_v53, 5 }
 0x180   : > { %v12480_v34 = vpop.f32.mrf.mxu2  ;;  %v1101_v55 = vpop.f32.mrf.mxu1  ;;  %v4340_v56 = vrot.slane %v4339_v43, 4  ;;  %v3114_v14 = vshll.u32 %v10207_v62, 16  ;;  %v3118_v15 = vshrl.u32 %v10207_v62, 16  ;;  %v3107_v19 = vrot.slane %v3105_v63, 4 }
 0x181   : > { %10397 = vmatmul.msk.bf16.gmra.mxu3 %vm308_vm5, %v4624_v41  ;;  %v1173_v4 = vadd.f32 %v1141_v0, %v1101_v55  ;;  %v442_v45 = vpop.f32.mrf.mxu0  ;;  %v1142_v25 = vld [vmem:[#allocation2 + $0xe0] sm:$0xff]  ;;  %v3098_v41 = vrot.slane %v3097_v13, 4  ;;  %v4625_v55 = vpack.c.b16 %v4600_v36, %v4599_v37  ;;  %v3093_v0 = vsel %vm11477_vm9, %v3088_v29, %v12486_v2 }
 0x182   : > { %v1643_v6 = vld [vmem:[#allocation2 + $0xd0] sm:$0xff]  ;;  %480 = vst.msk [vmem:[#allocation2 + $0xe8] sm:$0xff] %vm450_vm11, %v442_v45  ;;  %v4358_v45 = vor.u32 %v4357_v50, %v4354_v52  ;;  %v3838_v60 = vpack.c.b16 %v3814_v54, %v3813_v46  ;;  %v3110_v18 = vrot.slane %v3108_v47, 5  ;;  %v3313_v23 = vunpack.c.l.b16 %v3093_v0 }
 0x183   : > { %v1675_v20 = vadd.f32 %v1643_v6, %v12448_v11  ;;  %1205 = vst.msk [vmem:[#allocation2 + $0xd8] sm:$0xff] %vm450_vm11, %v1173_v4  ;;  %v4347_v11 = vrot.slane %v4345_v59, 6  ;;  %v10276_v59 = vld [vmem:[%s11437_s6 + $0x6c] sm:$0xe]  ;;  %v10278_v6 = vld [vmem:[%s11437_s6 + $0x74] sm:$0x1] }
 0x184   : > { %v2393_v16 = vpop.f32.mrf.mxu3  ;;  %v2433_v5 = vld [vmem:[#allocation2 + $0xc8] sm:$0xff]  ;;  %v4370_v13 = vshrl.u32 %v10363_v57, 16  ;;  %v4373_v24 = vshll.u32 %v10363_v57, 16  ;;  %v3745_v37 = vrot.slane %v10278_v6, 5  ;;  %v12544_v36 = vrot.slane %v3114_v14, 5 }
 0x185   : > { %10328 = vmatmul.msk.bf16.gmra.mxu2 %vm308_vm5, %v3837_v44  ;;  %1707 = vst.msk [vmem:[#allocation2 + $0xd0] sm:$0xff] %vm450_vm11, %v1675_v20  ;;  %v2465_v30 = vadd.f32 %v2433_v5, %v2390_v26  ;;  %v12510_v38 = vor.u32 %v4347_v11, %v4344_v8  ;;  %v4361_v20 = vshrl.u32 %v10362_v42, 16  ;;  %v10308_v11 = vrot.slane %v10276_v59, 9  ;;  %v10209_v14 = vld [vmem:[%s11437_s6 + $0x78] sm:$0xf] }
 0x186   : > { %v3120_v40 = vrot.slane %v3118_v15, 4  ;;  %v3111_v29 = vor.u32 %v3110_v18, %v3107_v19  ;;  %v4372_v49 = vrot.slane %v4370_v13, 5  ;;  %v10210_v15 = vld [vmem:[%s11437_s6 + $0x7c] sm:$0xf]  ;;  %v10279_v13 = vld [vmem:[%s11437_s6 + $0x78] sm:$0xe] }
 0x187   : > { %2497 = vst.msk [vmem:[#allocation2 + $0xc8] sm:$0xff] %vm450_vm11, %v2465_v30  ;;  %v4350_v4 = vrot.slane %v12510_v38, 4  ;;  %v4349_v30 = vsel %vm11499_vm10, %v4340_v56, %v12510_v38  ;;  %v4383_v38 = vshll.u32 %v10364_v33, 16  ;;  %v3743_v46 = vsel %vm11441_vm6, %v10308_v11, %v3742_v7 }
 0x188   : > { %v12502_v35 = vpop.f32.mrf.mxu2  ;;  %v1104_v26 = vpop.f32.mrf.mxu1  ;;  %v3815_v59 = vunpack.c.l.b16 %v3743_v46  ;;  %v3138_v11 = vshll.u32 %v10210_v15, 16 }
 0x189   : > { %v1174_v48 = vadd.f32 %v1142_v25, %v1104_v26  ;;  %v445_v51 = vpop.f32.mrf.mxu0  ;;  %v1143_v10 = vld [vmem:[#allocation2 + $0xe8] sm:$0xff]  ;;  %v4359_v8 = vsel %vm11499_vm10, %v4350_v4, %v4358_v45  ;;  %v10208_v25 = vld [vmem:[%s11437_s6 + $0x74] sm:$0x1]  ;;  %v4385_v56 = vrot.slane %v4383_v38, 6  ;;  %v2768_v4 = vld [vmem:[#allocation2] sm:$0xff] }
 0x18a   : > { %v1644_v21 = vld [vmem:[#allocation2 + $0xd8] sm:$0xff]  ;;  %481 = vst.msk [vmem:[#allocation2 + $0xf0] sm:$0xff] %vm450_vm11, %v445_v51  ;;  %v4380_v51 = vshrl.u32 %v10364_v33, 16  ;;  %v3124_v62 = vshll.u32 %v10208_v25, 16  ;;  %v3142_v33 = vshrl.u32 %v10210_v15, 16  ;;  %v2769_v38 = vld [vmem:[#allocation2 + $0x8] sm:$0xff] }
 0x18b   : > { %v1676_v61 = vadd.f32 %v1644_v21, %v12480_v34  ;;  %1206 = vst.msk [vmem:[#allocation2 + $0xe0] sm:$0xff] %vm450_vm11, %v1174_v48  ;;  %10242 = vmatmul.msk.bf16.gmra.mxu1 %vm308_vm5, %v3337_v31  ;;  %10173 = vmatmul.msk.bf16.gmra.mxu0 %vm308_vm5, %v11128_v32  ;;  %v3103_v34 = vsel %vm11477_vm9, %v3098_v41, %v3102_v28  ;;  %v3744_v32 = vrot.slane %v3742_v7, 4  ;;  %v4363_v41 = vrot.slane %v4361_v20, 5  ;;  %v12563_v45 = vld [vmem:[%s11437_s6 + $0x7c] sm:$0xf] }
 0x18c   : > { %v2395_v44 = vpop.f32.mrf.mxu3  ;;  %v2434_v39 = vld [vmem:[#allocation2 + $0xd0] sm:$0xff]  ;;  %v3314_v5 = vunpack.c.l.b16 %v3103_v34  ;;  %v4375_v48 = vrot.slane %v4373_v24, 6  ;;  %v4602_v21 = vunpack.c.l.b16 %v4359_v8  ;;  %v4382_v34 = vrot.slane %v4380_v51, 5 }
 0x18d   : > { %1708 = vst.msk [vmem:[#allocation2 + $0xd8] sm:$0xff] %vm450_vm11, %v1676_v61  ;;  %v2466_v3 = vadd.f32 %v2434_v39, %v2393_v16  ;;  %v4364_v16 = vshll.u32 %v10362_v42, 16  ;;  %v3746_v53 = vsel %vm11441_vm6, %v3744_v32, %v3745_v37  ;;  %v3121_v61 = vor.u32 %v3120_v40, %v12544_v36  ;;  %v11129_v39 = vld [vmem:[%s11437_s6 + $0x6c] sm:$0xff] }
 0x18e   : > { %v3338_v50 = vpack.c.b16 %v3314_v5, %v3313_v23  ;;  %v12560_v0 = vor.u32 %v4375_v48, %v4372_v49  ;;  %v3816_v6 = vunpack.c.l.b16 %v3746_v53  ;;  %v4386_v5 = vor.u32 %v4385_v56, %v4382_v34  ;;  %v10366_v49 = vld [vmem:[%s11437_s6 + $0x7c] sm:$0xf]  ;;  %v10211_v53 = vld [vmem:[%s11437_s6 + $0x80] sm:$0x1] }
 0x18f   : > { %2498 = vst.msk [vmem:[#allocation2 + $0xd0] sm:$0xff] %vm450_vm11, %v2466_v3  ;;  %v4366_v28 = vrot.slane %v4364_v16, 6  ;;  %v3122_v20 = vrot.slane %v3121_v61, 4  ;;  %v3126_v16 = vrot.slane %v3124_v62, 5  ;;  %v3749_v24 = vrot.slane %v12563_v45, 5 }
 0x190   : > { %v12534_v2 = vpop.f32.mrf.mxu2  ;;  %v1106_v1 = vpop.f32.mrf.mxu1  ;;  %v3132_v8 = vshll.u32 %v10209_v14, 16  ;;  %v3839_v32 = vpack.c.b16 %v3816_v6, %v3815_v59  ;;  %v3144_v61 = vrot.slane %v3142_v33, 4  ;;  %v4401_v34 = vshll.u32 %v10366_v49, 16  ;;  %v10212_v33 = vld [vmem:[%s11437_s6 + $0x84] sm:$0xf] }
 0x191   : > { %10398 = vmatmul.msk.bf16.gmra.mxu3 %vm308_vm5, %v4625_v55  ;;  %v1175_v12 = vadd.f32 %v1143_v10, %v1106_v1  ;;  %v447_v9 = vpop.f32.mrf.mxu0  ;;  %v4367_v63 = vor.u32 %v4366_v28, %v4363_v41  ;;  %v3112_v55 = vrot.slane %v3111_v29, 4  ;;  %v3127_v37 = vsel %vm11477_vm9, %v3122_v20, %v3126_v16 }
 0x192   : > { %v1645_v31 = vld [vmem:[#allocation2 + $0xe0] sm:$0xff]  ;;  %482 = vst.msk [vmem:[#allocation2 + $0xf8] sm:$0xff] %vm450_vm11, %v447_v9  ;;  %v10309_v41 = vrot.slane %v10279_v13, 9  ;;  %v3751_v28 = vrot.slane %v3749_v24, 4  ;;  %v4403_v16 = vrot.slane %v4401_v34, 6 }
 0x193   : > { %v1677_v27 = vadd.f32 %v1645_v31, %v12502_v35  ;;  %1207 = vst.msk [vmem:[#allocation2 + $0xe8] sm:$0xff] %vm450_vm11, %v1175_v12  ;;  %v4601_v35 = vunpack.c.l.b16 %v4349_v30  ;;  %v4368_v1 = vrot.slane %v4367_v63, 4  ;;  %v3117_v23 = vsel %vm11477_vm9, %v3112_v55, %v12544_v36  ;;  %v10281_v9 = vld [vmem:[%s11437_s6 + $0x80] sm:$0x1]  ;;  %v10369_v34 = vld [vmem:[%s11437_s6 + $0x88] sm:$0xf] }
 0x194   : > { %v2398_v26 = vpop.f32.mrf.mxu3  ;;  %v2435_v43 = vld [vmem:[#allocation2 + $0xd8] sm:$0xff]  ;;  %v3129_v30 = vshrl.u32 %v10209_v14, 16  ;;  %v12585_v36 = vunpack.c.l.b16 %v3117_v23  ;;  %v10367_v55 = vld [vmem:[%s11437_s6 + $0x80] sm:$0x3] }
 0x195   : > { %10329 = vmatmul.msk.bf16.gmra.mxu2 %vm308_vm5, %v3838_v60  ;;  %1709 = vst.msk [vmem:[#allocation2 + $0xe0] sm:$0xff] %vm450_vm11, %v1677_v27  ;;  %v2467_v52 = vadd.f32 %v2435_v43, %v2395_v44  ;;  %v1144_v44 = vld [vmem:[#allocation2 + $0xf0] sm:$0xff]  ;;  %v4626_v60 = vpack.c.b16 %v4602_v21, %v4601_v35  ;;  %v4377_v40 = vsel %vm11499_vm10, %v4368_v1, %v12560_v0  ;;  %v10365_v27 = vld [vmem:[%s11437_s6 + $0x78] sm:$0xe]  ;;  %v3752_v43 = vrot.slane %v10281_v9, 5 }
 0x196   : > { %v12595_v35 = vrot.slane %v3138_v11, 5  ;;  %v4389_v62 = vshrl.u32 %v10365_v27, 16  ;;  %v4392_v63 = vshll.u32 %v10365_v27, 16  ;;  %v4408_v14 = vshrl.u32 %v10367_v55, 16 }
 0x197   : > { %2499 = vst.msk [vmem:[#allocation2 + $0xd8] sm:$0xff] %vm450_vm11, %v2467_v52  ;;  %v3131_v52 = vrot.slane %v3129_v30, 4  ;;  %v3753_v45 = vsel %vm11441_vm6, %v3751_v28, %v3752_v43  ;;  %v4411_v1 = vshll.u32 %v10367_v55, 16  ;;  %v10282_v43 = vld [vmem:[%s11437_s6 + $0x84] sm:$0xe] }
 0x198   : > { %v12554_v54 = vpop.f32.mrf.mxu2  ;;  %v1109_v47 = vpop.f32.mrf.mxu1  ;;  %v4391_v59 = vrot.slane %v4389_v62, 5  ;;  %v4394_v6 = vrot.slane %v4392_v63, 6  ;;  %v3818_v30 = vunpack.c.l.b16 %v3753_v45  ;;  %v10284_v62 = vld [vmem:[%s11437_s6 + $0x8c] sm:$0x1]  ;;  %v10368_v63 = vld [vmem:[%s11437_s6 + $0x84] sm:$0xe] }
 0x199   : > { %v1176_v42 = vadd.f32 %v1144_v44, %v1109_v47  ;;  %v2688_v3 = vpop.f32.mrf.mxu0  ;;  %v1145_v25 = vld [vmem:[#allocation2 + $0xf8] sm:$0xff]  ;;  %v4413_v28 = vrot.slane %v4411_v1, 6  ;;  %v4429_v1 = vshll.u32 %v10369_v34, 16 }
 0x19a   : > { %v1646_v7 = vld [vmem:[#allocation2 + $0xe8] sm:$0xff]  ;;  %v2800_v57 = vadd.f32 %v2768_v4, %v2688_v3  ;;  %v3750_v4 = vsel %vm11441_vm6, %v10309_v41, %v3749_v24  ;;  %v4395_v27 = vor.u32 %v4394_v6, %v4391_v59  ;;  %v4417_v6 = vshrl.u32 %v10368_v63, 16 }
 0x19b   : > { %v1678_v19 = vadd.f32 %v1646_v7, %v12534_v2  ;;  %1208 = vst.msk [vmem:[#allocation2 + $0xf0] sm:$0xff] %vm450_vm11, %v1176_v42  ;;  %10243 = vmatmul.msk.bf16.gmra.mxu1 %vm308_vm5, %v3338_v50  ;;  %10174 = vmatmul.msk.bf16.gmra.mxu0 %vm308_vm5, %v11129_v39  ;;  %v4378_v2 = vrot.slane %v12560_v0, 4  ;;  %v3134_v50 = vrot.slane %v3132_v8, 5  ;;  %v3316_v39 = vunpack.c.l.b16 %v3127_v37  ;;  %v12615_v24 = vld [vmem:[%s11437_s6 + $0x88] sm:$0xf] }
 0x19c   : > { %v2400_v18 = vpop.f32.mrf.mxu3  ;;  %v2436_v10 = vld [vmem:[#allocation2 + $0xe0] sm:$0xff]  ;;  %2832 = vst.msk [vmem:[#allocation2] sm:$0xff] %vm450_vm11, %v2800_v57  ;;  %v4398_v0 = vshrl.u32 %v10366_v49, 16  ;;  %v4603_v42 = vunpack.c.l.b16 %v4377_v40  ;;  %v3148_v57 = vshll.u32 %v10211_v53, 16  ;;  %v3817_v13 = vunpack.c.l.b16 %v3750_v4  ;;  %v10214_v59 = vld [vmem:[%s11437_s6 + $0x8c] sm:$0x1] }
 0x19d   : > { %1710 = vst.msk [vmem:[#allocation2 + $0xe8] sm:$0xff] %vm450_vm11, %v1678_v19  ;;  %v2468_v12 = vadd.f32 %v2436_v10, %v2398_v26  ;;  %v4387_v29 = vsel %vm11499_vm10, %v4378_v2, %v4386_v5  ;;  %v3135_v7 = vor.u32 %v3134_v50, %v3131_v52  ;;  %v3339_v19 = vpack.c.b16 %v3316_v39, %v12585_v36  ;;  %v11130_v2 = vld [vmem:[%s11437_s6 + $0x78] sm:$0xff] }
 0x19e   : > { %v4604_v3 = vunpack.c.l.b16 %v4387_v29  ;;  %v4400_v20 = vrot.slane %v4398_v0, 5  ;;  %v3150_v11 = vrot.slane %v3148_v57, 5  ;;  %v3756_v49 = vrot.slane %v12615_v24, 5  ;;  %v2771_v57 = vld [vmem:[#allocation2 + $0x18] sm:$0xff]  ;;  %v10370_v24 = vld [vmem:[%s11437_s6 + $0x8c] sm:$0x3] }
 0x19f   : > { %2500 = vst.msk [vmem:[#allocation2 + $0xe0] sm:$0xff] %vm450_vm11, %v2468_v12  ;;  %v3136_v8 = vrot.slane %v3135_v7, 4 }
 0x1a0   : > { %v12581_v31 = vpop.f32.mrf.mxu2  ;;  %v1111_v26 = vpop.f32.mrf.mxu1  ;;  %v4627_v5 = vpack.c.b16 %v4604_v3, %v4603_v42  ;;  %v12622_v41 = vor.u32 %v4403_v16, %v4400_v20  ;;  %v3758_v0 = vrot.slane %v3756_v49, 4  ;;  %v4426_v16 = vshrl.u32 %v10369_v34, 16 }
 0x1a1   : > { %10399 = vmatmul.msk.bf16.gmra.mxu3 %vm308_vm5, %v4626_v60  ;;  %v1177_v48 = vadd.f32 %v1145_v25, %v1111_v26  ;;  %v2690_v51 = vpop.f32.mrf.mxu0  ;;  %v3145_v60 = vor.u32 %v3144_v61, %v12595_v35  ;;  %v4410_v26 = vrot.slane %v4408_v14, 5  ;;  %v4396_v61 = vrot.slane %v4395_v27, 4 }
 0x1a2   : > { %v1647_v21 = vld [vmem:[#allocation2 + $0xf0] sm:$0xff]  ;;  %v2801_v46 = vadd.f32 %v2769_v38, %v2690_v51  ;;  %v3153_v51 = vshrl.u32 %v10212_v33, 16  ;;  %v4406_v39 = vrot.slane %v12622_v41, 4  ;;  %v4420_v14 = vshll.u32 %v10368_v63, 16 }
 0x1a3   : > { %v1679_v47 = vadd.f32 %v1647_v21, %v12554_v54  ;;  %1209 = vst.msk [vmem:[#allocation2 + $0xf8] sm:$0xff] %vm450_vm11, %v1177_v48  ;;  %v3492_v23 = vld [vmem:[#allocation2] sm:$0xff]  ;;  %v3146_v40 = vrot.slane %v3145_v60, 4  ;;  %v3840_v21 = vpack.c.b16 %v3818_v30, %v3817_v13  ;;  %v4414_v55 = vor.u32 %v4413_v28, %v4410_v26  ;;  %v10216_v63 = vld [vmem:[%s11437_s6 + $0x94] sm:$0xf] }
 0x1a4   : > { %v2403_v44 = vpop.f32.mrf.mxu3  ;;  %v2437_v56 = vld [vmem:[#allocation2 + $0xe8] sm:$0xff]  ;;  %2833 = vst.msk [vmem:[#allocation2 + $0x8] sm:$0xff] %vm450_vm11, %v2801_v46  ;;  %v3141_v46 = vsel %vm11477_vm9, %v3136_v8, %v12595_v35  ;;  %v3155_v35 = vrot.slane %v3153_v51, 4  ;;  %v3759_v60 = vrot.slane %v10284_v62, 5  ;;  %v3172_v8 = vshll.u32 %v10214_v59, 16 }
 0x1a5   : > { %10330 = vmatmul.msk.bf16.gmra.mxu2 %vm308_vm5, %v3839_v32  ;;  %1711 = vst.msk [vmem:[#allocation2 + $0xf0] sm:$0xff] %vm450_vm11, %v1679_v47  ;;  %v2469_v54 = vadd.f32 %v2437_v56, %v2400_v18  ;;  %v2770_v18 = vld [vmem:[#allocation2 + $0x10] sm:$0xff]  ;;  %v10213_v32 = vld [vmem:[%s11437_s6 + $0x88] sm:$0xf]  ;;  %v3151_v53 = vsel %vm11477_vm9, %v3146_v40, %v3150_v11  ;;  %v3317_v20 = vunpack.c.l.b16 %v3141_v46  ;;  %v4415_v13 = vsel %vm11499_vm10, %v4406_v39, %v4414_v55  ;;  %v2772_v46 = vld [vmem:[#allocation2 + $0x20] sm:$0xff] }
 0x1a6   : > { %v3162_v38 = vshll.u32 %v10213_v32, 16  ;;  %v3166_v52 = vshrl.u32 %v10213_v32, 16  ;;  %v4419_v32 = vrot.slane %v4417_v6, 5  ;;  %v4431_v40 = vrot.slane %v4429_v1, 6  ;;  %v11131_v28 = vld [vmem:[%s11437_s6 + $0x84] sm:$0xff] }
 0x1a7   : > { %2501 = vst.msk [vmem:[#allocation2 + $0xe8] sm:$0xff] %vm450_vm11, %v2469_v54  ;;  %v4436_v27 = vshrl.u32 %v10370_v24, 16  ;;  %v4439_v26 = vshll.u32 %v10370_v24, 16  ;;  %v3186_v59 = vshll.u32 %v10216_v63, 16 }
 0x1a8   : > { %v12610_v15 = vpop.f32.mrf.mxu2  ;;  %v3412_v10 = vpop.f32.mrf.mxu1  ;;  %v12642_v4 = vrot.slane %v3162_v38, 5  ;;  %v3168_v54 = vrot.slane %v3166_v52, 4  ;;  %v3174_v38 = vrot.slane %v3172_v8, 5  ;;  %v10215_v52 = vld [vmem:[%s11437_s6 + $0x90] sm:$0xf] }
 0x1a9   : > { %v3524_v12 = vadd.f32 %v3492_v23, %v3412_v10  ;;  %v2693_v9 = vpop.f32.mrf.mxu0  ;;  %v4441_v34 = vrot.slane %v4439_v26, 6  ;;  %v10287_v8 = vld [vmem:[%s11437_s6 + $0x98] sm:$0x1] }
 0x1aa   : > { %v1648_v37 = vld [vmem:[#allocation2 + $0xf8] sm:$0xff]  ;;  %v2802_v36 = vadd.f32 %v2770_v18, %v2693_v9  ;;  %v3169_v30 = vor.u32 %v3168_v54, %v12642_v4  ;;  %v3180_v54 = vshll.u32 %v10215_v52, 16 }
 0x1ab   : > { %v1680_v25 = vadd.f32 %v1648_v37, %v12581_v31  ;;  %3556 = vst.msk [vmem:[#allocation2] sm:$0xff] %vm450_vm11, %v3524_v12  ;;  %10244 = vmatmul.msk.bf16.gmra.mxu1 %vm308_vm5, %v3339_v19  ;;  %10175 = vmatmul.msk.bf16.gmra.mxu0 %vm308_vm5, %v11130_v2  ;;  %v3156_v31 = vshll.u32 %v10212_v33, 16  ;;  %v3493_v42 = vld [vmem:[#allocation2 + $0x8] sm:$0xff]  ;;  %v3318_v2 = vunpack.c.l.b16 %v3151_v53  ;;  %v3760_v33 = vsel %vm11441_vm6, %v3758_v0, %v3759_v60  ;;  %v12683_v60 = vld [vmem:[%s11437_s6 + $0x94] sm:$0xf] }
 0x1ac   : > { %v2405_v29 = vpop.f32.mrf.mxu3  ;;  %v2438_v48 = vld [vmem:[#allocation2 + $0xf0] sm:$0xff]  ;;  %2834 = vst.msk [vmem:[#allocation2 + $0x10] sm:$0xff] %vm450_vm11, %v2802_v36  ;;  %v4422_v37 = vrot.slane %v4420_v14, 6  ;;  %v4428_v36 = vrot.slane %v4426_v16, 5  ;;  %v4438_v0 = vrot.slane %v4436_v27, 5  ;;  %v3190_v14 = vshrl.u32 %v10216_v63, 16 }
 0x1ad   : > { %1712 = vst.msk [vmem:[#allocation2 + $0xf8] sm:$0xff] %vm450_vm11, %v1680_v25  ;;  %v2470_v50 = vadd.f32 %v2438_v48, %v2403_v44  ;;  %v10310_v44 = vrot.slane %v10282_v43, 9  ;;  %v3158_v3 = vrot.slane %v3156_v31, 5  ;;  %v4606_v48 = vunpack.c.l.b16 %v4415_v13  ;;  %v10285_v13 = vld [vmem:[%s11437_s6 + $0x90] sm:$0xe] }
 0x1ae   : > { %v3170_v31 = vrot.slane %v3169_v30, 4  ;;  %v4423_v62 = vor.u32 %v4422_v37, %v4419_v32  ;;  %v3192_v27 = vrot.slane %v3190_v14, 4  ;;  %v10373_v26 = vld [vmem:[%s11437_s6 + $0x98] sm:$0x3] }
 0x1af   : > { %2502 = vst.msk [vmem:[#allocation2 + $0xf0] sm:$0xff] %vm450_vm11, %v2470_v50  ;;  %v3159_v9 = vor.u32 %v3158_v3, %v3155_v35  ;;  %v3177_v3 = vshrl.u32 %v10215_v52, 16  ;;  %v4464_v63 = vshrl.u32 %v10373_v26, 16 }
 0x1b0   : > { %v12637_v47 = vpop.f32.mrf.mxu2  ;;  %v3414_v56 = vpop.f32.mrf.mxu1  ;;  %v4424_v1 = vrot.slane %v4423_v62, 4 }
 0x1b1   : > { %10400 = vmatmul.msk.bf16.gmra.mxu3 %vm308_vm5, %v4627_v5  ;;  %v3525_v45 = vadd.f32 %v3493_v42, %v3414_v56  ;;  %v2695_v7 = vpop.f32.mrf.mxu0  ;;  %v4405_v5 = vsel %vm11499_vm10, %v4396_v61, %v12622_v41  ;;  %v3340_v41 = vpack.c.b16 %v3318_v2, %v3317_v20  ;;  %v3160_v51 = vrot.slane %v3159_v9, 4  ;;  %v10371_v56 = vld [vmem:[%s11437_s6 + $0x90] sm:$0xe] }
 0x1b2   : > { %v3992_v19 = vld [vmem:[#allocation2] sm:$0xff]  ;;  %v2803_v18 = vadd.f32 %v2771_v57, %v2695_v7  ;;  %v4605_v43 = vunpack.c.l.b16 %v4405_v5  ;;  %v3820_v61 = vunpack.c.l.b16 %v3760_v33  ;;  %v4448_v20 = vshll.u32 %v10371_v56, 16 }
 0x1b3   : > { %v4024_v10 = vadd.f32 %v3992_v19, %v12610_v15  ;;  %3557 = vst.msk [vmem:[#allocation2 + $0x8] sm:$0xff] %vm450_vm11, %v3525_v45  ;;  %v3757_v15 = vsel %vm11441_vm6, %v10310_v44, %v3756_v49  ;;  %v12667_v44 = vor.u32 %v4431_v40, %v4428_v36  ;;  %v3165_v57 = vsel %vm11477_vm9, %v3160_v51, %v12642_v4  ;;  %v10372_v19 = vld [vmem:[%s11437_s6 + $0x94] sm:$0xf]  ;;  %v2773_v40 = vld [vmem:[#allocation2 + $0x28] sm:$0xff] }
 0x1b4   : > { %v4700_v23 = vpop.f32.mrf.mxu3  ;;  %v2439_v12 = vld [vmem:[#allocation2 + $0xf8] sm:$0xff]  ;;  %2835 = vst.msk [vmem:[#allocation2 + $0x18] sm:$0xff] %vm450_vm11, %v2803_v18  ;;  %v3819_v53 = vunpack.c.l.b16 %v3757_v15  ;;  %v4628_v7 = vpack.c.b16 %v4606_v48, %v4605_v43  ;;  %v4445_v18 = vshrl.u32 %v10371_v56, 16  ;;  %v4442_v4 = vor.u32 %v4441_v34, %v4438_v0 }
 0x1b5   : > { %10331 = vmatmul.msk.bf16.gmra.mxu2 %vm308_vm5, %v3840_v21  ;;  %4056 = vst.msk [vmem:[#allocation2] sm:$0xff] %vm450_vm11, %v4024_v10  ;;  %v2471_v11 = vadd.f32 %v2439_v12, %v2405_v29  ;;  %v3494_v29 = vld [vmem:[#allocation2 + $0x10] sm:$0xff]  ;;  %v4434_v10 = vrot.slane %v12667_v44, 4  ;;  %v12691_v5 = vunpack.c.l.b16 %v3165_v57  ;;  %v3179_v24 = vrot.slane %v3177_v3, 4 }
 0x1b6   : > { %v3841_v16 = vpack.c.b16 %v3820_v61, %v3819_v53  ;;  %v3182_v12 = vrot.slane %v3180_v54, 5  ;;  %v4454_v33 = vshrl.u32 %v10372_v19, 16  ;;  %v4457_v32 = vshll.u32 %v10372_v19, 16 }
 0x1b7   : > { %2503 = vst.msk [vmem:[#allocation2 + $0xf8] sm:$0xff] %vm450_vm11, %v2471_v11  ;;  %v12699_v11 = vrot.slane %v3186_v59, 5  ;;  %v4443_v48 = vsel %vm11499_vm10, %v4434_v10, %v4442_v4  ;;  %v10311_v51 = vrot.slane %v10285_v13, 9  ;;  %v12727_v13 = vld [vmem:[%s11437_s6 + $0xa0] sm:$0xf] }
 0x1b8   : > { %v12662_v25 = vpop.f32.mrf.mxu2  ;;  %v3417_v49 = vpop.f32.mrf.mxu1  ;;  %v4456_v61 = vrot.slane %v4454_v33, 5  ;;  %v4459_v62 = vrot.slane %v4457_v32, 6  ;;  %v4608_v3 = vunpack.c.l.b16 %v4443_v48 }
 0x1b9   : > { %v3526_v50 = vadd.f32 %v3494_v29, %v3417_v49  ;;  %v2698_v21 = vpop.f32.mrf.mxu0  ;;  %v4433_v29 = vsel %vm11499_vm10, %v4424_v1, %v12667_v44 }
 0x1ba   : > { %v3993_v39 = vld [vmem:[#allocation2 + $0x8] sm:$0xff]  ;;  %v2804_v55 = vadd.f32 %v2772_v46, %v2698_v21  ;;  %v3766_v21 = vrot.slane %v10287_v8, 5  ;;  %v3183_v46 = vor.u32 %v3182_v12, %v3179_v24  ;;  %v4607_v34 = vunpack.c.l.b16 %v4433_v29 }
 0x1bb   : > { %v4025_v42 = vadd.f32 %v3993_v39, %v12637_v47  ;;  %3558 = vst.msk [vmem:[#allocation2 + $0x10] sm:$0xff] %vm450_vm11, %v3526_v50  ;;  %10245 = vmatmul.msk.bf16.gmra.mxu1 %vm308_vm5, %v3340_v41  ;;  %10176 = vmatmul.msk.bf16.gmra.mxu0 %vm308_vm5, %v11131_v28  ;;  %v3175_v47 = vsel %vm11477_vm9, %v3170_v31, %v3174_v38  ;;  %v3495_v9 = vld [vmem:[#allocation2 + $0x18] sm:$0xff]  ;;  %v4447_v41 = vrot.slane %v4445_v18, 5  ;;  %v4450_v28 = vrot.slane %v4448_v20, 6  ;;  %v2774_v20 = vld [vmem:[#allocation2 + $0x30] sm:$0xff] }
 0x1bc   : > { %v12673_v35 = vpop.f32.mrf.mxu3  ;;  %v4780_v45 = vld [vmem:[#allocation2] sm:$0xff]  ;;  %2836 = vst.msk [vmem:[#allocation2 + $0x20] sm:$0xff] %vm450_vm11, %v2804_v55  ;;  %v12696_v30 = vunpack.c.l.b16 %v3175_v47  ;;  %v10217_v31 = vld [vmem:[%s11437_s6 + $0x98] sm:$0x1]  ;;  %v4467_v39 = vshll.u32 %v10373_v26, 16  ;;  %v3193_v55 = vor.u32 %v3192_v27, %v12699_v11  ;;  %v11132_v47 = vld [vmem:[%s11437_s6 + $0x90] sm:$0xff]  ;;  %v4460_v59 = vor.u32 %v4459_v62, %v4456_v61 }
 0x1bd   : > { %4057 = vst.msk [vmem:[#allocation2 + $0x8] sm:$0xff] %vm450_vm11, %v4025_v42  ;;  %v4812_v6 = vadd.f32 %v4780_v45, %v4700_v23  ;;  %v3763_v23 = vrot.slane %v12683_v60, 5  ;;  %v3196_v44 = vshll.u32 %v10217_v31, 16  ;;  %v4451_v0 = vor.u32 %v4450_v28, %v4447_v41  ;;  %v10288_v28 = vld [vmem:[%s11437_s6 + $0x9c] sm:$0xe] }
 0x1be   : > { %v3341_v42 = vpack.c.b16 %v12696_v30, %v12691_v5  ;;  %v3184_v60 = vrot.slane %v3183_v46, 4  ;;  %v4469_v14 = vrot.slane %v4467_v39, 6  ;;  %v4629_v33 = vpack.c.b16 %v4608_v3, %v4607_v34  ;;  %v2775_v39 = vld [vmem:[#allocation2 + $0x38] sm:$0xff] }
 0x1bf   : > { %4844 = vst.msk [vmem:[#allocation2] sm:$0xff] %vm450_vm11, %v4812_v6  ;;  %v3765_v50 = vrot.slane %v3763_v23, 4  ;;  %v3764_v54 = vsel %vm11441_vm6, %v10311_v51, %v3763_v23  ;;  %v4466_v6 = vrot.slane %v4464_v63, 5  ;;  %v3198_v1 = vrot.slane %v3196_v44, 5 }
 0x1c0   : > { %v12689_v2 = vpop.f32.mrf.mxu2  ;;  %v3419_v15 = vpop.f32.mrf.mxu1  ;;  %v4452_v10 = vrot.slane %v4451_v0, 4  ;;  %v3189_v32 = vsel %vm11477_vm9, %v3184_v60, %v12699_v11  ;;  %v3770_v41 = vrot.slane %v12727_v13, 5  ;;  %v10375_v0 = vld [vmem:[%s11437_s6 + $0xa0] sm:$0xf]  ;;  %v10221_v13 = vld [vmem:[%s11437_s6 + $0xa8] sm:$0xf] }
 0x1c1   : > { %10401 = vmatmul.msk.bf16.gmra.mxu3 %vm308_vm5, %v4628_v7  ;;  %v3527_v37 = vadd.f32 %v3495_v9, %v3419_v15  ;;  %v2700_v36 = vpop.f32.mrf.mxu0  ;;  %v3767_v45 = vsel %vm11441_vm6, %v3765_v50, %v3766_v21  ;;  %v3821_v9 = vunpack.c.l.b16 %v3764_v54  ;;  %v12751_v21 = vunpack.c.l.b16 %v3189_v32 }
 0x1c2   : > { %v3994_v43 = vld [vmem:[#allocation2 + $0x10] sm:$0xff]  ;;  %v2805_v49 = vadd.f32 %v2773_v40, %v2700_v36  ;;  %v3822_v30 = vunpack.c.l.b16 %v3767_v45  ;;  %v10219_v36 = vld [vmem:[%s11437_s6 + $0xa0] sm:$0xf]  ;;  %v4461_v26 = vsel %vm11499_vm10, %v4452_v10, %v4460_v59 }
 0x1c3   : > { %v4026_v38 = vadd.f32 %v3994_v43, %v12662_v25  ;;  %3559 = vst.msk [vmem:[#allocation2 + $0x18] sm:$0xff] %vm450_vm11, %v3527_v37  ;;  %v3496_v57 = vld [vmem:[#allocation2 + $0x20] sm:$0xff]  ;;  %v4470_v37 = vor.u32 %v4469_v14, %v4466_v6  ;;  %v3210_v51 = vshll.u32 %v10219_v36, 16  ;;  %v3214_v31 = vshrl.u32 %v10219_v36, 16 }
 0x1c4   : > { %v4705_v52 = vpop.f32.mrf.mxu3  ;;  %v4781_v53 = vld [vmem:[#allocation2 + $0x8] sm:$0xff]  ;;  %2837 = vst.msk [vmem:[#allocation2 + $0x28] sm:$0xff] %vm450_vm11, %v2805_v49  ;;  %v10290_v43 = vld [vmem:[%s11437_s6 + $0xa4] sm:$0x1]  ;;  %v3842_v48 = vpack.c.b16 %v3822_v30, %v3821_v9  ;;  %v4609_v61 = vunpack.c.l.b16 %v4461_v26 }
 0x1c5   : > { %10332 = vmatmul.msk.bf16.gmra.mxu2 %vm308_vm5, %v3841_v16  ;;  %4058 = vst.msk [vmem:[#allocation2 + $0x10] sm:$0xff] %vm450_vm11, %v4026_v38  ;;  %v4813_v25 = vadd.f32 %v4781_v53, %v12673_v35  ;;  %v10218_v35 = vld [vmem:[%s11437_s6 + $0x9c] sm:$0xf]  ;;  %v3194_v16 = vrot.slane %v3193_v55, 4  ;;  %v3772_v55 = vrot.slane %v3770_v41, 4  ;;  %v3773_v44 = vrot.slane %v10290_v43, 5 }
 0x1c6   : > { %v3201_v23 = vshrl.u32 %v10218_v35, 16  ;;  %v3204_v24 = vshll.u32 %v10218_v35, 16  ;;  %v10374_v38 = vld [vmem:[%s11437_s6 + $0x9c] sm:$0xe]  ;;  %v12761_v60 = vrot.slane %v3210_v51, 5 }
 0x1c7   : > { %4845 = vst.msk [vmem:[#allocation2 + $0x8] sm:$0xff] %vm450_vm11, %v4813_v25  ;;  %v3199_v27 = vsel %vm11477_vm9, %v3194_v16, %v3198_v1  ;;  %v10312_v25 = vrot.slane %v10288_v28, 9  ;;  %v4473_v54 = vshrl.u32 %v10374_v38, 16  ;;  %v4476_v45 = vshll.u32 %v10374_v38, 16  ;;  %v10376_v14 = vld [vmem:[%s11437_s6 + $0xa4] sm:$0x3] }
 0x1c8   : > { %v12716_v56 = vpop.f32.mrf.mxu2  ;;  %v3422_v7 = vpop.f32.mrf.mxu1  ;;  %v3203_v49 = vrot.slane %v3201_v23, 4  ;;  %v3206_v29 = vrot.slane %v3204_v24, 5  ;;  %v12753_v46 = vunpack.c.l.b16 %v3199_v27  ;;  %v3774_v16 = vsel %vm11441_vm6, %v3772_v55, %v3773_v44  ;;  %v12781_v43 = vld [vmem:[%s11437_s6 + $0xac] sm:$0xf] }
 0x1c9   : > { %v3528_v19 = vadd.f32 %v3496_v57, %v3422_v7  ;;  %v2703_v18 = vpop.f32.mrf.mxu0  ;;  %v4492_v30 = vshrl.u32 %v10376_v14, 16  ;;  %v4495_v36 = vshll.u32 %v10376_v14, 16  ;;  %v3824_v28 = vunpack.c.l.b16 %v3774_v16  ;;  %v10378_v14 = vld [vmem:[%s11437_s6 + $0xac] sm:$0xf] }
 0x1ca   : > { %v3995_v4 = vld [vmem:[#allocation2 + $0x18] sm:$0xff]  ;;  %v2806_v5 = vadd.f32 %v2774_v20, %v2703_v18  ;;  %v3207_v3 = vor.u32 %v3206_v29, %v3203_v49  ;;  %v4485_v18 = vshll.u32 %v10375_v0, 16  ;;  %v3771_v20 = vsel %vm11441_vm6, %v10312_v25, %v3770_v41  ;;  %v2776_v41 = vld [vmem:[#allocation2 + $0x40] sm:$0xff] }
 0x1cb   : > { %v4027_v12 = vadd.f32 %v3995_v4, %v12689_v2  ;;  %3560 = vst.msk [vmem:[#allocation2 + $0x20] sm:$0xff] %vm450_vm11, %v3528_v19  ;;  %10246 = vmatmul.msk.bf16.gmra.mxu1 %vm308_vm5, %v3341_v42  ;;  %10177 = vmatmul.msk.bf16.gmra.mxu0 %vm308_vm5, %v11132_v47  ;;  %v4462_v2 = vrot.slane %v4460_v59, 4  ;;  %v3497_v50 = vld [vmem:[#allocation2 + $0x28] sm:$0xff]  ;;  %v10220_v47 = vld [vmem:[%s11437_s6 + $0xa4] sm:$0x1]  ;;  %v3216_v59 = vrot.slane %v3214_v31, 4  ;;  %v3342_v24 = vpack.c.b16 %v12753_v46, %v12751_v21 }
 0x1cc   : > { %v4707_v15 = vpop.f32.mrf.mxu3  ;;  %v4782_v8 = vld [vmem:[#allocation2 + $0x10] sm:$0xff]  ;;  %2838 = vst.msk [vmem:[#allocation2 + $0x30] sm:$0xff] %vm450_vm11, %v2806_v5  ;;  %v4482_v19 = vshrl.u32 %v10375_v0, 16  ;;  %v3208_v1 = vrot.slane %v3207_v3, 4  ;;  %v3220_v10 = vshll.u32 %v10220_v47, 16  ;;  %v4475_v4 = vrot.slane %v4473_v54, 5 }
 0x1cd   : > { %4059 = vst.msk [vmem:[#allocation2 + $0x18] sm:$0xff] %vm450_vm11, %v4027_v12  ;;  %v4814_v40 = vadd.f32 %v4782_v8, %v4705_v52  ;;  %v4471_v53 = vsel %vm11499_vm10, %v4462_v2, %v4470_v37  ;;  %v4478_v5 = vrot.slane %v4476_v45, 6  ;;  %v11133_v12 = vld [vmem:[%s11437_s6 + $0x9c] sm:$0xff]  ;;  %v3217_v9 = vor.u32 %v3216_v59, %v12761_v60  ;;  %v10291_v0 = vld [vmem:[%s11437_s6 + $0xa8] sm:$0xe] }
 0x1ce   : > { %v4610_v57 = vunpack.c.l.b16 %v4471_v53  ;;  %v3823_v32 = vunpack.c.l.b16 %v3771_v20  ;;  %v4484_v2 = vrot.slane %v4482_v19, 5  ;;  %v4487_v37 = vrot.slane %v4485_v18, 6 }
 0x1cf   : > { %4846 = vst.msk [vmem:[#allocation2 + $0x10] sm:$0xff] %vm450_vm11, %v4814_v40  ;;  %v10222_v40 = vld [vmem:[%s11437_s6 + $0xac] sm:$0xf]  ;;  %v3225_v49 = vshrl.u32 %v10221_v13, 16  ;;  %v3228_v29 = vshll.u32 %v10221_v13, 16  ;;  %v3213_v31 = vsel %vm11477_vm9, %v3208_v1, %v12761_v60  ;;  %v3222_v38 = vrot.slane %v3220_v10, 5 }
 0x1d0   : > { %v12747_v11 = vpop.f32.mrf.mxu2  ;;  %v3424_v52 = vpop.f32.mrf.mxu1  ;;  %v3218_v53 = vrot.slane %v3217_v9, 4  ;;  %v4494_v25 = vrot.slane %v4492_v30, 5  ;;  %v4497_v55 = vrot.slane %v4495_v36, 6  ;;  %v3843_v54 = vpack.c.b16 %v3824_v28, %v3823_v32  ;;  %v10223_v10 = vld [vmem:[%s11437_s6 + $0xb0] sm:$0x1]  ;;  %v2777_v13 = vld [vmem:[#allocation2 + $0x48] sm:$0xff] }
 0x1d1   : > { %10402 = vmatmul.msk.bf16.gmra.mxu3 %vm308_vm5, %v4629_v33  ;;  %v3529_v62 = vadd.f32 %v3497_v50, %v3424_v52  ;;  %v2705_v63 = vpop.f32.mrf.mxu0  ;;  %v4479_v52 = vor.u32 %v4478_v5, %v4475_v4  ;;  %v10377_v50 = vld [vmem:[%s11437_s6 + $0xa8] sm:$0xe]  ;;  %v12797_v45 = vunpack.c.l.b16 %v3213_v31  ;;  %v10313_v16 = vrot.slane %v10291_v0, 9 }
 0x1d2   : > { %v3996_v34 = vld [vmem:[#allocation2 + $0x20] sm:$0xff]  ;;  %v2807_v42 = vadd.f32 %v2775_v39, %v2705_v63  ;;  %v12792_v39 = vor.u32 %v4487_v37, %v4484_v2  ;;  %v4501_v3 = vshrl.u32 %v10377_v50, 16  ;;  %v3223_v60 = vsel %vm11477_vm9, %v3218_v53, %v3222_v38 }
 0x1d3   : > { %v4028_v35 = vadd.f32 %v3996_v34, %v12716_v56  ;;  %3561 = vst.msk [vmem:[#allocation2 + $0x28] sm:$0xff] %vm450_vm11, %v3529_v62  ;;  %v3498_v33 = vld [vmem:[#allocation2 + $0x30] sm:$0xff]  ;;  %v3238_v62 = vshrl.u32 %v10222_v40, 16  ;;  %v3227_v34 = vrot.slane %v3225_v49, 4  ;;  %v4480_v59 = vrot.slane %v4479_v52, 4 }
 0x1d4   : > { %v4710_v7 = vpop.f32.mrf.mxu3  ;;  %v4783_v6 = vld [vmem:[#allocation2 + $0x18] sm:$0xff]  ;;  %2839 = vst.msk [vmem:[#allocation2 + $0x38] sm:$0xff] %vm450_vm11, %v2807_v42  ;;  %v3230_v42 = vrot.slane %v3228_v29, 5  ;;  %v4498_v20 = vor.u32 %v4497_v55, %v4494_v25  ;;  %v4503_v9 = vrot.slane %v4501_v3, 5  ;;  %v4510_v32 = vshrl.u32 %v10378_v14, 16 }
 0x1d5   : > { %10333 = vmatmul.msk.bf16.gmra.mxu2 %vm308_vm5, %v3842_v48  ;;  %4060 = vst.msk [vmem:[#allocation2 + $0x20] sm:$0xff] %vm450_vm11, %v4028_v35  ;;  %v4815_v56 = vadd.f32 %v4783_v6, %v4707_v15  ;;  %v4630_v15 = vpack.c.b16 %v4610_v57, %v4609_v61  ;;  %v3234_v61 = vshll.u32 %v10222_v40, 16  ;;  %v10293_v35 = vld [vmem:[%s11437_s6 + $0xb0] sm:$0x1]  ;;  %v4504_v57 = vshll.u32 %v10377_v50, 16 }
 0x1d6   : > { %v4513_v2 = vshll.u32 %v10378_v14, 16  ;;  %v3324_v36 = vunpack.c.l.b16 %v3223_v60  ;;  %v4489_v28 = vsel %vm11499_vm10, %v4480_v59, %v12792_v39  ;;  %v4512_v31 = vrot.slane %v4510_v32, 5  ;;  %v10225_v14 = vld [vmem:[%s11437_s6 + $0xb8] sm:$0xf] }
 0x1d7   : > { %4847 = vst.msk [vmem:[#allocation2 + $0x18] sm:$0xff] %vm450_vm11, %v4815_v56  ;;  %v12805_v6 = vrot.slane %v3234_v61, 5  ;;  %v4490_v56 = vrot.slane %v12792_v39, 4  ;;  %v11134_v39 = vld [vmem:[%s11437_s6 + $0xa8] sm:$0xff]  ;;  %v4611_v25 = vunpack.c.l.b16 %v4489_v28 }
 0x1d8   : > { %v12773_v23 = vpop.f32.mrf.mxu2  ;;  %v3427_v8 = vpop.f32.mrf.mxu1  ;;  %v4515_v38 = vrot.slane %v4513_v2, 6 }
 0x1d9   : > { %v3530_v27 = vadd.f32 %v3498_v33, %v3427_v8  ;;  %v2708_v26 = vpop.f32.mrf.mxu0  ;;  %v4506_v33 = vrot.slane %v4504_v57, 6 }
 0x1da   : > { %v3997_v48 = vld [vmem:[#allocation2 + $0x28] sm:$0xff]  ;;  %v2808_v51 = vadd.f32 %v2776_v41, %v2708_v26  ;;  %v10379_v26 = vld [vmem:[%s11437_s6 + $0xb0] sm:$0x3]  ;;  %v4516_v59 = vor.u32 %v4515_v38, %v4512_v31 }
 0x1db   : > { %v4029_v21 = vadd.f32 %v3997_v48, %v12747_v11  ;;  %3562 = vst.msk [vmem:[#allocation2 + $0x30] sm:$0xff] %vm450_vm11, %v3530_v27  ;;  %10247 = vmatmul.msk.bf16.gmra.mxu1 %vm308_vm5, %v3342_v24  ;;  %10178 = vmatmul.msk.bf16.gmra.mxu0 %vm308_vm5, %v11133_v12  ;;  %v3777_v11 = vrot.slane %v12781_v43, 5  ;;  %v3499_v18 = vld [vmem:[#allocation2 + $0x38] sm:$0xff]  ;;  %v3780_v24 = vrot.slane %v10293_v35, 5  ;;  %v3231_v12 = vor.u32 %v3230_v42, %v3227_v34  ;;  %v2778_v34 = vld [vmem:[#allocation2 + $0x50] sm:$0xff] }
 0x1dc   : > { %v4712_v46 = vpop.f32.mrf.mxu3  ;;  %v4784_v63 = vld [vmem:[#allocation2 + $0x20] sm:$0xff]  ;;  %2840 = vst.msk [vmem:[#allocation2 + $0x40] sm:$0xff] %vm450_vm11, %v2808_v51  ;;  %v3244_v27 = vshll.u32 %v10223_v10, 16  ;;  %v4507_v51 = vor.u32 %v4506_v33, %v4503_v9  ;;  %v4520_v52 = vshrl.u32 %v10379_v26, 16  ;;  %v4523_v61 = vshll.u32 %v10379_v26, 16 }
 0x1dd   : > { %4061 = vst.msk [vmem:[#allocation2 + $0x28] sm:$0xff] %vm450_vm11, %v4029_v21  ;;  %v4816_v44 = vadd.f32 %v4784_v63, %v4710_v7  ;;  %v3240_v7 = vrot.slane %v3238_v62, 4  ;;  %v3779_v1 = vrot.slane %v3777_v11, 4  ;;  %v3778_v49 = vsel %vm11441_vm6, %v10313_v16, %v3777_v11  ;;  %v12833_v11 = vld [vmem:[%s11437_s6 + $0xb8] sm:$0xf] }
 0x1de   : > { %v3232_v48 = vrot.slane %v3231_v12, 4  ;;  %v3343_v21 = vpack.c.b16 %v3324_v36, %v12797_v45  ;;  %v3246_v53 = vrot.slane %v3244_v27, 5  ;;  %v3825_v42 = vunpack.c.l.b16 %v3778_v49  ;;  %v10224_v45 = vld [vmem:[%s11437_s6 + $0xb4] sm:$0xf] }
 0x1df   : > { %4848 = vst.msk [vmem:[#allocation2 + $0x20] sm:$0xff] %vm450_vm11, %v4816_v44  ;;  %v3241_v40 = vor.u32 %v3240_v7, %v12805_v6  ;;  %v3781_v29 = vsel %vm11441_vm6, %v3779_v1, %v3780_v24  ;;  %v4508_v60 = vrot.slane %v4507_v51, 4  ;;  %v4522_v7 = vrot.slane %v4520_v52, 5  ;;  %v10380_v33 = vld [vmem:[%s11437_s6 + $0xb4] sm:$0xe] }
 0x1e0   : > { %v12801_v47 = vpop.f32.mrf.mxu2  ;;  %v3429_v19 = vpop.f32.mrf.mxu1  ;;  %v3826_v3 = vunpack.c.l.b16 %v3781_v29  ;;  %v3249_v10 = vshrl.u32 %v10224_v45, 16  ;;  %v3258_v24 = vshll.u32 %v10225_v14, 16  ;;  %v3262_v12 = vshrl.u32 %v10225_v14, 16  ;;  %v10228_v14 = vld [vmem:[%s11437_s6 + $0xc4] sm:$0xf] }
 0x1e1   : > { %10403 = vmatmul.msk.bf16.gmra.mxu3 %vm308_vm5, %v4630_v15  ;;  %v3531_v4 = vadd.f32 %v3499_v18, %v3429_v19  ;;  %v2710_v5 = vpop.f32.mrf.mxu0  ;;  %v4517_v2 = vsel %vm11499_vm10, %v4508_v60, %v4516_v59  ;;  %v4529_v38 = vshrl.u32 %v10380_v33, 16 }
 0x1e2   : > { %v3998_v30 = vld [vmem:[#allocation2 + $0x30] sm:$0xff]  ;;  %v2809_v8 = vadd.f32 %v2777_v13, %v2710_v5  ;;  %v10296_v13 = vld [vmem:[%s11437_s6 + $0xbc] sm:$0x1]  ;;  %v3844_v9 = vpack.c.b16 %v3826_v3, %v3825_v42  ;;  %v12863_v51 = vrot.slane %v3258_v24, 5  ;;  %v3264_v31 = vrot.slane %v3262_v12, 4 }
 0x1e3   : > { %v4030_v15 = vadd.f32 %v3998_v30, %v12773_v23  ;;  %3563 = vst.msk [vmem:[#allocation2 + $0x38] sm:$0xff] %vm450_vm11, %v3531_v4  ;;  %v4499_v23 = vsel %vm11499_vm10, %v4490_v56, %v4498_v20  ;;  %v3500_v63 = vld [vmem:[#allocation2 + $0x40] sm:$0xff]  ;;  %v3784_v20 = vrot.slane %v12833_v11, 5  ;;  %v3252_v4 = vshll.u32 %v10224_v45, 16 }
 0x1e4   : > { %v4715_v37 = vpop.f32.mrf.mxu3  ;;  %v4785_v41 = vld [vmem:[#allocation2 + $0x28] sm:$0xff]  ;;  %2841 = vst.msk [vmem:[#allocation2 + $0x48] sm:$0xff] %vm450_vm11, %v2809_v8  ;;  %v4612_v55 = vunpack.c.l.b16 %v4499_v23  ;;  %v3787_v28 = vrot.slane %v10296_v13, 5  ;;  %v3251_v23 = vrot.slane %v3249_v10, 4 }
 0x1e5   : > { %10334 = vmatmul.msk.bf16.gmra.mxu2 %vm308_vm5, %v3843_v54  ;;  %4062 = vst.msk [vmem:[#allocation2 + $0x30] sm:$0xff] %vm450_vm11, %v4030_v15  ;;  %v4817_v43 = vadd.f32 %v4785_v41, %v4712_v46  ;;  %v3242_v46 = vrot.slane %v3241_v40, 4  ;;  %v3237_v54 = vsel %vm11477_vm9, %v3232_v48, %v12805_v6  ;;  %v4525_v6 = vrot.slane %v4523_v61, 6  ;;  %v2779_v48 = vld [vmem:[#allocation2 + $0x58] sm:$0xff] }
 0x1e6   : > { %v4631_v1 = vpack.c.b16 %v4612_v55, %v4611_v25  ;;  %v12851_v30 = vunpack.c.l.b16 %v3237_v54  ;;  %v4518_v15 = vrot.slane %v4516_v59, 4  ;;  %v3786_v41 = vrot.slane %v3784_v20, 4 }
 0x1e7   : > { %4849 = vst.msk [vmem:[#allocation2 + $0x28] sm:$0xff] %vm450_vm11, %v4817_v43  ;;  %v3247_v56 = vsel %vm11477_vm9, %v3242_v46, %v3246_v53  ;;  %v4526_v36 = vor.u32 %v4525_v6, %v4522_v7  ;;  %v3254_v43 = vrot.slane %v3252_v4, 5  ;;  %v10226_v46 = vld [vmem:[%s11437_s6 + $0xbc] sm:$0x1]  ;;  %v4532_v53 = vshll.u32 %v10380_v33, 16 }
 0x1e8   : > { %v12828_v50 = vpop.f32.mrf.mxu2  ;;  %v3432_v62 = vpop.f32.mrf.mxu1  ;;  %v12853_v8 = vunpack.c.l.b16 %v3247_v56  ;;  %v3788_v3 = vsel %vm11441_vm6, %v3786_v41, %v3787_v28  ;;  %v3265_v54 = vor.u32 %v3264_v31, %v12863_v51  ;;  %v3268_v45 = vshll.u32 %v10226_v46, 16  ;;  %v11135_v56 = vld [vmem:[%s11437_s6 + $0xb4] sm:$0xff] }
 0x1e9   : > { %v3532_v44 = vadd.f32 %v3500_v63, %v3432_v62  ;;  %v2713_v0 = vpop.f32.mrf.mxu0  ;;  %v4527_v11 = vsel %vm11499_vm10, %v4518_v15, %v4526_v36  ;;  %v4534_v60 = vrot.slane %v4532_v53, 6  ;;  %v3828_v10 = vunpack.c.l.b16 %v3788_v3 }
 0x1ea   : > { %v3999_v35 = vld [vmem:[#allocation2 + $0x38] sm:$0xff]  ;;  %v2810_v57 = vadd.f32 %v2778_v34, %v2713_v0  ;;  %v3344_v25 = vpack.c.b16 %v12853_v8, %v12851_v30  ;;  %v3255_v0 = vor.u32 %v3254_v43, %v3251_v23  ;;  %v4614_v6 = vunpack.c.l.b16 %v4527_v11  ;;  %v2780_v30 = vld [vmem:[#allocation2 + $0x60] sm:$0xff] }
 0x1eb   : > { %v4031_v19 = vadd.f32 %v3999_v35, %v12801_v47  ;;  %3564 = vst.msk [vmem:[#allocation2 + $0x40] sm:$0xff] %vm450_vm11, %v3532_v44  ;;  %10248 = vmatmul.msk.bf16.gmra.mxu1 %vm308_vm5, %v3343_v21  ;;  %10179 = vmatmul.msk.bf16.gmra.mxu0 %vm308_vm5, %v11134_v39  ;;  %v10294_v47 = vld [vmem:[%s11437_s6 + $0xb4] sm:$0xe]  ;;  %v3501_v26 = vld [vmem:[#allocation2 + $0x48] sm:$0xff]  ;;  %v4613_v44 = vunpack.c.l.b16 %v4517_v2  ;;  %v10382_v34 = vld [vmem:[%s11437_s6 + $0xbc] sm:$0x3] }
 0x1ec   : > { %v4717_v18 = vpop.f32.mrf.mxu3  ;;  %v4786_v16 = vld [vmem:[#allocation2 + $0x30] sm:$0xff]  ;;  %2842 = vst.msk [vmem:[#allocation2 + $0x50] sm:$0xff] %vm450_vm11, %v2810_v57  ;;  %v10314_v40 = vrot.slane %v10294_v47, 9  ;;  %v10227_v35 = vld [vmem:[%s11437_s6 + $0xc0] sm:$0xf]  ;;  %v4531_v57 = vrot.slane %v4529_v38, 5 }
 0x1ed   : > { %4063 = vst.msk [vmem:[#allocation2 + $0x38] sm:$0xff] %vm450_vm11, %v4031_v19  ;;  %v4818_v5 = vadd.f32 %v4786_v16, %v4715_v37  ;;  %v10381_v37 = vld [vmem:[%s11437_s6 + $0xb8] sm:$0xf]  ;;  %v4551_v16 = vshll.u32 %v10382_v34, 16  ;;  %v12887_v4 = vrot.slane %v3255_v0, 4  ;;  %v3273_v13 = vshrl.u32 %v10227_v35, 16 }
 0x1ee   : > { %v4538_v61 = vshrl.u32 %v10381_v37, 16  ;;  %v4541_v62 = vshll.u32 %v10381_v37, 16  ;;  %v3276_v24 = vshll.u32 %v10227_v35, 16  ;;  %v3266_v8 = vrot.slane %v3265_v54, 4 }
 0x1ef   : > { %4850 = vst.msk [vmem:[#allocation2 + $0x30] sm:$0xff] %vm450_vm11, %v4818_v5  ;;  %v12890_v5 = vld [vmem:[%s11437_s6 + $0xc4] sm:$0xf]  ;;  %v3282_v33 = vshll.u32 %v10228_v14, 16  ;;  %v3286_v2 = vshrl.u32 %v10228_v14, 16  ;;  %v4535_v37 = vor.u32 %v4534_v60, %v4531_v57  ;;  %v4553_v23 = vrot.slane %v4551_v16, 6 }
 0x1f0   : > { %v12857_v32 = vpop.f32.mrf.mxu2  ;;  %v3434_v27 = vpop.f32.mrf.mxu1  ;;  %v4540_v59 = vrot.slane %v4538_v61, 5  ;;  %v4543_v7 = vrot.slane %v4541_v62, 6  ;;  %v3791_v43 = vrot.slane %v12890_v5, 5  ;;  %v3278_v31 = vrot.slane %v3276_v24, 5  ;;  %v10229_v62 = vld [vmem:[%s11437_s6 + $0xc8] sm:$0x1] }
 0x1f1   : > { %10404 = vmatmul.msk.bf16.gmra.mxu3 %vm308_vm5, %v4631_v1  ;;  %v3533_v49 = vadd.f32 %v3501_v26, %v3434_v27  ;;  %v2715_v29 = vpop.f32.mrf.mxu0  ;;  %v3288_v46 = vrot.slane %v3286_v2, 4  ;;  %v3261_v61 = vsel %vm11477_vm9, %v12887_v4, %v12863_v51  ;;  %v2781_v57 = vld [vmem:[#allocation2 + $0x68] sm:$0xff] }
 0x1f2   : > { %v4000_v52 = vld [vmem:[#allocation2 + $0x40] sm:$0xff]  ;;  %v2811_v21 = vadd.f32 %v2779_v48, %v2715_v29  ;;  %v12892_v27 = vor.u32 %v4543_v7, %v4540_v59  ;;  %v4632_v29 = vpack.c.b16 %v4614_v6, %v4613_v44  ;;  %v3793_v51 = vrot.slane %v3791_v43, 4  ;;  %v10385_v5 = vld [vmem:[%s11437_s6 + $0xc8] sm:$0x3] }
 0x1f3   : > { %v4032_v63 = vadd.f32 %v4000_v52, %v12828_v50  ;;  %3565 = vst.msk [vmem:[#allocation2 + $0x48] sm:$0xff] %vm450_vm11, %v3533_v49  ;;  %v3785_v50 = vsel %vm11441_vm6, %v10314_v40, %v3784_v20  ;;  %v4548_v20 = vshrl.u32 %v10382_v34, 16  ;;  %v3502_v47 = vld [vmem:[#allocation2 + $0x50] sm:$0xff]  ;;  %v3270_v40 = vrot.slane %v3268_v45, 5  ;;  %v10297_v48 = vld [vmem:[%s11437_s6 + $0xc0] sm:$0xe] }
 0x1f4   : > { %v4720_v39 = vpop.f32.mrf.mxu3  ;;  %v4787_v55 = vld [vmem:[#allocation2 + $0x38] sm:$0xff]  ;;  %2843 = vst.msk [vmem:[#allocation2 + $0x58] sm:$0xff] %vm450_vm11, %v2811_v21  ;;  %v10299_v52 = vld [vmem:[%s11437_s6 + $0xc8] sm:$0x1]  ;;  %v12903_v21 = vrot.slane %v3282_v33, 5  ;;  %v4546_v11 = vrot.slane %v12892_v27, 4 }
 0x1f5   : > { %10335 = vmatmul.msk.bf16.gmra.mxu2 %vm308_vm5, %v3844_v9  ;;  %4064 = vst.msk [vmem:[#allocation2 + $0x40] sm:$0xff] %vm450_vm11, %v4032_v63  ;;  %v4819_v42 = vadd.f32 %v4787_v55, %v4717_v18  ;;  %v3827_v18 = vunpack.c.l.b16 %v3785_v50  ;;  %v4550_v28 = vrot.slane %v4548_v20, 5  ;;  %v10383_v63 = vld [vmem:[%s11437_s6 + $0xc0] sm:$0xe]  ;;  %v3271_v55 = vsel %vm11477_vm9, %v3266_v8, %v3270_v40  ;;  %v10384_v50 = vld [vmem:[%s11437_s6 + $0xc4] sm:$0xf] }
 0x1f6   : > { %v3794_v3 = vrot.slane %v10299_v52, 5  ;;  %v3289_v60 = vor.u32 %v3288_v46, %v12903_v21  ;;  %v3292_v59 = vshll.u32 %v10229_v62, 16  ;;  %v4557_v7 = vshrl.u32 %v10383_v63, 16  ;;  %v12948_v52 = vld [vmem:[%s11437_s6 + $0x1c] sm:$0xf] }
 0x1f7   : > { %4851 = vst.msk [vmem:[#allocation2 + $0x38] sm:$0xff] %vm450_vm11, %v4819_v42  ;;  %v3845_v53 = vpack.c.b16 %v3828_v10, %v3827_v18  ;;  %v4554_v44 = vor.u32 %v4553_v23, %v4550_v28  ;;  %v10315_v42 = vrot.slane %v10297_v48, 9  ;;  %v4560_v6 = vshll.u32 %v10383_v63, 16  ;;  %v10852_v23 = vld [vmem:[%s15063_s1 + $0x60] sm:$0xf] }
 0x1f8   : > { %v12884_v19 = vpop.f32.mrf.mxu2  ;;  %v3437_v1 = vpop.f32.mrf.mxu1  ;;  %v4566_v18 = vshrl.u32 %v10384_v50, 16  ;;  %v4569_v20 = vshll.u32 %v10384_v50, 16  ;;  %v3328_v10 = vunpack.c.l.b16 %v3271_v55  ;;  %v3290_v8 = vrot.slane %v3289_v60, 4 }
 0x1f9   : > { %v3534_v12 = vadd.f32 %v3502_v47, %v3437_v1  ;;  %v2718_v9 = vpop.f32.mrf.mxu0  ;;  %v3327_v47 = vunpack.c.l.b16 %v3261_v61  ;;  %v4555_v24 = vsel %vm11499_vm10, %v4546_v11, %v4554_v44  ;;  %v3294_v33 = vrot.slane %v3292_v59, 5  ;;  %v2782_v61 = vld [vmem:[#allocation2 + $0x70] sm:$0xff]  ;;  %v10598_v59 = vld [vmem:[%s11437_s6 + $0x20] sm:$0x1] }
 0x1fa   : > { %v4001_v15 = vld [vmem:[#allocation2 + $0x48] sm:$0xff]  ;;  %v2812_v36 = vadd.f32 %v2780_v30, %v2718_v9  ;;  %v4559_v2 = vrot.slane %v4557_v7, 5  ;;  %v4571_v40 = vrot.slane %v4569_v20, 6  ;;  %v4579_v28 = vshll.u32 %v10385_v5, 16 }
 0x1fb   : > { %v4033_v26 = vadd.f32 %v4001_v15, %v12857_v32  ;;  %3566 = vst.msk [vmem:[#allocation2 + $0x50] sm:$0xff] %vm450_vm11, %v3534_v12  ;;  %10249 = vmatmul.msk.bf16.gmra.mxu1 %vm308_vm5, %v3344_v25  ;;  %10180 = vmatmul.msk.bf16.gmra.mxu0 %vm308_vm5, %v11135_v56  ;;  %v3275_v32 = vrot.slane %v3273_v13, 4  ;;  %v3503_v34 = vld [vmem:[#allocation2 + $0x58] sm:$0xff]  ;;  %v3795_v12 = vsel %vm11441_vm6, %v3793_v51, %v3794_v3  ;;  %v4562_v15 = vrot.slane %v4560_v6, 6 }
 0x1fc   : > { %v4722_v41 = vpop.f32.mrf.mxu3  ;;  %v4788_v49 = vld [vmem:[#allocation2 + $0x40] sm:$0xff]  ;;  %2844 = vst.msk [vmem:[#allocation2 + $0x60] sm:$0xff] %vm450_vm11, %v2812_v36  ;;  %v4568_v36 = vrot.slane %v4566_v18, 5  ;;  %v3830_v62 = vunpack.c.l.b16 %v3795_v12  ;;  %v3295_v55 = vsel %vm11477_vm9, %v3290_v8, %v3294_v33  ;;  %v10682_v18 = vld [vmem:[%s11437_s6 + $0x18] sm:$0xe] }
 0x1fd   : > { %4065 = vst.msk [vmem:[#allocation2 + $0x48] sm:$0xff] %vm450_vm11, %v4033_v26  ;;  %v4820_v38 = vadd.f32 %v4788_v49, %v4720_v39  ;;  %v4536_v39 = vrot.slane %v4535_v37, 4  ;;  %v3279_v54 = vor.u32 %v3278_v31, %v3275_v32  ;;  %v4576_v37 = vshrl.u32 %v10385_v5, 16 }
 0x1fe   : > { %v3345_v26 = vpack.c.b16 %v3328_v10, %v3327_v47  ;;  %v4616_v32 = vunpack.c.l.b16 %v4555_v24  ;;  %v4563_v50 = vor.u32 %v4562_v15, %v4559_v2  ;;  %v12973_v47 = vunpack.c.l.b16 %v3295_v55 }
 0x1ff   : > { %4852 = vst.msk [vmem:[#allocation2 + $0x40] sm:$0xff] %vm450_vm11, %v4820_v38  ;;  %v4545_v4 = vsel %vm11499_vm10, %v4536_v39, %v12892_v27  ;;  %v3280_v9 = vrot.slane %v3279_v54, 4  ;;  %v10526_v39 = vld [vmem:[%s11437_s6 + $0x18] sm:$0xf]  ;;  %v4578_v3 = vrot.slane %v4576_v37, 5  ;;  %v4581_v54 = vrot.slane %v4579_v28, 6 }
 0x200   : > { %v12912_v25 = vpop.f32.mrf.mxu2  ;;  %v3439_v0 = vpop.f32.mrf.mxu1  ;;  %v4615_v48 = vunpack.c.l.b16 %v4545_v4  ;;  %v5288_v7 = vshll.u32 %v10526_v39, 16  ;;  %v4564_v10 = vrot.slane %v4563_v50, 4  ;;  %v6509_v2 = vshrl.u32 %v10682_v18, 16  ;;  %v10528_v37 = vld [vmem:[%s11437_s6 + $0x20] sm:$0x1] }
 0x201   : > { %10405 = vmatmul.msk.bf16.gmra.mxu3 %vm308_vm5, %v4632_v29  ;;  %v3535_v45 = vadd.f32 %v3503_v34, %v3439_v0  ;;  %v2720_v35 = vpop.f32.mrf.mxu0  ;;  %v11136_v29 = vld [vmem:[%s11437_s6 + $0xc0] sm:$0xff]  ;;  %v3285_v63 = vsel %vm11477_vm9, %v3280_v9, %v12903_v21  ;;  %v12956_v0 = vor.u32 %v4571_v40, %v4568_v36  ;;  %v2783_v40 = vld [vmem:[#allocation2 + $0x78] sm:$0xff]  ;;  %v11178_v50 = vld [vmem:[%s15063_s1 + $0x68] sm:$0x30] }
 0x202   : > { %v4002_v14 = vld [vmem:[#allocation2 + $0x50] sm:$0xff]  ;;  %v2813_v56 = vadd.f32 %v2781_v57, %v2720_v35  ;;  %v6058_v35 = vrot.slane %v12948_v52, 5  ;;  %v4633_v60 = vpack.c.b16 %v4616_v32, %v4615_v48  ;;  %v5290_v33 = vrot.slane %v5288_v7, 5 }
 0x203   : > { %v4034_v16 = vadd.f32 %v4002_v14, %v12884_v19  ;;  %3567 = vst.msk [vmem:[#allocation2 + $0x58] sm:$0xff] %vm450_vm11, %v3535_v45  ;;  %v3792_v19 = vsel %vm11441_vm6, %v10315_v42, %v3791_v43  ;;  %v3504_v49 = vld [vmem:[#allocation2 + $0x60] sm:$0xff]  ;;  %v10527_v42 = vld [vmem:[%s11437_s6 + $0x1c] sm:$0xf]  ;;  %v10596_v45 = vld [vmem:[%s11437_s6 + $0x18] sm:$0xe] }
 0x204   : > { %v12922_v1 = vpop.f32.mrf.mxu3  ;;  %v4789_v13 = vld [vmem:[#allocation2 + $0x48] sm:$0xff]  ;;  %2845 = vst.msk [vmem:[#allocation2 + $0x68] sm:$0xff] %vm450_vm11, %v2813_v56  ;;  %v3829_v31 = vunpack.c.l.b16 %v3792_v19  ;;  %v5294_v56 = vshll.u32 %v10527_v42, 16  ;;  %v5298_v6 = vshrl.u32 %v10527_v42, 16  ;;  %v4574_v5 = vrot.slane %v12956_v0, 4 }
 0x205   : > { %10336 = vmatmul.msk.bf16.gmra.mxu2 %vm308_vm5, %v3845_v53  ;;  %4066 = vst.msk [vmem:[#allocation2 + $0x50] sm:$0xff] %vm450_vm11, %v4034_v16  ;;  %v4821_v30 = vadd.f32 %v4789_v13, %v4722_v41  ;;  %v11177_v41 = vld [vmem:[%s15063_s1 + $0x60] sm:$0x30]  ;;  %v12971_v16 = vunpack.c.l.b16 %v3285_v63  ;;  %v4582_v13 = vor.u32 %v4581_v54, %v4578_v3  ;;  %v10644_v24 = vrot.slane %v10596_v45, 9 }
 0x206   : > { %v10853_v38 = vor.u32 %v11177_v41, %v10852_v23  ;;  %v3846_v20 = vpack.c.b16 %v3830_v62, %v3829_v31  ;;  %v6060_v19 = vrot.slane %v6058_v35, 4  ;;  %v5300_v28 = vrot.slane %v5298_v6, 4  ;;  %v10529_v3 = vld [vmem:[%s11437_s6 + $0x24] sm:$0xf] }
 0x207   : > { %4853 = vst.msk [vmem:[#allocation2 + $0x48] sm:$0xff] %vm450_vm11, %v4821_v30  ;;  %v6061_v30 = vrot.slane %v10598_v59, 5  ;;  %v6512_v23 = vshll.u32 %v10682_v18, 16  ;;  %v3346_v31 = vpack.c.b16 %v12973_v47, %v12971_v16  ;;  %v4583_v52 = vsel %vm11499_vm10, %v4574_v5, %v4582_v13  ;;  %v11179_v59 = vld [vmem:[%s15063_s1 + $0x70] sm:$0x30]  ;;  %v2784_v5 = vld [vmem:[#allocation2 + $0x80] sm:$0xff] }
 0x208   : > { %v12938_v27 = vpop.f32.mrf.mxu2  ;;  %v3442_v43 = vpop.f32.mrf.mxu1  ;;  %v7421_v34 = vsel %vm357_vm0, %v10853_v38, 0  ;;  %v4573_v38 = vsel %vm11499_vm10, %v4564_v10, %v12956_v0  ;;  %v5304_v62 = vshll.u32 %v10528_v37, 16  ;;  %v6511_v63 = vrot.slane %v6509_v2, 5 }
 0x209   : > { %v3536_v46 = vadd.f32 %v3504_v49, %v3442_v43  ;;  %v2723_v53 = vpop.f32.mrf.mxu0  ;;  %7430 = vmatpush.bf16.msrb.mxu0 %v7421_v34  ;;  %v6514_v0 = vrot.slane %v6512_v23, 6  ;;  %v4617_v45 = vunpack.c.l.b16 %v4573_v38  ;;  %v5309_v2 = vshrl.u32 %v10529_v3, 16 }
 0x20a   : > { %v4003_v11 = vld [vmem:[#allocation2 + $0x58] sm:$0xff]  ;;  %v2814_v44 = vadd.f32 %v2782_v61, %v2723_v53 }
 0x20b   : > { %v4035_v51 = vadd.f32 %v4003_v11, %v12912_v25  ;;  %3568 = vst.msk [vmem:[#allocation2 + $0x60] sm:$0xff] %vm450_vm11, %v3536_v46  ;;  %10250 = vmatmul.msk.bf16.gmra.mxu1 %vm308_vm5, %v3345_v26  ;;  %10181 = vmatmul.msk.bf16.gmra.mxu0 %vm308_vm5, %v11136_v29  ;;  %v5285_v25 = vshrl.u32 %v10526_v39, 16  ;;  %v3505_v9 = vld [vmem:[#allocation2 + $0x68] sm:$0xff]  ;;  %v12982_v26 = vrot.slane %v5294_v56, 5  ;;  %v10684_v46 = vld [vmem:[%s11437_s6 + $0x20] sm:$0x3]  ;;  %v13005_v39 = vsel %vm11441_vm6, %v6060_v19, %v6061_v30 }
 0x20c   : > { %v4727_v21 = vpop.f32.mrf.mxu3  ;;  %v4790_v57 = vld [vmem:[#allocation2 + $0x50] sm:$0xff]  ;;  %2846 = vst.msk [vmem:[#allocation2 + $0x70] sm:$0xff] %vm450_vm11, %v2814_v44  ;;  %v10922_v44 = vld [vmem:[%s15063_s1 + $0x68] sm:$0xf]  ;;  %v11141_v56 = vld [vmem:[%s11437_s6 + $0x18] sm:$0xff]  ;;  %v6172_v6 = vunpack.c.l.b16 %v13005_v39  ;;  %v6515_v19 = vor.u32 %v6514_v0, %v6511_v63 }
 0x20d   : > { %4067 = vst.msk [vmem:[#allocation2 + $0x58] sm:$0xff] %vm450_vm11, %v4035_v51  ;;  %v4822_v14 = vadd.f32 %v4790_v57, %v12922_v1  ;;  %v10683_v1 = vld [vmem:[%s11437_s6 + $0x1c] sm:$0xf]  ;;  %v5287_v8 = vrot.slane %v5285_v25, 4  ;;  %v5301_v11 = vor.u32 %v5300_v28, %v12982_v26  ;;  %v10923_v34 = vor.u32 %v11178_v50, %v10922_v44  ;;  %v11078_v63 = vld [vmem:[%s15063_s1 + $0x78] sm:$0xf] }
 0x20e   : > { %v6518_v49 = vshrl.u32 %v10683_v1, 16  ;;  %v6521_v29 = vshll.u32 %v10683_v1, 16  ;;  %v6531_v25 = vshll.u32 %v10684_v46, 16  ;;  %v10530_v1 = vld [vmem:[%s11437_s6 + $0x28] sm:$0xf]  ;;  %v5312_v28 = vshll.u32 %v10529_v3, 16 }
 0x20f   : > { %4854 = vst.msk [vmem:[#allocation2 + $0x50] sm:$0xff] %vm450_vm11, %v4822_v14  ;;  %v5291_v61 = vor.u32 %v5290_v33, %v5287_v8  ;;  %v5302_v13 = vrot.slane %v5301_v11, 4  ;;  %v13033_v33 = vld [vmem:[%s11437_s6 + $0x28] sm:$0xf] }
 0x210   : > { %v12976_v4 = vpop.f32.mrf.mxu2  ;;  %v3444_v12 = vpop.f32.mrf.mxu1  ;;  %v6520_v42 = vrot.slane %v6518_v49, 5  ;;  %v6523_v51 = vrot.slane %v6521_v29, 6  ;;  %v6533_v37 = vrot.slane %v6531_v25, 6  ;;  %v5322_v49 = vshrl.u32 %v10530_v1, 16  ;;  %v2785_v50 = vld [vmem:[#allocation2 + $0x88] sm:$0xff] }
 0x211   : > { %10406 = vmatmul.msk.bf16.gmra.mxu3 %vm308_vm5, %v4633_v60  ;;  %v3537_v15 = vadd.f32 %v3505_v9, %v3444_v12  ;;  %v2725_v36 = vpop.f32.mrf.mxu0  ;;  %v11008_v60 = vld [vmem:[%s15063_s1 + $0x70] sm:$0xf]  ;;  %v5292_v18 = vrot.slane %v5291_v61, 4  ;;  %v6065_v38 = vrot.slane %v13033_v33, 5  ;;  %v5314_v39 = vrot.slane %v5312_v28, 5 }
 0x212   : > { %v4004_v41 = vld [vmem:[#allocation2 + $0x60] sm:$0xff]  ;;  %v2815_v43 = vadd.f32 %v2783_v40, %v2725_v36  ;;  %v11009_v16 = vor.u32 %v11179_v59, %v11008_v60  ;;  %v13030_v8 = vor.u32 %v6523_v51, %v6520_v42  ;;  %v10531_v59 = vld [vmem:[%s11437_s6 + $0x2c] sm:$0x1]  ;;  %v10686_v25 = vld [vmem:[%s11437_s6 + $0x28] sm:$0xf] }
 0x213   : > { %v4036_v48 = vadd.f32 %v4004_v41, %v12938_v27  ;;  %3569 = vst.msk [vmem:[#allocation2 + $0x68] sm:$0xff] %vm450_vm11, %v3537_v15  ;;  %v13000_v27 = vsel %vm11441_vm6, %v10644_v24, %v6058_v35  ;;  %v4618_v35 = vunpack.c.l.b16 %v4583_v52  ;;  %v3506_v14 = vld [vmem:[#allocation2 + $0x70] sm:$0xff]  ;;  %v5306_v24 = vrot.slane %v5304_v62, 5 }
 0x214   : > { %v12986_v32 = vpop.f32.mrf.mxu3  ;;  %v4791_v53 = vld [vmem:[#allocation2 + $0x58] sm:$0xff]  ;;  %2847 = vst.msk [vmem:[#allocation2 + $0x78] sm:$0xff] %vm450_vm11, %v2815_v43  ;;  %v6171_v57 = vunpack.c.l.b16 %v13000_v27  ;;  %v8645_v30 = vsel %vm357_vm0, %v11009_v16, 0  ;;  %v5318_v43 = vshll.u32 %v10530_v1, 16  ;;  %v6526_v52 = vrot.slane %v13030_v8, 4 }
 0x215   : > { %10337 = vmatmul.msk.bf16.gmra.mxu2 %vm308_vm5, %v3846_v20  ;;  %4068 = vst.msk [vmem:[#allocation2 + $0x60] sm:$0xff] %vm450_vm11, %v4036_v48  ;;  %v4823_v55 = vadd.f32 %v4791_v53, %v4727_v21  ;;  %v6528_v21 = vshrl.u32 %v10684_v46, 16  ;;  %v8145_v20 = vsel %vm357_vm0, %v10923_v34, 0  ;;  %v4634_v41 = vpack.c.b16 %v4618_v35, %v4617_v45  ;;  %v10599_v46 = vld [vmem:[%s11437_s6 + $0x24] sm:$0xe] }
 0x216   : > { %8154 = vmatpush.bf16.msrb.mxu1 %v8145_v20  ;;  %8654 = vmatpush.bf16.msrb.mxu2 %v8645_v30  ;;  %v5307_v48 = vsel %vm11477_vm9, %v5302_v13, %v5306_v24  ;;  %v5311_v53 = vrot.slane %v5309_v2, 4  ;;  %v10685_v27 = vld [vmem:[%s11437_s6 + $0x24] sm:$0xe]  ;;  %v6203_v61 = vpack.c.b16 %v6172_v6, %v6171_v57  ;;  %v10601_v34 = vld [vmem:[%s11437_s6 + $0x2c] sm:$0x1]  ;;  %v13068_v51 = vrot.slane %v5318_v43, 5 }
 0x217   : > { %4855 = vst.msk [vmem:[#allocation2 + $0x58] sm:$0xff] %vm450_vm11, %v4823_v55  ;;  %v6530_v40 = vrot.slane %v6528_v21, 5  ;;  %v11180_v55 = vld [vmem:[%s15063_s1 + $0x78] sm:$0x30]  ;;  %v13065_v0 = vunpack.c.l.b16 %v5307_v48  ;;  %v5324_v21 = vrot.slane %v5322_v49, 4  ;;  %v10645_v57 = vrot.slane %v10599_v46, 9 }
 0x218   : > { %v13016_v54 = vpop.f32.mrf.mxu2  ;;  %v3447_v7 = vpop.f32.mrf.mxu1  ;;  %v11079_v42 = vor.u32 %v11180_v55, %v11078_v63  ;;  %v6067_v60 = vrot.slane %v6065_v38, 4  ;;  %v6537_v6 = vshrl.u32 %v10685_v27, 16  ;;  %v10687_v13 = vld [vmem:[%s11437_s6 + $0x2c] sm:$0x3]  ;;  %v5328_v1 = vshll.u32 %v10531_v59, 16  ;;  %v11142_v49 = vld [vmem:[%s11437_s6 + $0x24] sm:$0xff] }
 0x219   : > { %v3538_v47 = vadd.f32 %v3506_v14, %v3447_v7  ;;  %v2728_v10 = vpop.f32.mrf.mxu0  ;;  %v6066_v2 = vsel %vm11441_vm6, %v10645_v57, %v6065_v38 }
 0x21a   : > { %v4005_v12 = vld [vmem:[#allocation2 + $0x68] sm:$0xff]  ;;  %v2816_v9 = vadd.f32 %v2784_v5, %v2728_v10  ;;  %v6068_v10 = vrot.slane %v10601_v34, 5  ;;  %v5315_v5 = vor.u32 %v5314_v39, %v5311_v53  ;;  %v5330_v48 = vrot.slane %v5328_v1, 5  ;;  %v2786_v53 = vld [vmem:[#allocation2 + $0x90] sm:$0xff] }
 0x21b   : > { %v4037_v15 = vadd.f32 %v4005_v12, %v12976_v4  ;;  %3570 = vst.msk [vmem:[#allocation2 + $0x70] sm:$0xff] %vm450_vm11, %v3538_v47  ;;  %10251 = vmatmul.msk.bf16.gmra.mxu1 %vm308_vm5, %v3346_v31  ;;  %10510 = vmatmul.msk.bf16.vlgmr.msra.gmra.mxu0 %vm308_vm5, %v11141_v56  ;;  %v5297_v4 = vsel %vm11477_vm9, %v5292_v18, %v12982_v26  ;;  %v6516_v31 = vrot.slane %v6515_v19, 4  ;;  %v3507_v44 = vld [vmem:[#allocation2 + $0x78] sm:$0xff]  ;;  %v9433_v56 = vsel %vm357_vm0, %v11079_v42, 0 }
 0x21c   : > { %v13038_v36 = vpop.f32.mrf.mxu3  ;;  %v4792_v23 = vld [vmem:[#allocation2 + $0x60] sm:$0xff]  ;;  %2848 = vst.msk [vmem:[#allocation2 + $0x80] sm:$0xff] %vm450_vm11, %v2816_v9  ;;  %v13056_v62 = vunpack.c.l.b16 %v5297_v4  ;;  %v6540_v18 = vshll.u32 %v10685_v27, 16  ;;  %9442 = vmatpush.bf16.msrb.mxu3 %v9433_v56  ;;  %v5325_v19 = vor.u32 %v5324_v21, %v13068_v51  ;;  %v6546_v12 = vshrl.u32 %v10686_v25, 16  ;;  %v10688_v56 = vld [vmem:[%s11437_s6 + $0x30] sm:$0xe] }
 0x21d   : > { %4069 = vst.msk [vmem:[#allocation2 + $0x68] sm:$0xff] %vm450_vm11, %v4037_v15  ;;  %v4824_v29 = vadd.f32 %v4792_v23, %v12986_v32  ;;  %v6534_v32 = vor.u32 %v6533_v37, %v6530_v40  ;;  %v6525_v35 = vsel %vm11499_vm10, %v6516_v31, %v13030_v8  ;;  %v6539_v15 = vrot.slane %v6537_v6, 5 }
 0x21e   : > { %v5703_v30 = vpack.c.b16 %v13065_v0, %v13056_v62  ;;  %v6959_v8 = vunpack.c.l.b16 %v6525_v35  ;;  %v6542_v40 = vrot.slane %v6540_v18, 6  ;;  %v6069_v28 = vsel %vm11441_vm6, %v6067_v60, %v6068_v10  ;;  %v10603_v60 = vld [vmem:[%s11437_s6 + $0x34] sm:$0xf]  ;;  %v10604_v10 = vld [vmem:[%s11437_s6 + $0x38] sm:$0x1] }
 0x21f   : > { %4856 = vst.msk [vmem:[#allocation2 + $0x60] sm:$0xff] %vm450_vm11, %v4824_v29  ;;  %v6535_v47 = vsel %vm11499_vm10, %v6526_v52, %v6534_v32  ;;  %v5316_v23 = vrot.slane %v5315_v5, 4  ;;  %v5326_v29 = vrot.slane %v5325_v19, 4  ;;  %v6548_v31 = vrot.slane %v6546_v12, 5 }
 0x220   : > { %v13054_v26 = vpop.f32.mrf.mxu2  ;;  %v3449_v11 = vpop.f32.mrf.mxu1  ;;  %v6960_v33 = vunpack.c.l.b16 %v6535_v47  ;;  %v6173_v27 = vunpack.c.l.b16 %v6066_v2  ;;  %v6174_v55 = vunpack.c.l.b16 %v6069_v28  ;;  %v6543_v39 = vor.u32 %v6542_v40, %v6539_v15 }
 0x221   : > { %10407 = vmatmul.msk.bf16.gmra.mxu3 %vm308_vm5, %v4634_v41  ;;  %v3539_v3 = vadd.f32 %v3507_v44, %v3449_v11  ;;  %v2730_v45 = vpop.f32.mrf.mxu0  ;;  %v6559_v41 = vshll.u32 %v10687_v13, 16  ;;  %v10533_v11 = vld [vmem:[%s11437_s6 + $0x34] sm:$0xf]  ;;  %v5321_v0 = vsel %vm11477_vm9, %v5316_v23, %v13068_v51  ;;  %v6072_v1 = vrot.slane %v10603_v60, 5 }
 0x222   : > { %v4006_v7 = vld [vmem:[#allocation2 + $0x70] sm:$0xff]  ;;  %v2817_v14 = vadd.f32 %v2785_v50, %v2730_v45  ;;  %v6991_v63 = vpack.c.b16 %v6960_v33, %v6959_v8  ;;  %v5342_v59 = vshll.u32 %v10533_v11, 16  ;;  %v13117_v18 = vunpack.c.l.b16 %v5321_v0  ;;  %v2787_v8 = vld [vmem:[#allocation2 + $0x98] sm:$0xff] }
 0x223   : > { %v4038_v20 = vadd.f32 %v4006_v7, %v13016_v54  ;;  %3571 = vst.msk [vmem:[#allocation2 + $0x78] sm:$0xff] %vm450_vm11, %v3539_v3  ;;  %v6549_v54 = vshll.u32 %v10686_v25, 16  ;;  %v3508_v43 = vld [vmem:[#allocation2 + $0x80] sm:$0xff]  ;;  %v6561_v42 = vrot.slane %v6559_v41, 6  ;;  %v10602_v45 = vld [vmem:[%s11437_s6 + $0x30] sm:$0xe]  ;;  %v6204_v7 = vpack.c.b16 %v6174_v55, %v6173_v27 }
 0x224   : > { %v4735_v16 = vpop.f32.mrf.mxu3  ;;  %v4793_v24 = vld [vmem:[#allocation2 + $0x68] sm:$0xff]  ;;  %2849 = vst.msk [vmem:[#allocation2 + $0x88] sm:$0xff] %vm450_vm11, %v2817_v14  ;;  %v5346_v25 = vshrl.u32 %v10533_v11, 16  ;;  %v6544_v14 = vrot.slane %v6543_v39, 4  ;;  %v10646_v5 = vrot.slane %v10602_v45, 9  ;;  %v13126_v2 = vrot.slane %v5342_v59, 5 }
 0x225   : > { %10666 = vmatmul.msk.bf16.vlgmr.msra.gmra.mxu2 %vm308_vm5, %v6203_v61  ;;  %4070 = vst.msk [vmem:[#allocation2 + $0x70] sm:$0xff] %vm450_vm11, %v4038_v20  ;;  %v4825_v9 = vadd.f32 %v4793_v24, %v13038_v36  ;;  %v6556_v36 = vshrl.u32 %v10687_v13, 16  ;;  %v6551_v38 = vrot.slane %v6549_v54, 6  ;;  %v10532_v61 = vld [vmem:[%s11437_s6 + $0x30] sm:$0xf]  ;;  %v6565_v40 = vshrl.u32 %v10688_v56, 16 }
 0x226   : > { %v5333_v35 = vshrl.u32 %v10532_v61, 16  ;;  %v5336_v57 = vshll.u32 %v10532_v61, 16  ;;  %v10689_v13 = vld [vmem:[%s11437_s6 + $0x34] sm:$0xf]  ;;  %v10534_v33 = vld [vmem:[%s11437_s6 + $0x38] sm:$0x1] }
 0x227   : > { %4857 = vst.msk [vmem:[#allocation2 + $0x68] sm:$0xff] %vm450_vm11, %v4825_v9  ;;  %v6558_v34 = vrot.slane %v6556_v36, 5  ;;  %v13108_v3 = vor.u32 %v6551_v38, %v6548_v31  ;;  %v5348_v15 = vrot.slane %v5346_v25, 4  ;;  %v10690_v36 = vld [vmem:[%s11437_s6 + $0x38] sm:$0x3]  ;;  %v6568_v41 = vshll.u32 %v10688_v56, 16 }
 0x228   : > { %v13091_v37 = vpop.f32.mrf.mxu2  ;;  %v3452_v4 = vpop.f32.mrf.mxu1  ;;  %v5335_v12 = vrot.slane %v5333_v35, 4  ;;  %v5338_v54 = vrot.slane %v5336_v57, 5  ;;  %v13136_v31 = vsel %vm11441_vm6, %v10646_v5, %v6072_v1  ;;  %v6075_v38 = vrot.slane %v10604_v10, 5  ;;  %v2788_v25 = vld [vmem:[#allocation2 + $0xa0] sm:$0xff] }
 0x229   : > { %v3540_v52 = vadd.f32 %v3508_v43, %v3452_v4  ;;  %v2733_v46 = vpop.f32.mrf.mxu0  ;;  %v6562_v47 = vor.u32 %v6561_v42, %v6558_v34  ;;  %v6554_v19 = vrot.slane %v13108_v3, 4  ;;  %v6574_v4 = vshrl.u32 %v10689_v13, 16 }
 0x22a   : > { %v4007_v62 = vld [vmem:[#allocation2 + $0x78] sm:$0xff]  ;;  %v2818_v32 = vadd.f32 %v2786_v53, %v2733_v46  ;;  %v6577_v43 = vshll.u32 %v10689_v13, 16  ;;  %v6074_v46 = vrot.slane %v6072_v1, 4  ;;  %v5339_v53 = vor.u32 %v5338_v54, %v5335_v12 }
 0x22b   : > { %v4039_v44 = vadd.f32 %v4007_v62, %v13054_v26  ;;  %3572 = vst.msk [vmem:[#allocation2 + $0x80] sm:$0xff] %vm450_vm11, %v3540_v52  ;;  %10580 = vmatmul.msk.bf16.vlgmr.msra.gmra.mxu1 %vm308_vm5, %v5703_v30  ;;  %10511 = vmatmul.msk.bf16.gmra.mxu0 %vm308_vm5, %v11142_v49  ;;  %v5331_v26 = vsel %vm11477_vm9, %v5326_v29, %v5330_v48  ;;  %v3509_v24 = vld [vmem:[#allocation2 + $0x88] sm:$0xff]  ;;  %v5352_v27 = vshll.u32 %v10534_v33, 16  ;;  %v6570_v55 = vrot.slane %v6568_v41, 6 }
 0x22c   : > { %v4737_v50 = vpop.f32.mrf.mxu3  ;;  %v4794_v21 = vld [vmem:[#allocation2 + $0x70] sm:$0xff]  ;;  %2850 = vst.msk [vmem:[#allocation2 + $0x90] sm:$0xff] %vm450_vm11, %v2818_v32  ;;  %v13119_v20 = vunpack.c.l.b16 %v5331_v26  ;;  %v6553_v48 = vsel %vm11499_vm10, %v6544_v14, %v13108_v3  ;;  %v5349_v62 = vor.u32 %v5348_v15, %v13126_v2  ;;  %v6567_v32 = vrot.slane %v6565_v40, 5 }
 0x22d   : > { %4071 = vst.msk [vmem:[#allocation2 + $0x78] sm:$0xff] %vm450_vm11, %v4039_v44  ;;  %v4826_v51 = vadd.f32 %v4794_v21, %v4735_v16  ;;  %v6576_v39 = vrot.slane %v6574_v4, 5  ;;  %v6579_v11 = vrot.slane %v6577_v43, 6  ;;  %v6587_v44 = vshll.u32 %v10690_v36, 16  ;;  %v11143_v26 = vld [vmem:[%s11437_s6 + $0x30] sm:$0xff] }
 0x22e   : > { %v5704_v34 = vpack.c.b16 %v13119_v20, %v13117_v18  ;;  %v6961_v42 = vunpack.c.l.b16 %v6553_v48  ;;  %v6076_v45 = vsel %vm11441_vm6, %v6074_v46, %v6075_v38  ;;  %v6175_v35 = vunpack.c.l.b16 %v13136_v31  ;;  %v10536_v18 = vld [vmem:[%s11437_s6 + $0x40] sm:$0xf]  ;;  %v10605_v4 = vld [vmem:[%s11437_s6 + $0x3c] sm:$0xe]  ;;  %v10607_v43 = vld [vmem:[%s11437_s6 + $0x44] sm:$0x1] }
 0x22f   : > { %4858 = vst.msk [vmem:[#allocation2 + $0x70] sm:$0xff] %vm450_vm11, %v4826_v51  ;;  %v5354_v57 = vrot.slane %v5352_v27, 5  ;;  %v10535_v51 = vld [vmem:[%s11437_s6 + $0x3c] sm:$0xf]  ;;  %v5350_v14 = vrot.slane %v5349_v62, 4  ;;  %v6571_v10 = vor.u32 %v6570_v55, %v6567_v32  ;;  %v13155_v5 = vor.u32 %v6579_v11, %v6576_v39 }
 0x230   : > { %v13115_v6 = vpop.f32.mrf.mxu2  ;;  %v3454_v16 = vpop.f32.mrf.mxu1  ;;  %v6589_v13 = vrot.slane %v6587_v44, 6  ;;  %v6176_v1 = vunpack.c.l.b16 %v6076_v45  ;;  %v5357_v12 = vshrl.u32 %v10535_v51, 16  ;;  %v5360_v54 = vshll.u32 %v10535_v51, 16  ;;  %v10537_v48 = vld [vmem:[%s11437_s6 + $0x44] sm:$0x1] }
 0x231   : > { %10736 = vmatmul.msk.bf16.vlgmr.msra.gmra.mxu3 %vm308_vm5, %v6991_v63  ;;  %v3541_v9 = vadd.f32 %v3509_v24, %v3454_v16  ;;  %v2735_v30 = vpop.f32.mrf.mxu0  ;;  %v6584_v63 = vshrl.u32 %v10690_v36, 16  ;;  %v13158_v16 = vld [vmem:[%s11437_s6 + $0x40] sm:$0xf]  ;;  %v5370_v33 = vshrl.u32 %v10536_v18, 16  ;;  %v5355_v40 = vsel %vm11477_vm9, %v5350_v14, %v5354_v57 }
 0x232   : > { %v4008_v28 = vld [vmem:[#allocation2 + $0x80] sm:$0xff]  ;;  %v2819_v23 = vadd.f32 %v2787_v8, %v2735_v30  ;;  %v5366_v8 = vshll.u32 %v10536_v18, 16  ;;  %v6582_v36 = vrot.slane %v13155_v5, 4  ;;  %v5359_v31 = vrot.slane %v5357_v12, 4 }
 0x233   : > { %v4040_v49 = vadd.f32 %v4008_v28, %v13091_v37  ;;  %3573 = vst.msk [vmem:[#allocation2 + $0x88] sm:$0xff] %vm450_vm11, %v3541_v9  ;;  %v6563_v37 = vsel %vm11499_vm10, %v6554_v19, %v6562_v47  ;;  %v6586_v56 = vrot.slane %v6584_v63, 5  ;;  %v6079_v28 = vrot.slane %v13158_v16, 5  ;;  %v2789_v63 = vld [vmem:[#allocation2 + $0xa8] sm:$0xff]  ;;  %v10692_v44 = vld [vmem:[%s11437_s6 + $0x40] sm:$0xf] }
 0x234   : > { %v4740_v29 = vpop.f32.mrf.mxu3  ;;  %v4795_v52 = vld [vmem:[#allocation2 + $0x78] sm:$0xff]  ;;  %2851 = vst.msk [vmem:[#allocation2 + $0x98] sm:$0xff] %vm450_vm11, %v2819_v23  ;;  %v6962_v3 = vunpack.c.l.b16 %v6563_v37  ;;  %v6572_v23 = vrot.slane %v6571_v10, 4  ;;  %v13182_v46 = vunpack.c.l.b16 %v5355_v40  ;;  %v5372_v27 = vrot.slane %v5370_v33, 4 }
 0x235   : > { %10667 = vmatmul.msk.bf16.gmra.mxu2 %vm308_vm5, %v6204_v7  ;;  %4072 = vst.msk [vmem:[#allocation2 + $0x80] sm:$0xff] %vm450_vm11, %v4040_v49  ;;  %v4827_v61 = vadd.f32 %v4795_v52, %v4737_v50  ;;  %v3510_v50 = vld [vmem:[#allocation2 + $0x90] sm:$0xff]  ;;  %v5340_v7 = vrot.slane %v5339_v53, 4  ;;  %v6590_v41 = vor.u32 %v6589_v13, %v6586_v56  ;;  %v13184_v53 = vrot.slane %v5366_v8, 5  ;;  %v10538_v13 = vld [vmem:[%s11437_s6 + $0x48] sm:$0xf] }
 0x236   : > { %v6992_v30 = vpack.c.b16 %v6962_v3, %v6961_v42  ;;  %v10647_v55 = vrot.slane %v10605_v4, 9  ;;  %v6081_v39 = vrot.slane %v6079_v28, 4  ;;  %v6082_v11 = vrot.slane %v10607_v43, 5 }
 0x237   : > { %4859 = vst.msk [vmem:[#allocation2 + $0x78] sm:$0xff] %vm450_vm11, %v4827_v61  ;;  %v5345_v15 = vsel %vm11477_vm9, %v5340_v7, %v13126_v2  ;;  %v5362_v2 = vrot.slane %v5360_v54, 5  ;;  %v10691_v61 = vld [vmem:[%s11437_s6 + $0x3c] sm:$0xe]  ;;  %v6602_v7 = vshrl.u32 %v10692_v44, 16  ;;  %v6605_v14 = vshll.u32 %v10692_v44, 16 }
 0x238   : > { %v13145_v0 = vpop.f32.mrf.mxu2  ;;  %v3457_v21 = vpop.f32.mrf.mxu1  ;;  %v13180_v37 = vunpack.c.l.b16 %v5345_v15  ;;  %v6593_v57 = vshrl.u32 %v10691_v61, 16  ;;  %v6596_v51 = vshll.u32 %v10691_v61, 16  ;;  %v6080_v18 = vsel %vm11441_vm6, %v10647_v55, %v6079_v28 }
 0x239   : > { %v3542_v60 = vadd.f32 %v3510_v50, %v3457_v21  ;;  %v2738_v59 = vpop.f32.mrf.mxu0  ;;  %v6581_v21 = vsel %vm11499_vm10, %v6572_v23, %v13155_v5  ;;  %v6591_v50 = vsel %vm11499_vm10, %v6582_v36, %v6590_v41  ;;  %v6083_v10 = vsel %vm11441_vm6, %v6081_v39, %v6082_v11  ;;  %v2790_v23 = vld [vmem:[#allocation2 + $0xb0] sm:$0xff]  ;;  %v13212_v36 = vld [vmem:[%s11437_s6 + $0x4c] sm:$0xf]  ;;  %v10608_v39 = vld [vmem:[%s11437_s6 + $0x48] sm:$0xe] }
 0x23a   : > { %v4009_v20 = vld [vmem:[#allocation2 + $0x88] sm:$0xff]  ;;  %v2820_v47 = vadd.f32 %v2788_v25, %v2738_v59  ;;  %v5373_v59 = vor.u32 %v5372_v27, %v13184_v53  ;;  %v10693_v25 = vld [vmem:[%s11437_s6 + $0x44] sm:$0x3]  ;;  %v5705_v56 = vpack.c.b16 %v13182_v46, %v13180_v37  ;;  %v6604_v33 = vrot.slane %v6602_v7, 5 }
 0x23b   : > { %v4041_v24 = vadd.f32 %v4009_v20, %v13115_v6  ;;  %3574 = vst.msk [vmem:[#allocation2 + $0x90] sm:$0xff] %vm450_vm11, %v3542_v60  ;;  %10581 = vmatmul.msk.bf16.gmra.mxu1 %vm308_vm5, %v5704_v34  ;;  %10512 = vmatmul.msk.bf16.gmra.mxu0 %vm308_vm5, %v11143_v26  ;;  %v3511_v52 = vld [vmem:[#allocation2 + $0x98] sm:$0xff]  ;;  %v5376_v26 = vshll.u32 %v10537_v48, 16  ;;  %v6963_v20 = vunpack.c.l.b16 %v6581_v21  ;;  %v6612_v12 = vshrl.u32 %v10693_v25, 16 }
 0x23c   : > { %v4742_v19 = vpop.f32.mrf.mxu3  ;;  %v4796_v9 = vld [vmem:[#allocation2 + $0x80] sm:$0xff]  ;;  %2852 = vst.msk [vmem:[#allocation2 + $0xa0] sm:$0xff] %vm450_vm11, %v2820_v47  ;;  %v6964_v47 = vunpack.c.l.b16 %v6591_v50  ;;  %v5374_v8 = vrot.slane %v5373_v59, 4  ;;  %v6615_v15 = vshll.u32 %v10693_v25, 16  ;;  %v5381_v41 = vshrl.u32 %v10538_v13, 16 }
 0x23d   : > { %4073 = vst.msk [vmem:[#allocation2 + $0x88] sm:$0xff] %vm450_vm11, %v4041_v24  ;;  %v4828_v6 = vadd.f32 %v4796_v9, %v4740_v29  ;;  %v6205_v29 = vpack.c.b16 %v6176_v1, %v6175_v35  ;;  %v5363_v35 = vor.u32 %v5362_v2, %v5359_v31  ;;  %v5378_v5 = vrot.slane %v5376_v26, 5 }
 0x23e   : > { %v6598_v1 = vrot.slane %v6596_v51, 6  ;;  %v5384_v4 = vshll.u32 %v10538_v13, 16  ;;  %v6993_v48 = vpack.c.b16 %v6964_v47, %v6963_v20  ;;  %v6177_v31 = vunpack.c.l.b16 %v6080_v18  ;;  %v10694_v51 = vld [vmem:[%s11437_s6 + $0x48] sm:$0xe]  ;;  %v2791_v20 = vld [vmem:[#allocation2 + $0xb8] sm:$0xff] }
 0x23f   : > { %4860 = vst.msk [vmem:[#allocation2 + $0x80] sm:$0xff] %vm450_vm11, %v4828_v6  ;;  %v5364_v24 = vrot.slane %v5363_v35, 4  ;;  %v6607_v6 = vrot.slane %v6605_v14, 6  ;;  %v6178_v2 = vunpack.c.l.b16 %v6083_v10  ;;  %v6614_v61 = vrot.slane %v6612_v12, 5 }
 0x240   : > { %v13176_v49 = vpop.f32.mrf.mxu2  ;;  %v3459_v38 = vpop.f32.mrf.mxu1  ;;  %v6086_v55 = vrot.slane %v13212_v36, 5  ;;  %v5383_v11 = vrot.slane %v5381_v41, 4  ;;  %v5386_v44 = vrot.slane %v5384_v4, 5  ;;  %v10648_v7 = vrot.slane %v10608_v39, 9 }
 0x241   : > { %10737 = vmatmul.msk.bf16.gmra.mxu3 %vm308_vm5, %v6992_v30  ;;  %v3543_v62 = vadd.f32 %v3511_v52, %v3459_v38  ;;  %v2740_v32 = vpop.f32.mrf.mxu0  ;;  %v11144_v30 = vld [vmem:[%s11437_s6 + $0x3c] sm:$0xff]  ;;  %v10539_v38 = vld [vmem:[%s11437_s6 + $0x4c] sm:$0xf]  ;;  %v5369_v46 = vsel %vm11477_vm9, %v5364_v24, %v13184_v53  ;;  %v6206_v26 = vpack.c.b16 %v6178_v2, %v6177_v31  ;;  %v6621_v12 = vshrl.u32 %v10694_v51, 16 }
 0x242   : > { %v4010_v34 = vld [vmem:[#allocation2 + $0x90] sm:$0xff]  ;;  %v2821_v42 = vadd.f32 %v2789_v63, %v2740_v32  ;;  %v13225_v32 = vor.u32 %v6607_v6, %v6604_v33  ;;  %v6617_v63 = vrot.slane %v6615_v15, 6  ;;  %v5394_v21 = vshrl.u32 %v10539_v38, 16 }
 0x243   : > { %v4042_v3 = vadd.f32 %v4010_v34, %v13145_v0  ;;  %3575 = vst.msk [vmem:[#allocation2 + $0x98] sm:$0xff] %vm450_vm11, %v3543_v62  ;;  %v3512_v9 = vld [vmem:[#allocation2 + $0xa0] sm:$0xff]  ;;  %v5390_v34 = vshll.u32 %v10539_v38, 16  ;;  %v6088_v14 = vrot.slane %v6086_v55, 4  ;;  %v5387_v10 = vor.u32 %v5386_v44, %v5383_v11 }
 0x244   : > { %v4745_v45 = vpop.f32.mrf.mxu3  ;;  %v4797_v60 = vld [vmem:[#allocation2 + $0x88] sm:$0xff]  ;;  %2853 = vst.msk [vmem:[#allocation2 + $0xa8] sm:$0xff] %vm450_vm11, %v2821_v42  ;;  %v10610_v42 = vld [vmem:[%s11437_s6 + $0x50] sm:$0x1]  ;;  %v6610_v59 = vrot.slane %v13225_v32, 4  ;;  %v6618_v25 = vor.u32 %v6617_v63, %v6614_v61  ;;  %v6087_v36 = vsel %vm11441_vm6, %v10648_v7, %v6086_v55 }
 0x245   : > { %10668 = vmatmul.msk.bf16.gmra.mxu2 %vm308_vm5, %v6205_v29  ;;  %4074 = vst.msk [vmem:[#allocation2 + $0x90] sm:$0xff] %vm450_vm11, %v4042_v3  ;;  %v4829_v0 = vadd.f32 %v4797_v60, %v4742_v19  ;;  %v6595_v19 = vrot.slane %v6593_v57, 5  ;;  %v13234_v3 = vunpack.c.l.b16 %v5369_v46  ;;  %v6089_v47 = vrot.slane %v10610_v42, 5  ;;  %v10541_v42 = vld [vmem:[%s11437_s6 + $0x54] sm:$0xf] }
 0x246   : > { %v6179_v39 = vunpack.c.l.b16 %v6087_v36 }
 0x247   : > { %4861 = vst.msk [vmem:[#allocation2 + $0x88] sm:$0xff] %vm450_vm11, %v4829_v0  ;;  %v6599_v27 = vor.u32 %v6598_v1, %v6595_v19  ;;  %v10695_v0 = vld [vmem:[%s11437_s6 + $0x4c] sm:$0xf]  ;;  %v10540_v19 = vld [vmem:[%s11437_s6 + $0x50] sm:$0x1]  ;;  %v5396_v1 = vrot.slane %v5394_v21, 4  ;;  %v6090_v41 = vsel %vm11441_vm6, %v6088_v14, %v6089_v47 }
 0x248   : > { %v13208_v16 = vpop.f32.mrf.mxu2  ;;  %v3462_v54 = vpop.f32.mrf.mxu1  ;;  %v6633_v33 = vshll.u32 %v10695_v0, 16  ;;  %v5400_v4 = vshll.u32 %v10540_v19, 16  ;;  %v6180_v11 = vunpack.c.l.b16 %v6090_v41  ;;  %v10613_v47 = vld [vmem:[%s11437_s6 + $0x5c] sm:$0x1] }
 0x249   : > { %v3544_v40 = vadd.f32 %v3512_v9, %v3462_v54  ;;  %v2743_v28 = vpop.f32.mrf.mxu0  ;;  %v6600_v57 = vrot.slane %v6599_v27, 4  ;;  %v6624_v54 = vshll.u32 %v10694_v51, 16  ;;  %v10542_v51 = vld [vmem:[%s11437_s6 + $0x58] sm:$0xf] }
 0x24a   : > { %v4011_v43 = vld [vmem:[#allocation2 + $0x98] sm:$0xff]  ;;  %v2822_v29 = vadd.f32 %v2790_v23, %v2743_v28  ;;  %v10696_v28 = vld [vmem:[%s11437_s6 + $0x50] sm:$0x3]  ;;  %v5402_v44 = vrot.slane %v5400_v4, 5  ;;  %v2793_v4 = vld [vmem:[#allocation2 + $0xc8] sm:$0xff] }
 0x24b   : > { %v4043_v52 = vadd.f32 %v4011_v43, %v13176_v49  ;;  %3576 = vst.msk [vmem:[#allocation2 + $0xa0] sm:$0xff] %vm450_vm11, %v3544_v40  ;;  %10582 = vmatmul.msk.bf16.gmra.mxu1 %vm308_vm5, %v5705_v56  ;;  %10513 = vmatmul.msk.bf16.gmra.mxu0 %vm308_vm5, %v11144_v30  ;;  %v5379_v49 = vsel %vm11477_vm9, %v5374_v8, %v5378_v5  ;;  %v13242_v5 = vrot.slane %v5390_v34, 5  ;;  %v6630_v8 = vshrl.u32 %v10695_v0, 16  ;;  %v13268_v34 = vld [vmem:[%s11437_s6 + $0x58] sm:$0xf] }
 0x24c   : > { %v4747_v37 = vpop.f32.mrf.mxu3  ;;  %v4798_v62 = vld [vmem:[#allocation2 + $0x90] sm:$0xff]  ;;  %2854 = vst.msk [vmem:[#allocation2 + $0xb0] sm:$0xff] %vm450_vm11, %v2822_v29  ;;  %v13236_v35 = vunpack.c.l.b16 %v5379_v49  ;;  %v6609_v40 = vsel %vm11499_vm10, %v6600_v57, %v13225_v32  ;;  %v5388_v43 = vrot.slane %v5387_v10, 4  ;;  %v6626_v31 = vrot.slane %v6624_v54, 6 }
 0x24d   : > { %4075 = vst.msk [vmem:[#allocation2 + $0x98] sm:$0xff] %vm450_vm11, %v4043_v52  ;;  %v4830_v53 = vadd.f32 %v4798_v62, %v4745_v45  ;;  %v3513_v45 = vld [vmem:[#allocation2 + $0xa8] sm:$0xff]  ;;  %v5397_v29 = vor.u32 %v5396_v1, %v13242_v5  ;;  %v6632_v38 = vrot.slane %v6630_v8, 5  ;;  %v6635_v52 = vrot.slane %v6633_v33, 6 }
 0x24e   : > { %v5706_v15 = vpack.c.b16 %v13236_v35, %v13234_v3  ;;  %v6643_v46 = vshll.u32 %v10696_v28, 16  ;;  %v11145_v62 = vld [vmem:[%s11437_s6 + $0x48] sm:$0xff]  ;;  %v6965_v49 = vunpack.c.l.b16 %v6609_v40  ;;  %v5393_v3 = vsel %vm11477_vm9, %v5388_v43, %v13242_v5 }
 0x24f   : > { %4862 = vst.msk [vmem:[#allocation2 + $0x90] sm:$0xff] %vm450_vm11, %v4830_v53  ;;  %v2792_v53 = vld [vmem:[#allocation2 + $0xc0] sm:$0xff]  ;;  %v5398_v35 = vrot.slane %v5397_v29, 4  ;;  %v5408_v10 = vshll.u32 %v10541_v42, 16  ;;  %v5414_v5 = vshll.u32 %v10542_v51, 16  ;;  %v13286_v19 = vunpack.c.l.b16 %v5393_v3 }
 0x250   : > { %v13232_v50 = vpop.f32.mrf.mxu2  ;;  %v3464_v60 = vpop.f32.mrf.mxu1  ;;  %v6645_v7 = vrot.slane %v6643_v46, 6 }
 0x251   : > { %10738 = vmatmul.msk.bf16.gmra.mxu3 %vm308_vm5, %v6993_v48  ;;  %v3545_v56 = vadd.f32 %v3513_v45, %v3464_v60  ;;  %v2745_v18 = vpop.f32.mrf.mxu0  ;;  %v6623_v48 = vrot.slane %v6621_v12, 5  ;;  %v5403_v12 = vsel %vm11477_vm9, %v5398_v35, %v5402_v44  ;;  %v5410_v43 = vrot.slane %v5408_v10, 5 }
 0x252   : > { %v4012_v13 = vld [vmem:[#allocation2 + $0xa0] sm:$0xff]  ;;  %v2823_v24 = vadd.f32 %v2791_v20, %v2745_v18  ;;  %v6093_v18 = vrot.slane %v13268_v34, 5  ;;  %v13297_v29 = vrot.slane %v5414_v5, 5 }
 0x253   : > { %v4044_v9 = vadd.f32 %v4012_v13, %v13208_v16  ;;  %3577 = vst.msk [vmem:[#allocation2 + $0xa8] sm:$0xff] %vm450_vm11, %v3545_v56  ;;  %v6619_v16 = vsel %vm11499_vm10, %v6610_v59, %v6618_v25  ;;  %v3514_v61 = vld [vmem:[#allocation2 + $0xb0] sm:$0xff]  ;;  %v6627_v57 = vor.u32 %v6626_v31, %v6623_v48  ;;  %v13278_v59 = vor.u32 %v6635_v52, %v6632_v38 }
 0x254   : > { %v4750_v30 = vpop.f32.mrf.mxu3  ;;  %v4799_v6 = vld [vmem:[#allocation2 + $0x98] sm:$0xff]  ;;  %2855 = vst.msk [vmem:[#allocation2 + $0xb8] sm:$0xff] %vm450_vm11, %v2823_v24  ;;  %v6966_v32 = vunpack.c.l.b16 %v6619_v16  ;;  %v10611_v56 = vld [vmem:[%s11437_s6 + $0x54] sm:$0xe]  ;;  %v5418_v13 = vshrl.u32 %v10542_v51, 16  ;;  %v6207_v24 = vpack.c.b16 %v6180_v11, %v6179_v39  ;;  %v6095_v40 = vrot.slane %v6093_v18, 4 }
 0x255   : > { %10669 = vmatmul.msk.bf16.gmra.mxu2 %vm308_vm5, %v6206_v26  ;;  %4076 = vst.msk [vmem:[#allocation2 + $0xa0] sm:$0xff] %vm450_vm11, %v4044_v9  ;;  %v4831_v23 = vadd.f32 %v4799_v6, %v4747_v37  ;;  %v6640_v37 = vshrl.u32 %v10696_v28, 16  ;;  %v6628_v54 = vrot.slane %v6627_v57, 4  ;;  %v6638_v9 = vrot.slane %v13278_v59, 4 }
 0x256   : > { %v6994_v0 = vpack.c.b16 %v6966_v32, %v6965_v49  ;;  %v10649_v8 = vrot.slane %v10611_v56, 9  ;;  %v6096_v16 = vrot.slane %v10613_v47, 5  ;;  %v5420_v48 = vrot.slane %v5418_v13, 4  ;;  %v10699_v32 = vld [vmem:[%s11437_s6 + $0x5c] sm:$0x3]  ;;  %v2794_v13 = vld [vmem:[#allocation2 + $0xd0] sm:$0xff] }
 0x257   : > { %4863 = vst.msk [vmem:[#allocation2 + $0x98] sm:$0xff] %vm450_vm11, %v4831_v23  ;;  %v6642_v25 = vrot.slane %v6640_v37, 5  ;;  %v10698_v23 = vld [vmem:[%s11437_s6 + $0x58] sm:$0xf]  ;;  %v5680_v52 = vunpack.c.l.b16 %v5403_v12  ;;  %v10543_v37 = vld [vmem:[%s11437_s6 + $0x5c] sm:$0x1]  ;;  %v6637_v49 = vsel %vm11499_vm10, %v6628_v54, %v13278_v59 }
 0x258   : > { %v13264_v2 = vpop.f32.mrf.mxu2  ;;  %v3467_v27 = vpop.f32.mrf.mxu1  ;;  %v6097_v11 = vsel %vm11441_vm6, %v6095_v40, %v6096_v16  ;;  %v6668_v35 = vshrl.u32 %v10699_v32, 16  ;;  %v6671_v57 = vshll.u32 %v10699_v32, 16  ;;  %v11146_v59 = vld [vmem:[%s11437_s6 + $0x54] sm:$0xff]  ;;  %v10544_v47 = vld [vmem:[%s11437_s6 + $0x60] sm:$0xf] }
 0x259   : > { %v3546_v63 = vadd.f32 %v3514_v61, %v3467_v27  ;;  %v2748_v55 = vpop.f32.mrf.mxu0 }
 0x25a   : > { %v4013_v21 = vld [vmem:[#allocation2 + $0xa8] sm:$0xff]  ;;  %v2824_v26 = vadd.f32 %v2792_v53, %v2748_v55  ;;  %v6661_v55 = vshll.u32 %v10698_v23, 16 }
 0x25b   : > { %v4045_v60 = vadd.f32 %v4013_v21, %v13232_v50  ;;  %3578 = vst.msk [vmem:[#allocation2 + $0xb0] sm:$0xff] %vm450_vm11, %v3546_v63  ;;  %10583 = vmatmul.msk.bf16.gmra.mxu1 %vm308_vm5, %v5706_v15  ;;  %10514 = vmatmul.msk.bf16.gmra.mxu0 %vm308_vm5, %v11145_v62  ;;  %v5405_v50 = vshrl.u32 %v10541_v42, 16  ;;  %v3515_v6 = vld [vmem:[#allocation2 + $0xb8] sm:$0xff]  ;;  %v6646_v15 = vor.u32 %v6645_v7, %v6642_v25  ;;  %v6658_v63 = vshrl.u32 %v10698_v23, 16 }
 0x25c   : > { %v4752_v45 = vpop.f32.mrf.mxu3  ;;  %v4800_v14 = vld [vmem:[#allocation2 + $0xa0] sm:$0xff]  ;;  %2856 = vst.msk [vmem:[#allocation2 + $0xc0] sm:$0xff] %vm450_vm11, %v2824_v26  ;;  %v5421_v42 = vor.u32 %v5420_v48, %v13297_v29  ;;  %v5424_v21 = vshll.u32 %v10543_v37, 16  ;;  %v5429_v23 = vshrl.u32 %v10544_v47, 16 }
 0x25d   : > { %4077 = vst.msk [vmem:[#allocation2 + $0xa8] sm:$0xff] %vm450_vm11, %v4045_v60  ;;  %v4832_v20 = vadd.f32 %v4800_v14, %v4750_v30  ;;  %v10697_v30 = vld [vmem:[%s11437_s6 + $0x54] sm:$0xe]  ;;  %v5407_v28 = vrot.slane %v5405_v50, 4  ;;  %v6647_v39 = vsel %vm11499_vm10, %v6638_v9, %v6646_v15  ;;  %v5707_v60 = vpack.c.b16 %v5680_v52, %v13286_v19  ;;  %v10545_v19 = vld [vmem:[%s11437_s6 + $0x64] sm:$0xf] }
 0x25e   : > { %v6649_v46 = vshrl.u32 %v10697_v30, 16  ;;  %v6652_v27 = vshll.u32 %v10697_v30, 16  ;;  %v6660_v25 = vrot.slane %v6658_v63, 5  ;;  %v6968_v56 = vunpack.c.l.b16 %v6647_v39 }
 0x25f   : > { %4864 = vst.msk [vmem:[#allocation2 + $0xa0] sm:$0xff] %vm450_vm11, %v4832_v20  ;;  %v5411_v34 = vor.u32 %v5410_v43, %v5407_v28  ;;  %v6182_v50 = vunpack.c.l.b16 %v6097_v11  ;;  %v13322_v20 = vld [vmem:[%s11437_s6 + $0x64] sm:$0xf]  ;;  %v5422_v12 = vrot.slane %v5421_v42, 4  ;;  %v5426_v54 = vrot.slane %v5424_v21, 5 }
 0x260   : > { %v13289_v1 = vpop.f32.mrf.mxu2  ;;  %v3469_v33 = vpop.f32.mrf.mxu1  ;;  %v6651_v26 = vrot.slane %v6649_v46, 5  ;;  %v6654_v3 = vrot.slane %v6652_v27, 6  ;;  %v6100_v28 = vrot.slane %v13322_v20, 5  ;;  %v5438_v43 = vshll.u32 %v10545_v19, 16 }
 0x261   : > { %10739 = vmatmul.msk.bf16.gmra.mxu3 %vm308_vm5, %v6994_v0  ;;  %v3547_v36 = vadd.f32 %v3515_v6, %v3469_v33  ;;  %v2750_v41 = vpop.f32.mrf.mxu0  ;;  %v6967_v0 = vunpack.c.l.b16 %v6637_v49  ;;  %v6670_v33 = vrot.slane %v6668_v35, 5  ;;  %v6673_v6 = vrot.slane %v6671_v57, 6 }
 0x262   : > { %v4014_v31 = vld [vmem:[#allocation2 + $0xb0] sm:$0xff]  ;;  %v2825_v38 = vadd.f32 %v2793_v4, %v2750_v41  ;;  %v6655_v30 = vor.u32 %v6654_v3, %v6651_v26  ;;  %v10614_v4 = vld [vmem:[%s11437_s6 + $0x60] sm:$0xe]  ;;  %v5427_v46 = vsel %vm11477_vm9, %v5422_v12, %v5426_v54  ;;  %v5431_v11 = vrot.slane %v5429_v23, 4  ;;  %v2795_v26 = vld [vmem:[#allocation2 + $0xd8] sm:$0xff] }
 0x263   : > { %v4046_v61 = vadd.f32 %v4014_v31, %v13264_v2  ;;  %3579 = vst.msk [vmem:[#allocation2 + $0xb8] sm:$0xff] %vm450_vm11, %v3547_v36  ;;  %v6094_v2 = vsel %vm11441_vm6, %v10649_v8, %v6093_v18  ;;  %v3516_v14 = vld [vmem:[#allocation2 + $0xc0] sm:$0xff]  ;;  %v6995_v41 = vpack.c.b16 %v6968_v56, %v6967_v0  ;;  %v10616_v31 = vld [vmem:[%s11437_s6 + $0x68] sm:$0x1]  ;;  %v10650_v63 = vrot.slane %v10614_v4, 9 }
 0x264   : > { %v4755_v62 = vpop.f32.mrf.mxu3  ;;  %v4801_v53 = vld [vmem:[#allocation2 + $0xa8] sm:$0xff]  ;;  %2857 = vst.msk [vmem:[#allocation2 + $0xc8] sm:$0xff] %vm450_vm11, %v2825_v38  ;;  %v6181_v18 = vunpack.c.l.b16 %v6094_v2  ;;  %v5442_v38 = vshrl.u32 %v10545_v19, 16  ;;  %v6656_v27 = vrot.slane %v6655_v30, 4 }
 0x265   : > { %10670 = vmatmul.msk.bf16.gmra.mxu2 %vm308_vm5, %v6207_v24  ;;  %4078 = vst.msk [vmem:[#allocation2 + $0xb0] sm:$0xff] %vm450_vm11, %v4046_v61  ;;  %v4833_v44 = vadd.f32 %v4801_v53, %v4752_v45  ;;  %v6663_v45 = vrot.slane %v6661_v55, 6  ;;  %v5412_v24 = vrot.slane %v5411_v34, 4  ;;  %v10700_v61 = vld [vmem:[%s11437_s6 + $0x60] sm:$0xe]  ;;  %v6102_v55 = vrot.slane %v6100_v28, 4 }
 0x266   : > { %v6208_v52 = vpack.c.b16 %v6182_v50, %v6181_v18  ;;  %v10701_v53 = vld [vmem:[%s11437_s6 + $0x64] sm:$0xf]  ;;  %v13349_v34 = vrot.slane %v5438_v43, 5  ;;  %v10546_v3 = vld [vmem:[%s11437_s6 + $0x68] sm:$0x1]  ;;  %v5444_v35 = vrot.slane %v5442_v38, 4  ;;  %v5682_v18 = vunpack.c.l.b16 %v5427_v46 }
 0x267   : > { %4865 = vst.msk [vmem:[#allocation2 + $0xa8] sm:$0xff] %vm450_vm11, %v4833_v44  ;;  %v13329_v16 = vor.u32 %v6663_v45, %v6660_v25  ;;  %v5417_v37 = vsel %vm11477_vm9, %v5412_v24, %v13297_v29  ;;  %v6103_v29 = vrot.slane %v10616_v31, 5  ;;  %v6677_v57 = vshrl.u32 %v10700_v61, 16  ;;  %v10548_v31 = vld [vmem:[%s11437_s6 + $0x70] sm:$0xf] }
 0x268   : > { %v13317_v51 = vpop.f32.mrf.mxu2  ;;  %v3472_v7 = vpop.f32.mrf.mxu1  ;;  %v5681_v45 = vunpack.c.l.b16 %v5417_v37  ;;  %v5448_v24 = vshll.u32 %v10546_v3, 16  ;;  %v5445_v54 = vor.u32 %v5444_v35, %v13349_v34  ;;  %v2796_v37 = vld [vmem:[#allocation2 + $0xe0] sm:$0xff]  ;;  %v5466_v3 = vshrl.u32 %v10548_v31, 16 }
 0x269   : > { %v3548_v10 = vadd.f32 %v3516_v14, %v3472_v7  ;;  %v2753_v5 = vpop.f32.mrf.mxu0  ;;  %v6666_v32 = vrot.slane %v13329_v16, 4  ;;  %v6686_v7 = vshrl.u32 %v10701_v53, 16  ;;  %v6689_v14 = vshll.u32 %v10701_v53, 16 }
 0x26a   : > { %v4015_v9 = vld [vmem:[#allocation2 + $0xb8] sm:$0xff]  ;;  %v2826_v8 = vadd.f32 %v2794_v13, %v2753_v5  ;;  %v6665_v50 = vsel %vm11499_vm10, %v6656_v27, %v13329_v16  ;;  %v6104_v5 = vsel %vm11441_vm6, %v6102_v55, %v6103_v29  ;;  %v6679_v19 = vrot.slane %v6677_v57, 5  ;;  %v13382_v29 = vld [vmem:[%s11437_s6 + $0x70] sm:$0xf] }
 0x26b   : > { %v4047_v15 = vadd.f32 %v4015_v9, %v13289_v1  ;;  %3580 = vst.msk [vmem:[#allocation2 + $0xc0] sm:$0xff] %vm450_vm11, %v3548_v10  ;;  %10584 = vmatmul.msk.bf16.gmra.mxu1 %vm308_vm5, %v5707_v60  ;;  %10515 = vmatmul.msk.bf16.gmra.mxu0 %vm308_vm5, %v11146_v59  ;;  %v5432_v1 = vshll.u32 %v10544_v47, 16  ;;  %v3517_v2 = vld [vmem:[#allocation2 + $0xc8] sm:$0xff]  ;;  %v6680_v60 = vshll.u32 %v10700_v61, 16  ;;  %v6691_v30 = vrot.slane %v6689_v14, 6 }
 0x26c   : > { %v4757_v40 = vpop.f32.mrf.mxu3  ;;  %v4802_v36 = vld [vmem:[#allocation2 + $0xb0] sm:$0xff]  ;;  %2858 = vst.msk [vmem:[#allocation2 + $0xd0] sm:$0xff] %vm450_vm11, %v2826_v8  ;;  %v10702_v47 = vld [vmem:[%s11437_s6 + $0x68] sm:$0x3]  ;;  %v6688_v8 = vrot.slane %v6686_v7, 5  ;;  %v5708_v16 = vpack.c.b16 %v5682_v18, %v5681_v45  ;;  %v6969_v23 = vunpack.c.l.b16 %v6665_v50  ;;  %v5446_v46 = vrot.slane %v5445_v54, 4 }
 0x26d   : > { %4079 = vst.msk [vmem:[#allocation2 + $0xb8] sm:$0xff] %vm450_vm11, %v4047_v15  ;;  %v4834_v48 = vadd.f32 %v4802_v36, %v4755_v62  ;;  %v6674_v62 = vor.u32 %v6673_v6, %v6670_v33  ;;  %v5434_v44 = vrot.slane %v5432_v1, 5  ;;  %v6682_v9 = vrot.slane %v6680_v60, 6  ;;  %v10619_v18 = vld [vmem:[%s11437_s6 + $0x74] sm:$0x1] }
 0x26e   : > { %v6696_v33 = vshrl.u32 %v10702_v47, 16  ;;  %v6699_v6 = vshll.u32 %v10702_v47, 16  ;;  %v6184_v1 = vunpack.c.l.b16 %v6104_v5  ;;  %v5450_v27 = vrot.slane %v5448_v24, 5 }
 0x26f   : > { %4866 = vst.msk [vmem:[#allocation2 + $0xb0] sm:$0xff] %vm450_vm11, %v4834_v48  ;;  %v6675_v20 = vsel %vm11499_vm10, %v6666_v32, %v6674_v62  ;;  %v5435_v13 = vor.u32 %v5434_v44, %v5431_v11  ;;  %v10547_v48 = vld [vmem:[%s11437_s6 + $0x6c] sm:$0xf]  ;;  %v6683_v61 = vor.u32 %v6682_v9, %v6679_v19  ;;  %v6107_v50 = vrot.slane %v13382_v29, 5 }
 0x270   : > { %v13344_v49 = vpop.f32.mrf.mxu2  ;;  %v3474_v39 = vpop.f32.mrf.mxu1  ;;  %v6698_v55 = vrot.slane %v6696_v33, 5  ;;  %v6701_v53 = vrot.slane %v6699_v6, 6  ;;  %v5453_v11 = vshrl.u32 %v10547_v48, 16  ;;  %v5456_v44 = vshll.u32 %v10547_v48, 16 }
 0x271   : > { %10740 = vmatmul.msk.bf16.gmra.mxu3 %vm308_vm5, %v6995_v41  ;;  %v3549_v42 = vadd.f32 %v3517_v2, %v3474_v39  ;;  %v2755_v21 = vpop.f32.mrf.mxu0  ;;  %v5436_v43 = vrot.slane %v5435_v13, 4  ;;  %v6684_v60 = vrot.slane %v6683_v61, 4  ;;  %v5451_v45 = vsel %vm11477_vm9, %v5446_v46, %v5450_v27 }
 0x272   : > { %v4016_v59 = vld [vmem:[#allocation2 + $0xc0] sm:$0xff]  ;;  %v2827_v25 = vadd.f32 %v2795_v26, %v2755_v21  ;;  %v6702_v14 = vor.u32 %v6701_v53, %v6698_v55  ;;  %v5455_v47 = vrot.slane %v5453_v11, 4  ;;  %v5468_v24 = vrot.slane %v5466_v3, 4 }
 0x273   : > { %v4048_v0 = vadd.f32 %v4016_v59, %v13317_v51  ;;  %3581 = vst.msk [vmem:[#allocation2 + $0xc8] sm:$0xff] %vm450_vm11, %v3549_v42  ;;  %v6101_v51 = vsel %vm11441_vm6, %v10650_v63, %v6100_v28  ;;  %v11147_v28 = vld [vmem:[%s11437_s6 + $0x60] sm:$0xff]  ;;  %v3518_v41 = vld [vmem:[#allocation2 + $0xd0] sm:$0xff]  ;;  %v13374_v63 = vor.u32 %v6691_v30, %v6688_v8  ;;  %v5462_v42 = vshll.u32 %v10548_v31, 16  ;;  %v10703_v59 = vld [vmem:[%s11437_s6 + $0x6c] sm:$0xe] }
 0x274   : > { %v4760_v56 = vpop.f32.mrf.mxu3  ;;  %v4803_v10 = vld [vmem:[#allocation2 + $0xb8] sm:$0xff]  ;;  %2859 = vst.msk [vmem:[#allocation2 + $0xd8] sm:$0xff] %vm450_vm11, %v2827_v25  ;;  %v6183_v4 = vunpack.c.l.b16 %v6101_v51  ;;  %v5441_v26 = vsel %vm11477_vm9, %v5436_v43, %v13349_v34  ;;  %v10704_v25 = vld [vmem:[%s11437_s6 + $0x70] sm:$0xf]  ;;  %v6708_v54 = vshll.u32 %v10703_v59, 16  ;;  %v2797_v30 = vld [vmem:[#allocation2 + $0xe8] sm:$0xff]  ;;  %v5684_v33 = vunpack.c.l.b16 %v5451_v45 }
 0x275   : > { %10671 = vmatmul.msk.bf16.gmra.mxu2 %vm308_vm5, %v6208_v52  ;;  %4080 = vst.msk [vmem:[#allocation2 + $0xc0] sm:$0xff] %vm450_vm11, %v4048_v0  ;;  %v4835_v12 = vadd.f32 %v4803_v10, %v4757_v40  ;;  %v6970_v40 = vunpack.c.l.b16 %v6675_v20  ;;  %v6694_v7 = vrot.slane %v13374_v63, 4  ;;  %v10617_v0 = vld [vmem:[%s11437_s6 + $0x6c] sm:$0xe]  ;;  %v13401_v20 = vunpack.c.l.b16 %v5441_v26  ;;  %v2798_v45 = vld [vmem:[#allocation2 + $0xf0] sm:$0xff] }
 0x276   : > { %v6209_v57 = vpack.c.b16 %v6184_v1, %v6183_v4  ;;  %v5458_v10 = vrot.slane %v5456_v44, 5  ;;  %v13404_v51 = vrot.slane %v5462_v42, 5  ;;  %v6714_v19 = vshrl.u32 %v10704_v25, 16  ;;  %v10705_v4 = vld [vmem:[%s11437_s6 + $0x74] sm:$0x3] }
 0x277   : > { %4867 = vst.msk [vmem:[#allocation2 + $0xb8] sm:$0xff] %vm450_vm11, %v4835_v12  ;;  %v6705_v12 = vshrl.u32 %v10703_v59, 16  ;;  %v6693_v6 = vsel %vm11499_vm10, %v6684_v60, %v13374_v63  ;;  %v6110_v48 = vrot.slane %v10619_v18, 5  ;;  %v6710_v27 = vrot.slane %v6708_v54, 6  ;;  %v10551_v60 = vld [vmem:[%s11437_s6 + $0x7c] sm:$0xf] }
 0x278   : > { %v13369_v15 = vpop.f32.mrf.mxu2  ;;  %v3477_v36 = vpop.f32.mrf.mxu1  ;;  %v5459_v31 = vor.u32 %v5458_v10, %v5455_v47  ;;  %v6716_v61 = vrot.slane %v6714_v19, 5  ;;  %v6727_v63 = vshll.u32 %v10705_v4, 16  ;;  %v5709_v55 = vpack.c.b16 %v5684_v33, %v13401_v20 }
 0x279   : > { %v3550_v38 = vadd.f32 %v3518_v41, %v3477_v36  ;;  %v2758_v52 = vpop.f32.mrf.mxu0  ;;  %v6703_v36 = vsel %vm11499_vm10, %v6694_v7, %v6702_v14  ;;  %v10651_v41 = vrot.slane %v10617_v0, 9  ;;  %v6707_v46 = vrot.slane %v6705_v12, 5 }
 0x27a   : > { %v4017_v32 = vld [vmem:[#allocation2 + $0xc8] sm:$0xff]  ;;  %v2828_v62 = vadd.f32 %v2796_v37, %v2758_v52  ;;  %v5469_v37 = vor.u32 %v5468_v24, %v13404_v51  ;;  %v6971_v29 = vunpack.c.l.b16 %v6693_v6  ;;  %v6972_v11 = vunpack.c.l.b16 %v6703_v36  ;;  %v10622_v36 = vld [vmem:[%s11437_s6 + $0x80] sm:$0x1] }
 0x27b   : > { %v4049_v39 = vadd.f32 %v4017_v32, %v13344_v49  ;;  %3582 = vst.msk [vmem:[#allocation2 + $0xd0] sm:$0xff] %vm450_vm11, %v3550_v38  ;;  %10585 = vmatmul.msk.bf16.gmra.mxu1 %vm308_vm5, %v5708_v16  ;;  %10516 = vmatmul.msk.bf16.gmra.mxu0 %vm308_vm5, %v11147_v28  ;;  %v6996_v49 = vpack.c.b16 %v6970_v40, %v6969_v23  ;;  %v3519_v13 = vld [vmem:[#allocation2 + $0xd8] sm:$0xff]  ;;  %v6717_v16 = vshll.u32 %v10704_v25, 16  ;;  %v6109_v40 = vrot.slane %v6107_v50, 4 }
 0x27c   : > { %v13379_v2 = vpop.f32.mrf.mxu3  ;;  %v4804_v21 = vld [vmem:[#allocation2 + $0xc0] sm:$0xff]  ;;  %2860 = vst.msk [vmem:[#allocation2 + $0xe0] sm:$0xff] %vm450_vm11, %v2828_v62  ;;  %v6724_v62 = vshrl.u32 %v10705_v4, 16  ;;  %v6108_v44 = vsel %vm11441_vm6, %v10651_v41, %v6107_v50  ;;  %v5460_v26 = vrot.slane %v5459_v31, 4  ;;  %v5470_v3 = vrot.slane %v5469_v37, 4 }
 0x27d   : > { %4081 = vst.msk [vmem:[#allocation2 + $0xc8] sm:$0xff] %vm450_vm11, %v4049_v39  ;;  %v4836_v35 = vadd.f32 %v4804_v21, %v4760_v56  ;;  %v10549_v56 = vld [vmem:[%s11437_s6 + $0x74] sm:$0x1]  ;;  %v6719_v32 = vrot.slane %v6717_v16, 6  ;;  %v11148_v39 = vld [vmem:[%s11437_s6 + $0x6c] sm:$0xff]  ;;  %v6111_v42 = vsel %vm11441_vm6, %v6109_v40, %v6110_v48  ;;  %v6729_v0 = vrot.slane %v6727_v63, 6 }
 0x27e   : > { %v5472_v38 = vshll.u32 %v10549_v56, 16  ;;  %v6726_v14 = vrot.slane %v6724_v62, 5  ;;  %v6185_v20 = vunpack.c.l.b16 %v6108_v44  ;;  %v13434_v56 = vld [vmem:[%s11437_s6 + $0x7c] sm:$0xf]  ;;  %v6997_v24 = vpack.c.b16 %v6972_v11, %v6971_v29  ;;  %v10552_v4 = vld [vmem:[%s11437_s6 + $0x80] sm:$0x1] }
 0x27f   : > { %4868 = vst.msk [vmem:[#allocation2 + $0xc0] sm:$0xff] %vm450_vm11, %v4836_v35  ;;  %v13431_v7 = vor.u32 %v6719_v32, %v6716_v61  ;;  %v5486_v12 = vshll.u32 %v10551_v60, 16  ;;  %v5490_v54 = vshrl.u32 %v10551_v60, 16  ;;  %v2799_v32 = vld [vmem:[#allocation2 + $0xf8] sm:$0xff]  ;;  %v6117_v44 = vrot.slane %v10622_v36, 5 }
 0x280   : > { %v13399_v34 = vpop.f32.mrf.mxu2  ;;  %v3479_v5 = vpop.f32.mrf.mxu1  ;;  %v5474_v35 = vrot.slane %v5472_v38, 5  ;;  %v6730_v16 = vor.u32 %v6729_v0, %v6726_v14 }
 0x281   : > { %10741 = vmatmul.msk.bf16.gmra.mxu3 %vm308_vm5, %v6996_v49  ;;  %v3551_v9 = vadd.f32 %v3519_v13, %v3479_v5  ;;  %v2760_v8 = vpop.f32.mrf.mxu0  ;;  %v6722_v6 = vrot.slane %v13431_v7, 4  ;;  %v5492_v48 = vrot.slane %v5490_v54, 4  ;;  %v11149_v54 = vld [vmem:[%s11437_s6 + $0x78] sm:$0xff] }
 0x282   : > { %v4018_v28 = vld [vmem:[#allocation2 + $0xd0] sm:$0xff]  ;;  %v2829_v23 = vadd.f32 %v2797_v30, %v2760_v8  ;;  %v5475_v8 = vsel %vm11477_vm9, %v5470_v3, %v5474_v35 }
 0x283   : > { %v4050_v1 = vadd.f32 %v4018_v28, %v13369_v15  ;;  %3583 = vst.msk [vmem:[#allocation2 + $0xd8] sm:$0xff] %vm450_vm11, %v3551_v9  ;;  %v3520_v49 = vld [vmem:[#allocation2 + $0xe0] sm:$0xff]  ;;  %v6186_v9 = vunpack.c.l.b16 %v6111_v42  ;;  %v6114_v28 = vrot.slane %v13434_v56, 5  ;;  %v13460_v37 = vunpack.c.l.b16 %v5475_v8 }
 0x284   : > { %v4765_v43 = vpop.f32.mrf.mxu3  ;;  %v4805_v52 = vld [vmem:[#allocation2 + $0xc8] sm:$0xff]  ;;  %2861 = vst.msk [vmem:[#allocation2 + $0xe8] sm:$0xff] %vm450_vm11, %v2829_v23  ;;  %v10620_v23 = vld [vmem:[%s11437_s6 + $0x78] sm:$0xe]  ;;  %v6731_v62 = vsel %vm11499_vm10, %v6722_v6, %v6730_v16  ;;  %v5140_v6 = vld [vmem:[#allocation2] sm:$0xff] }
 0x285   : > { %10672 = vmatmul.msk.bf16.gmra.mxu2 %vm308_vm5, %v6209_v57  ;;  %4082 = vst.msk [vmem:[#allocation2 + $0xd0] sm:$0xff] %vm450_vm11, %v4050_v1  ;;  %v4837_v15 = vadd.f32 %v4805_v52, %v13379_v2  ;;  %v10550_v2 = vld [vmem:[%s11437_s6 + $0x78] sm:$0xf]  ;;  %v6711_v57 = vor.u32 %v6710_v27, %v6707_v46  ;;  %v13455_v1 = vrot.slane %v5486_v12, 5  ;;  %v6210_v38 = vpack.c.b16 %v6186_v9, %v6185_v20  ;;  %v10553_v20 = vld [vmem:[%s11437_s6 + $0x84] sm:$0xf] }
 0x286   : > { %v5477_v47 = vshrl.u32 %v10550_v2, 16  ;;  %v5480_v10 = vshll.u32 %v10550_v2, 16  ;;  %v10706_v27 = vld [vmem:[%s11437_s6 + $0x78] sm:$0xe]  ;;  %v10652_v63 = vrot.slane %v10620_v23, 9  ;;  %v5496_v2 = vshll.u32 %v10552_v4, 16 }
 0x287   : > { %4869 = vst.msk [vmem:[#allocation2 + $0xc8] sm:$0xff] %vm450_vm11, %v4837_v15  ;;  %v6712_v30 = vrot.slane %v6711_v57, 4  ;;  %v6733_v3 = vshrl.u32 %v10706_v27, 16  ;;  %v6736_v35 = vshll.u32 %v10706_v27, 16  ;;  %v6974_v14 = vunpack.c.l.b16 %v6731_v62  ;;  %v13488_v16 = vld [vmem:[%s11437_s6 + $0x88] sm:$0xf] }
 0x288   : > { %v13422_v53 = vpop.f32.mrf.mxu2  ;;  %v3482_v21 = vpop.f32.mrf.mxu1  ;;  %v5479_v41 = vrot.slane %v5477_v47, 4  ;;  %v5482_v40 = vrot.slane %v5480_v10, 5  ;;  %v6115_v0 = vsel %vm11441_vm6, %v10652_v63, %v6114_v28  ;;  %v5498_v10 = vrot.slane %v5496_v2, 5  ;;  %v10623_v62 = vld [vmem:[%s11437_s6 + $0x84] sm:$0xe] }
 0x289   : > { %v3552_v59 = vadd.f32 %v3520_v49, %v3482_v21  ;;  %v2763_v25 = vpop.f32.mrf.mxu0  ;;  %v6721_v46 = vsel %vm11499_vm10, %v6712_v30, %v13431_v7  ;;  %v10708_v7 = vld [vmem:[%s11437_s6 + $0x80] sm:$0x3]  ;;  %v5504_v23 = vshll.u32 %v10553_v20, 16  ;;  %v6187_v4 = vunpack.c.l.b16 %v6115_v0 }
 0x28a   : > { %v4019_v18 = vld [vmem:[#allocation2 + $0xd8] sm:$0xff]  ;;  %v2830_v50 = vadd.f32 %v2798_v45, %v2763_v25  ;;  %v5483_v42 = vor.u32 %v5482_v40, %v5479_v41  ;;  %v6973_v45 = vunpack.c.l.b16 %v6721_v46  ;;  %v6755_v8 = vshll.u32 %v10708_v7, 16 }
 0x28b   : > { %v4051_v5 = vadd.f32 %v4019_v18, %v13399_v34  ;;  %3584 = vst.msk [vmem:[#allocation2 + $0xe0] sm:$0xff] %vm450_vm11, %v3552_v59  ;;  %10586 = vmatmul.msk.bf16.gmra.mxu1 %vm308_vm5, %v5709_v55  ;;  %10517 = vmatmul.msk.bf16.gmra.mxu0 %vm308_vm5, %v11148_v39  ;;  %v5465_v34 = vsel %vm11477_vm9, %v5460_v26, %v13404_v51  ;;  %v3521_v31 = vld [vmem:[#allocation2 + $0xe8] sm:$0xff]  ;;  %v6116_v55 = vrot.slane %v6114_v28, 4  ;;  %v10707_v39 = vld [vmem:[%s11437_s6 + $0x7c] sm:$0xf]  ;;  %v5501_v28 = vshrl.u32 %v10553_v20, 16 }
 0x28c   : > { %v4767_v13 = vpop.f32.mrf.mxu3  ;;  %v4806_v19 = vld [vmem:[#allocation2 + $0xd0] sm:$0xff]  ;;  %2862 = vst.msk [vmem:[#allocation2 + $0xf0] sm:$0xff] %vm450_vm11, %v2830_v50  ;;  %v13458_v52 = vunpack.c.l.b16 %v5465_v34  ;;  %v5493_v26 = vor.u32 %v5492_v48, %v13455_v1  ;;  %v6742_v60 = vshrl.u32 %v10707_v39, 16  ;;  %v6745_v59 = vshll.u32 %v10707_v39, 16 }
 0x28d   : > { %4083 = vst.msk [vmem:[#allocation2 + $0xd8] sm:$0xff] %vm450_vm11, %v4051_v5  ;;  %v4838_v33 = vadd.f32 %v4806_v19, %v4765_v43  ;;  %v6118_v18 = vsel %vm11441_vm6, %v6116_v55, %v6117_v44  ;;  %v5484_v50 = vrot.slane %v5483_v42, 4  ;;  %v6735_v5 = vrot.slane %v6733_v3, 5  ;;  %v10709_v3 = vld [vmem:[%s11437_s6 + $0x84] sm:$0xe] }
 0x28e   : > { %v5494_v47 = vrot.slane %v5493_v26, 4  ;;  %v6744_v19 = vrot.slane %v6742_v60, 5  ;;  %v6747_v9 = vrot.slane %v6745_v59, 6  ;;  %v6752_v34 = vshrl.u32 %v10708_v7, 16 }
 0x28f   : > { %4870 = vst.msk [vmem:[#allocation2 + $0xd0] sm:$0xff] %vm450_vm11, %v4838_v33  ;;  %v6998_v40 = vpack.c.b16 %v6974_v14, %v6973_v45  ;;  %v5489_v48 = vsel %vm11477_vm9, %v5484_v50, %v13455_v1  ;;  %v5503_v63 = vrot.slane %v5501_v28, 4  ;;  %v5506_v55 = vrot.slane %v5504_v23, 5  ;;  %v5141_v14 = vld [vmem:[#allocation2 + $0x8] sm:$0xff] }
 0x290   : > { %v13452_v51 = vpop.f32.mrf.mxu2  ;;  %v3484_v43 = vpop.f32.mrf.mxu1  ;;  %v13501_v1 = vor.u32 %v6747_v9, %v6744_v19  ;;  %v13510_v2 = vunpack.c.l.b16 %v5489_v48  ;;  %v10653_v59 = vrot.slane %v10623_v62, 9 }
 0x291   : > { %10742 = vmatmul.msk.bf16.gmra.mxu3 %vm308_vm5, %v6997_v24  ;;  %v3553_v61 = vadd.f32 %v3521_v31, %v3484_v43  ;;  %v2765_v15 = vpop.f32.mrf.mxu0  ;;  %v10554_v43 = vld [vmem:[%s11437_s6 + $0x88] sm:$0xf] }
 0x292   : > { %v4020_v29 = vld [vmem:[#allocation2 + $0xe0] sm:$0xff]  ;;  %v2831_v11 = vadd.f32 %v2799_v32, %v2765_v15  ;;  %v6121_v15 = vrot.slane %v13488_v16, 5  ;;  %v5510_v39 = vshll.u32 %v10554_v43, 16 }
 0x293   : > { %v4052_v21 = vadd.f32 %v4020_v29, %v13422_v53  ;;  %3585 = vst.msk [vmem:[#allocation2 + $0xe8] sm:$0xff] %vm450_vm11, %v3553_v61  ;;  %v5710_v53 = vpack.c.b16 %v13460_v37, %v13458_v52  ;;  %v3522_v12 = vld [vmem:[#allocation2 + $0xf0] sm:$0xff]  ;;  %v6188_v52 = vunpack.c.l.b16 %v6118_v18  ;;  %v5499_v37 = vsel %vm11477_vm9, %v5494_v47, %v5498_v10  ;;  %v10625_v29 = vld [vmem:[%s11437_s6 + $0x8c] sm:$0x1] }
 0x294   : > { %v4770_v49 = vpop.f32.mrf.mxu3  ;;  %v4807_v57 = vld [vmem:[#allocation2 + $0xd8] sm:$0xff]  ;;  %2863 = vst.msk [vmem:[#allocation2 + $0xf8] sm:$0xff] %vm450_vm11, %v2831_v11  ;;  %v6757_v61 = vrot.slane %v6755_v8, 6  ;;  %v5514_v11 = vshrl.u32 %v10554_v43, 16  ;;  %v6124_v0 = vrot.slane %v10625_v29, 5  ;;  %v5507_v18 = vor.u32 %v5506_v55, %v5503_v63 }
 0x295   : > { %10673 = vmatmul.msk.bf16.gmra.mxu2 %vm308_vm5, %v6210_v38  ;;  %4084 = vst.msk [vmem:[#allocation2 + $0xe0] sm:$0xff] %vm450_vm11, %v4052_v21  ;;  %v4839_v25 = vadd.f32 %v4807_v57, %v4767_v13  ;;  %v6738_v13 = vrot.slane %v6736_v35, 6  ;;  %v6211_v42 = vpack.c.b16 %v6188_v52, %v6187_v4  ;;  %v13512_v21 = vunpack.c.l.b16 %v5499_v37  ;;  %v10555_v10 = vld [vmem:[%s11437_s6 + $0x8c] sm:$0x1]  ;;  %v10556_v29 = vld [vmem:[%s11437_s6 + $0x90] sm:$0xf] }
 0x296   : > { %v6750_v57 = vrot.slane %v13501_v1, 4  ;;  %v13518_v50 = vrot.slane %v5510_v39, 5  ;;  %v6122_v16 = vsel %vm11441_vm6, %v10653_v59, %v6121_v15  ;;  %v5520_v23 = vshll.u32 %v10555_v10, 16  ;;  %v13544_v39 = vld [vmem:[%s11437_s6 + $0x94] sm:$0xf] }
 0x297   : > { %4871 = vst.msk [vmem:[#allocation2 + $0xd8] sm:$0xff] %vm450_vm11, %v4839_v25  ;;  %v6739_v46 = vor.u32 %v6738_v13, %v6735_v5  ;;  %v6123_v25 = vrot.slane %v6121_v15, 4  ;;  %v5516_v5 = vrot.slane %v5514_v11, 4  ;;  %v6761_v13 = vshrl.u32 %v10709_v3, 16 }
 0x298   : > { %v13484_v56 = vpop.f32.mrf.mxu2  ;;  %v3487_v24 = vpop.f32.mrf.mxu1  ;;  %v5711_v8 = vpack.c.b16 %v13512_v21, %v13510_v2  ;;  %v6189_v62 = vunpack.c.l.b16 %v6122_v16  ;;  %v5522_v55 = vrot.slane %v5520_v23, 5  ;;  %v5143_v23 = vld [vmem:[#allocation2 + $0x18] sm:$0xff] }
 0x299   : > { %v3554_v30 = vadd.f32 %v3522_v12, %v3487_v24  ;;  %v5060_v33 = vpop.f32.mrf.mxu0  ;;  %v6740_v26 = vrot.slane %v6739_v46, 4  ;;  %v6764_v24 = vshll.u32 %v10709_v3, 16  ;;  %v6125_v28 = vsel %vm11441_vm6, %v6123_v25, %v6124_v0  ;;  %v10557_v3 = vld [vmem:[%s11437_s6 + $0x94] sm:$0xf]  ;;  %v10628_v0 = vld [vmem:[%s11437_s6 + $0x98] sm:$0x1] }
 0x29a   : > { %v4021_v36 = vld [vmem:[#allocation2 + $0xe8] sm:$0xff]  ;;  %v5172_v41 = vadd.f32 %v5140_v6, %v5060_v33  ;;  %v6190_v63 = vunpack.c.l.b16 %v6125_v28 }
 0x29b   : > { %v4053_v31 = vadd.f32 %v4021_v36, %v13452_v51  ;;  %3586 = vst.msk [vmem:[#allocation2 + $0xf0] sm:$0xff] %vm450_vm11, %v3554_v30  ;;  %10587 = vmatmul.msk.bf16.gmra.mxu1 %vm308_vm5, %v5710_v53  ;;  %10518 = vmatmul.msk.bf16.gmra.mxu0 %vm308_vm5, %v11149_v54  ;;  %v6754_v51 = vrot.slane %v6752_v34, 5  ;;  %v10710_v53 = vld [vmem:[%s11437_s6 + $0x88] sm:$0xf]  ;;  %v6749_v30 = vsel %vm11499_vm10, %v6740_v26, %v13501_v1  ;;  %v10711_v33 = vld [vmem:[%s11437_s6 + $0x8c] sm:$0x3] }
 0x29c   : > { %v4772_v38 = vpop.f32.mrf.mxu3  ;;  %v4808_v27 = vld [vmem:[#allocation2 + $0xe0] sm:$0xff]  ;;  %5204 = vst.msk [vmem:[#allocation2] sm:$0xff] %vm450_vm11, %v5172_v41  ;;  %v6770_v19 = vshrl.u32 %v10710_v53, 16  ;;  %v6773_v9 = vshll.u32 %v10710_v53, 16  ;;  %v5508_v36 = vrot.slane %v5507_v18, 4  ;;  %v5517_v41 = vor.u32 %v5516_v5, %v13518_v50 }
 0x29d   : > { %4085 = vst.msk [vmem:[#allocation2 + $0xe8] sm:$0xff] %vm450_vm11, %v4053_v31  ;;  %v4840_v32 = vadd.f32 %v4808_v27, %v4770_v49  ;;  %v3523_v49 = vld [vmem:[#allocation2 + $0xf8] sm:$0xff]  ;;  %v6758_v60 = vor.u32 %v6757_v61, %v6754_v51  ;;  %v6766_v4 = vrot.slane %v6764_v24, 6  ;;  %v6783_v52 = vshll.u32 %v10711_v33, 16  ;;  %v11150_v27 = vld [vmem:[%s11437_s6 + $0x84] sm:$0xff] }
 0x29e   : > { %v6772_v43 = vrot.slane %v6770_v19, 5  ;;  %v6775_v31 = vrot.slane %v6773_v9, 6  ;;  %v6975_v1 = vunpack.c.l.b16 %v6749_v30  ;;  %v5513_v2 = vsel %vm11477_vm9, %v5508_v36, %v13518_v50 }
 0x29f   : > { %4872 = vst.msk [vmem:[#allocation2 + $0xe0] sm:$0xff] %vm450_vm11, %v4840_v32  ;;  %v5142_v32 = vld [vmem:[#allocation2 + $0x10] sm:$0xff]  ;;  %v5518_v21 = vrot.slane %v5517_v41, 4  ;;  %v6785_v59 = vrot.slane %v6783_v52, 6  ;;  %v5528_v18 = vshll.u32 %v10556_v29, 16  ;;  %v5534_v50 = vshll.u32 %v10557_v3, 16 }
 0x2a0   : > { %v13508_v44 = vpop.f32.mrf.mxu2  ;;  %v3489_v35 = vpop.f32.mrf.mxu1  ;;  %v13562_v10 = vunpack.c.l.b16 %v5513_v2 }
 0x2a1   : > { %10743 = vmatmul.msk.bf16.gmra.mxu3 %vm308_vm5, %v6998_v40  ;;  %v3555_v45 = vadd.f32 %v3523_v49, %v3489_v35  ;;  %v5062_v7 = vpop.f32.mrf.mxu0  ;;  %v6763_v40 = vrot.slane %v6761_v13, 5  ;;  %v5523_v13 = vsel %vm11477_vm9, %v5518_v21, %v5522_v55  ;;  %v5530_v36 = vrot.slane %v5528_v18, 5 }
 0x2a2   : > { %v4022_v20 = vld [vmem:[#allocation2 + $0xf0] sm:$0xff]  ;;  %v5173_v47 = vadd.f32 %v5141_v14, %v5062_v7  ;;  %v6128_v7 = vrot.slane %v13544_v39, 5  ;;  %v13573_v41 = vrot.slane %v5534_v50, 5 }
 0x2a3   : > { %v4054_v12 = vadd.f32 %v4022_v20, %v13484_v56  ;;  %3587 = vst.msk [vmem:[#allocation2 + $0xf8] sm:$0xff] %vm450_vm11, %v3555_v45  ;;  %v6759_v56 = vsel %vm11499_vm10, %v6750_v57, %v6758_v60  ;;  %v5864_v46 = vld [vmem:[#allocation2] sm:$0xff]  ;;  %v6767_v26 = vor.u32 %v6766_v4, %v6763_v40  ;;  %v13554_v57 = vor.u32 %v6775_v31, %v6772_v43  ;;  %v10626_v45 = vld [vmem:[%s11437_s6 + $0x90] sm:$0xe] }
 0x2a4   : > { %v4775_v54 = vpop.f32.mrf.mxu3  ;;  %v4809_v34 = vld [vmem:[#allocation2 + $0xe8] sm:$0xff]  ;;  %5205 = vst.msk [vmem:[#allocation2 + $0x8] sm:$0xff] %vm450_vm11, %v5173_v47  ;;  %v6976_v51 = vunpack.c.l.b16 %v6759_v56  ;;  %v5538_v20 = vshrl.u32 %v10557_v3, 16  ;;  %v6212_v47 = vpack.c.b16 %v6190_v63, %v6189_v62  ;;  %v10654_v19 = vrot.slane %v10626_v45, 9 }
 0x2a5   : > { %10674 = vmatmul.msk.bf16.gmra.mxu2 %vm308_vm5, %v6211_v42  ;;  %4086 = vst.msk [vmem:[#allocation2 + $0xf0] sm:$0xff] %vm450_vm11, %v4054_v12  ;;  %v4841_v6 = vadd.f32 %v4809_v34, %v4772_v38  ;;  %v6780_v38 = vshrl.u32 %v10711_v33, 16  ;;  %v6768_v24 = vrot.slane %v6767_v26, 4  ;;  %v6778_v12 = vrot.slane %v13554_v57, 4 }
 0x2a6   : > { %v6999_v53 = vpack.c.b16 %v6976_v51, %v6975_v1  ;;  %v6130_v30 = vrot.slane %v6128_v7, 4  ;;  %v6131_v56 = vrot.slane %v10628_v0, 5  ;;  %v5540_v40 = vrot.slane %v5538_v20, 4  ;;  %v10714_v51 = vld [vmem:[%s11437_s6 + $0x98] sm:$0x3]  ;;  %v5144_v20 = vld [vmem:[#allocation2 + $0x20] sm:$0xff] }
 0x2a7   : > { %4873 = vst.msk [vmem:[#allocation2 + $0xe8] sm:$0xff] %vm450_vm11, %v4841_v6  ;;  %v6782_v60 = vrot.slane %v6780_v38, 5  ;;  %v10713_v6 = vld [vmem:[%s11437_s6 + $0x94] sm:$0xf]  ;;  %v5690_v31 = vunpack.c.l.b16 %v5523_v13  ;;  %v10558_v38 = vld [vmem:[%s11437_s6 + $0x98] sm:$0x1]  ;;  %v6777_v1 = vsel %vm11499_vm10, %v6768_v24, %v13554_v57 }
 0x2a8   : > { %v13540_v48 = vpop.f32.mrf.mxu2  ;;  %v5784_v37 = vpop.f32.mrf.mxu1  ;;  %v6132_v63 = vsel %vm11441_vm6, %v6130_v30, %v6131_v56  ;;  %v6808_v21 = vshrl.u32 %v10714_v51, 16  ;;  %v6811_v26 = vshll.u32 %v10714_v51, 16  ;;  %v11151_v57 = vld [vmem:[%s11437_s6 + $0x90] sm:$0xff]  ;;  %v10559_v0 = vld [vmem:[%s11437_s6 + $0x9c] sm:$0xf] }
 0x2a9   : > { %v5896_v61 = vadd.f32 %v5864_v46, %v5784_v37  ;;  %v5065_v15 = vpop.f32.mrf.mxu0 }
 0x2aa   : > { %v4023_v11 = vld [vmem:[#allocation2 + $0xf8] sm:$0xff]  ;;  %v5174_v42 = vadd.f32 %v5142_v32, %v5065_v15  ;;  %v6801_v15 = vshll.u32 %v10713_v6, 16 }
 0x2ab   : > { %v4055_v35 = vadd.f32 %v4023_v11, %v13508_v44  ;;  %5928 = vst.msk [vmem:[#allocation2] sm:$0xff] %vm450_vm11, %v5896_v61  ;;  %10588 = vmatmul.msk.bf16.gmra.mxu1 %vm308_vm5, %v5711_v8  ;;  %10519 = vmatmul.msk.bf16.gmra.mxu0 %vm308_vm5, %v11150_v27  ;;  %v5525_v44 = vshrl.u32 %v10556_v29, 16  ;;  %v5865_v34 = vld [vmem:[#allocation2 + $0x8] sm:$0xff]  ;;  %v6786_v8 = vor.u32 %v6785_v59, %v6782_v60  ;;  %v6798_v61 = vshrl.u32 %v10713_v6, 16 }
 0x2ac   : > { %v4777_v49 = vpop.f32.mrf.mxu3  ;;  %v4810_v25 = vld [vmem:[#allocation2 + $0xf0] sm:$0xff]  ;;  %5206 = vst.msk [vmem:[#allocation2 + $0x10] sm:$0xff] %vm450_vm11, %v5174_v42  ;;  %v5541_v29 = vor.u32 %v5540_v40, %v13573_v41  ;;  %v5544_v11 = vshll.u32 %v10558_v38, 16  ;;  %v5549_v6 = vshrl.u32 %v10559_v0, 16 }
 0x2ad   : > { %4087 = vst.msk [vmem:[#allocation2 + $0xf8] sm:$0xff] %vm450_vm11, %v4055_v35  ;;  %v4842_v14 = vadd.f32 %v4810_v25, %v4775_v54  ;;  %v10712_v54 = vld [vmem:[%s11437_s6 + $0x90] sm:$0xe]  ;;  %v5527_v33 = vrot.slane %v5525_v44, 4  ;;  %v6787_v62 = vsel %vm11499_vm10, %v6778_v12, %v6786_v8  ;;  %v5712_v35 = vpack.c.b16 %v5690_v31, %v13562_v10  ;;  %v10560_v10 = vld [vmem:[%s11437_s6 + $0xa0] sm:$0xf] }
 0x2ae   : > { %v6789_v52 = vshrl.u32 %v10712_v54, 16  ;;  %v6792_v37 = vshll.u32 %v10712_v54, 16  ;;  %v6800_v60 = vrot.slane %v6798_v61, 5  ;;  %v6978_v45 = vunpack.c.l.b16 %v6787_v62 }
 0x2af   : > { %4874 = vst.msk [vmem:[#allocation2 + $0xf0] sm:$0xff] %vm450_vm11, %v4842_v14  ;;  %v5531_v39 = vor.u32 %v5530_v36, %v5527_v33  ;;  %v6192_v44 = vunpack.c.l.b16 %v6132_v63  ;;  %v13598_v14 = vld [vmem:[%s11437_s6 + $0xa0] sm:$0xf]  ;;  %v5542_v13 = vrot.slane %v5541_v29, 4  ;;  %v5546_v24 = vrot.slane %v5544_v11, 5 }
 0x2b0   : > { %v13565_v5 = vpop.f32.mrf.mxu2  ;;  %v5786_v9 = vpop.f32.mrf.mxu1  ;;  %v6791_v42 = vrot.slane %v6789_v52, 5  ;;  %v6794_v2 = vrot.slane %v6792_v37, 6  ;;  %v6135_v33 = vrot.slane %v13598_v14, 5  ;;  %v5558_v36 = vshll.u32 %v10560_v10, 16 }
 0x2b1   : > { %10744 = vmatmul.msk.bf16.gmra.mxu3 %vm308_vm5, %v6999_v53  ;;  %v5897_v16 = vadd.f32 %v5865_v34, %v5786_v9  ;;  %v5067_v28 = vpop.f32.mrf.mxu0  ;;  %v6977_v53 = vunpack.c.l.b16 %v6777_v1  ;;  %v6810_v9 = vrot.slane %v6808_v21, 5  ;;  %v6813_v34 = vrot.slane %v6811_v26, 6 }
 0x2b2   : > { %v6364_v4 = vld [vmem:[#allocation2] sm:$0xff]  ;;  %v5175_v43 = vadd.f32 %v5143_v23, %v5067_v28  ;;  %v6795_v54 = vor.u32 %v6794_v2, %v6791_v42  ;;  %v10629_v23 = vld [vmem:[%s11437_s6 + $0x9c] sm:$0xe]  ;;  %v5547_v52 = vsel %vm11477_vm9, %v5542_v13, %v5546_v24  ;;  %v5551_v63 = vrot.slane %v5549_v6, 4  ;;  %v5145_v42 = vld [vmem:[#allocation2 + $0x28] sm:$0xff] }
 0x2b3   : > { %v6396_v46 = vadd.f32 %v6364_v4, %v13540_v48  ;;  %5929 = vst.msk [vmem:[#allocation2 + $0x8] sm:$0xff] %vm450_vm11, %v5897_v16  ;;  %v6129_v48 = vsel %vm11441_vm6, %v10654_v19, %v6128_v7  ;;  %v5866_v25 = vld [vmem:[#allocation2 + $0x10] sm:$0xff]  ;;  %v7000_v28 = vpack.c.b16 %v6978_v45, %v6977_v53  ;;  %v10631_v4 = vld [vmem:[%s11437_s6 + $0xa4] sm:$0x1]  ;;  %v10655_v61 = vrot.slane %v10629_v23, 9 }
 0x2b4   : > { %v7072_v27 = vpop.f32.mrf.mxu3  ;;  %v4811_v32 = vld [vmem:[#allocation2 + $0xf8] sm:$0xff]  ;;  %5207 = vst.msk [vmem:[#allocation2 + $0x18] sm:$0xff] %vm450_vm11, %v5175_v43  ;;  %v6191_v7 = vunpack.c.l.b16 %v6129_v48  ;;  %v5562_v43 = vshrl.u32 %v10560_v10, 16  ;;  %v6796_v37 = vrot.slane %v6795_v54, 4  ;;  %v10561_v2 = vld [vmem:[%s11437_s6 + $0xa4] sm:$0x1] }
 0x2b5   : > { %10675 = vmatmul.msk.bf16.gmra.mxu2 %vm308_vm5, %v6212_v47  ;;  %6428 = vst.msk [vmem:[#allocation2] sm:$0xff] %vm450_vm11, %v6396_v46  ;;  %v4843_v55 = vadd.f32 %v4811_v32, %v4777_v49  ;;  %v6803_v49 = vrot.slane %v6801_v15, 6  ;;  %v5532_v47 = vrot.slane %v5531_v39, 4  ;;  %v10715_v46 = vld [vmem:[%s11437_s6 + $0x9c] sm:$0xe]  ;;  %v6137_v15 = vrot.slane %v6135_v33, 4 }
 0x2b6   : > { %v6213_v31 = vpack.c.b16 %v6192_v44, %v6191_v7  ;;  %v10716_v32 = vld [vmem:[%s11437_s6 + $0xa0] sm:$0xf]  ;;  %v13625_v39 = vrot.slane %v5558_v36, 5  ;;  %v5564_v21 = vrot.slane %v5562_v43, 4  ;;  %v6817_v26 = vshrl.u32 %v10715_v46, 16 }
 0x2b7   : > { %4875 = vst.msk [vmem:[#allocation2 + $0xf8] sm:$0xff] %vm450_vm11, %v4843_v55  ;;  %v13605_v56 = vor.u32 %v6803_v49, %v6800_v60  ;;  %v5537_v38 = vsel %vm11477_vm9, %v5532_v47, %v13573_v41  ;;  %v6138_v41 = vrot.slane %v10631_v4, 5  ;;  %v5692_v7 = vunpack.c.l.b16 %v5547_v52  ;;  %v10563_v4 = vld [vmem:[%s11437_s6 + $0xac] sm:$0xf] }
 0x2b8   : > { %v13593_v3 = vpop.f32.mrf.mxu2  ;;  %v5789_v59 = vpop.f32.mrf.mxu1  ;;  %v5691_v49 = vunpack.c.l.b16 %v5537_v38  ;;  %v5568_v47 = vshll.u32 %v10561_v2, 16  ;;  %v5565_v24 = vor.u32 %v5564_v21, %v13625_v39  ;;  %v6819_v10 = vrot.slane %v6817_v26, 5  ;;  %v5146_v38 = vld [vmem:[#allocation2 + $0x30] sm:$0xff] }
 0x2b9   : > { %v5898_v18 = vadd.f32 %v5866_v25, %v5789_v59  ;;  %v5070_v50 = vpop.f32.mrf.mxu0  ;;  %v6806_v51 = vrot.slane %v13605_v56, 4  ;;  %v6826_v59 = vshrl.u32 %v10716_v32, 16  ;;  %v6829_v25 = vshll.u32 %v10716_v32, 16 }
 0x2ba   : > { %v6365_v12 = vld [vmem:[#allocation2 + $0x8] sm:$0xff]  ;;  %v5176_v19 = vadd.f32 %v5144_v20, %v5070_v50  ;;  %v6805_v44 = vsel %vm11499_vm10, %v6796_v37, %v13605_v56  ;;  %v6139_v50 = vsel %vm11441_vm6, %v6137_v15, %v6138_v41  ;;  %v5713_v56 = vpack.c.b16 %v5692_v7, %v5691_v49  ;;  %v10634_v7 = vld [vmem:[%s11437_s6 + $0xb0] sm:$0x1] }
 0x2bb   : > { %v6397_v8 = vadd.f32 %v6365_v12, %v13565_v5  ;;  %5930 = vst.msk [vmem:[#allocation2 + $0x10] sm:$0xff] %vm450_vm11, %v5898_v18  ;;  %10589 = vmatmul.msk.bf16.gmra.mxu1 %vm308_vm5, %v5712_v35  ;;  %10520 = vmatmul.msk.bf16.gmra.mxu0 %vm308_vm5, %v11151_v57  ;;  %v5552_v5 = vshll.u32 %v10559_v0, 16  ;;  %v5867_v48 = vld [vmem:[#allocation2 + $0x18] sm:$0xff]  ;;  %v6820_v35 = vshll.u32 %v10715_v46, 16  ;;  %v10717_v0 = vld [vmem:[%s11437_s6 + $0xa4] sm:$0x3]  ;;  %v6979_v6 = vunpack.c.l.b16 %v6805_v44 }
 0x2bc   : > { %v7074_v30 = vpop.f32.mrf.mxu3  ;;  %v7152_v16 = vld [vmem:[#allocation2] sm:$0xff]  ;;  %5208 = vst.msk [vmem:[#allocation2 + $0x20] sm:$0xff] %vm450_vm11, %v5176_v19  ;;  %v6828_v19 = vrot.slane %v6826_v59, 5  ;;  %v6831_v54 = vrot.slane %v6829_v25, 6  ;;  %v5566_v52 = vrot.slane %v5565_v24, 4  ;;  %v5570_v37 = vrot.slane %v5568_v47, 5 }
 0x2bd   : > { %6429 = vst.msk [vmem:[#allocation2 + $0x8] sm:$0xff] %vm450_vm11, %v6397_v8  ;;  %v7184_v40 = vadd.f32 %v7152_v16, %v7072_v27  ;;  %v6814_v27 = vor.u32 %v6813_v34, %v6810_v9  ;;  %v5554_v55 = vrot.slane %v5552_v5, 5  ;;  %v6822_v12 = vrot.slane %v6820_v35, 6  ;;  %v13658_v41 = vld [vmem:[%s11437_s6 + $0xac] sm:$0xf] }
 0x2be   : > { %v6836_v9 = vshrl.u32 %v10717_v0, 16  ;;  %v6839_v34 = vshll.u32 %v10717_v0, 16  ;;  %v6194_v5 = vunpack.c.l.b16 %v6139_v50  ;;  %v5586_v2 = vshrl.u32 %v10563_v4, 16 }
 0x2bf   : > { %7216 = vst.msk [vmem:[#allocation2] sm:$0xff] %vm450_vm11, %v7184_v40  ;;  %v6815_v14 = vsel %vm11499_vm10, %v6806_v51, %v6814_v27  ;;  %v5555_v20 = vor.u32 %v5554_v55, %v5551_v63  ;;  %v10562_v40 = vld [vmem:[%s11437_s6 + $0xa8] sm:$0xf]  ;;  %v6823_v46 = vor.u32 %v6822_v12, %v6819_v10  ;;  %v5571_v49 = vsel %vm11477_vm9, %v5566_v52, %v5570_v37 }
 0x2c0   : > { %v13620_v1 = vpop.f32.mrf.mxu2  ;;  %v5791_v62 = vpop.f32.mrf.mxu1  ;;  %v6838_v15 = vrot.slane %v6836_v9, 5  ;;  %v6841_v32 = vrot.slane %v6839_v34, 6  ;;  %v5573_v63 = vshrl.u32 %v10562_v40, 16  ;;  %v5576_v55 = vshll.u32 %v10562_v40, 16 }
 0x2c1   : > { %10745 = vmatmul.msk.bf16.gmra.mxu3 %vm308_vm5, %v7000_v28  ;;  %v5899_v29 = vadd.f32 %v5867_v48, %v5791_v62  ;;  %v5072_v11 = vpop.f32.mrf.mxu0  ;;  %v5556_v36 = vrot.slane %v5555_v20, 4  ;;  %v6824_v35 = vrot.slane %v6823_v46, 4  ;;  %v6142_v44 = vrot.slane %v13658_v41, 5 }
 0x2c2   : > { %v6366_v57 = vld [vmem:[#allocation2 + $0x10] sm:$0xff]  ;;  %v5177_v60 = vadd.f32 %v5145_v42, %v5072_v11  ;;  %v6842_v25 = vor.u32 %v6841_v32, %v6838_v15  ;;  %v5575_v0 = vrot.slane %v5573_v63, 4  ;;  %v5588_v47 = vrot.slane %v5586_v2, 4 }
 0x2c3   : > { %v6398_v53 = vadd.f32 %v6366_v57, %v13593_v3  ;;  %5931 = vst.msk [vmem:[#allocation2 + $0x18] sm:$0xff] %vm450_vm11, %v5899_v29  ;;  %v6136_v3 = vsel %vm11441_vm6, %v10655_v61, %v6135_v33  ;;  %v11152_v33 = vld [vmem:[%s11437_s6 + $0x9c] sm:$0xff]  ;;  %v13650_v61 = vor.u32 %v6831_v54, %v6828_v19  ;;  %v5582_v29 = vshll.u32 %v10563_v4, 16  ;;  %v10718_v57 = vld [vmem:[%s11437_s6 + $0xa8] sm:$0xe] }
 0x2c4   : > { %v7077_v45 = vpop.f32.mrf.mxu3  ;;  %v7153_v18 = vld [vmem:[#allocation2 + $0x8] sm:$0xff]  ;;  %5209 = vst.msk [vmem:[#allocation2 + $0x28] sm:$0xff] %vm450_vm11, %v5177_v60  ;;  %v5868_v28 = vld [vmem:[#allocation2 + $0x20] sm:$0xff]  ;;  %v6193_v23 = vunpack.c.l.b16 %v6136_v3  ;;  %v5561_v42 = vsel %vm11477_vm9, %v5556_v36, %v13625_v39  ;;  %v6848_v24 = vshll.u32 %v10718_v57, 16  ;;  %v5147_v54 = vld [vmem:[#allocation2 + $0x38] sm:$0xff]  ;;  %v5694_v9 = vunpack.c.l.b16 %v5571_v49 }
 0x2c5   : > { %10676 = vmatmul.msk.bf16.gmra.mxu2 %vm308_vm5, %v6213_v31  ;;  %6430 = vst.msk [vmem:[#allocation2 + $0x10] sm:$0xff] %vm450_vm11, %v6398_v53  ;;  %v7185_v13 = vadd.f32 %v7153_v18, %v7074_v30  ;;  %v6980_v30 = vunpack.c.l.b16 %v6815_v14  ;;  %v10719_v60 = vld [vmem:[%s11437_s6 + $0xac] sm:$0xf]  ;;  %v6834_v59 = vrot.slane %v13650_v61, 4  ;;  %v10632_v53 = vld [vmem:[%s11437_s6 + $0xa8] sm:$0xe]  ;;  %v13677_v14 = vunpack.c.l.b16 %v5561_v42 }
 0x2c6   : > { %v6214_v26 = vpack.c.b16 %v6194_v5, %v6193_v23  ;;  %v5578_v18 = vrot.slane %v5576_v55, 5  ;;  %v13680_v3 = vrot.slane %v5582_v29, 5  ;;  %v6854_v10 = vshrl.u32 %v10719_v60, 16  ;;  %v10720_v23 = vld [vmem:[%s11437_s6 + $0xb0] sm:$0x3]  ;;  %v5148_v49 = vld [vmem:[#allocation2 + $0x40] sm:$0xff] }
 0x2c7   : > { %7217 = vst.msk [vmem:[#allocation2 + $0x8] sm:$0xff] %vm450_vm11, %v7185_v13  ;;  %v6845_v13 = vshrl.u32 %v10718_v57, 16  ;;  %v6833_v34 = vsel %vm11499_vm10, %v6824_v35, %v13650_v61  ;;  %v6145_v40 = vrot.slane %v10634_v7, 5  ;;  %v6850_v37 = vrot.slane %v6848_v24, 6  ;;  %v10566_v35 = vld [vmem:[%s11437_s6 + $0xb8] sm:$0xf] }
 0x2c8   : > { %v13645_v8 = vpop.f32.mrf.mxu2  ;;  %v5794_v16 = vpop.f32.mrf.mxu1  ;;  %v5579_v4 = vor.u32 %v5578_v18, %v5575_v0  ;;  %v6856_v46 = vrot.slane %v6854_v10, 5  ;;  %v6867_v61 = vshll.u32 %v10720_v23, 16  ;;  %v5714_v15 = vpack.c.b16 %v5694_v9, %v13677_v14 }
 0x2c9   : > { %v5900_v43 = vadd.f32 %v5868_v28, %v5794_v16  ;;  %v5075_v31 = vpop.f32.mrf.mxu0  ;;  %v6843_v16 = vsel %vm11499_vm10, %v6834_v59, %v6842_v25  ;;  %v10656_v28 = vrot.slane %v10632_v53, 9  ;;  %v6847_v52 = vrot.slane %v6845_v13, 5 }
 0x2ca   : > { %v6367_v51 = vld [vmem:[#allocation2 + $0x18] sm:$0xff]  ;;  %v5178_v27 = vadd.f32 %v5146_v38, %v5075_v31  ;;  %v5589_v38 = vor.u32 %v5588_v47, %v13680_v3  ;;  %v6981_v41 = vunpack.c.l.b16 %v6833_v34  ;;  %v6982_v63 = vunpack.c.l.b16 %v6843_v16 }
 0x2cb   : > { %v6399_v62 = vadd.f32 %v6367_v51, %v13620_v1  ;;  %5932 = vst.msk [vmem:[#allocation2 + $0x20] sm:$0xff] %vm450_vm11, %v5900_v43  ;;  %10590 = vmatmul.msk.bf16.gmra.mxu1 %vm308_vm5, %v5713_v56  ;;  %10521 = vmatmul.msk.bf16.gmra.mxu0 %vm308_vm5, %v11152_v33  ;;  %v7001_v1 = vpack.c.b16 %v6980_v30, %v6979_v6  ;;  %v5869_v20 = vld [vmem:[#allocation2 + $0x28] sm:$0xff]  ;;  %v6857_v56 = vshll.u32 %v10719_v60, 16  ;;  %v6144_v30 = vrot.slane %v6142_v44, 4  ;;  %v10637_v16 = vld [vmem:[%s11437_s6 + $0xbc] sm:$0x1] }
 0x2cc   : > { %v13655_v48 = vpop.f32.mrf.mxu3  ;;  %v7154_v11 = vld [vmem:[#allocation2 + $0x10] sm:$0xff]  ;;  %5210 = vst.msk [vmem:[#allocation2 + $0x30] sm:$0xff] %vm450_vm11, %v5178_v27  ;;  %v6864_v27 = vshrl.u32 %v10720_v23, 16  ;;  %v6143_v55 = vsel %vm11441_vm6, %v10656_v28, %v6142_v44  ;;  %v5580_v42 = vrot.slane %v5579_v4, 4  ;;  %v5590_v2 = vrot.slane %v5589_v38, 4 }
 0x2cd   : > { %6431 = vst.msk [vmem:[#allocation2 + $0x18] sm:$0xff] %vm450_vm11, %v6399_v62  ;;  %v7186_v21 = vadd.f32 %v7154_v11, %v7077_v45  ;;  %v10564_v45 = vld [vmem:[%s11437_s6 + $0xb0] sm:$0x1]  ;;  %v6859_v51 = vrot.slane %v6857_v56, 6  ;;  %v11153_v62 = vld [vmem:[%s11437_s6 + $0xa8] sm:$0xff]  ;;  %v6146_v29 = vsel %vm11441_vm6, %v6144_v30, %v6145_v40  ;;  %v6869_v53 = vrot.slane %v6867_v61, 6 }
 0x2ce   : > { %v5592_v43 = vshll.u32 %v10564_v45, 16  ;;  %v6866_v25 = vrot.slane %v6864_v27, 5  ;;  %v6195_v14 = vunpack.c.l.b16 %v6143_v55  ;;  %v13710_v45 = vld [vmem:[%s11437_s6 + $0xb8] sm:$0xf]  ;;  %v7002_v47 = vpack.c.b16 %v6982_v63, %v6981_v41  ;;  %v10567_v23 = vld [vmem:[%s11437_s6 + $0xbc] sm:$0x1] }
 0x2cf   : > { %7218 = vst.msk [vmem:[#allocation2 + $0x10] sm:$0xff] %vm450_vm11, %v7186_v21  ;;  %v13707_v59 = vor.u32 %v6859_v51, %v6856_v46  ;;  %v5606_v13 = vshll.u32 %v10566_v35, 16  ;;  %v5610_v24 = vshrl.u32 %v10566_v35, 16  ;;  %v5149_v51 = vld [vmem:[#allocation2 + $0x48] sm:$0xff]  ;;  %v6152_v55 = vrot.slane %v10637_v16, 5 }
 0x2d0   : > { %v13675_v39 = vpop.f32.mrf.mxu2  ;;  %v5796_v50 = vpop.f32.mrf.mxu1  ;;  %v5594_v21 = vrot.slane %v5592_v43, 5  ;;  %v6870_v56 = vor.u32 %v6869_v53, %v6866_v25 }
 0x2d1   : > { %10746 = vmatmul.msk.bf16.gmra.mxu3 %vm308_vm5, %v7001_v1  ;;  %v5901_v12 = vadd.f32 %v5869_v20, %v5796_v50  ;;  %v5077_v19 = vpop.f32.mrf.mxu0  ;;  %v6862_v34 = vrot.slane %v13707_v59, 4  ;;  %v5612_v40 = vrot.slane %v5610_v24, 4  ;;  %v11154_v24 = vld [vmem:[%s11437_s6 + $0xb4] sm:$0xff] }
 0x2d2   : > { %v6368_v33 = vld [vmem:[#allocation2 + $0x20] sm:$0xff]  ;;  %v5179_v6 = vadd.f32 %v5147_v54, %v5077_v19  ;;  %v5595_v19 = vsel %vm11477_vm9, %v5590_v2, %v5594_v21 }
 0x2d3   : > { %v6400_v5 = vadd.f32 %v6368_v33, %v13645_v8  ;;  %5933 = vst.msk [vmem:[#allocation2 + $0x28] sm:$0xff] %vm450_vm11, %v5901_v12  ;;  %v5870_v1 = vld [vmem:[#allocation2 + $0x30] sm:$0xff]  ;;  %v6196_v12 = vunpack.c.l.b16 %v6146_v29  ;;  %v6149_v33 = vrot.slane %v13710_v45, 5  ;;  %v13736_v38 = vunpack.c.l.b16 %v5595_v19 }
 0x2d4   : > { %v7082_v36 = vpop.f32.mrf.mxu3  ;;  %v7155_v31 = vld [vmem:[#allocation2 + $0x18] sm:$0xff]  ;;  %5211 = vst.msk [vmem:[#allocation2 + $0x38] sm:$0xff] %vm450_vm11, %v5179_v6  ;;  %v10635_v6 = vld [vmem:[%s11437_s6 + $0xb4] sm:$0xe]  ;;  %v6871_v27 = vsel %vm11499_vm10, %v6862_v34, %v6870_v56  ;;  %v13764_v56 = vld [vmem:[%s11437_s6 + $0xc4] sm:$0xf] }
 0x2d5   : > { %10677 = vmatmul.msk.bf16.gmra.mxu2 %vm308_vm5, %v6214_v26  ;;  %6432 = vst.msk [vmem:[#allocation2 + $0x20] sm:$0xff] %vm450_vm11, %v6400_v5  ;;  %v7187_v8 = vadd.f32 %v7155_v31, %v13655_v48  ;;  %v10565_v48 = vld [vmem:[%s11437_s6 + $0xb4] sm:$0xf]  ;;  %v6851_v26 = vor.u32 %v6850_v37, %v6847_v52  ;;  %v13731_v5 = vrot.slane %v5606_v13, 5  ;;  %v6215_v43 = vpack.c.b16 %v6196_v12, %v6195_v14  ;;  %v10568_v14 = vld [vmem:[%s11437_s6 + $0xc0] sm:$0xf] }
 0x2d6   : > { %v5597_v0 = vshrl.u32 %v10565_v48, 16  ;;  %v5600_v18 = vshll.u32 %v10565_v48, 16  ;;  %v10721_v37 = vld [vmem:[%s11437_s6 + $0xb4] sm:$0xe]  ;;  %v10657_v61 = vrot.slane %v10635_v6, 9  ;;  %v5616_v48 = vshll.u32 %v10567_v23, 16 }
 0x2d7   : > { %7219 = vst.msk [vmem:[#allocation2 + $0x18] sm:$0xff] %vm450_vm11, %v7187_v8  ;;  %v6852_v54 = vrot.slane %v6851_v26, 4  ;;  %v6873_v2 = vshrl.u32 %v10721_v37, 16  ;;  %v6876_v21 = vshll.u32 %v10721_v37, 16  ;;  %v6984_v25 = vunpack.c.l.b16 %v6871_v27  ;;  %v5150_v34 = vld [vmem:[#allocation2 + $0x50] sm:$0xff] }
 0x2d8   : > { %v13698_v32 = vpop.f32.mrf.mxu2  ;;  %v5799_v11 = vpop.f32.mrf.mxu1  ;;  %v5599_v28 = vrot.slane %v5597_v0, 4  ;;  %v5602_v30 = vrot.slane %v5600_v18, 5  ;;  %v6150_v53 = vsel %vm11441_vm6, %v10657_v61, %v6149_v33  ;;  %v5618_v18 = vrot.slane %v5616_v48, 5  ;;  %v10638_v27 = vld [vmem:[%s11437_s6 + $0xc0] sm:$0xe] }
 0x2d9   : > { %v5902_v57 = vadd.f32 %v5870_v1, %v5799_v11  ;;  %v5080_v60 = vpop.f32.mrf.mxu0  ;;  %v6861_v52 = vsel %vm11499_vm10, %v6852_v54, %v13707_v59  ;;  %v10723_v59 = vld [vmem:[%s11437_s6 + $0xbc] sm:$0x3]  ;;  %v5624_v6 = vshll.u32 %v10568_v14, 16  ;;  %v6197_v23 = vunpack.c.l.b16 %v6150_v53 }
 0x2da   : > { %v6369_v7 = vld [vmem:[#allocation2 + $0x28] sm:$0xff]  ;;  %v5180_v44 = vadd.f32 %v5148_v49, %v5080_v60  ;;  %v5603_v29 = vor.u32 %v5602_v30, %v5599_v28  ;;  %v6983_v49 = vunpack.c.l.b16 %v6861_v52  ;;  %v6895_v19 = vshll.u32 %v10723_v59, 16 }
 0x2db   : > { %v6401_v50 = vadd.f32 %v6369_v7, %v13675_v39  ;;  %5934 = vst.msk [vmem:[#allocation2 + $0x30] sm:$0xff] %vm450_vm11, %v5902_v57  ;;  %10591 = vmatmul.msk.bf16.gmra.mxu1 %vm308_vm5, %v5714_v15  ;;  %10522 = vmatmul.msk.bf16.gmra.mxu0 %vm308_vm5, %v11153_v62  ;;  %v5585_v39 = vsel %vm11477_vm9, %v5580_v42, %v13680_v3  ;;  %v5871_v4 = vld [vmem:[#allocation2 + $0x38] sm:$0xff]  ;;  %v6151_v15 = vrot.slane %v6149_v33, 4  ;;  %v5621_v33 = vshrl.u32 %v10568_v14, 16 }
 0x2dc   : > { %v7084_v20 = vpop.f32.mrf.mxu3  ;;  %v7156_v10 = vld [vmem:[#allocation2 + $0x20] sm:$0xff]  ;;  %5212 = vst.msk [vmem:[#allocation2 + $0x40] sm:$0xff] %vm450_vm11, %v5180_v44  ;;  %v13734_v31 = vunpack.c.l.b16 %v5585_v39  ;;  %v10722_v62 = vld [vmem:[%s11437_s6 + $0xb8] sm:$0xf]  ;;  %v5613_v42 = vor.u32 %v5612_v40, %v13731_v5  ;;  %v5604_v44 = vrot.slane %v5603_v29, 4  ;;  %v6892_v39 = vshrl.u32 %v10723_v59, 16 }
 0x2dd   : > { %6433 = vst.msk [vmem:[#allocation2 + $0x28] sm:$0xff] %vm450_vm11, %v6401_v50  ;;  %v7188_v9 = vadd.f32 %v7156_v10, %v7082_v36  ;;  %v6882_v35 = vshrl.u32 %v10722_v62, 16  ;;  %v6885_v57 = vshll.u32 %v10722_v62, 16  ;;  %v6153_v7 = vsel %vm11441_vm6, %v6151_v15, %v6152_v55 }
 0x2de   : > { %v5614_v0 = vrot.slane %v5613_v42, 4  ;;  %v6875_v50 = vrot.slane %v6873_v2, 5  ;;  %v7003_v30 = vpack.c.b16 %v6984_v25, %v6983_v49  ;;  %v5609_v40 = vsel %vm11477_vm9, %v5604_v44, %v13731_v5  ;;  %v10724_v2 = vld [vmem:[%s11437_s6 + $0xc0] sm:$0xe]  ;;  %v5151_v25 = vld [vmem:[#allocation2 + $0x58] sm:$0xff] }
 0x2df   : > { %7220 = vst.msk [vmem:[#allocation2 + $0x20] sm:$0xff] %vm450_vm11, %v7188_v9  ;;  %v6884_v10 = vrot.slane %v6882_v35, 5  ;;  %v6887_v12 = vrot.slane %v6885_v57, 6  ;;  %v5623_v61 = vrot.slane %v5621_v33, 4  ;;  %v5626_v15 = vrot.slane %v5624_v6, 5 }
 0x2e0   : > { %v13728_v3 = vpop.f32.mrf.mxu2  ;;  %v5801_v36 = vpop.f32.mrf.mxu1  ;;  %v13786_v48 = vunpack.c.l.b16 %v5609_v40  ;;  %v10658_v57 = vrot.slane %v10638_v27, 9 }
 0x2e1   : > { %10747 = vmatmul.msk.bf16.gmra.mxu3 %vm308_vm5, %v7002_v47  ;;  %v5903_v46 = vadd.f32 %v5871_v4, %v5801_v36  ;;  %v5082_v8 = vpop.f32.mrf.mxu0  ;;  %v10569_v36 = vld [vmem:[%s11437_s6 + $0xc4] sm:$0xf]  ;;  %v13777_v5 = vor.u32 %v6887_v12, %v6884_v10 }
 0x2e2   : > { %v6370_v41 = vld [vmem:[#allocation2 + $0x30] sm:$0xff]  ;;  %v5181_v63 = vadd.f32 %v5149_v51, %v5082_v8  ;;  %v6156_v8 = vrot.slane %v13764_v56, 5  ;;  %v5630_v62 = vshll.u32 %v10569_v36, 16 }
 0x2e3   : > { %v6402_v11 = vadd.f32 %v6370_v41, %v13698_v32  ;;  %5935 = vst.msk [vmem:[#allocation2 + $0x38] sm:$0xff] %vm450_vm11, %v5903_v46  ;;  %v5715_v32 = vpack.c.b16 %v13736_v38, %v13734_v31  ;;  %v5872_v13 = vld [vmem:[#allocation2 + $0x40] sm:$0xff]  ;;  %v6198_v31 = vunpack.c.l.b16 %v6153_v7  ;;  %v5619_v38 = vsel %vm11477_vm9, %v5614_v0, %v5618_v18  ;;  %v10640_v41 = vld [vmem:[%s11437_s6 + $0xc8] sm:$0x1] }
 0x2e4   : > { %v7087_v1 = vpop.f32.mrf.mxu3  ;;  %v7157_v26 = vld [vmem:[#allocation2 + $0x28] sm:$0xff]  ;;  %5213 = vst.msk [vmem:[#allocation2 + $0x48] sm:$0xff] %vm450_vm11, %v5181_v63  ;;  %v6897_v46 = vrot.slane %v6895_v19, 6  ;;  %v5634_v63 = vshrl.u32 %v10569_v36, 16  ;;  %v6159_v53 = vrot.slane %v10640_v41, 5  ;;  %v5627_v7 = vor.u32 %v5626_v15, %v5623_v61 }
 0x2e5   : > { %10678 = vmatmul.msk.bf16.gmra.mxu2 %vm308_vm5, %v6215_v43  ;;  %6434 = vst.msk [vmem:[#allocation2 + $0x30] sm:$0xff] %vm450_vm11, %v6402_v11  ;;  %v7189_v60 = vadd.f32 %v7157_v26, %v7084_v20  ;;  %v6878_v20 = vrot.slane %v6876_v21, 6  ;;  %v6216_v29 = vpack.c.b16 %v6198_v31, %v6197_v23  ;;  %v13788_v11 = vunpack.c.l.b16 %v5619_v38  ;;  %v10570_v18 = vld [vmem:[%s11437_s6 + $0xc8] sm:$0x1]  ;;  %v10571_v41 = vld [vmem:[%s11437_s6 + $0xcc] sm:$0xf] }
 0x2e6   : > { %v6890_v26 = vrot.slane %v13777_v5, 4  ;;  %v13794_v44 = vrot.slane %v5630_v62, 5  ;;  %v6157_v56 = vsel %vm11441_vm6, %v10658_v57, %v6156_v8  ;;  %v5640_v6 = vshll.u32 %v10570_v18, 16  ;;  %v13820_v62 = vld [vmem:[%s11437_s6 + $0xd0] sm:$0xf] }
 0x2e7   : > { %7221 = vst.msk [vmem:[#allocation2 + $0x28] sm:$0xff] %vm450_vm11, %v7189_v60  ;;  %v6879_v52 = vor.u32 %v6878_v20, %v6875_v50  ;;  %v6158_v60 = vrot.slane %v6156_v8, 4  ;;  %v5636_v50 = vrot.slane %v5634_v63, 4  ;;  %v6901_v20 = vshrl.u32 %v10724_v2, 16 }
 0x2e8   : > { %v13760_v45 = vpop.f32.mrf.mxu2  ;;  %v5804_v47 = vpop.f32.mrf.mxu1  ;;  %v5716_v19 = vpack.c.b16 %v13788_v11, %v13786_v48  ;;  %v6199_v27 = vunpack.c.l.b16 %v6157_v56  ;;  %v5642_v15 = vrot.slane %v5640_v6, 5  ;;  %v5153_v6 = vld [vmem:[#allocation2 + $0x68] sm:$0xff] }
 0x2e9   : > { %v5904_v54 = vadd.f32 %v5872_v13, %v5804_v47  ;;  %v5085_v9 = vpop.f32.mrf.mxu0  ;;  %v6880_v42 = vrot.slane %v6879_v52, 4  ;;  %v6904_v47 = vshll.u32 %v10724_v2, 16  ;;  %v6160_v33 = vsel %vm11441_vm6, %v6158_v60, %v6159_v53  ;;  %v10572_v2 = vld [vmem:[%s11437_s6 + $0xd0] sm:$0xf]  ;;  %v10643_v53 = vld [vmem:[%s11437_s6 + $0xd4] sm:$0x1] }
 0x2ea   : > { %v6371_v16 = vld [vmem:[#allocation2 + $0x38] sm:$0xff]  ;;  %v5182_v28 = vadd.f32 %v5150_v34, %v5085_v9  ;;  %v10726_v9 = vld [vmem:[%s11437_s6 + $0xc8] sm:$0x3]  ;;  %v6200_v61 = vunpack.c.l.b16 %v6160_v33 }
 0x2eb   : > { %v6403_v4 = vadd.f32 %v6371_v16, %v13728_v3  ;;  %5936 = vst.msk [vmem:[#allocation2 + $0x40] sm:$0xff] %vm450_vm11, %v5904_v54  ;;  %10592 = vmatmul.msk.bf16.gmra.mxu1 %vm308_vm5, %v5715_v32  ;;  %10523 = vmatmul.msk.bf16.gmra.mxu0 %vm308_vm5, %v11154_v24  ;;  %v6894_v3 = vrot.slane %v6892_v39, 5  ;;  %v10725_v32 = vld [vmem:[%s11437_s6 + $0xc4] sm:$0xf]  ;;  %v6889_v54 = vsel %vm11499_vm10, %v6880_v42, %v13777_v5  ;;  %v5628_v16 = vrot.slane %v5627_v7, 4 }
 0x2ec   : > { %v7089_v43 = vpop.f32.mrf.mxu3  ;;  %v7158_v37 = vld [vmem:[#allocation2 + $0x30] sm:$0xff]  ;;  %5214 = vst.msk [vmem:[#allocation2 + $0x50] sm:$0xff] %vm450_vm11, %v5182_v28  ;;  %v6910_v10 = vshrl.u32 %v10725_v32, 16  ;;  %v6913_v12 = vshll.u32 %v10725_v32, 16  ;;  %v5637_v28 = vor.u32 %v5636_v50, %v13794_v44  ;;  %v6906_v23 = vrot.slane %v6904_v47, 6 }
 0x2ed   : > { %6435 = vst.msk [vmem:[#allocation2 + $0x38] sm:$0xff] %vm450_vm11, %v6403_v4  ;;  %v7190_v51 = vadd.f32 %v7158_v37, %v7087_v1  ;;  %v5873_v1 = vld [vmem:[#allocation2 + $0x48] sm:$0xff]  ;;  %v6898_v35 = vor.u32 %v6897_v46, %v6894_v3  ;;  %v6923_v31 = vshll.u32 %v10726_v9, 16  ;;  %v11155_v37 = vld [vmem:[%s11437_s6 + $0xc0] sm:$0xff]  ;;  %v6985_v5 = vunpack.c.l.b16 %v6889_v54 }
 0x2ee   : > { %v6912_v36 = vrot.slane %v6910_v10, 5  ;;  %v6915_v4 = vrot.slane %v6913_v12, 6  ;;  %v5633_v48 = vsel %vm11477_vm9, %v5628_v16, %v13794_v44  ;;  %v5638_v11 = vrot.slane %v5637_v28, 4 }
 0x2ef   : > { %7222 = vst.msk [vmem:[#allocation2 + $0x30] sm:$0xff] %vm450_vm11, %v7190_v51  ;;  %v5152_v51 = vld [vmem:[#allocation2 + $0x60] sm:$0xff]  ;;  %v6925_v57 = vrot.slane %v6923_v31, 6  ;;  %v5648_v7 = vshll.u32 %v10571_v41, 16  ;;  %v5654_v44 = vshll.u32 %v10572_v2, 16  ;;  %v13838_v18 = vunpack.c.l.b16 %v5633_v48 }
 0x2f0   : > { %v13784_v55 = vpop.f32.mrf.mxu2  ;;  %v5806_v21 = vpop.f32.mrf.mxu1 }
 0x2f1   : > { %10748 = vmatmul.msk.bf16.gmra.mxu3 %vm308_vm5, %v7003_v30  ;;  %v5905_v49 = vadd.f32 %v5873_v1, %v5806_v21  ;;  %v5087_v59 = vpop.f32.mrf.mxu0  ;;  %v6903_v30 = vrot.slane %v6901_v20, 5  ;;  %v5643_v20 = vsel %vm11477_vm9, %v5638_v11, %v5642_v15  ;;  %v5650_v16 = vrot.slane %v5648_v7, 5 }
 0x2f2   : > { %v6372_v14 = vld [vmem:[#allocation2 + $0x40] sm:$0xff]  ;;  %v5183_v0 = vadd.f32 %v5151_v25, %v5087_v59  ;;  %v6163_v59 = vrot.slane %v13820_v62, 5  ;;  %v13849_v28 = vrot.slane %v5654_v44, 5 }
 0x2f3   : > { %v6404_v13 = vadd.f32 %v6372_v14, %v13760_v45  ;;  %5937 = vst.msk [vmem:[#allocation2 + $0x48] sm:$0xff] %vm450_vm11, %v5905_v49  ;;  %v6899_v45 = vsel %vm11499_vm10, %v6890_v26, %v6898_v35  ;;  %v5874_v52 = vld [vmem:[#allocation2 + $0x50] sm:$0xff]  ;;  %v6907_v42 = vor.u32 %v6906_v23, %v6903_v30  ;;  %v13830_v26 = vor.u32 %v6915_v4, %v6912_v36  ;;  %v10641_v49 = vld [vmem:[%s11437_s6 + $0xcc] sm:$0xe] }
 0x2f4   : > { %v7092_v24 = vpop.f32.mrf.mxu3  ;;  %v7159_v39 = vld [vmem:[#allocation2 + $0x38] sm:$0xff]  ;;  %5215 = vst.msk [vmem:[#allocation2 + $0x58] sm:$0xff] %vm450_vm11, %v5183_v0  ;;  %v6986_v3 = vunpack.c.l.b16 %v6899_v45  ;;  %v5658_v14 = vshrl.u32 %v10572_v2, 16  ;;  %v6217_v0 = vpack.c.b16 %v6200_v61, %v6199_v27  ;;  %v10659_v10 = vrot.slane %v10641_v49, 9 }
 0x2f5   : > { %10679 = vmatmul.msk.bf16.gmra.mxu2 %vm308_vm5, %v6216_v29  ;;  %6436 = vst.msk [vmem:[#allocation2 + $0x40] sm:$0xff] %vm450_vm11, %v6404_v13  ;;  %v7191_v34 = vadd.f32 %v7159_v39, %v7089_v43  ;;  %v6920_v43 = vshrl.u32 %v10726_v9, 16  ;;  %v6908_v47 = vrot.slane %v6907_v42, 4  ;;  %v6918_v13 = vrot.slane %v13830_v26, 4 }
 0x2f6   : > { %v7004_v32 = vpack.c.b16 %v6986_v3, %v6985_v5  ;;  %v6165_v54 = vrot.slane %v6163_v59, 4  ;;  %v6166_v45 = vrot.slane %v10643_v53, 5  ;;  %v5660_v30 = vrot.slane %v5658_v14, 4  ;;  %v10729_v3 = vld [vmem:[%s11437_s6 + $0xd4] sm:$0x3] }
 0x2f7   : > { %7223 = vst.msk [vmem:[#allocation2 + $0x38] sm:$0xff] %vm450_vm11, %v7191_v34  ;;  %v6922_v35 = vrot.slane %v6920_v43, 5  ;;  %v10728_v34 = vld [vmem:[%s11437_s6 + $0xd0] sm:$0xf]  ;;  %v5700_v4 = vunpack.c.l.b16 %v5643_v20  ;;  %v10573_v43 = vld [vmem:[%s11437_s6 + $0xd4] sm:$0x1]  ;;  %v6917_v5 = vsel %vm11499_vm10, %v6908_v47, %v13830_v26 }
 0x2f8   : > { %v13816_v40 = vpop.f32.mrf.mxu2  ;;  %v5809_v38 = vpop.f32.mrf.mxu1  ;;  %v6167_v61 = vsel %vm11441_vm6, %v6165_v54, %v6166_v45  ;;  %v6948_v11 = vshrl.u32 %v10729_v3, 16  ;;  %v6951_v42 = vshll.u32 %v10729_v3, 16  ;;  %v11156_v26 = vld [vmem:[%s11437_s6 + $0xcc] sm:$0xff]  ;;  %v10870_v53 = vld [vmem:[%s11437_s6 + $0x24] sm:$0xf] }
 0x2f9   : > { %v5906_v46 = vadd.f32 %v5874_v52, %v5809_v38  ;;  %v5090_v8 = vpop.f32.mrf.mxu0  ;;  %v5154_v14 = vld [vmem:[#allocation2 + $0x70] sm:$0xff] }
 0x2fa   : > { %v6373_v63 = vld [vmem:[#allocation2 + $0x48] sm:$0xff]  ;;  %v5184_v29 = vadd.f32 %v5152_v51, %v5090_v8  ;;  %v6941_v8 = vshll.u32 %v10728_v34, 16 }
 0x2fb   : > { %v6405_v21 = vadd.f32 %v6373_v63, %v13784_v55  ;;  %5938 = vst.msk [vmem:[#allocation2 + $0x50] sm:$0xff] %vm450_vm11, %v5906_v46  ;;  %10593 = vmatmul.msk.bf16.gmra.mxu1 %vm308_vm5, %v5716_v19  ;;  %10524 = vmatmul.msk.bf16.gmra.mxu0 %vm308_vm5, %v11155_v37  ;;  %v5645_v55 = vshrl.u32 %v10571_v41, 16  ;;  %v5875_v39 = vld [vmem:[#allocation2 + $0x58] sm:$0xff]  ;;  %v6926_v19 = vor.u32 %v6925_v57, %v6922_v35  ;;  %v6938_v46 = vshrl.u32 %v10728_v34, 16 }
 0x2fc   : > { %v7094_v1 = vpop.f32.mrf.mxu3  ;;  %v7160_v60 = vld [vmem:[#allocation2 + $0x40] sm:$0xff]  ;;  %5216 = vst.msk [vmem:[#allocation2 + $0x60] sm:$0xff] %vm450_vm11, %v5184_v29  ;;  %v5661_v41 = vor.u32 %v5660_v30, %v13849_v28  ;;  %v5664_v63 = vshll.u32 %v10573_v43, 16  ;;  %v7657_v34 = vshrl.u32 %v10870_v53, 16 }
 0x2fd   : > { %6437 = vst.msk [vmem:[#allocation2 + $0x48] sm:$0xff] %vm450_vm11, %v6405_v21  ;;  %v7192_v25 = vadd.f32 %v7160_v60, %v7092_v24  ;;  %v10727_v24 = vld [vmem:[%s11437_s6 + $0xcc] sm:$0xe]  ;;  %v5647_v9 = vrot.slane %v5645_v55, 4  ;;  %v6927_v27 = vsel %vm11499_vm10, %v6918_v13, %v6926_v19  ;;  %v5717_v21 = vpack.c.b16 %v5700_v4, %v13838_v18  ;;  %v10871_v18 = vld [vmem:[%s11437_s6 + $0x28] sm:$0xf] }
 0x2fe   : > { %v6929_v31 = vshrl.u32 %v10727_v24, 16  ;;  %v6932_v38 = vshll.u32 %v10727_v24, 16  ;;  %v6940_v35 = vrot.slane %v6938_v46, 5  ;;  %v6988_v49 = vunpack.c.l.b16 %v6927_v27 }
 0x2ff   : > { %7224 = vst.msk [vmem:[#allocation2 + $0x40] sm:$0xff] %vm450_vm11, %v7192_v25  ;;  %v5651_v62 = vor.u32 %v5650_v16, %v5647_v9  ;;  %v6202_v55 = vunpack.c.l.b16 %v6167_v61  ;;  %v13874_v25 = vld [vmem:[%s11437_s6 + $0x28] sm:$0xf]  ;;  %v5662_v20 = vrot.slane %v5661_v41, 4  ;;  %v5666_v47 = vrot.slane %v5664_v63, 5 }
 0x300   : > { %v13841_v50 = vpop.f32.mrf.mxu2  ;;  %v5811_v12 = vpop.f32.mrf.mxu1  ;;  %v6931_v29 = vrot.slane %v6929_v31, 5  ;;  %v6934_v48 = vrot.slane %v6932_v38, 6  ;;  %v8430_v9 = vrot.slane %v13874_v25, 5  ;;  %v7666_v16 = vshll.u32 %v10871_v18, 16 }
 0x301   : > { %10749 = vmatmul.msk.bf16.gmra.mxu3 %vm308_vm5, %v7004_v32  ;;  %v5907_v56 = vadd.f32 %v5875_v39, %v5811_v12  ;;  %v5092_v33 = vpop.f32.mrf.mxu0  ;;  %v6987_v32 = vunpack.c.l.b16 %v6917_v5  ;;  %v6950_v12 = vrot.slane %v6948_v11, 5  ;;  %v6953_v39 = vrot.slane %v6951_v42, 6 }
 0x302   : > { %v6374_v23 = vld [vmem:[#allocation2 + $0x50] sm:$0xff]  ;;  %v5185_v36 = vadd.f32 %v5153_v6, %v5092_v33  ;;  %v6935_v24 = vor.u32 %v6934_v48, %v6931_v29  ;;  %v10940_v6 = vld [vmem:[%s11437_s6 + $0x24] sm:$0xe]  ;;  %v5667_v31 = vsel %vm11477_vm9, %v5662_v20, %v5666_v47  ;;  %v7659_v61 = vrot.slane %v7657_v34, 4  ;;  %v5155_v29 = vld [vmem:[#allocation2 + $0x78] sm:$0xff] }
 0x303   : > { %v6406_v52 = vadd.f32 %v6374_v23, %v13816_v40  ;;  %5939 = vst.msk [vmem:[#allocation2 + $0x58] sm:$0xff] %vm450_vm11, %v5907_v56  ;;  %v6164_v40 = vsel %vm11441_vm6, %v10659_v10, %v6163_v59  ;;  %v5876_v60 = vld [vmem:[#allocation2 + $0x60] sm:$0xff]  ;;  %v7005_v33 = vpack.c.b16 %v6988_v49, %v6987_v32  ;;  %v10942_v23 = vld [vmem:[%s11437_s6 + $0x2c] sm:$0x1]  ;;  %v10988_v46 = vrot.slane %v10940_v6, 9 }
 0x304   : > { %v7097_v37 = vpop.f32.mrf.mxu3  ;;  %v7161_v51 = vld [vmem:[#allocation2 + $0x48] sm:$0xff]  ;;  %5217 = vst.msk [vmem:[#allocation2 + $0x68] sm:$0xff] %vm450_vm11, %v5185_v36  ;;  %v6201_v59 = vunpack.c.l.b16 %v6164_v40  ;;  %v7670_v36 = vshrl.u32 %v10871_v18, 16  ;;  %v6936_v38 = vrot.slane %v6935_v24, 4 }
 0x305   : > { %10680 = vmatmul.msk.bf16.gmra.mxu2 %vm308_vm5, %v6217_v0  ;;  %6438 = vst.msk [vmem:[#allocation2 + $0x50] sm:$0xff] %vm450_vm11, %v6406_v52  ;;  %v7193_v15 = vadd.f32 %v7161_v51, %v7094_v1  ;;  %v6943_v1 = vrot.slane %v6941_v8, 6  ;;  %v5652_v0 = vrot.slane %v5651_v62, 4  ;;  %v11026_v52 = vld [vmem:[%s11437_s6 + $0x24] sm:$0xe]  ;;  %v8432_v8 = vrot.slane %v8430_v9, 4 }
 0x306   : > { %v6218_v4 = vpack.c.b16 %v6202_v55, %v6201_v59  ;;  %v11027_v51 = vld [vmem:[%s11437_s6 + $0x28] sm:$0xf]  ;;  %v13901_v62 = vrot.slane %v7666_v16, 5  ;;  %v10872_v48 = vld [vmem:[%s11437_s6 + $0x2c] sm:$0x1]  ;;  %v7672_v11 = vrot.slane %v7670_v36, 4  ;;  %v5702_v59 = vunpack.c.l.b16 %v5667_v31 }
 0x307   : > { %7225 = vst.msk [vmem:[#allocation2 + $0x48] sm:$0xff] %vm450_vm11, %v7193_v15  ;;  %v13881_v45 = vor.u32 %v6943_v1, %v6940_v35  ;;  %v5657_v43 = vsel %vm11477_vm9, %v5652_v0, %v13849_v28  ;;  %v8433_v28 = vrot.slane %v10942_v23, 5  ;;  %v8881_v42 = vshrl.u32 %v11026_v52, 16  ;;  %v10874_v23 = vld [vmem:[%s11437_s6 + $0x34] sm:$0xf] }
 0x308   : > { %v13869_v2 = vpop.f32.mrf.mxu2  ;;  %v5814_v57 = vpop.f32.mrf.mxu1  ;;  %v5701_v1 = vunpack.c.l.b16 %v5657_v43  ;;  %v7676_v0 = vshll.u32 %v10872_v48, 16  ;;  %v7673_v47 = vor.u32 %v7672_v11, %v13901_v62  ;;  %v5156_v43 = vld [vmem:[#allocation2 + $0x80] sm:$0xff]  ;;  %v7694_v48 = vshrl.u32 %v10874_v23, 16 }
 0x309   : > { %v5908_v7 = vadd.f32 %v5876_v60, %v5814_v57  ;;  %v5095_v44 = vpop.f32.mrf.mxu0  ;;  %v6946_v3 = vrot.slane %v13881_v45, 4  ;;  %v8890_v57 = vshrl.u32 %v11027_v51, 16  ;;  %v8893_v60 = vshll.u32 %v11027_v51, 16 }
 0x30a   : > { %v6375_v13 = vld [vmem:[#allocation2 + $0x58] sm:$0xff]  ;;  %v5186_v10 = vadd.f32 %v5154_v14, %v5095_v44  ;;  %v6945_v55 = vsel %vm11499_vm10, %v6936_v38, %v13881_v45  ;;  %v8434_v44 = vsel %vm11441_vm6, %v8432_v8, %v8433_v28  ;;  %v8883_v18 = vrot.slane %v8881_v42, 5  ;;  %v13934_v28 = vld [vmem:[%s11437_s6 + $0x34] sm:$0xf] }
 0x30b   : > { %v6407_v19 = vadd.f32 %v6375_v13, %v13841_v50  ;;  %5940 = vst.msk [vmem:[#allocation2 + $0x60] sm:$0xff] %vm450_vm11, %v5908_v7  ;;  %10594 = vmatmul.msk.bf16.gmra.mxu1 %vm308_vm5, %v5717_v21  ;;  %10525 = vmatmul.msk.bf16.gmra.mxu0 %vm308_vm5, %v11156_v26  ;;  %v7660_v50 = vshll.u32 %v10870_v53, 16  ;;  %v5877_v40 = vld [vmem:[#allocation2 + $0x68] sm:$0xff]  ;;  %v8884_v21 = vshll.u32 %v11026_v52, 16  ;;  %v8895_v24 = vrot.slane %v8893_v60, 6 }
 0x30c   : > { %v7099_v54 = vpop.f32.mrf.mxu3  ;;  %v7162_v56 = vld [vmem:[#allocation2 + $0x50] sm:$0xff]  ;;  %5218 = vst.msk [vmem:[#allocation2 + $0x70] sm:$0xff] %vm450_vm11, %v5186_v10  ;;  %v11028_v53 = vld [vmem:[%s11437_s6 + $0x2c] sm:$0x3]  ;;  %v8892_v10 = vrot.slane %v8890_v57, 5  ;;  %v5718_v45 = vpack.c.b16 %v5702_v59, %v5701_v1  ;;  %v6989_v34 = vunpack.c.l.b16 %v6945_v55  ;;  %v7674_v31 = vrot.slane %v7673_v47, 4 }
 0x30d   : > { %6439 = vst.msk [vmem:[#allocation2 + $0x58] sm:$0xff] %vm450_vm11, %v6407_v19  ;;  %v7194_v30 = vadd.f32 %v7162_v56, %v7097_v37  ;;  %v6954_v37 = vor.u32 %v6953_v39, %v6950_v12  ;;  %v7662_v15 = vrot.slane %v7660_v50, 5  ;;  %v8886_v13 = vrot.slane %v8884_v21, 6  ;;  %v10945_v59 = vld [vmem:[%s11437_s6 + $0x38] sm:$0x1] }
 0x30e   : > { %v8900_v12 = vshrl.u32 %v11028_v53, 16  ;;  %v8903_v39 = vshll.u32 %v11028_v53, 16  ;;  %v8544_v50 = vunpack.c.l.b16 %v8434_v44  ;;  %v7678_v38 = vrot.slane %v7676_v0, 5 }
 0x30f   : > { %7226 = vst.msk [vmem:[#allocation2 + $0x50] sm:$0xff] %vm450_vm11, %v7194_v30  ;;  %v6955_v25 = vsel %vm11499_vm10, %v6946_v3, %v6954_v37  ;;  %v7663_v14 = vor.u32 %v7662_v15, %v7659_v61  ;;  %v10873_v30 = vld [vmem:[%s11437_s6 + $0x30] sm:$0xf]  ;;  %v8887_v52 = vor.u32 %v8886_v13, %v8883_v18  ;;  %v8437_v55 = vrot.slane %v13934_v28, 5 }
 0x310   : > { %v13896_v5 = vpop.f32.mrf.mxu2  ;;  %v5816_v27 = vpop.f32.mrf.mxu1  ;;  %v8902_v8 = vrot.slane %v8900_v12, 5  ;;  %v8905_v51 = vrot.slane %v8903_v39, 6  ;;  %v7681_v61 = vshrl.u32 %v10873_v30, 16  ;;  %v7684_v15 = vshll.u32 %v10873_v30, 16 }
 0x311   : > { %10750 = vmatmul.msk.bf16.gmra.mxu3 %vm308_vm5, %v7005_v33  ;;  %v5909_v41 = vadd.f32 %v5877_v40, %v5816_v27  ;;  %v5097_v63 = vpop.f32.mrf.mxu0  ;;  %v7664_v16 = vrot.slane %v7663_v14, 4  ;;  %v8888_v21 = vrot.slane %v8887_v52, 4  ;;  %v7679_v1 = vsel %vm11477_vm9, %v7674_v31, %v7678_v38 }
 0x312   : > { %v6376_v26 = vld [vmem:[#allocation2 + $0x60] sm:$0xff]  ;;  %v5187_v35 = vadd.f32 %v5155_v29, %v5097_v63  ;;  %v8906_v60 = vor.u32 %v8905_v51, %v8902_v8  ;;  %v7683_v53 = vrot.slane %v7681_v61, 4  ;;  %v7696_v0 = vrot.slane %v7694_v48, 4 }
 0x313   : > { %v6408_v32 = vadd.f32 %v6376_v26, %v13869_v2  ;;  %5941 = vst.msk [vmem:[#allocation2 + $0x68] sm:$0xff] %vm450_vm11, %v5909_v41  ;;  %v8431_v2 = vsel %vm11441_vm6, %v10988_v46, %v8430_v9  ;;  %v11161_v9 = vld [vmem:[%s11437_s6 + $0x24] sm:$0xff]  ;;  %v5878_v33 = vld [vmem:[#allocation2 + $0x70] sm:$0xff]  ;;  %v13926_v46 = vor.u32 %v8895_v24, %v8892_v10  ;;  %v7690_v41 = vshll.u32 %v10874_v23, 16 }
 0x314   : > { %v7102_v49 = vpop.f32.mrf.mxu3  ;;  %v7163_v7 = vld [vmem:[#allocation2 + $0x58] sm:$0xff]  ;;  %5219 = vst.msk [vmem:[#allocation2 + $0x78] sm:$0xff] %vm450_vm11, %v5187_v35  ;;  %v8543_v6 = vunpack.c.l.b16 %v8431_v2  ;;  %v7669_v29 = vsel %vm11477_vm9, %v7664_v16, %v13901_v62  ;;  %v11029_v26 = vld [vmem:[%s11437_s6 + $0x30] sm:$0xe]  ;;  %v11030_v35 = vld [vmem:[%s11437_s6 + $0x34] sm:$0xf]  ;;  %v8044_v12 = vunpack.c.l.b16 %v7679_v1 }
 0x315   : > { %10681 = vmatmul.msk.bf16.gmra.mxu2 %vm308_vm5, %v6218_v4  ;;  %6440 = vst.msk [vmem:[#allocation2 + $0x60] sm:$0xff] %vm450_vm11, %v6408_v32  ;;  %v7195_v20 = vadd.f32 %v7163_v7, %v7099_v54  ;;  %v6990_v54 = vunpack.c.l.b16 %v6955_v25  ;;  %v8898_v57 = vrot.slane %v13926_v46, 4  ;;  %v10943_v32 = vld [vmem:[%s11437_s6 + $0x30] sm:$0xe]  ;;  %v13953_v25 = vunpack.c.l.b16 %v7669_v29  ;;  %v5157_v24 = vld [vmem:[#allocation2 + $0x88] sm:$0xff] }
 0x316   : > { %v8575_v42 = vpack.c.b16 %v8544_v50, %v8543_v6  ;;  %v7686_v7 = vrot.slane %v7684_v15, 5  ;;  %v13956_v2 = vrot.slane %v7690_v41, 5  ;;  %v8912_v47 = vshll.u32 %v11029_v26, 16  ;;  %v11031_v6 = vld [vmem:[%s11437_s6 + $0x38] sm:$0x3]  ;;  %v5158_v1 = vld [vmem:[#allocation2 + $0x90] sm:$0xff] }
 0x317   : > { %7227 = vst.msk [vmem:[#allocation2 + $0x58] sm:$0xff] %vm450_vm11, %v7195_v20  ;;  %v8909_v20 = vshrl.u32 %v11029_v26, 16  ;;  %v8918_v18 = vshrl.u32 %v11030_v35, 16  ;;  %v8897_v39 = vsel %vm11499_vm10, %v8888_v21, %v13926_v46  ;;  %v8440_v30 = vrot.slane %v10945_v59, 5  ;;  %v10877_v21 = vld [vmem:[%s11437_s6 + $0x40] sm:$0xf] }
 0x318   : > { %v13921_v19 = vpop.f32.mrf.mxu2  ;;  %v5819_v56 = vpop.f32.mrf.mxu1  ;;  %v7687_v23 = vor.u32 %v7686_v7, %v7683_v53  ;;  %v8914_v38 = vrot.slane %v8912_v47, 6  ;;  %v8931_v46 = vshll.u32 %v11031_v6, 16  ;;  %v8075_v8 = vpack.c.b16 %v8044_v12, %v13953_v25 }
 0x319   : > { %v5910_v36 = vadd.f32 %v5878_v33, %v5819_v56  ;;  %v5100_v4 = vpop.f32.mrf.mxu0  ;;  %v8907_v56 = vsel %vm11499_vm10, %v8898_v57, %v8906_v60  ;;  %v10989_v33 = vrot.slane %v10943_v32, 9  ;;  %v8911_v31 = vrot.slane %v8909_v20, 5 }
 0x31a   : > { %v6377_v3 = vld [vmem:[#allocation2 + $0x68] sm:$0xff]  ;;  %v5188_v37 = vadd.f32 %v5156_v43, %v5100_v4  ;;  %v7697_v43 = vor.u32 %v7696_v0, %v13956_v2  ;;  %v8920_v52 = vrot.slane %v8918_v18, 5  ;;  %v9331_v28 = vunpack.c.l.b16 %v8897_v39 }
 0x31b   : > { %v6409_v27 = vadd.f32 %v6377_v3, %v13896_v5  ;;  %5942 = vst.msk [vmem:[#allocation2 + $0x70] sm:$0xff] %vm450_vm11, %v5910_v36  ;;  %10595 = vmatmul.msk.bf16.gmra.mxu1 %vm308_vm5, %v5718_v45  ;;  %10854 = vmatmul.msk.bf16.vlgmr.msrb.gmra.mxu0 %vm308_vm5, %v11161_v9  ;;  %v7006_v5 = vpack.c.b16 %v6990_v54, %v6989_v34  ;;  %v5879_v14 = vld [vmem:[#allocation2 + $0x78] sm:$0xff]  ;;  %v8921_v45 = vshll.u32 %v11030_v35, 16  ;;  %v8439_v54 = vrot.slane %v8437_v55, 4 }
 0x31c   : > { %v13931_v40 = vpop.f32.mrf.mxu3  ;;  %v7164_v63 = vld [vmem:[#allocation2 + $0x60] sm:$0xff]  ;;  %5220 = vst.msk [vmem:[#allocation2 + $0x80] sm:$0xff] %vm450_vm11, %v5188_v37  ;;  %v8928_v37 = vshrl.u32 %v11031_v6, 16  ;;  %v9332_v61 = vunpack.c.l.b16 %v8907_v56  ;;  %v8438_v15 = vsel %vm11441_vm6, %v10989_v33, %v8437_v55  ;;  %v7688_v29 = vrot.slane %v7687_v23, 4 }
 0x31d   : > { %6441 = vst.msk [vmem:[#allocation2 + $0x68] sm:$0xff] %vm450_vm11, %v6409_v27  ;;  %v7196_v11 = vadd.f32 %v7164_v63, %v7102_v49  ;;  %v10875_v49 = vld [vmem:[%s11437_s6 + $0x38] sm:$0x1]  ;;  %v8923_v3 = vrot.slane %v8921_v45, 6  ;;  %v11162_v27 = vld [vmem:[%s11437_s6 + $0x30] sm:$0xff]  ;;  %v8441_v41 = vsel %vm11441_vm6, %v8439_v54, %v8440_v30  ;;  %v7698_v48 = vrot.slane %v7697_v43, 4 }
 0x31e   : > { %v7700_v36 = vshll.u32 %v10875_v49, 16  ;;  %v8930_v60 = vrot.slane %v8928_v37, 5  ;;  %v8933_v32 = vrot.slane %v8931_v46, 6  ;;  %v8545_v25 = vunpack.c.l.b16 %v8438_v15  ;;  %v13986_v49 = vld [vmem:[%s11437_s6 + $0x40] sm:$0xf] }
 0x31f   : > { %7228 = vst.msk [vmem:[#allocation2 + $0x60] sm:$0xff] %vm450_vm11, %v7196_v11  ;;  %v13983_v57 = vor.u32 %v8923_v3, %v8920_v52  ;;  %v9363_v0 = vpack.c.b16 %v9332_v61, %v9331_v28  ;;  %v7714_v20 = vshll.u32 %v10877_v21, 16  ;;  %v7718_v47 = vshrl.u32 %v10877_v21, 16  ;;  %v10948_v56 = vld [vmem:[%s11437_s6 + $0x44] sm:$0x1]  ;;  %v5159_v3 = vld [vmem:[#allocation2 + $0x98] sm:$0xff] }
 0x320   : > { %v13951_v62 = vpop.f32.mrf.mxu2  ;;  %v5821_v44 = vpop.f32.mrf.mxu1  ;;  %v7702_v11 = vrot.slane %v7700_v36, 5  ;;  %v8934_v45 = vor.u32 %v8933_v32, %v8930_v60  ;;  %v10878_v6 = vld [vmem:[%s11437_s6 + $0x44] sm:$0x1]  ;;  %v8447_v15 = vrot.slane %v10948_v56, 5 }
 0x321   : > { %10751 = vmatmul.msk.bf16.gmra.mxu3 %vm308_vm5, %v7006_v5  ;;  %v5911_v13 = vadd.f32 %v5879_v14, %v5821_v44  ;;  %v5102_v10 = vpop.f32.mrf.mxu0  ;;  %v8926_v39 = vrot.slane %v13983_v57, 4  ;;  %v7720_v30 = vrot.slane %v7718_v47, 4  ;;  %v11163_v47 = vld [vmem:[%s11437_s6 + $0x3c] sm:$0xff] }
 0x322   : > { %v6378_v9 = vld [vmem:[#allocation2 + $0x70] sm:$0xff]  ;;  %v5189_v34 = vadd.f32 %v5157_v24, %v5102_v10  ;;  %v7703_v10 = vsel %vm11477_vm9, %v7698_v48, %v7702_v11 }
 0x323   : > { %v6410_v50 = vadd.f32 %v6378_v9, %v13921_v19  ;;  %5943 = vst.msk [vmem:[#allocation2 + $0x78] sm:$0xff] %vm450_vm11, %v5911_v13  ;;  %v5880_v5 = vld [vmem:[#allocation2 + $0x80] sm:$0xff]  ;;  %v8546_v13 = vunpack.c.l.b16 %v8441_v41  ;;  %v8444_v9 = vrot.slane %v13986_v49, 5  ;;  %v14012_v43 = vunpack.c.l.b16 %v7703_v10 }
 0x324   : > { %v7107_v16 = vpop.f32.mrf.mxu3  ;;  %v7165_v4 = vld [vmem:[#allocation2 + $0x68] sm:$0xff]  ;;  %5221 = vst.msk [vmem:[#allocation2 + $0x88] sm:$0xff] %vm450_vm11, %v5189_v34  ;;  %v10946_v34 = vld [vmem:[%s11437_s6 + $0x3c] sm:$0xe]  ;;  %v8935_v37 = vsel %vm11499_vm10, %v8926_v39, %v8934_v45  ;;  %v5160_v39 = vld [vmem:[#allocation2 + $0xa0] sm:$0xff] }
 0x325   : > { %11010 = vmatmul.msk.bf16.vlgmr.msrb.gmra.mxu2 %vm308_vm5, %v8575_v42  ;;  %6442 = vst.msk [vmem:[#allocation2 + $0x70] sm:$0xff] %vm450_vm11, %v6410_v50  ;;  %v7197_v19 = vadd.f32 %v7165_v4, %v13931_v40  ;;  %v10876_v40 = vld [vmem:[%s11437_s6 + $0x3c] sm:$0xf]  ;;  %v8915_v42 = vor.u32 %v8914_v38, %v8911_v31  ;;  %v14007_v50 = vrot.slane %v7714_v20, 5  ;;  %v8576_v36 = vpack.c.b16 %v8546_v13, %v8545_v25  ;;  %v10879_v25 = vld [vmem:[%s11437_s6 + $0x48] sm:$0xf] }
 0x326   : > { %v7705_v53 = vshrl.u32 %v10876_v40, 16  ;;  %v7708_v7 = vshll.u32 %v10876_v40, 16  ;;  %v11032_v38 = vld [vmem:[%s11437_s6 + $0x3c] sm:$0xe]  ;;  %v10990_v46 = vrot.slane %v10946_v34, 9  ;;  %v7724_v40 = vshll.u32 %v10878_v6, 16 }
 0x327   : > { %7229 = vst.msk [vmem:[#allocation2 + $0x68] sm:$0xff] %vm450_vm11, %v7197_v19  ;;  %v8916_v24 = vrot.slane %v8915_v42, 4  ;;  %v8937_v48 = vshrl.u32 %v11032_v38, 16  ;;  %v8940_v11 = vshll.u32 %v11032_v38, 16  ;;  %v9334_v60 = vunpack.c.l.b16 %v8935_v37  ;;  %v14040_v45 = vld [vmem:[%s11437_s6 + $0x4c] sm:$0xf] }
 0x328   : > { %v13974_v51 = vpop.f32.mrf.mxu2  ;;  %v5824_v63 = vpop.f32.mrf.mxu1  ;;  %v7707_v33 = vrot.slane %v7705_v53, 4  ;;  %v7710_v54 = vrot.slane %v7708_v7, 5  ;;  %v8445_v32 = vsel %vm11441_vm6, %v10990_v46, %v8444_v9  ;;  %v7726_v7 = vrot.slane %v7724_v40, 5  ;;  %v10949_v37 = vld [vmem:[%s11437_s6 + $0x48] sm:$0xe] }
 0x329   : > { %v5912_v26 = vadd.f32 %v5880_v5, %v5824_v63  ;;  %v5105_v35 = vpop.f32.mrf.mxu0  ;;  %v8925_v31 = vsel %vm11499_vm10, %v8916_v24, %v13983_v57  ;;  %v11034_v57 = vld [vmem:[%s11437_s6 + $0x44] sm:$0x3]  ;;  %v7732_v34 = vshll.u32 %v10879_v25, 16  ;;  %v8547_v6 = vunpack.c.l.b16 %v8445_v32 }
 0x32a   : > { %v6379_v59 = vld [vmem:[#allocation2 + $0x78] sm:$0xff]  ;;  %v5190_v55 = vadd.f32 %v5158_v1, %v5105_v35  ;;  %v7711_v41 = vor.u32 %v7710_v54, %v7707_v33  ;;  %v9333_v1 = vunpack.c.l.b16 %v8925_v31  ;;  %v8959_v10 = vshll.u32 %v11034_v57, 16 }
 0x32b   : > { %v6411_v44 = vadd.f32 %v6379_v59, %v13951_v62  ;;  %5944 = vst.msk [vmem:[#allocation2 + $0x80] sm:$0xff] %vm450_vm11, %v5912_v26  ;;  %10924 = vmatmul.msk.bf16.vlgmr.msrb.gmra.mxu1 %vm308_vm5, %v8075_v8  ;;  %10855 = vmatmul.msk.bf16.gmra.mxu0 %vm308_vm5, %v11162_v27  ;;  %v7693_v62 = vsel %vm11477_vm9, %v7688_v29, %v13956_v2  ;;  %v5881_v23 = vld [vmem:[#allocation2 + $0x88] sm:$0xff]  ;;  %v8446_v8 = vrot.slane %v8444_v9, 4  ;;  %v11033_v27 = vld [vmem:[%s11437_s6 + $0x40] sm:$0xf]  ;;  %v7729_v9 = vshrl.u32 %v10879_v25, 16 }
 0x32c   : > { %v7109_v14 = vpop.f32.mrf.mxu3  ;;  %v7166_v18 = vld [vmem:[#allocation2 + $0x70] sm:$0xff]  ;;  %5222 = vst.msk [vmem:[#allocation2 + $0x90] sm:$0xff] %vm450_vm11, %v5190_v55  ;;  %v14010_v4 = vunpack.c.l.b16 %v7693_v62  ;;  %v7721_v29 = vor.u32 %v7720_v30, %v14007_v50  ;;  %v8946_v21 = vshrl.u32 %v11033_v27, 16  ;;  %v8949_v26 = vshll.u32 %v11033_v27, 16 }
 0x32d   : > { %6443 = vst.msk [vmem:[#allocation2 + $0x78] sm:$0xff] %vm450_vm11, %v6411_v44  ;;  %v7198_v12 = vadd.f32 %v7166_v18, %v7107_v16  ;;  %v8448_v59 = vsel %vm11441_vm6, %v8446_v8, %v8447_v15  ;;  %v7712_v55 = vrot.slane %v7711_v41, 4  ;;  %v8939_v44 = vrot.slane %v8937_v48, 5  ;;  %v11035_v48 = vld [vmem:[%s11437_s6 + $0x48] sm:$0xe] }
 0x32e   : > { %v7722_v53 = vrot.slane %v7721_v29, 4  ;;  %v8948_v18 = vrot.slane %v8946_v21, 5  ;;  %v8951_v13 = vrot.slane %v8949_v26, 6  ;;  %v8956_v62 = vshrl.u32 %v11034_v57, 16 }
 0x32f   : > { %7230 = vst.msk [vmem:[#allocation2 + $0x70] sm:$0xff] %vm450_vm11, %v7198_v12  ;;  %v9364_v54 = vpack.c.b16 %v9334_v60, %v9333_v1  ;;  %v7717_v30 = vsel %vm11477_vm9, %v7712_v55, %v14007_v50  ;;  %v7731_v46 = vrot.slane %v7729_v9, 4  ;;  %v7734_v8 = vrot.slane %v7732_v34, 5  ;;  %v5161_v60 = vld [vmem:[#allocation2 + $0xa8] sm:$0xff] }
 0x330   : > { %v14004_v2 = vpop.f32.mrf.mxu2  ;;  %v5826_v16 = vpop.f32.mrf.mxu1  ;;  %v14053_v50 = vor.u32 %v8951_v13, %v8948_v18  ;;  %v14062_v40 = vunpack.c.l.b16 %v7717_v30  ;;  %v10991_v26 = vrot.slane %v10949_v37, 9 }
 0x331   : > { %11080 = vmatmul.msk.bf16.vlgmr.msrb.gmra.mxu3 %vm308_vm5, %v9363_v0  ;;  %v5913_v52 = vadd.f32 %v5881_v23, %v5826_v16  ;;  %v5107_v19 = vpop.f32.mrf.mxu0  ;;  %v10880_v16 = vld [vmem:[%s11437_s6 + $0x4c] sm:$0xf] }
 0x332   : > { %v6380_v28 = vld [vmem:[#allocation2 + $0x80] sm:$0xff]  ;;  %v5191_v61 = vadd.f32 %v5159_v3, %v5107_v19  ;;  %v8451_v19 = vrot.slane %v14040_v45, 5  ;;  %v7738_v27 = vshll.u32 %v10880_v16, 16 }
 0x333   : > { %v6412_v63 = vadd.f32 %v6380_v28, %v13974_v51  ;;  %5945 = vst.msk [vmem:[#allocation2 + $0x88] sm:$0xff] %vm450_vm11, %v5913_v52  ;;  %v8076_v51 = vpack.c.b16 %v14012_v43, %v14010_v4  ;;  %v5882_v20 = vld [vmem:[#allocation2 + $0x90] sm:$0xff]  ;;  %v8548_v4 = vunpack.c.l.b16 %v8448_v59  ;;  %v7727_v43 = vsel %vm11477_vm9, %v7722_v53, %v7726_v7 }
 0x334   : > { %v7112_v5 = vpop.f32.mrf.mxu3  ;;  %v7167_v42 = vld [vmem:[#allocation2 + $0x78] sm:$0xff]  ;;  %5223 = vst.msk [vmem:[#allocation2 + $0x98] sm:$0xff] %vm450_vm11, %v5191_v61  ;;  %v8961_v52 = vrot.slane %v8959_v10, 6  ;;  %v10951_v28 = vld [vmem:[%s11437_s6 + $0x50] sm:$0x1]  ;;  %v7742_v61 = vshrl.u32 %v10880_v16, 16  ;;  %v7735_v59 = vor.u32 %v7734_v8, %v7731_v46  ;;  %v8452_v45 = vsel %vm11441_vm6, %v10991_v26, %v8451_v19 }
 0x335   : > { %11011 = vmatmul.msk.bf16.gmra.mxu2 %vm308_vm5, %v8576_v36  ;;  %6444 = vst.msk [vmem:[#allocation2 + $0x80] sm:$0xff] %vm450_vm11, %v6412_v63  ;;  %v7199_v35 = vadd.f32 %v7167_v42, %v7109_v14  ;;  %v8942_v14 = vrot.slane %v8940_v11, 6  ;;  %v8577_v41 = vpack.c.b16 %v8548_v4, %v8547_v6  ;;  %v14064_v63 = vunpack.c.l.b16 %v7727_v43  ;;  %v10881_v7 = vld [vmem:[%s11437_s6 + $0x50] sm:$0x1] }
 0x336   : > { %v8954_v42 = vrot.slane %v14053_v50, 4  ;;  %v8454_v32 = vrot.slane %v10951_v28, 5  ;;  %v14070_v55 = vrot.slane %v7738_v27, 5  ;;  %v7748_v34 = vshll.u32 %v10881_v7, 16  ;;  %v14096_v27 = vld [vmem:[%s11437_s6 + $0x58] sm:$0xf] }
 0x337   : > { %7231 = vst.msk [vmem:[#allocation2 + $0x78] sm:$0xff] %vm450_vm11, %v7199_v35  ;;  %v8943_v31 = vor.u32 %v8942_v14, %v8939_v44  ;;  %v8453_v35 = vrot.slane %v8451_v19, 4  ;;  %v7744_v44 = vrot.slane %v7742_v61, 4  ;;  %v8965_v14 = vshrl.u32 %v11035_v48, 16  ;;  %v10882_v28 = vld [vmem:[%s11437_s6 + $0x54] sm:$0xf] }
 0x338   : > { %v14036_v49 = vpop.f32.mrf.mxu2  ;;  %v5829_v0 = vpop.f32.mrf.mxu1  ;;  %v8077_v10 = vpack.c.b16 %v14064_v63, %v14062_v40  ;;  %v8549_v37 = vunpack.c.l.b16 %v8452_v45  ;;  %v7750_v8 = vrot.slane %v7748_v34, 5  ;;  %v5163_v34 = vld [vmem:[#allocation2 + $0xb8] sm:$0xff] }
 0x339   : > { %v5914_v24 = vadd.f32 %v5882_v20, %v5829_v0  ;;  %v5110_v12 = vpop.f32.mrf.mxu0  ;;  %v8944_v29 = vrot.slane %v8943_v31, 4  ;;  %v8968_v0 = vshll.u32 %v11035_v48, 16  ;;  %v8455_v9 = vsel %vm11441_vm6, %v8453_v35, %v8454_v32  ;;  %v10883_v48 = vld [vmem:[%s11437_s6 + $0x58] sm:$0xf]  ;;  %v10954_v32 = vld [vmem:[%s11437_s6 + $0x5c] sm:$0x1] }
 0x33a   : > { %v6381_v56 = vld [vmem:[#allocation2 + $0x88] sm:$0xff]  ;;  %v5192_v33 = vadd.f32 %v5160_v39, %v5110_v12  ;;  %v11037_v12 = vld [vmem:[%s11437_s6 + $0x50] sm:$0x3]  ;;  %v8550_v46 = vunpack.c.l.b16 %v8455_v9 }
 0x33b   : > { %v6413_v23 = vadd.f32 %v6381_v56, %v14004_v2  ;;  %5946 = vst.msk [vmem:[#allocation2 + $0x90] sm:$0xff] %vm450_vm11, %v5914_v24  ;;  %10925 = vmatmul.msk.bf16.gmra.mxu1 %vm308_vm5, %v8076_v51  ;;  %10856 = vmatmul.msk.bf16.gmra.mxu0 %vm308_vm5, %v11163_v47  ;;  %v8958_v2 = vrot.slane %v8956_v62, 5  ;;  %v11036_v51 = vld [vmem:[%s11437_s6 + $0x4c] sm:$0xf]  ;;  %v8953_v24 = vsel %vm11499_vm10, %v8944_v29, %v14053_v50  ;;  %v7736_v56 = vrot.slane %v7735_v59, 4 }
 0x33c   : > { %v7114_v36 = vpop.f32.mrf.mxu3  ;;  %v7168_v38 = vld [vmem:[#allocation2 + $0x80] sm:$0xff]  ;;  %5224 = vst.msk [vmem:[#allocation2 + $0xa0] sm:$0xff] %vm450_vm11, %v5192_v33  ;;  %v8974_v18 = vshrl.u32 %v11036_v51, 16  ;;  %v8977_v13 = vshll.u32 %v11036_v51, 16  ;;  %v7745_v33 = vor.u32 %v7744_v44, %v14070_v55  ;;  %v8970_v6 = vrot.slane %v8968_v0, 6 }
 0x33d   : > { %6445 = vst.msk [vmem:[#allocation2 + $0x88] sm:$0xff] %vm450_vm11, %v6413_v23  ;;  %v7200_v3 = vadd.f32 %v7168_v38, %v7112_v5  ;;  %v5883_v5 = vld [vmem:[#allocation2 + $0x98] sm:$0xff]  ;;  %v8962_v21 = vor.u32 %v8961_v52, %v8958_v2  ;;  %v8987_v4 = vshll.u32 %v11037_v12, 16  ;;  %v11164_v38 = vld [vmem:[%s11437_s6 + $0x48] sm:$0xff]  ;;  %v9335_v50 = vunpack.c.l.b16 %v8953_v24 }
 0x33e   : > { %v8976_v16 = vrot.slane %v8974_v18, 5  ;;  %v8979_v23 = vrot.slane %v8977_v13, 6  ;;  %v7741_v40 = vsel %vm11477_vm9, %v7736_v56, %v14070_v55  ;;  %v7746_v63 = vrot.slane %v7745_v33, 4 }
 0x33f   : > { %7232 = vst.msk [vmem:[#allocation2 + $0x80] sm:$0xff] %vm450_vm11, %v7200_v3  ;;  %v5162_v3 = vld [vmem:[#allocation2 + $0xb0] sm:$0xff]  ;;  %v8989_v26 = vrot.slane %v8987_v4, 6  ;;  %v7756_v59 = vshll.u32 %v10882_v28, 16  ;;  %v7762_v55 = vshll.u32 %v10883_v48, 16  ;;  %v14114_v7 = vunpack.c.l.b16 %v7741_v40 }
 0x340   : > { %v14060_v15 = vpop.f32.mrf.mxu2  ;;  %v5831_v11 = vpop.f32.mrf.mxu1 }
 0x341   : > { %11081 = vmatmul.msk.bf16.gmra.mxu3 %vm308_vm5, %v9364_v54  ;;  %v5915_v1 = vadd.f32 %v5883_v5, %v5831_v11  ;;  %v5112_v57 = vpop.f32.mrf.mxu0  ;;  %v8967_v54 = vrot.slane %v8965_v14, 5  ;;  %v7751_v14 = vsel %vm11477_vm9, %v7746_v63, %v7750_v8  ;;  %v7758_v56 = vrot.slane %v7756_v59, 5 }
 0x342   : > { %v6382_v25 = vld [vmem:[#allocation2 + $0x90] sm:$0xff]  ;;  %v5193_v53 = vadd.f32 %v5161_v60, %v5112_v57  ;;  %v8458_v57 = vrot.slane %v14096_v27, 5  ;;  %v14125_v33 = vrot.slane %v7762_v55, 5 }
 0x343   : > { %v6414_v20 = vadd.f32 %v6382_v25, %v14036_v49  ;;  %5947 = vst.msk [vmem:[#allocation2 + $0x98] sm:$0xff] %vm450_vm11, %v5915_v1  ;;  %v8963_v49 = vsel %vm11499_vm10, %v8954_v42, %v8962_v21  ;;  %v5884_v31 = vld [vmem:[#allocation2 + $0xa0] sm:$0xff]  ;;  %v8971_v29 = vor.u32 %v8970_v6, %v8967_v54  ;;  %v14106_v42 = vor.u32 %v8979_v23, %v8976_v16  ;;  %v10952_v1 = vld [vmem:[%s11437_s6 + $0x54] sm:$0xe] }
 0x344   : > { %v7117_v47 = vpop.f32.mrf.mxu3  ;;  %v7169_v62 = vld [vmem:[#allocation2 + $0x88] sm:$0xff]  ;;  %5225 = vst.msk [vmem:[#allocation2 + $0xa8] sm:$0xff] %vm450_vm11, %v5193_v53  ;;  %v9336_v2 = vunpack.c.l.b16 %v8963_v49  ;;  %v7766_v25 = vshrl.u32 %v10883_v48, 16  ;;  %v8578_v53 = vpack.c.b16 %v8550_v46, %v8549_v37  ;;  %v10992_v18 = vrot.slane %v10952_v1, 9 }
 0x345   : > { %11012 = vmatmul.msk.bf16.gmra.mxu2 %vm308_vm5, %v8577_v41  ;;  %6446 = vst.msk [vmem:[#allocation2 + $0x90] sm:$0xff] %vm450_vm11, %v6414_v20  ;;  %v7201_v39 = vadd.f32 %v7169_v62, %v7114_v36  ;;  %v8984_v36 = vshrl.u32 %v11037_v12, 16  ;;  %v8972_v0 = vrot.slane %v8971_v29, 4  ;;  %v8982_v20 = vrot.slane %v14106_v42, 4 }
 0x346   : > { %v9365_v51 = vpack.c.b16 %v9336_v2, %v9335_v50  ;;  %v8460_v24 = vrot.slane %v8458_v57, 4  ;;  %v8461_v49 = vrot.slane %v10954_v32, 5  ;;  %v7768_v54 = vrot.slane %v7766_v25, 4  ;;  %v11040_v2 = vld [vmem:[%s11437_s6 + $0x5c] sm:$0x3]  ;;  %v5164_v25 = vld [vmem:[#allocation2 + $0xc0] sm:$0xff] }
 0x347   : > { %7233 = vst.msk [vmem:[#allocation2 + $0x88] sm:$0xff] %vm450_vm11, %v7201_v39  ;;  %v8986_v21 = vrot.slane %v8984_v36, 5  ;;  %v11039_v39 = vld [vmem:[%s11437_s6 + $0x58] sm:$0xf]  ;;  %v8050_v23 = vunpack.c.l.b16 %v7751_v14  ;;  %v10884_v36 = vld [vmem:[%s11437_s6 + $0x5c] sm:$0x1]  ;;  %v8981_v50 = vsel %vm11499_vm10, %v8972_v0, %v14106_v42 }
 0x348   : > { %v14092_v30 = vpop.f32.mrf.mxu2  ;;  %v5834_v43 = vpop.f32.mrf.mxu1  ;;  %v8462_v46 = vsel %vm11441_vm6, %v8460_v24, %v8461_v49  ;;  %v9012_v63 = vshrl.u32 %v11040_v2, 16  ;;  %v9015_v29 = vshll.u32 %v11040_v2, 16  ;;  %v11165_v42 = vld [vmem:[%s11437_s6 + $0x54] sm:$0xff]  ;;  %v10885_v32 = vld [vmem:[%s11437_s6 + $0x60] sm:$0xf] }
 0x349   : > { %v5916_v52 = vadd.f32 %v5884_v31, %v5834_v43  ;;  %v5115_v19 = vpop.f32.mrf.mxu0 }
 0x34a   : > { %v6383_v61 = vld [vmem:[#allocation2 + $0x98] sm:$0xff]  ;;  %v5194_v41 = vadd.f32 %v5162_v3, %v5115_v19  ;;  %v9005_v19 = vshll.u32 %v11039_v39, 16 }
 0x34b   : > { %v6415_v11 = vadd.f32 %v6383_v61, %v14060_v15  ;;  %5948 = vst.msk [vmem:[#allocation2 + $0xa0] sm:$0xff] %vm450_vm11, %v5916_v52  ;;  %10926 = vmatmul.msk.bf16.gmra.mxu1 %vm308_vm5, %v8077_v10  ;;  %10857 = vmatmul.msk.bf16.gmra.mxu0 %vm308_vm5, %v11164_v38  ;;  %v7753_v15 = vshrl.u32 %v10882_v28, 16  ;;  %v5885_v62 = vld [vmem:[#allocation2 + $0xa8] sm:$0xff]  ;;  %v8990_v10 = vor.u32 %v8989_v26, %v8986_v21  ;;  %v9002_v52 = vshrl.u32 %v11039_v39, 16 }
 0x34c   : > { %v7119_v5 = vpop.f32.mrf.mxu3  ;;  %v7170_v35 = vld [vmem:[#allocation2 + $0x90] sm:$0xff]  ;;  %5226 = vst.msk [vmem:[#allocation2 + $0xb0] sm:$0xff] %vm450_vm11, %v5194_v41  ;;  %v7769_v28 = vor.u32 %v7768_v54, %v14125_v33  ;;  %v7772_v61 = vshll.u32 %v10884_v36, 16  ;;  %v7777_v39 = vshrl.u32 %v10885_v32, 16 }
 0x34d   : > { %6447 = vst.msk [vmem:[#allocation2 + $0x98] sm:$0xff] %vm450_vm11, %v6415_v11  ;;  %v7202_v60 = vadd.f32 %v7170_v35, %v7117_v47  ;;  %v11038_v47 = vld [vmem:[%s11437_s6 + $0x54] sm:$0xe]  ;;  %v7755_v12 = vrot.slane %v7753_v15, 4  ;;  %v8991_v37 = vsel %vm11499_vm10, %v8982_v20, %v8990_v10  ;;  %v8078_v11 = vpack.c.b16 %v8050_v23, %v14114_v7  ;;  %v10886_v7 = vld [vmem:[%s11437_s6 + $0x64] sm:$0xf] }
 0x34e   : > { %v8993_v4 = vshrl.u32 %v11038_v47, 16  ;;  %v8996_v43 = vshll.u32 %v11038_v47, 16  ;;  %v9004_v21 = vrot.slane %v9002_v52, 5  ;;  %v9338_v1 = vunpack.c.l.b16 %v8991_v37 }
 0x34f   : > { %7234 = vst.msk [vmem:[#allocation2 + $0x90] sm:$0xff] %vm450_vm11, %v7202_v60  ;;  %v7759_v27 = vor.u32 %v7758_v56, %v7755_v12  ;;  %v8552_v15 = vunpack.c.l.b16 %v8462_v46  ;;  %v14150_v60 = vld [vmem:[%s11437_s6 + $0x64] sm:$0xf]  ;;  %v7770_v14 = vrot.slane %v7769_v28, 4  ;;  %v7774_v0 = vrot.slane %v7772_v61, 5 }
 0x350   : > { %v14117_v44 = vpop.f32.mrf.mxu2  ;;  %v5836_v13 = vpop.f32.mrf.mxu1  ;;  %v8995_v41 = vrot.slane %v8993_v4, 5  ;;  %v8998_v40 = vrot.slane %v8996_v43, 6  ;;  %v8465_v12 = vrot.slane %v14150_v60, 5  ;;  %v7786_v56 = vshll.u32 %v10886_v7, 16 }
 0x351   : > { %11082 = vmatmul.msk.bf16.gmra.mxu3 %vm308_vm5, %v9365_v51  ;;  %v5917_v45 = vadd.f32 %v5885_v62, %v5836_v13  ;;  %v5117_v9 = vpop.f32.mrf.mxu0  ;;  %v9337_v51 = vunpack.c.l.b16 %v8981_v50  ;;  %v9014_v13 = vrot.slane %v9012_v63, 5  ;;  %v9017_v62 = vrot.slane %v9015_v29, 6 }
 0x352   : > { %v6384_v6 = vld [vmem:[#allocation2 + $0xa0] sm:$0xff]  ;;  %v5195_v16 = vadd.f32 %v5163_v34, %v5117_v9  ;;  %v8999_v47 = vor.u32 %v8998_v40, %v8995_v41  ;;  %v7775_v4 = vsel %vm11477_vm9, %v7770_v14, %v7774_v0  ;;  %v7779_v46 = vrot.slane %v7777_v39, 4  ;;  %v5165_v41 = vld [vmem:[#allocation2 + $0xc8] sm:$0xff] }
 0x353   : > { %v6416_v31 = vadd.f32 %v6384_v6, %v14092_v30  ;;  %5949 = vst.msk [vmem:[#allocation2 + $0xa8] sm:$0xff] %vm450_vm11, %v5917_v45  ;;  %v8459_v30 = vsel %vm11441_vm6, %v10992_v18, %v8458_v57  ;;  %v5886_v35 = vld [vmem:[#allocation2 + $0xb0] sm:$0xff]  ;;  %v9366_v9 = vpack.c.b16 %v9338_v1, %v9337_v51  ;;  %v10955_v34 = vld [vmem:[%s11437_s6 + $0x60] sm:$0xe]  ;;  %v10957_v6 = vld [vmem:[%s11437_s6 + $0x68] sm:$0x1] }
 0x354   : > { %v7122_v38 = vpop.f32.mrf.mxu3  ;;  %v7171_v3 = vld [vmem:[#allocation2 + $0x98] sm:$0xff]  ;;  %5227 = vst.msk [vmem:[#allocation2 + $0xb8] sm:$0xff] %vm450_vm11, %v5195_v16  ;;  %v8551_v57 = vunpack.c.l.b16 %v8459_v30  ;;  %v7790_v16 = vshrl.u32 %v10886_v7, 16  ;;  %v9000_v43 = vrot.slane %v8999_v47, 4  ;;  %v10993_v52 = vrot.slane %v10955_v34, 9  ;;  %v11166_v34 = vld [vmem:[%s11437_s6 + $0x60] sm:$0xff] }
 0x355   : > { %11013 = vmatmul.msk.bf16.gmra.mxu2 %vm308_vm5, %v8578_v53  ;;  %6448 = vst.msk [vmem:[#allocation2 + $0xa0] sm:$0xff] %vm450_vm11, %v6416_v31  ;;  %v7203_v8 = vadd.f32 %v7171_v3, %v7119_v5  ;;  %v9007_v5 = vrot.slane %v9005_v19, 6  ;;  %v7760_v53 = vrot.slane %v7759_v27, 4  ;;  %v11041_v31 = vld [vmem:[%s11437_s6 + $0x60] sm:$0xe]  ;;  %v8467_v19 = vrot.slane %v8465_v12, 4 }
 0x356   : > { %v8579_v23 = vpack.c.b16 %v8552_v15, %v8551_v57  ;;  %v11042_v3 = vld [vmem:[%s11437_s6 + $0x64] sm:$0xf]  ;;  %v14177_v27 = vrot.slane %v7786_v56, 5  ;;  %v10887_v40 = vld [vmem:[%s11437_s6 + $0x68] sm:$0x1]  ;;  %v7792_v63 = vrot.slane %v7790_v16, 4  ;;  %v8052_v57 = vunpack.c.l.b16 %v7775_v4 }
 0x357   : > { %7235 = vst.msk [vmem:[#allocation2 + $0x98] sm:$0xff] %vm450_vm11, %v7203_v8  ;;  %v14157_v49 = vor.u32 %v9007_v5, %v9004_v21  ;;  %v7765_v36 = vsel %vm11477_vm9, %v7760_v53, %v14125_v33  ;;  %v8468_v33 = vrot.slane %v10957_v6, 5  ;;  %v9021_v29 = vshrl.u32 %v11041_v31, 16  ;;  %v14201_v6 = vld [vmem:[%s11437_s6 + $0x70] sm:$0xf] }
 0x358   : > { %v14145_v48 = vpop.f32.mrf.mxu2  ;;  %v5839_v26 = vpop.f32.mrf.mxu1  ;;  %v8051_v5 = vunpack.c.l.b16 %v7765_v36  ;;  %v7796_v53 = vshll.u32 %v10887_v40, 16  ;;  %v7793_v0 = vor.u32 %v7792_v63, %v14177_v27 }
 0x359   : > { %v5918_v59 = vadd.f32 %v5886_v35, %v5839_v26  ;;  %v5120_v55 = vpop.f32.mrf.mxu0  ;;  %v9010_v2 = vrot.slane %v14157_v49, 4  ;;  %v9030_v26 = vshrl.u32 %v11042_v3, 16  ;;  %v9033_v35 = vshll.u32 %v11042_v3, 16 }
 0x35a   : > { %v6385_v20 = vld [vmem:[#allocation2 + $0xa8] sm:$0xff]  ;;  %v5196_v18 = vadd.f32 %v5164_v25, %v5120_v55  ;;  %v9009_v15 = vsel %vm11499_vm10, %v9000_v43, %v14157_v49  ;;  %v8469_v55 = vsel %vm11441_vm6, %v8467_v19, %v8468_v33  ;;  %v9023_v7 = vrot.slane %v9021_v29, 5 }
 0x35b   : > { %v6417_v10 = vadd.f32 %v6385_v20, %v14117_v44  ;;  %5950 = vst.msk [vmem:[#allocation2 + $0xb0] sm:$0xff] %vm450_vm11, %v5918_v59  ;;  %10927 = vmatmul.msk.bf16.gmra.mxu1 %vm308_vm5, %v8078_v11  ;;  %10858 = vmatmul.msk.bf16.gmra.mxu0 %vm308_vm5, %v11165_v42  ;;  %v7780_v44 = vshll.u32 %v10885_v32, 16  ;;  %v5887_v30 = vld [vmem:[#allocation2 + $0xb8] sm:$0xff]  ;;  %v9024_v11 = vshll.u32 %v11041_v31, 16  ;;  %v11043_v32 = vld [vmem:[%s11437_s6 + $0x68] sm:$0x3]  ;;  %v8079_v49 = vpack.c.b16 %v8052_v57, %v8051_v5 }
 0x35c   : > { %v7124_v24 = vpop.f32.mrf.mxu3  ;;  %v7172_v45 = vld [vmem:[#allocation2 + $0xa0] sm:$0xff]  ;;  %5228 = vst.msk [vmem:[#allocation2 + $0xc0] sm:$0xff] %vm450_vm11, %v5196_v18  ;;  %v9032_v18 = vrot.slane %v9030_v26, 5  ;;  %v9035_v47 = vrot.slane %v9033_v35, 6  ;;  %v9339_v39 = vunpack.c.l.b16 %v9009_v15  ;;  %v8554_v56 = vunpack.c.l.b16 %v8469_v55  ;;  %v10888_v31 = vld [vmem:[%s11437_s6 + $0x6c] sm:$0xf] }
 0x35d   : > { %6449 = vst.msk [vmem:[#allocation2 + $0xa8] sm:$0xff] %vm450_vm11, %v6417_v10  ;;  %v7204_v54 = vadd.f32 %v7172_v45, %v7122_v38  ;;  %v9018_v38 = vor.u32 %v9017_v62, %v9014_v13  ;;  %v7782_v8 = vrot.slane %v7780_v44, 5  ;;  %v9026_v20 = vrot.slane %v9024_v11, 6 }
 0x35e   : > { %v9040_v13 = vshrl.u32 %v11043_v32, 16  ;;  %v9043_v62 = vshll.u32 %v11043_v32, 16  ;;  %v7794_v36 = vrot.slane %v7793_v0, 4  ;;  %v7798_v4 = vrot.slane %v7796_v53, 5 }
 0x35f   : > { %7236 = vst.msk [vmem:[#allocation2 + $0xa0] sm:$0xff] %vm450_vm11, %v7204_v54  ;;  %v9019_v60 = vsel %vm11499_vm10, %v9010_v2, %v9018_v38  ;;  %v7783_v25 = vor.u32 %v7782_v8, %v7779_v46  ;;  %v9027_v43 = vor.u32 %v9026_v20, %v9023_v7  ;;  %v10889_v2 = vld [vmem:[%s11437_s6 + $0x70] sm:$0xf]  ;;  %v14205_v19 = vor.u32 %v9035_v47, %v9032_v18  ;;  %v10958_v8 = vld [vmem:[%s11437_s6 + $0x6c] sm:$0xe]  ;;  %v5167_v20 = vld [vmem:[#allocation2 + $0xd8] sm:$0xff] }
 0x360   : > { %v14172_v50 = vpop.f32.mrf.mxu2  ;;  %v5841_v37 = vpop.f32.mrf.mxu1  ;;  %v9042_v3 = vrot.slane %v9040_v13, 5  ;;  %v7801_v40 = vshrl.u32 %v10888_v31, 16  ;;  %v7804_v63 = vshll.u32 %v10888_v31, 16  ;;  %v7810_v29 = vshll.u32 %v10889_v2, 16  ;;  %v10890_v47 = vld [vmem:[%s11437_s6 + $0x74] sm:$0x1] }
 0x361   : > { %11083 = vmatmul.msk.bf16.gmra.mxu3 %vm308_vm5, %v9366_v9  ;;  %v5919_v28 = vadd.f32 %v5887_v30, %v5841_v37  ;;  %v5122_v61 = vpop.f32.mrf.mxu0  ;;  %v7784_v54 = vrot.slane %v7783_v25, 4  ;;  %v9045_v37 = vrot.slane %v9043_v62, 6  ;;  %v7799_v5 = vsel %vm11477_vm9, %v7794_v36, %v7798_v4 }
 0x362   : > { %v6386_v42 = vld [vmem:[#allocation2 + $0xb0] sm:$0xff]  ;;  %v5197_v21 = vadd.f32 %v5165_v41, %v5122_v61  ;;  %v8472_v61 = vrot.slane %v14201_v6, 5  ;;  %v9028_v26 = vrot.slane %v9027_v43, 4  ;;  %v9038_v35 = vrot.slane %v14205_v19, 4 }
 0x363   : > { %v6418_v51 = vadd.f32 %v6386_v42, %v14145_v48  ;;  %5951 = vst.msk [vmem:[#allocation2 + $0xb8] sm:$0xff] %vm450_vm11, %v5919_v28  ;;  %v8466_v48 = vsel %vm11441_vm6, %v10993_v52, %v8465_v12  ;;  %v5166_v12 = vld [vmem:[#allocation2 + $0xd0] sm:$0xff]  ;;  %v5888_v9 = vld [vmem:[#allocation2 + $0xc0] sm:$0xff]  ;;  %v9046_v15 = vor.u32 %v9045_v37, %v9042_v3  ;;  %v7806_v25 = vrot.slane %v7804_v63, 5 }
 0x364   : > { %v7127_v1 = vpop.f32.mrf.mxu3  ;;  %v7173_v59 = vld [vmem:[#allocation2 + $0xa8] sm:$0xff]  ;;  %5229 = vst.msk [vmem:[#allocation2 + $0xc8] sm:$0xff] %vm450_vm11, %v5197_v21  ;;  %v8553_v44 = vunpack.c.l.b16 %v8466_v48  ;;  %v10960_v28 = vld [vmem:[%s11437_s6 + $0x74] sm:$0x1]  ;;  %v7789_v21 = vsel %vm11477_vm9, %v7784_v54, %v14177_v27  ;;  %v7803_v27 = vrot.slane %v7801_v40, 4  ;;  %v14228_v53 = vrot.slane %v7810_v29, 5 }
 0x365   : > { %11014 = vmatmul.msk.bf16.gmra.mxu2 %vm308_vm5, %v8579_v23  ;;  %6450 = vst.msk [vmem:[#allocation2 + $0xb0] sm:$0xff] %vm450_vm11, %v6418_v51  ;;  %v7205_v14 = vadd.f32 %v7173_v59, %v7124_v24  ;;  %v9340_v24 = vunpack.c.l.b16 %v9019_v60  ;;  %v11044_v51 = vld [vmem:[%s11437_s6 + $0x6c] sm:$0xe]  ;;  %v10994_v60 = vrot.slane %v10958_v8, 9  ;;  %v8475_v32 = vrot.slane %v10960_v28, 5 }
 0x366   : > { %v8580_v42 = vpack.c.b16 %v8554_v56, %v8553_v44  ;;  %v11045_v59 = vld [vmem:[%s11437_s6 + $0x70] sm:$0xf]  ;;  %v8053_v18 = vunpack.c.l.b16 %v7789_v21  ;;  %v9049_v13 = vshrl.u32 %v11044_v51, 16  ;;  %v9052_v62 = vshll.u32 %v11044_v51, 16  ;;  %v14251_v28 = vld [vmem:[%s11437_s6 + $0x7c] sm:$0xf] }
 0x367   : > { %7237 = vst.msk [vmem:[#allocation2 + $0xa8] sm:$0xff] %vm450_vm11, %v7205_v14  ;;  %v9367_v46 = vpack.c.b16 %v9340_v24, %v9339_v39  ;;  %v8054_v39 = vunpack.c.l.b16 %v7799_v5  ;;  %v11046_v24 = vld [vmem:[%s11437_s6 + $0x74] sm:$0x3]  ;;  %v9037_v56 = vsel %vm11499_vm10, %v9028_v26, %v14205_v19  ;;  %v9047_v54 = vsel %vm11499_vm10, %v9038_v35, %v9046_v15  ;;  %v5168_v5 = vld [vmem:[#allocation2 + $0xe0] sm:$0xff]  ;;  %v10892_v15 = vld [vmem:[%s11437_s6 + $0x7c] sm:$0xf] }
 0x368   : > { %v14197_v10 = vpop.f32.mrf.mxu2  ;;  %v5844_v45 = vpop.f32.mrf.mxu1  ;;  %v8473_v6 = vsel %vm11441_vm6, %v10994_v60, %v8472_v61  ;;  %v7820_v4 = vshll.u32 %v10890_v47, 16  ;;  %v9051_v31 = vrot.slane %v9049_v13, 5  ;;  %v9071_v3 = vshll.u32 %v11046_v24, 16 }
 0x369   : > { %v5920_v16 = vadd.f32 %v5888_v9, %v5844_v45  ;;  %v5125_v23 = vpop.f32.mrf.mxu0  ;;  %v9058_v45 = vshrl.u32 %v11045_v59, 16  ;;  %v9061_v9 = vshll.u32 %v11045_v59, 16  ;;  %v9342_v8 = vunpack.c.l.b16 %v9047_v54  ;;  %v11048_v54 = vld [vmem:[%s11437_s6 + $0x7c] sm:$0xf] }
 0x36a   : > { %v6387_v38 = vld [vmem:[#allocation2 + $0xb8] sm:$0xff]  ;;  %v5198_v52 = vadd.f32 %v5166_v12, %v5125_v23  ;;  %v7807_v23 = vor.u32 %v7806_v25, %v7803_v27  ;;  %v8555_v40 = vunpack.c.l.b16 %v8473_v6  ;;  %v9073_v59 = vrot.slane %v9071_v3, 6  ;;  %v5169_v3 = vld [vmem:[#allocation2 + $0xe8] sm:$0xff] }
 0x36b   : > { %v6419_v30 = vadd.f32 %v6387_v38, %v14172_v50  ;;  %5952 = vst.msk [vmem:[#allocation2 + $0xc0] sm:$0xff] %vm450_vm11, %v5920_v16  ;;  %10928 = vmatmul.msk.bf16.gmra.mxu1 %vm308_vm5, %v8079_v49  ;;  %10859 = vmatmul.msk.bf16.gmra.mxu0 %vm308_vm5, %v11166_v34  ;;  %v7814_v50 = vshrl.u32 %v10889_v2, 16  ;;  %v5889_v55 = vld [vmem:[#allocation2 + $0xc8] sm:$0xff]  ;;  %v9054_v2 = vrot.slane %v9052_v62, 6  ;;  %v9068_v38 = vshrl.u32 %v11046_v24, 16 }
 0x36c   : > { %v7129_v33 = vpop.f32.mrf.mxu3  ;;  %v7174_v41 = vld [vmem:[#allocation2 + $0xb0] sm:$0xff]  ;;  %5230 = vst.msk [vmem:[#allocation2 + $0xd0] sm:$0xff] %vm450_vm11, %v5198_v52  ;;  %v9060_v52 = vrot.slane %v9058_v45, 5  ;;  %v9063_v19 = vrot.slane %v9061_v9, 6  ;;  %v7808_v29 = vrot.slane %v7807_v23, 4  ;;  %v7834_v47 = vshll.u32 %v10892_v15, 16 }
 0x36d   : > { %6451 = vst.msk [vmem:[#allocation2 + $0xb8] sm:$0xff] %vm450_vm11, %v6419_v30  ;;  %v7206_v11 = vadd.f32 %v7174_v41, %v7127_v1  ;;  %v8474_v1 = vrot.slane %v8472_v61, 4  ;;  %v7816_v14 = vrot.slane %v7814_v50, 4  ;;  %v8080_v30 = vpack.c.b16 %v8054_v39, %v8053_v18  ;;  %v10961_v25 = vld [vmem:[%s11437_s6 + $0x78] sm:$0xe] }
 0x36e   : > { %v7822_v50 = vrot.slane %v7820_v4, 5  ;;  %v9055_v35 = vor.u32 %v9054_v2, %v9051_v31  ;;  %v9070_v51 = vrot.slane %v9068_v38, 5  ;;  %v10963_v18 = vld [vmem:[%s11437_s6 + $0x80] sm:$0x1]  ;;  %v7838_v13 = vshrl.u32 %v10892_v15, 16 }
 0x36f   : > { %7238 = vst.msk [vmem:[#allocation2 + $0xb0] sm:$0xff] %vm450_vm11, %v7206_v11  ;;  %v7817_v36 = vor.u32 %v7816_v14, %v14228_v53  ;;  %v10891_v11 = vld [vmem:[%s11437_s6 + $0x78] sm:$0xf] }
 0x370   : > { %v14224_v57 = vpop.f32.mrf.mxu2  ;;  %v5846_v48 = vpop.f32.mrf.mxu1  ;;  %v7825_v14 = vshrl.u32 %v10891_v11, 16  ;;  %v9056_v39 = vrot.slane %v9055_v35, 4  ;;  %v11047_v24 = vld [vmem:[%s11437_s6 + $0x78] sm:$0xe]  ;;  %v9074_v9 = vor.u32 %v9073_v59, %v9070_v51  ;;  %v7840_v31 = vrot.slane %v7838_v13, 4 }
 0x371   : > { %11084 = vmatmul.msk.bf16.gmra.mxu3 %vm308_vm5, %v9367_v46  ;;  %v5921_v0 = vadd.f32 %v5889_v55, %v5846_v48  ;;  %v5127_v7 = vpop.f32.mrf.mxu0  ;;  %v9341_v46 = vunpack.c.l.b16 %v9037_v56  ;;  %v7818_v26 = vrot.slane %v7817_v36, 4  ;;  %v8479_v48 = vrot.slane %v14251_v28, 5 }
 0x372   : > { %v6388_v49 = vld [vmem:[#allocation2 + $0xc0] sm:$0xff]  ;;  %v5199_v12 = vadd.f32 %v5167_v20, %v5127_v7  ;;  %v9077_v2 = vshrl.u32 %v11047_v24, 16  ;;  %v9080_v38 = vshll.u32 %v11047_v24, 16  ;;  %v9089_v28 = vshll.u32 %v11048_v54, 16 }
 0x373   : > { %v6420_v34 = vadd.f32 %v6388_v49, %v14197_v10  ;;  %5953 = vst.msk [vmem:[#allocation2 + $0xc8] sm:$0xff] %vm450_vm11, %v5921_v0  ;;  %v8476_v10 = vsel %vm11441_vm6, %v8474_v1, %v8475_v32  ;;  %v5890_v41 = vld [vmem:[#allocation2 + $0xd0] sm:$0xff]  ;;  %v14256_v32 = vor.u32 %v9063_v19, %v9060_v52  ;;  %v7828_v0 = vshll.u32 %v10891_v11, 16 }
 0x374   : > { %v7132_v44 = vpop.f32.mrf.mxu3  ;;  %v7175_v16 = vld [vmem:[#allocation2 + $0xb8] sm:$0xff]  ;;  %5231 = vst.msk [vmem:[#allocation2 + $0xd8] sm:$0xff] %vm450_vm11, %v5199_v12  ;;  %v8556_v63 = vunpack.c.l.b16 %v8476_v10  ;;  %v9368_v20 = vpack.c.b16 %v9342_v8, %v9341_v46  ;;  %v7823_v12 = vsel %vm11477_vm9, %v7818_v26, %v7822_v50  ;;  %v8481_v56 = vrot.slane %v8479_v48, 4  ;;  %v11049_v46 = vld [vmem:[%s11437_s6 + $0x80] sm:$0x3] }
 0x375   : > { %11015 = vmatmul.msk.bf16.gmra.mxu2 %vm308_vm5, %v8580_v42  ;;  %6452 = vst.msk [vmem:[#allocation2 + $0xc0] sm:$0xff] %vm450_vm11, %v6420_v34  ;;  %v7207_v43 = vadd.f32 %v7175_v16, %v7129_v33  ;;  %v11167_v33 = vld [vmem:[%s11437_s6 + $0x6c] sm:$0xff]  ;;  %v9066_v45 = vrot.slane %v14256_v32, 4  ;;  %v10995_v34 = vrot.slane %v10961_v25, 9  ;;  %v10893_v16 = vld [vmem:[%s11437_s6 + $0x80] sm:$0x1] }
 0x376   : > { %v8581_v49 = vpack.c.b16 %v8556_v63, %v8555_v40  ;;  %v7827_v10 = vrot.slane %v7825_v14, 4  ;;  %v7830_v23 = vrot.slane %v7828_v0, 5  ;;  %v9086_v8 = vshrl.u32 %v11048_v54, 16  ;;  %v11168_v0 = vld [vmem:[%s11437_s6 + $0x78] sm:$0xff] }
 0x377   : > { %7239 = vst.msk [vmem:[#allocation2 + $0xb8] sm:$0xff] %vm450_vm11, %v7207_v43  ;;  %v14284_v43 = vrot.slane %v7834_v47, 5  ;;  %v9075_v40 = vsel %vm11499_vm10, %v9066_v45, %v9074_v9  ;;  %v8480_v63 = vsel %vm11441_vm6, %v10995_v34, %v8479_v48  ;;  %v9079_v35 = vrot.slane %v9077_v2, 5  ;;  %v5170_v9 = vld [vmem:[#allocation2 + $0xf0] sm:$0xff] }
 0x378   : > { %v14248_v37 = vpop.f32.mrf.mxu2  ;;  %v5849_v61 = vpop.f32.mrf.mxu1  ;;  %v9082_v51 = vrot.slane %v9080_v38, 6  ;;  %v9344_v48 = vunpack.c.l.b16 %v9075_v40  ;;  %v11051_v40 = vld [vmem:[%s11437_s6 + $0x88] sm:$0xf] }
 0x379   : > { %v5922_v42 = vadd.f32 %v5890_v41, %v5849_v61  ;;  %v5130_v21 = vpop.f32.mrf.mxu0  ;;  %v7841_v26 = vor.u32 %v7840_v31, %v14284_v43 }
 0x37a   : > { %v6389_v60 = vld [vmem:[#allocation2 + $0xc8] sm:$0xff]  ;;  %v5200_v1 = vadd.f32 %v5168_v5, %v5130_v21  ;;  %v7844_v21 = vshll.u32 %v10893_v16, 16 }
 0x37b   : > { %v6421_v55 = vadd.f32 %v6389_v60, %v14224_v57  ;;  %5954 = vst.msk [vmem:[#allocation2 + $0xd0] sm:$0xff] %vm450_vm11, %v5922_v42  ;;  %10929 = vmatmul.msk.bf16.gmra.mxu1 %vm308_vm5, %v8080_v30  ;;  %10860 = vmatmul.msk.bf16.gmra.mxu0 %vm308_vm5, %v11167_v33  ;;  %v7813_v57 = vsel %vm11477_vm9, %v7808_v29, %v14228_v53  ;;  %v5891_v4 = vld [vmem:[#allocation2 + $0xd8] sm:$0xff]  ;;  %v8056_v30 = vunpack.c.l.b16 %v7823_v12  ;;  %v9088_v60 = vrot.slane %v9086_v8, 5 }
 0x37c   : > { %v14262_v27 = vpop.f32.mrf.mxu3  ;;  %v7176_v7 = vld [vmem:[#allocation2 + $0xc0] sm:$0xff]  ;;  %5232 = vst.msk [vmem:[#allocation2 + $0xe0] sm:$0xff] %vm450_vm11, %v5200_v1  ;;  %v14280_v6 = vunpack.c.l.b16 %v7813_v57  ;;  %v9065_v33 = vsel %vm11499_vm10, %v9056_v39, %v14256_v32  ;;  %v7831_v42 = vor.u32 %v7830_v23, %v7827_v10  ;;  %v9091_v1 = vrot.slane %v9089_v28, 6  ;;  %v10895_v39 = vld [vmem:[%s11437_s6 + $0x88] sm:$0xf] }
 0x37d   : > { %6453 = vst.msk [vmem:[#allocation2 + $0xc8] sm:$0xff] %vm450_vm11, %v6421_v55  ;;  %v7208_v62 = vadd.f32 %v7176_v7, %v7132_v44  ;;  %v8482_v44 = vrot.slane %v10963_v18, 5  ;;  %v9099_v32 = vshll.u32 %v11049_v46, 16  ;;  %v9343_v59 = vunpack.c.l.b16 %v9065_v33  ;;  %v14304_v55 = vld [vmem:[%s11437_s6 + $0x88] sm:$0xf] }
 0x37e   : > { %v8081_v14 = vpack.c.b16 %v8056_v30, %v14280_v6  ;;  %v8557_v7 = vunpack.c.l.b16 %v8480_v63  ;;  %v7832_v57 = vrot.slane %v7831_v42, 4  ;;  %v10894_v18 = vld [vmem:[%s11437_s6 + $0x84] sm:$0xf]  ;;  %v7842_v13 = vrot.slane %v7841_v26, 4  ;;  %v10966_v23 = vld [vmem:[%s11437_s6 + $0x8c] sm:$0x1] }
 0x37f   : > { %7240 = vst.msk [vmem:[#allocation2 + $0xc0] sm:$0xff] %vm450_vm11, %v7208_v62  ;;  %v8483_v11 = vsel %vm11441_vm6, %v8481_v56, %v8482_v44  ;;  %v7846_v62 = vrot.slane %v7844_v21, 5  ;;  %v14313_v34 = vor.u32 %v9091_v1, %v9088_v60  ;;  %v9101_v56 = vrot.slane %v9099_v32, 6  ;;  %v10964_v10 = vld [vmem:[%s11437_s6 + $0x84] sm:$0xe] }
 0x380   : > { %v14278_v53 = vpop.f32.mrf.mxu2  ;;  %v5851_v36 = vpop.f32.mrf.mxu1  ;;  %v8486_v54 = vrot.slane %v14304_v55, 5  ;;  %v9369_v16 = vpack.c.b16 %v9344_v48, %v9343_v59  ;;  %v7852_v2 = vshll.u32 %v10894_v18, 16  ;;  %v7858_v38 = vshll.u32 %v10895_v39, 16  ;;  %v10896_v60 = vld [vmem:[%s11437_s6 + $0x8c] sm:$0x1]  ;;  %v5171_v55 = vld [vmem:[#allocation2 + $0xf8] sm:$0xff] }
 0x381   : > { %11085 = vmatmul.msk.bf16.gmra.mxu3 %vm308_vm5, %v9368_v20  ;;  %v5923_v52 = vadd.f32 %v5891_v4, %v5851_v36  ;;  %v5132_v19 = vpop.f32.mrf.mxu0  ;;  %v8558_v20 = vunpack.c.l.b16 %v8483_v11  ;;  %v7849_v36 = vshrl.u32 %v10894_v18, 16  ;;  %v10996_v33 = vrot.slane %v10964_v10, 9 }
 0x382   : > { %v6390_v61 = vld [vmem:[#allocation2 + $0xd0] sm:$0xff]  ;;  %v5201_v41 = vadd.f32 %v5169_v3, %v5132_v19  ;;  %v11050_v19 = vld [vmem:[%s11437_s6 + $0x84] sm:$0xe]  ;;  %v8488_v63 = vrot.slane %v8486_v54, 4  ;;  %v14335_v26 = vrot.slane %v7858_v38, 5  ;;  %v9114_v1 = vshrl.u32 %v11051_v40, 16 }
 0x383   : > { %v6422_v29 = vadd.f32 %v6390_v61, %v14248_v37  ;;  %5955 = vst.msk [vmem:[#allocation2 + $0xd8] sm:$0xff] %vm450_vm11, %v5923_v52  ;;  %v9096_v37 = vshrl.u32 %v11049_v46, 16  ;;  %v5892_v47 = vld [vmem:[#allocation2 + $0xe0] sm:$0xff]  ;;  %v7862_v52 = vshrl.u32 %v10895_v39, 16  ;;  %v8582_v30 = vpack.c.b16 %v8558_v20, %v8557_v7  ;;  %v11052_v20 = vld [vmem:[%s11437_s6 + $0x8c] sm:$0x3] }
 0x384   : > { %v7137_v50 = vpop.f32.mrf.mxu3  ;;  %v7177_v5 = vld [vmem:[#allocation2 + $0xc8] sm:$0xff]  ;;  %5233 = vst.msk [vmem:[#allocation2 + $0xe8] sm:$0xff] %vm450_vm11, %v5201_v41  ;;  %v7847_v46 = vsel %vm11477_vm9, %v7842_v13, %v7846_v62  ;;  %v9094_v61 = vrot.slane %v14313_v34, 4  ;;  %v9105_v11 = vshrl.u32 %v11050_v19, 16  ;;  %v9108_v42 = vshll.u32 %v11050_v19, 16 }
 0x385   : > { %11016 = vmatmul.msk.bf16.gmra.mxu2 %vm308_vm5, %v8581_v49  ;;  %6454 = vst.msk [vmem:[#allocation2 + $0xd0] sm:$0xff] %vm450_vm11, %v6422_v29  ;;  %v7209_v15 = vadd.f32 %v7177_v5, %v14262_v27  ;;  %v9083_v49 = vor.u32 %v9082_v51, %v9079_v35  ;;  %v9098_v12 = vrot.slane %v9096_v37, 5  ;;  %v8489_v29 = vrot.slane %v10966_v23, 5 }
 0x386   : > { %v7851_v21 = vrot.slane %v7849_v36, 4  ;;  %v7854_v5 = vrot.slane %v7852_v2, 5  ;;  %v9117_v32 = vshll.u32 %v11051_v40, 16  ;;  %v8487_v7 = vsel %vm11441_vm6, %v10996_v33, %v8486_v54  ;;  %v11169_v36 = vld [vmem:[%s11437_s6 + $0x84] sm:$0xff]  ;;  %v10897_v33 = vld [vmem:[%s11437_s6 + $0x90] sm:$0xf] }
 0x387   : > { %7241 = vst.msk [vmem:[#allocation2 + $0xc8] sm:$0xff] %vm450_vm11, %v7209_v15  ;;  %v9084_v8 = vrot.slane %v9083_v49, 4  ;;  %v9102_v41 = vor.u32 %v9101_v56, %v9098_v12  ;;  %v8058_v15 = vunpack.c.l.b16 %v7847_v46  ;;  %v9110_v13 = vrot.slane %v9108_v42, 6  ;;  %v10898_v42 = vld [vmem:[%s11437_s6 + $0x94] sm:$0xf] }
 0x388   : > { %v14307_v25 = vpop.f32.mrf.mxu2  ;;  %v5854_v27 = vpop.f32.mrf.mxu1  ;;  %v7855_v12 = vor.u32 %v7854_v5, %v7851_v21  ;;  %v9124_v56 = vshrl.u32 %v11052_v20, 16  ;;  %v9127_v54 = vshll.u32 %v11052_v20, 16 }
 0x389   : > { %v5924_v24 = vadd.f32 %v5892_v47, %v5854_v27  ;;  %v5135_v45 = vpop.f32.mrf.mxu0  ;;  %v8490_v27 = vsel %vm11441_vm6, %v8488_v63, %v8489_v29  ;;  %v9107_v47 = vrot.slane %v9105_v11, 5 }
 0x38a   : > { %v6391_v6 = vld [vmem:[#allocation2 + $0xd8] sm:$0xff]  ;;  %v5202_v44 = vadd.f32 %v5170_v9, %v5135_v45  ;;  %v9116_v9 = vrot.slane %v9114_v1, 5  ;;  %v8560_v2 = vunpack.c.l.b16 %v8490_v27  ;;  %v7856_v38 = vrot.slane %v7855_v12, 4 }
 0x38b   : > { %v6423_v4 = vadd.f32 %v6391_v6, %v14278_v53  ;;  %5956 = vst.msk [vmem:[#allocation2 + $0xe0] sm:$0xff] %vm450_vm11, %v5924_v24  ;;  %10930 = vmatmul.msk.bf16.gmra.mxu1 %vm308_vm5, %v8081_v14  ;;  %10861 = vmatmul.msk.bf16.gmra.mxu0 %vm308_vm5, %v11168_v0  ;;  %v7837_v53 = vsel %vm11477_vm9, %v7832_v57, %v14284_v43  ;;  %v5893_v51 = vld [vmem:[#allocation2 + $0xe8] sm:$0xff]  ;;  %v7868_v24 = vshll.u32 %v10896_v60, 16  ;;  %v9129_v46 = vrot.slane %v9127_v54, 6  ;;  %v11055_v54 = vld [vmem:[%s11437_s6 + $0x98] sm:$0x3] }
 0x38c   : > { %v7139_v31 = vpop.f32.mrf.mxu3  ;;  %v7178_v3 = vld [vmem:[#allocation2 + $0xd0] sm:$0xff]  ;;  %5234 = vst.msk [vmem:[#allocation2 + $0xf0] sm:$0xff] %vm450_vm11, %v5202_v44  ;;  %v8057_v37 = vunpack.c.l.b16 %v7837_v53  ;;  %v9093_v14 = vsel %vm11499_vm10, %v9084_v8, %v14313_v34  ;;  %v9103_v0 = vsel %vm11499_vm10, %v9094_v61, %v9102_v41  ;;  %v9119_v34 = vrot.slane %v9117_v32, 6  ;;  %v7512_v41 = vld [vmem:[#allocation2] sm:$0xff] }
 0x38d   : > { %6455 = vst.msk [vmem:[#allocation2 + $0xd8] sm:$0xff] %vm450_vm11, %v6423_v4  ;;  %v7210_v28 = vadd.f32 %v7178_v3, %v7137_v50  ;;  %v7864_v50 = vrot.slane %v7862_v52, 4  ;;  %v9345_v44 = vunpack.c.l.b16 %v9093_v14  ;;  %v9111_v10 = vor.u32 %v9110_v13, %v9107_v47  ;;  %v14362_v8 = vld [vmem:[%s11437_s6 + $0x94] sm:$0xf] }
 0x38e   : > { %v8082_v6 = vpack.c.b16 %v8058_v15, %v8057_v37  ;;  %v8559_v4 = vunpack.c.l.b16 %v8487_v7  ;;  %v7870_v52 = vrot.slane %v7868_v24, 5  ;;  %v9126_v53 = vrot.slane %v9124_v56, 5  ;;  %v11053_v37 = vld [vmem:[%s11437_s6 + $0x90] sm:$0xe]  ;;  %v11054_v15 = vld [vmem:[%s11437_s6 + $0x94] sm:$0xf] }
 0x38f   : > { %7242 = vst.msk [vmem:[#allocation2 + $0xd0] sm:$0xff] %vm450_vm11, %v7210_v28  ;;  %v7865_v39 = vor.u32 %v7864_v50, %v14335_v26  ;;  %v14365_v11 = vrot.slane %v9111_v10, 4  ;;  %v7876_v14 = vshll.u32 %v10897_v33, 16  ;;  %v7886_v7 = vshrl.u32 %v10898_v42, 16 }
 0x390   : > { %v14333_v43 = vpop.f32.mrf.mxu2  ;;  %v5856_v35 = vpop.f32.mrf.mxu1  ;;  %v8583_v50 = vpack.c.b16 %v8560_v2, %v8559_v4  ;;  %v9130_v32 = vor.u32 %v9129_v46, %v9126_v53  ;;  %v9142_v27 = vshrl.u32 %v11054_v15, 16  ;;  %v9145_v12 = vshll.u32 %v11054_v15, 16 }
 0x391   : > { %11086 = vmatmul.msk.bf16.gmra.mxu3 %vm308_vm5, %v9369_v16  ;;  %v5925_v59 = vadd.f32 %v5893_v51, %v5856_v35  ;;  %v5137_v48 = vpop.f32.mrf.mxu0  ;;  %v9346_v16 = vunpack.c.l.b16 %v9103_v0  ;;  %v7861_v35 = vsel %vm11477_vm9, %v7856_v38, %v14335_v26  ;;  %v8493_v51 = vrot.slane %v14362_v8, 5 }
 0x392   : > { %v6392_v57 = vld [vmem:[#allocation2 + $0xe0] sm:$0xff]  ;;  %v5203_v18 = vadd.f32 %v5171_v55, %v5137_v48  ;;  %v7873_v48 = vshrl.u32 %v10897_v33, 16  ;;  %v10969_v55 = vld [vmem:[%s11437_s6 + $0x98] sm:$0x1]  ;;  %v7882_v0 = vshll.u32 %v10898_v42, 16  ;;  %v14385_v20 = vunpack.c.l.b16 %v7861_v35 }
 0x393   : > { %v6424_v62 = vadd.f32 %v6392_v57, %v14307_v25  ;;  %5957 = vst.msk [vmem:[#allocation2 + $0xe8] sm:$0xff] %vm450_vm11, %v5925_v59  ;;  %v5894_v3 = vld [vmem:[#allocation2 + $0xf0] sm:$0xff]  ;;  %v9370_v29 = vpack.c.b16 %v9346_v16, %v9345_v44  ;;  %v9133_v57 = vshrl.u32 %v11053_v37, 16  ;;  %v7513_v44 = vld [vmem:[#allocation2 + $0x8] sm:$0xff]  ;;  %v7878_v16 = vrot.slane %v7876_v14, 5 }
 0x394   : > { %v7142_v49 = vpop.f32.mrf.mxu3  ;;  %v7179_v45 = vld [vmem:[#allocation2 + $0xd8] sm:$0xff]  ;;  %5235 = vst.msk [vmem:[#allocation2 + $0xf8] sm:$0xff] %vm450_vm11, %v5203_v18  ;;  %v10967_v59 = vld [vmem:[%s11437_s6 + $0x90] sm:$0xe]  ;;  %v9136_v18 = vshll.u32 %v11053_v37, 16  ;;  %v7875_v56 = vrot.slane %v7873_v48, 4 }
 0x395   : > { %11017 = vmatmul.msk.bf16.gmra.mxu2 %vm308_vm5, %v8582_v30  ;;  %6456 = vst.msk [vmem:[#allocation2 + $0xe0] sm:$0xff] %vm450_vm11, %v6424_v62  ;;  %v7211_v25 = vadd.f32 %v7179_v45, %v7139_v31  ;;  %v7866_v30 = vrot.slane %v7865_v39, 4  ;;  %v14359_v31 = vor.u32 %v9119_v34, %v9116_v9  ;;  %v8495_v9 = vrot.slane %v8493_v51, 4 }
 0x396   : > { %v8496_v34 = vrot.slane %v10969_v55, 5  ;;  %v14400_v10 = vrot.slane %v7882_v0, 5  ;;  %v9135_v38 = vrot.slane %v9133_v57, 5  ;;  %v9147_v53 = vrot.slane %v9145_v12, 6 }
 0x397   : > { %7243 = vst.msk [vmem:[#allocation2 + $0xd8] sm:$0xff] %vm450_vm11, %v7211_v25  ;;  %v9122_v1 = vrot.slane %v14359_v31, 4  ;;  %v9121_v62 = vsel %vm11499_vm10, %v14365_v11, %v14359_v31  ;;  %v10899_v31 = vld [vmem:[%s11437_s6 + $0x98] sm:$0x1]  ;;  %v9152_v46 = vshrl.u32 %v11055_v54, 16  ;;  %v9155_v8 = vshll.u32 %v11055_v54, 16 }
 0x398   : > { %v14356_v23 = vpop.f32.mrf.mxu2  ;;  %v5859_v19 = vpop.f32.mrf.mxu1  ;;  %v9347_v33 = vunpack.c.l.b16 %v9121_v62  ;;  %v10901_v11 = vld [vmem:[%s11437_s6 + $0xa0] sm:$0xf]  ;;  %v8497_v42 = vsel %vm11441_vm6, %v8495_v9, %v8496_v34 }
 0x399   : > { %v5926_v28 = vadd.f32 %v5894_v3, %v5859_v19  ;;  %v7432_v61 = vpop.f32.mrf.mxu0  ;;  %v9131_v45 = vsel %vm11499_vm10, %v9122_v1, %v9130_v32  ;;  %v9144_v19 = vrot.slane %v9142_v27, 5  ;;  %v9154_v15 = vrot.slane %v9152_v46, 5 }
 0x39a   : > { %v6393_v40 = vld [vmem:[#allocation2 + $0xe8] sm:$0xff]  ;;  %v7544_v63 = vadd.f32 %v7512_v41, %v7432_v61  ;;  %v7906_v55 = vshll.u32 %v10901_v11, 16  ;;  %v7910_v14 = vshrl.u32 %v10901_v11, 16  ;;  %v7515_v11 = vld [vmem:[#allocation2 + $0x18] sm:$0xff] }
 0x39b   : > { %v6425_v21 = vadd.f32 %v6393_v40, %v14333_v43  ;;  %5958 = vst.msk [vmem:[#allocation2 + $0xf0] sm:$0xff] %vm450_vm11, %v5926_v28  ;;  %10931 = vmatmul.msk.bf16.gmra.mxu1 %vm308_vm5, %v8082_v6  ;;  %10862 = vmatmul.msk.bf16.gmra.mxu0 %vm308_vm5, %v11169_v36  ;;  %v7871_v43 = vsel %vm11477_vm9, %v7866_v30, %v7870_v52  ;;  %v5895_v24 = vld [vmem:[#allocation2 + $0xf8] sm:$0xff]  ;;  %v7888_v36 = vrot.slane %v7886_v7, 4  ;;  %v9138_v52 = vrot.slane %v9136_v18, 6 }
 0x39c   : > { %v7144_v5 = vpop.f32.mrf.mxu3  ;;  %v7180_v60 = vld [vmem:[#allocation2 + $0xe0] sm:$0xff]  ;;  %7576 = vst.msk [vmem:[#allocation2] sm:$0xff] %vm450_vm11, %v7544_v63  ;;  %v14390_v13 = vunpack.c.l.b16 %v7871_v43  ;;  %v9348_v40 = vunpack.c.l.b16 %v9131_v45  ;;  %v7879_v63 = vor.u32 %v7878_v16, %v7875_v56  ;;  %v14423_v37 = vor.u32 %v9147_v53, %v9144_v19  ;;  %v10970_v56 = vld [vmem:[%s11437_s6 + $0x9c] sm:$0xe] }
 0x39d   : > { %6457 = vst.msk [vmem:[#allocation2 + $0xe8] sm:$0xff] %vm450_vm11, %v6425_v21  ;;  %v7212_v26 = vadd.f32 %v7180_v60, %v7142_v49  ;;  %v10997_v49 = vrot.slane %v10967_v59, 9  ;;  %v7889_v21 = vor.u32 %v7888_v36, %v14400_v10  ;;  %v9139_v35 = vor.u32 %v9138_v52, %v9135_v38  ;;  %v14426_v43 = vld [vmem:[%s11437_s6 + $0xa0] sm:$0xf]  ;;  %v11170_v59 = vld [vmem:[%s11437_s6 + $0x90] sm:$0xff] }
 0x39e   : > { %v8083_v61 = vpack.c.b16 %v14390_v13, %v14385_v20  ;;  %v9157_v60 = vrot.slane %v9155_v8, 6  ;;  %v7514_v20 = vld [vmem:[#allocation2 + $0x10] sm:$0xff]  ;;  %v9371_v57 = vpack.c.b16 %v9348_v40, %v9347_v33  ;;  %v8562_v18 = vunpack.c.l.b16 %v8497_v42  ;;  %v11056_v8 = vld [vmem:[%s11437_s6 + $0x9c] sm:$0xe]  ;;  %v11057_v40 = vld [vmem:[%s11437_s6 + $0xa0] sm:$0xf] }
 0x39f   : > { %7244 = vst.msk [vmem:[#allocation2 + $0xe0] sm:$0xff] %vm450_vm11, %v7212_v26  ;;  %v7880_v27 = vrot.slane %v7879_v63, 4  ;;  %v9150_v9 = vrot.slane %v14423_v37, 4  ;;  %v8500_v54 = vrot.slane %v14426_v43, 5  ;;  %v7912_v16 = vrot.slane %v7910_v14, 4 }
 0x3a0   : > { %v14388_v47 = vpop.f32.mrf.mxu2  ;;  %v5861_v39 = vpop.f32.mrf.mxu1  ;;  %v9158_v34 = vor.u32 %v9157_v60, %v9154_v15  ;;  %v11058_v60 = vld [vmem:[%s11437_s6 + $0xa4] sm:$0x3]  ;;  %v9161_v43 = vshrl.u32 %v11056_v8, 16 }
 0x3a1   : > { %11087 = vmatmul.msk.bf16.gmra.mxu3 %vm308_vm5, %v9370_v29  ;;  %v5927_v25 = vadd.f32 %v5895_v24, %v5861_v39  ;;  %v7434_v6 = vpop.f32.mrf.mxu0  ;;  %v10900_v29 = vld [vmem:[%s11437_s6 + $0x9c] sm:$0xf]  ;;  %v9140_v39 = vrot.slane %v9139_v35, 4  ;;  %v7885_v38 = vsel %vm11477_vm9, %v7880_v27, %v14400_v10  ;;  %v8502_v46 = vrot.slane %v8500_v54, 4  ;;  %v10903_v27 = vld [vmem:[%s11437_s6 + $0xa8] sm:$0xf] }
 0x3a2   : > { %v6394_v4 = vld [vmem:[#allocation2 + $0xf0] sm:$0xff]  ;;  %v7545_v2 = vadd.f32 %v7513_v44, %v7434_v6  ;;  %v7897_v48 = vshrl.u32 %v10900_v29, 16  ;;  %v7900_v26 = vshll.u32 %v10900_v29, 16  ;;  %v14437_v44 = vrot.slane %v7906_v55, 5 }
 0x3a3   : > { %v6426_v3 = vadd.f32 %v6394_v4, %v14356_v23  ;;  %5959 = vst.msk [vmem:[#allocation2 + $0xf8] sm:$0xff] %vm450_vm11, %v5927_v25  ;;  %v14411_v23 = vsel %vm11441_vm6, %v10997_v49, %v8493_v51  ;;  %v8236_v32 = vld [vmem:[#allocation2] sm:$0xff]  ;;  %v7890_v49 = vrot.slane %v7889_v21, 4  ;;  %v9149_v19 = vsel %vm11499_vm10, %v9140_v39, %v14423_v37  ;;  %v10904_v39 = vld [vmem:[%s11437_s6 + $0xac] sm:$0xf] }
 0x3a4   : > { %v7147_v30 = vpop.f32.mrf.mxu3  ;;  %v7181_v28 = vld [vmem:[#allocation2 + $0xe8] sm:$0xff]  ;;  %7577 = vst.msk [vmem:[#allocation2 + $0x8] sm:$0xff] %vm450_vm11, %v7545_v2  ;;  %v7899_v6 = vrot.slane %v7897_v48, 4  ;;  %v10972_v4 = vld [vmem:[%s11437_s6 + $0xa4] sm:$0x1]  ;;  %v9159_v53 = vsel %vm11499_vm10, %v9150_v9, %v9158_v34  ;;  %v8061_v42 = vunpack.c.l.b16 %v7885_v38  ;;  %v9170_v48 = vshrl.u32 %v11057_v40, 16 }
 0x3a5   : > { %11018 = vmatmul.msk.bf16.gmra.mxu2 %vm308_vm5, %v8583_v50  ;;  %6458 = vst.msk [vmem:[#allocation2 + $0xf0] sm:$0xff] %vm450_vm11, %v6426_v3  ;;  %v7213_v41 = vadd.f32 %v7181_v28, %v7144_v5  ;;  %v7892_v50 = vshll.u32 %v10899_v31, 16  ;;  %v8561_v5 = vunpack.c.l.b16 %v14411_v23  ;;  %v10902_v2 = vld [vmem:[%s11437_s6 + $0xa4] sm:$0x1]  ;;  %v10998_v3 = vrot.slane %v10970_v56, 9 }
 0x3a6   : > { %v7916_v33 = vshll.u32 %v10902_v2, 16  ;;  %v9350_v37 = vunpack.c.l.b16 %v9159_v53  ;;  %v9172_v56 = vrot.slane %v9170_v48, 5  ;;  %v7921_v2 = vshrl.u32 %v10903_v27, 16 }
 0x3a7   : > { %7245 = vst.msk [vmem:[#allocation2 + $0xe8] sm:$0xff] %vm450_vm11, %v7213_v41  ;;  %v7894_v12 = vrot.slane %v7892_v50, 5  ;;  %v7913_v41 = vor.u32 %v7912_v16, %v14437_v44  ;;  %v9349_v50 = vunpack.c.l.b16 %v9149_v19  ;;  %v14461_v15 = vsel %vm11441_vm6, %v10998_v3, %v8500_v54  ;;  %v11059_v54 = vld [vmem:[%s11437_s6 + $0xa8] sm:$0xe]  ;;  %v7516_v3 = vld [vmem:[#allocation2 + $0x20] sm:$0xff] }
 0x3a8   : > { %v14420_v51 = vpop.f32.mrf.mxu2  ;;  %v8156_v1 = vpop.f32.mrf.mxu1  ;;  %v7924_v38 = vshll.u32 %v10903_v27, 16  ;;  %v7930_v53 = vshll.u32 %v10904_v39, 16 }
 0x3a9   : > { %v8268_v0 = vadd.f32 %v8236_v32, %v8156_v1  ;;  %v7437_v7 = vpop.f32.mrf.mxu0  ;;  %v7895_v52 = vsel %vm11477_vm9, %v7890_v49, %v7894_v12  ;;  %v9163_v49 = vrot.slane %v9161_v43, 5  ;;  %v9183_v12 = vshll.u32 %v11058_v60, 16 }
 0x3aa   : > { %v6395_v13 = vld [vmem:[#allocation2 + $0xf8] sm:$0xff]  ;;  %v7546_v62 = vadd.f32 %v7514_v20, %v7437_v7  ;;  %v8062_v21 = vunpack.c.l.b16 %v7895_v52  ;;  %v7914_v7 = vrot.slane %v7913_v41, 4  ;;  %v14513_v43 = vrot.slane %v7930_v53, 5 }
 0x3ab   : > { %v6427_v24 = vadd.f32 %v6395_v13, %v14388_v47  ;;  %8300 = vst.msk [vmem:[#allocation2] sm:$0xff] %vm450_vm11, %v8268_v0  ;;  %10932 = vmatmul.msk.bf16.gmra.mxu1 %vm308_vm5, %v8083_v61  ;;  %10863 = vmatmul.msk.bf16.gmra.mxu0 %vm308_vm5, %v11170_v59  ;;  %v7902_v47 = vrot.slane %v7900_v26, 5  ;;  %v8237_v28 = vld [vmem:[#allocation2 + $0x8] sm:$0xff]  ;;  %v8503_v61 = vrot.slane %v10972_v4, 5  ;;  %v9164_v59 = vshll.u32 %v11056_v8, 16 }
 0x3ac   : > { %v7149_v45 = vpop.f32.mrf.mxu3  ;;  %v7182_v25 = vld [vmem:[#allocation2 + $0xf0] sm:$0xff]  ;;  %7578 = vst.msk [vmem:[#allocation2 + $0x10] sm:$0xff] %vm450_vm11, %v7546_v62  ;;  %v9173_v26 = vshll.u32 %v11057_v40, 16  ;;  %v14474_v13 = vpack.c.b16 %v9350_v37, %v9349_v50  ;;  %v8563_v62 = vunpack.c.l.b16 %v14461_v15  ;;  %v14489_v4 = vld [vmem:[%s11437_s6 + $0xac] sm:$0xf] }
 0x3ad   : > { %6459 = vst.msk [vmem:[#allocation2 + $0xf8] sm:$0xff] %vm450_vm11, %v6427_v24  ;;  %v7214_v36 = vadd.f32 %v7182_v25, %v7147_v30  ;;  %v8584_v30 = vpack.c.b16 %v8562_v18, %v8561_v5  ;;  %v7903_v23 = vor.u32 %v7902_v47, %v7899_v6  ;;  %v8504_v14 = vsel %vm11441_vm6, %v8502_v46, %v8503_v61  ;;  %v11171_v47 = vld [vmem:[%s11437_s6 + $0x9c] sm:$0xff]  ;;  %v10975_v50 = vld [vmem:[%s11437_s6 + $0xb0] sm:$0x1] }
 0x3ae   : > { %v9180_v18 = vshrl.u32 %v11058_v60, 16  ;;  %v8564_v9 = vunpack.c.l.b16 %v8504_v14  ;;  %v9166_v34 = vrot.slane %v9164_v59, 6  ;;  %v7934_v46 = vshrl.u32 %v10904_v39, 16  ;;  %v10905_v60 = vld [vmem:[%s11437_s6 + $0xb0] sm:$0x1] }
 0x3af   : > { %7246 = vst.msk [vmem:[#allocation2 + $0xf0] sm:$0xff] %vm450_vm11, %v7214_v36  ;;  %v7904_v0 = vrot.slane %v7903_v23, 4  ;;  %v9192_v61 = vshll.u32 %v11059_v54, 16  ;;  %v11061_v59 = vld [vmem:[%s11437_s6 + $0xb0] sm:$0x3] }
 0x3b0   : > { %v14451_v31 = vpop.f32.mrf.mxu2  ;;  %v8158_v10 = vpop.f32.mrf.mxu1 }
 0x3b1   : > { %11088 = vmatmul.msk.bf16.gmra.mxu3 %vm308_vm5, %v9371_v57  ;;  %v8269_v63 = vadd.f32 %v8237_v28, %v8158_v10  ;;  %v7439_v29 = vpop.f32.mrf.mxu0  ;;  %v8084_v57 = vpack.c.b16 %v8062_v21, %v8061_v42  ;;  %v7909_v16 = vsel %vm11477_vm9, %v7904_v0, %v14437_v44  ;;  %v9185_v28 = vrot.slane %v9183_v12, 6 }
 0x3b2   : > { %v8736_v35 = vld [vmem:[#allocation2] sm:$0xff]  ;;  %v7547_v5 = vadd.f32 %v7515_v11, %v7439_v29  ;;  %v9189_v44 = vshrl.u32 %v11059_v54, 16  ;;  %v8507_v29 = vrot.slane %v14489_v4, 5  ;;  %v11060_v11 = vld [vmem:[%s11437_s6 + $0xac] sm:$0xf]  ;;  %v14505_v21 = vunpack.c.l.b16 %v7909_v16 }
 0x3b3   : > { %v8768_v1 = vadd.f32 %v8736_v35, %v14420_v51  ;;  %8301 = vst.msk [vmem:[#allocation2 + $0x8] sm:$0xff] %vm450_vm11, %v8269_v63  ;;  %v7918_v51 = vrot.slane %v7916_v33, 5  ;;  %v8238_v6 = vld [vmem:[#allocation2 + $0x10] sm:$0xff]  ;;  %v9167_v33 = vor.u32 %v9166_v34, %v9163_v49  ;;  %v10973_v63 = vld [vmem:[%s11437_s6 + $0xa8] sm:$0xe]  ;;  %v7923_v35 = vrot.slane %v7921_v2, 4 }
 0x3b4   : > { %v14466_v32 = vpop.f32.mrf.mxu3  ;;  %v7183_v55 = vld [vmem:[#allocation2 + $0xf8] sm:$0xff]  ;;  %7579 = vst.msk [vmem:[#allocation2 + $0x18] sm:$0xff] %vm450_vm11, %v7547_v5  ;;  %v7926_v5 = vrot.slane %v7924_v38, 5  ;;  %v9191_v48 = vrot.slane %v9189_v44, 5  ;;  %v9201_v14 = vshll.u32 %v11060_v11, 16  ;;  %v8509_v27 = vrot.slane %v8507_v29, 4 }
 0x3b5   : > { %11019 = vmatmul.msk.bf16.gmra.mxu2 %vm308_vm5, %v8584_v30  ;;  %8800 = vst.msk [vmem:[#allocation2] sm:$0xff] %vm450_vm11, %v8768_v1  ;;  %v7215_v20 = vadd.f32 %v7183_v55, %v7149_v45  ;;  %v9175_v45 = vrot.slane %v9173_v26, 6  ;;  %v7919_v36 = vsel %vm11477_vm9, %v7914_v7, %v7918_v51  ;;  %v14491_v30 = vrot.slane %v9180_v18, 5  ;;  %v7517_v34 = vld [vmem:[#allocation2 + $0x28] sm:$0xff]  ;;  %v10906_v44 = vld [vmem:[%s11437_s6 + $0xb4] sm:$0xf] }
 0x3b6   : > { %v14510_v15 = vunpack.c.l.b16 %v7919_v36  ;;  %v7936_v1 = vrot.slane %v7934_v46, 4  ;;  %v9194_v26 = vrot.slane %v9192_v61, 6  ;;  %v9198_v55 = vshrl.u32 %v11060_v11, 16 }
 0x3b7   : > { %7247 = vst.msk [vmem:[#allocation2 + $0xf8] sm:$0xff] %vm450_vm11, %v7215_v20  ;;  %v14498_v40 = vor.u32 %v9175_v45, %v9172_v56  ;;  %v9168_v7 = vrot.slane %v9167_v33, 4  ;;  %v10999_v20 = vrot.slane %v10973_v63, 9  ;;  %v7927_v49 = vor.u32 %v7926_v5, %v7923_v35 }
 0x3b8   : > { %v14479_v24 = vpop.f32.mrf.mxu2  ;;  %v8161_v25 = vpop.f32.mrf.mxu1  ;;  %v7940_v12 = vshll.u32 %v10905_v60, 16  ;;  %v7937_v56 = vor.u32 %v7936_v1, %v14513_v43  ;;  %v9208_v45 = vshrl.u32 %v11061_v59, 16  ;;  %v9211_v54 = vshll.u32 %v11061_v59, 16 }
 0x3b9   : > { %v8270_v52 = vadd.f32 %v8238_v6, %v8161_v25  ;;  %v7442_v19 = vpop.f32.mrf.mxu0  ;;  %v9178_v51 = vrot.slane %v14498_v40, 4  ;;  %v9200_v16 = vrot.slane %v9198_v55, 5  ;;  %v9203_v36 = vrot.slane %v9201_v14, 6  ;;  %v7518_v55 = vld [vmem:[#allocation2 + $0x30] sm:$0xff] }
 0x3ba   : > { %v8737_v8 = vld [vmem:[#allocation2 + $0x8] sm:$0xff]  ;;  %v7548_v10 = vadd.f32 %v7516_v3, %v7442_v19  ;;  %v9177_v38 = vsel %vm11499_vm10, %v9168_v7, %v14498_v40  ;;  %v7942_v53 = vrot.slane %v7940_v12, 5  ;;  %v7945_v60 = vshrl.u32 %v10906_v44, 16 }
 0x3bb   : > { %v8769_v23 = vadd.f32 %v8737_v8, %v14451_v31  ;;  %8302 = vst.msk [vmem:[#allocation2 + $0x10] sm:$0xff] %vm450_vm11, %v8270_v52  ;;  %10933 = vmatmul.msk.bf16.gmra.mxu1 %vm308_vm5, %v8084_v57  ;;  %10864 = vmatmul.msk.bf16.gmra.mxu0 %vm308_vm5, %v11171_v47  ;;  %v8585_v31 = vpack.c.b16 %v8564_v9, %v8563_v62  ;;  %v8239_v18 = vld [vmem:[#allocation2 + $0x18] sm:$0xff]  ;;  %v8510_v62 = vrot.slane %v10975_v50, 5  ;;  %v7938_v8 = vrot.slane %v7937_v56, 4 }
 0x3bc   : > { %v14496_v41 = vpop.f32.mrf.mxu3  ;;  %v9524_v42 = vld [vmem:[#allocation2] sm:$0xff]  ;;  %7580 = vst.msk [vmem:[#allocation2 + $0x20] sm:$0xff] %vm450_vm11, %v7548_v10  ;;  %v9195_v47 = vor.u32 %v9194_v26, %v9191_v48  ;;  %v9210_v10 = vrot.slane %v9208_v45, 5  ;;  %v9204_v40 = vor.u32 %v9203_v36, %v9200_v16  ;;  %v7948_v1 = vshll.u32 %v10906_v44, 16 }
 0x3bd   : > { %8801 = vst.msk [vmem:[#allocation2 + $0x8] sm:$0xff] %vm450_vm11, %v8769_v23  ;;  %v9556_v37 = vadd.f32 %v9524_v42, %v14466_v32  ;;  %v9186_v32 = vor.u32 %v9185_v28, %v14491_v30  ;;  %v8511_v3 = vsel %vm11441_vm6, %v8509_v27, %v8510_v62  ;;  %v7928_v30 = vrot.slane %v7927_v49, 4  ;;  %v10976_v49 = vld [vmem:[%s11437_s6 + $0xb4] sm:$0xe] }
 0x3be   : > { %v9213_v28 = vrot.slane %v9211_v54, 6  ;;  %v8085_v23 = vpack.c.b16 %v14510_v15, %v14505_v21  ;;  %v9196_v33 = vrot.slane %v9195_v47, 4  ;;  %v11172_v21 = vld [vmem:[%s11437_s6 + $0xa8] sm:$0xff]  ;;  %v8566_v5 = vunpack.c.l.b16 %v8511_v3  ;;  %v10907_v15 = vld [vmem:[%s11437_s6 + $0xb8] sm:$0xf] }
 0x3bf   : > { %9588 = vst.msk [vmem:[#allocation2] sm:$0xff] %vm450_vm11, %v9556_v37  ;;  %v9187_v52 = vsel %vm11499_vm10, %v9178_v51, %v9186_v32  ;;  %v7933_v37 = vsel %vm11477_vm9, %v7928_v30, %v14513_v43  ;;  %v7943_v14 = vsel %vm11477_vm9, %v7938_v8, %v7942_v53  ;;  %v7954_v12 = vshll.u32 %v10907_v15, 16  ;;  %v11062_v47 = vld [vmem:[%s11437_s6 + $0xb4] sm:$0xe] }
 0x3c0   : > { %v14517_v0 = vpop.f32.mrf.mxu2  ;;  %v8163_v57 = vpop.f32.mrf.mxu1  ;;  %v9352_v11 = vunpack.c.l.b16 %v9187_v52  ;;  %v9214_v7 = vor.u32 %v9213_v28, %v9210_v10  ;;  %v7947_v56 = vrot.slane %v7945_v60, 4  ;;  %v14590_v36 = vunpack.c.l.b16 %v7943_v14  ;;  %v10908_v28 = vld [vmem:[%s11437_s6 + $0xbc] sm:$0x1]  ;;  %v10909_v14 = vld [vmem:[%s11437_s6 + $0xc0] sm:$0xf] }
 0x3c1   : > { %11089 = vmatmul.msk.bf16.gmra.mxu3 %vm308_vm5, %v14474_v13  ;;  %v8271_v39 = vadd.f32 %v8239_v18, %v8163_v57  ;;  %v7444_v9 = vpop.f32.mrf.mxu0  ;;  %v14527_v13 = vld [vmem:[%s15064_s2] ss:$0 sm:$0xff]  ;;  %v9206_v57 = vrot.slane %v9204_v40, 4  ;;  %v11000_v52 = vrot.slane %v10976_v49, 9  ;;  %v14599_v30 = vrot.slane %v7954_v12, 5 }
 0x3c2   : > { %v8738_v25 = vld [vmem:[#allocation2 + $0x10] sm:$0xff]  ;;  %v7549_v6 = vadd.f32 %v7517_v34, %v7444_v9 }
 0x3c3   : > { %v8770_v4 = vadd.f32 %v8738_v25, %v14479_v24  ;;  %8303 = vst.msk [vmem:[#allocation2 + $0x18] sm:$0xff] %vm450_vm11, %v8271_v39  ;;  %v8508_v24 = vsel %vm11441_vm6, %v10999_v20, %v8507_v29  ;;  %v9351_v29 = vunpack.c.l.b16 %v9177_v38  ;;  %v8240_v35 = vld [vmem:[#allocation2 + $0x20] sm:$0xff]  ;;  %v9205_v20 = vsel %vm11499_vm10, %v9196_v33, %v9204_v40 }
 0x3c4   : > { %v14531_v2 = vpop.f32.mrf.mxu3  ;;  %v9525_v19 = vld [vmem:[#allocation2 + $0x8] sm:$0xff]  ;;  %7581 = vst.msk [vmem:[#allocation2 + $0x28] sm:$0xff] %vm450_vm11, %v7549_v6  ;;  %v8565_v42 = vunpack.c.l.b16 %v8508_v24  ;;  %v7958_v39 = vshrl.u32 %v10907_v15, 16  ;;  %v14585_v25 = vunpack.c.l.b16 %v7933_v37  ;;  %v10978_v6 = vld [vmem:[%s11437_s6 + $0xbc] sm:$0x1]  ;;  %v9353_v38 = vunpack.c.l.b16 %v9205_v20 }
 0x3c5   : > { %11020 = vmatmul.msk.bf16.gmra.mxu2 %vm308_vm5, %v8585_v31  ;;  %8802 = vst.msk [vmem:[#allocation2 + $0x10] sm:$0xff] %vm450_vm11, %v8770_v4  ;;  %v9557_v46 = vadd.f32 %v9525_v19, %v14496_v41  ;;  %v14559_v31 = vld [vmem:[%s11437_s6 + $0xb8] sm:$0xf]  ;;  %v9373_v34 = vpack.c.b16 %v9352_v11, %v9351_v29  ;;  %v9215_v4 = vsel %vm11499_vm10, %v9206_v57, %v9214_v7  ;;  %v8517_v10 = vrot.slane %v10978_v6, 5 }
 0x3c6   : > { %v9620_v61 = vld [vmem:[#allocation2] sm:$0xff]  ;;  %v8514_v43 = vrot.slane %v14559_v31, 5  ;;  %v8586_v54 = vpack.c.b16 %v8566_v5, %v8565_v42  ;;  %v11063_v19 = vld [vmem:[%s11437_s6 + $0xb8] sm:$0xf]  ;;  %v7960_v53 = vrot.slane %v7958_v39, 4  ;;  %v9354_v11 = vunpack.c.l.b16 %v9215_v4 }
 0x3c7   : > { %v9656_v63 = vadd.f32 %v14527_v13, %v9620_v61  ;;  %9589 = vst.msk [vmem:[#allocation2 + $0x8] sm:$0xff] %vm450_vm11, %v9557_v46  ;;  %v9217_v61 = vshrl.u32 %v11062_v47, 16  ;;  %v7519_v29 = vld [vmem:[#allocation2 + $0x38] sm:$0xff]  ;;  %v9226_v42 = vshrl.u32 %v11063_v19, 16 }
 0x3c8   : > { %v14556_v41 = vpop.f32.mrf.mxu2  ;;  %v8166_v50 = vpop.f32.mrf.mxu1  ;;  %v8516_v3 = vrot.slane %v8514_v43, 4  ;;  %v7961_v60 = vor.u32 %v7960_v53, %v14599_v30 }
 0x3c9   : > { %v9688_v59 = vmax.f32 %v9656_v63, 0.0  ;;  %v8272_v48 = vadd.f32 %v8240_v35, %v8166_v50  ;;  %v7447_v26 = vpop.f32.mrf.mxu0  ;;  %v14605_v35 = vsel %vm11441_vm6, %v11000_v52, %v8514_v43  ;;  %v9228_v57 = vrot.slane %v9226_v42, 5  ;;  %v10910_v43 = vld [vmem:[%s11437_s6 + $0xc4] sm:$0xf] }
 0x3ca   : > { %v8739_v51 = vld [vmem:[#allocation2 + $0x18] sm:$0xff]  ;;  %v7550_v32 = vadd.f32 %v7518_v55, %v7447_v26  ;;  %v9219_v55 = vrot.slane %v9217_v61, 5  ;;  %v8567_v20 = vunpack.c.l.b16 %v14605_v35  ;;  %v7982_v4 = vshrl.u32 %v10910_v43, 16 }
 0x3cb   : > { %v9720_v18 = vpack.c.bf16 %v9688_v59, %v9688_v59  ;;  %v8771_v27 = vadd.f32 %v8739_v51, %v14517_v0  ;;  %8304 = vst.msk [vmem:[#allocation2 + $0x20] sm:$0xff] %vm450_vm11, %v8272_v48  ;;  %10934 = vmatmul.msk.bf16.gmra.mxu1 %vm308_vm5, %v8085_v23  ;;  %10865 = vmatmul.msk.bf16.gmra.mxu0 %vm308_vm5, %v11172_v21  ;;  %v7950_v0 = vrot.slane %v7948_v1, 5  ;;  %v8241_v8 = vld [vmem:[#allocation2 + $0x28] sm:$0xff]  ;;  %v9220_v23 = vshll.u32 %v11062_v47, 16  ;;  %v11064_v59 = vld [vmem:[%s11437_s6 + $0xbc] sm:$0x3] }
 0x3cc   : > { %v14574_v62 = vpop.f32.mrf.mxu3  ;;  %v9526_v9 = vld [vmem:[#allocation2 + $0x10] sm:$0xff]  ;;  %7582 = vst.msk [vmem:[#allocation2 + $0x30] sm:$0xff] %vm450_vm11, %v7550_v32  ;;  %v9229_v21 = vshll.u32 %v11063_v19, 16  ;;  %v7964_v1 = vshll.u32 %v10908_v28, 16  ;;  %v8518_v48 = vsel %vm11441_vm6, %v8516_v3, %v8517_v10  ;;  %v8086_v51 = vpack.c.b16 %v14590_v36, %v14585_v25  ;;  %v14635_v25 = vld [vmem:[%s11437_s6 + $0xc4] sm:$0xf] }
 0x3cd   : > { %9753 = vst.msk [vmem:[%s14580_s7] sm:$0xf] %vm9752_vm12, %v9720_v18  ;;  %v9558_v45 = vadd.f32 %v9526_v9, %v14531_v2  ;;  %v7951_v44 = vor.u32 %v7950_v0, %v7947_v56  ;;  %v14624_v32 = vpack.c.b16 %v9354_v11, %v9353_v38  ;;  %v9236_v12 = vshrl.u32 %v11064_v59, 16  ;;  %v11173_v56 = vld [vmem:[%s11437_s6 + $0xb4] sm:$0xff] }
 0x3ce   : > { %v9621_v16 = vld [vmem:[#allocation2 + $0x8] sm:$0xff]  ;;  %8803 = vst.msk [vmem:[#allocation2 + $0x18] sm:$0xff] %vm450_vm11, %v8771_v27  ;;  %v9231_v49 = vrot.slane %v9229_v21, 6  ;;  %v9239_v39 = vshll.u32 %v11064_v59, 16  ;;  %v8568_v0 = vunpack.c.l.b16 %v8518_v48  ;;  %v7972_v36 = vshll.u32 %v10909_v14, 16 }
 0x3cf   : > { %v9657_v24 = vadd.f32 %v14527_v13, %v9621_v16  ;;  %9590 = vst.msk [vmem:[#allocation2 + $0x10] sm:$0xff] %vm450_vm11, %v9558_v45  ;;  %v14617_v26 = vrot.slane %v7951_v44, 4  ;;  %v7962_v45 = vrot.slane %v7961_v60, 4  ;;  %v7969_v16 = vshrl.u32 %v10909_v14, 16  ;;  %v11065_v48 = vld [vmem:[%s11437_s6 + $0xc0] sm:$0xe] }
 0x3d0   : > { %v14597_v2 = vpop.f32.mrf.mxu2  ;;  %v8168_v46 = vpop.f32.mrf.mxu1  ;;  %v14642_v10 = vor.u32 %v9231_v49, %v9228_v57  ;;  %v9238_v28 = vrot.slane %v9236_v12, 5  ;;  %v9241_v44 = vrot.slane %v9239_v39, 6  ;;  %v7974_v11 = vrot.slane %v7972_v36, 5 }
 0x3d1   : > { %11090 = vmatmul.msk.bf16.gmra.mxu3 %vm308_vm5, %v9373_v34  ;;  %v9689_v33 = vmax.f32 %v9657_v24, 0.0  ;;  %v8273_v40 = vadd.f32 %v8241_v8, %v8168_v46  ;;  %v7449_v63 = vpop.f32.mrf.mxu0  ;;  %v7520_v24 = vld [vmem:[#allocation2 + $0x40] sm:$0xff]  ;;  %v7957_v3 = vsel %vm11477_vm9, %v14617_v26, %v14599_v30  ;;  %v8587_v35 = vpack.c.b16 %v8568_v0, %v8567_v20 }
 0x3d2   : > { %v8740_v31 = vld [vmem:[#allocation2 + $0x20] sm:$0xff]  ;;  %v7551_v50 = vadd.f32 %v7519_v29, %v7449_v63  ;;  %v10981_v63 = vld [vmem:[%s11437_s6 + $0xc8] sm:$0x1]  ;;  %v8521_v29 = vrot.slane %v14635_v25, 5  ;;  %v14663_v60 = vunpack.c.l.b16 %v7957_v3  ;;  %v9234_v59 = vrot.slane %v14642_v10, 4 }
 0x3d3   : > { %v9721_v5 = vpack.c.bf16 %v9689_v33, %v9689_v33  ;;  %v8772_v37 = vadd.f32 %v8740_v31, %v14556_v41  ;;  %8305 = vst.msk [vmem:[#allocation2 + $0x28] sm:$0xff] %vm450_vm11, %v8273_v40  ;;  %v9222_v41 = vrot.slane %v9220_v23, 6  ;;  %v8242_v47 = vld [vmem:[#allocation2 + $0x30] sm:$0xff]  ;;  %v10979_v40 = vld [vmem:[%s11437_s6 + $0xc0] sm:$0xe]  ;;  %v7984_v31 = vrot.slane %v7982_v4, 4 }
 0x3d4   : > { %v14609_v15 = vpop.f32.mrf.mxu3  ;;  %7583 = vst.msk [vmem:[#allocation2 + $0x38] sm:$0xff] %vm450_vm11, %v7551_v50  ;;  %v11001_v14 = vrot.slane %v10979_v40, 9  ;;  %v11066_v20 = vld [vmem:[%s11437_s6 + $0xc4] sm:$0xf]  ;;  %v9245_v0 = vshrl.u32 %v11065_v48, 16 }
 0x3d5   : > { %11021 = vmatmul.msk.bf16.gmra.mxu2 %vm308_vm5, %v8586_v54  ;;  %9754 = vst.msk [vmem:[%s14580_s7 + $0x4] sm:$0xf] %vm9752_vm12, %v9721_v5  ;;  %v9527_v7 = vld [vmem:[#allocation2 + $0x18] sm:$0xff]  ;;  %v7966_v54 = vrot.slane %v7964_v1, 5  ;;  %v9223_v53 = vor.u32 %v9222_v41, %v9219_v55  ;;  %v10911_v5 = vld [vmem:[%s11437_s6 + $0xc8] sm:$0x1]  ;;  %v9242_v41 = vor.u32 %v9241_v44, %v9238_v28 }
 0x3d6   : > { %v9622_v18 = vld [vmem:[#allocation2 + $0x10] sm:$0xff]  ;;  %8804 = vst.msk [vmem:[#allocation2 + $0x20] sm:$0xff] %vm450_vm11, %v8772_v37  ;;  %v9559_v27 = vadd.f32 %v9527_v7, %v14574_v62  ;;  %v7978_v62 = vshll.u32 %v10910_v43, 16  ;;  %v8523_v7 = vrot.slane %v8521_v29, 4  ;;  %v7988_v49 = vshll.u32 %v10911_v5, 16 }
 0x3d7   : > { %v9658_v9 = vadd.f32 %v14527_v13, %v9622_v18  ;;  %v7967_v30 = vsel %vm11477_vm9, %v7962_v45, %v7966_v54  ;;  %v9224_v21 = vrot.slane %v9223_v53, 4  ;;  %v9248_v45 = vshll.u32 %v11065_v48, 16 }
 0x3d8   : > { %v14631_v34 = vpop.f32.mrf.mxu2  ;;  %9591 = vst.msk [vmem:[#allocation2 + $0x18] sm:$0xff] %vm450_vm11, %v9559_v27  ;;  %v8171_v6 = vpop.f32.mrf.mxu1  ;;  %v14656_v42 = vrot.slane %v7978_v62, 5  ;;  %v14665_v1 = vunpack.c.l.b16 %v7967_v30  ;;  %v9257_v36 = vshll.u32 %v11066_v20, 16  ;;  %v9243_v4 = vsel %vm11499_vm10, %v9234_v59, %v9242_v41 }
 0x3d9   : > { %v9690_v38 = vmax.f32 %v9658_v9, 0.0  ;;  %v8274_v52 = vadd.f32 %v8242_v47, %v8171_v6  ;;  %v7452_v19 = vpop.f32.mrf.mxu0  ;;  %v7521_v9 = vld [vmem:[#allocation2 + $0x48] sm:$0xff]  ;;  %v14695_v3 = vrot.slane %v7988_v49, 5 }
 0x3da   : > { %v8741_v46 = vld [vmem:[#allocation2 + $0x28] sm:$0xff]  ;;  %v7552_v8 = vadd.f32 %v7520_v24, %v7452_v19  ;;  %v7985_v27 = vor.u32 %v7984_v31, %v14656_v42 }
 0x3db   : > { %v9722_v61 = vpack.c.bf16 %v9690_v38, %v9690_v38  ;;  %v8773_v23 = vadd.f32 %v8741_v46, %v14597_v2  ;;  %8306 = vst.msk [vmem:[#allocation2 + $0x30] sm:$0xff] %vm450_vm11, %v8274_v52  ;;  %10935 = vmatmul.msk.bf16.gmra.mxu1 %vm308_vm5, %v8086_v51  ;;  %10866 = vmatmul.msk.bf16.gmra.mxu0 %vm308_vm5, %v11173_v56  ;;  %v7971_v2 = vrot.slane %v7969_v16, 4  ;;  %v8524_v51 = vrot.slane %v10981_v63, 5  ;;  %v8243_v43 = vld [vmem:[#allocation2 + $0x38] sm:$0xff]  ;;  %v11067_v47 = vld [vmem:[%s11437_s6 + $0xc8] sm:$0x3] }
 0x3dc   : > { %v14647_v33 = vpop.f32.mrf.mxu3  ;;  %7584 = vst.msk [vmem:[#allocation2 + $0x40] sm:$0xff] %vm450_vm11, %v7552_v8  ;;  %v9233_v56 = vsel %vm11499_vm10, %v9224_v21, %v14642_v10  ;;  %v9254_v16 = vshrl.u32 %v11066_v20, 16  ;;  %v8522_v38 = vsel %vm11441_vm6, %v11001_v14, %v8521_v29  ;;  %v14693_v24 = vrot.slane %v7985_v27, 4  ;;  %v10912_v31 = vld [vmem:[%s11437_s6 + $0xcc] sm:$0xf]  ;;  %v11174_v21 = vld [vmem:[%s11437_s6 + $0xc0] sm:$0xff] }
 0x3dd   : > { %9755 = vst.msk [vmem:[%s14580_s7 + $0x8] sm:$0xf] %vm9752_vm12, %v9722_v61  ;;  %v9528_v50 = vld [vmem:[#allocation2 + $0x20] sm:$0xff]  ;;  %v7975_v18 = vor.u32 %v7974_v11, %v7971_v2  ;;  %v8525_v52 = vsel %vm11441_vm6, %v8523_v7, %v8524_v51  ;;  %v9247_v46 = vrot.slane %v9245_v0, 5  ;;  %v9250_v8 = vrot.slane %v9248_v45, 6 }
 0x3de   : > { %8805 = vst.msk [vmem:[#allocation2 + $0x28] sm:$0xff] %vm450_vm11, %v8773_v23  ;;  %v9560_v37 = vadd.f32 %v9528_v50, %v14609_v15  ;;  %v9264_v10 = vshrl.u32 %v11067_v47, 16  ;;  %v9267_v28 = vshll.u32 %v11067_v47, 16  ;;  %v9256_v61 = vrot.slane %v9254_v16, 5  ;;  %v14718_v51 = vld [vmem:[%s11437_s6 + $0xd0] sm:$0xf] }
 0x3df   : > { %v9623_v26 = vld [vmem:[#allocation2 + $0x18] sm:$0xff]  ;;  %v9259_v23 = vrot.slane %v9257_v36, 6  ;;  %v8087_v63 = vpack.c.b16 %v14665_v1, %v14663_v60  ;;  %v9355_v29 = vunpack.c.l.b16 %v9233_v56  ;;  %v9356_v2 = vunpack.c.l.b16 %v9243_v4  ;;  %v10913_v1 = vld [vmem:[%s11437_s6 + $0xd0] sm:$0xf] }
 0x3e0   : > { %v14669_v55 = vpop.f32.mrf.mxu2  ;;  %v9659_v57 = vadd.f32 %v14527_v13, %v9623_v26  ;;  %9592 = vst.msk [vmem:[#allocation2 + $0x20] sm:$0xff] %vm450_vm11, %v9560_v37  ;;  %v8173_v15 = vpop.f32.mrf.mxu1  ;;  %v8569_v11 = vunpack.c.l.b16 %v8522_v38  ;;  %v8570_v5 = vunpack.c.l.b16 %v8525_v52  ;;  %v7991_v60 = vsel %vm11477_vm9, %v14693_v24, %v14695_v3  ;;  %v7522_v26 = vld [vmem:[#allocation2 + $0x50] sm:$0xff] }
 0x3e1   : > { %11091 = vmatmul.msk.bf16.gmra.mxu3 %vm308_vm5, %v14624_v32  ;;  %v8275_v12 = vadd.f32 %v8243_v43, %v8173_v15  ;;  %v7454_v39 = vpop.f32.mrf.mxu0  ;;  %v9251_v41 = vor.u32 %v9250_v8, %v9247_v46  ;;  %v9266_v14 = vrot.slane %v9264_v10, 5  ;;  %v9269_v7 = vrot.slane %v9267_v28, 6  ;;  %v11069_v4 = vld [vmem:[%s11437_s6 + $0xd0] sm:$0xf] }
 0x3e2   : > { %v9691_v54 = vmax.f32 %v9659_v57, 0.0  ;;  %v8742_v25 = vld [vmem:[#allocation2 + $0x30] sm:$0xff]  ;;  %v7553_v6 = vadd.f32 %v7521_v9, %v7454_v39  ;;  %v14720_v43 = vor.u32 %v9259_v23, %v9256_v61  ;;  %v8002_v39 = vshll.u32 %v10913_v1, 16 }
 0x3e3   : > { %v8774_v32 = vadd.f32 %v8742_v25, %v14631_v34  ;;  %8307 = vst.msk [vmem:[#allocation2 + $0x38] sm:$0xff] %vm450_vm11, %v8275_v12  ;;  %v7976_v34 = vrot.slane %v7975_v18, 4  ;;  %v7993_v18 = vshrl.u32 %v10912_v31, 16  ;;  %v7996_v12 = vshll.u32 %v10912_v31, 16  ;;  %v14735_v25 = vld [vmem:[%s11437_s6 + $0xd4] sm:$0x1] }
 0x3e4   : > { %v14683_v62 = vpop.f32.mrf.mxu3  ;;  %v9723_v19 = vpack.c.bf16 %v9691_v54, %v9691_v54  ;;  %7585 = vst.msk [vmem:[#allocation2 + $0x48] sm:$0xff] %vm450_vm11, %v7553_v6  ;;  %v8006_v9 = vshrl.u32 %v10913_v1, 16  ;;  %v9375_v45 = vpack.c.b16 %v9356_v2, %v9355_v29  ;;  %v11068_v6 = vld [vmem:[%s11437_s6 + $0xcc] sm:$0xe]  ;;  %v9252_v16 = vrot.slane %v9251_v41, 4 }
 0x3e5   : > { %11022 = vmatmul.msk.bf16.gmra.mxu2 %vm308_vm5, %v8587_v35  ;;  %8806 = vst.msk [vmem:[#allocation2 + $0x30] sm:$0xff] %vm450_vm11, %v8774_v32  ;;  %v9529_v53 = vld [vmem:[#allocation2 + $0x28] sm:$0xff]  ;;  %v7981_v37 = vsel %vm11477_vm9, %v7976_v34, %v14656_v42  ;;  %v8528_v32 = vrot.slane %v14718_v51, 5  ;;  %v14745_v38 = vunpack.c.l.b16 %v7991_v60  ;;  %v9262_v52 = vrot.slane %v14720_v43, 4  ;;  %v10914_v34 = vld [vmem:[%s11437_s6 + $0xd4] sm:$0x1] }
 0x3e6   : > { %9756 = vst.msk [vmem:[%s14580_s7 + $0xc] sm:$0xf] %vm9752_vm12, %v9723_v19  ;;  %v9561_v44 = vadd.f32 %v9529_v53, %v14647_v33  ;;  %v8244_v33 = vld [vmem:[#allocation2 + $0x40] sm:$0xff]  ;;  %v14723_v42 = vld [vmem:[%s11437_s6 + $0xcc] sm:$0xe]  ;;  %v14732_v54 = vunpack.c.l.b16 %v7981_v37  ;;  %v9270_v19 = vor.u32 %v9269_v7, %v9266_v14  ;;  %v7995_v24 = vrot.slane %v7993_v18, 4 }
 0x3e7   : > { %v9624_v30 = vld [vmem:[#allocation2 + $0x20] sm:$0xff]  ;;  %v11002_v36 = vrot.slane %v14723_v42, 9  ;;  %v14752_v46 = vrot.slane %v8002_v39, 5  ;;  %v8008_v8 = vrot.slane %v8006_v9, 4  ;;  %v9273_v10 = vshrl.u32 %v11068_v6, 16 }
 0x3e8   : > { %v14701_v40 = vpop.f32.mrf.mxu2  ;;  %v9660_v50 = vadd.f32 %v14527_v13, %v9624_v30  ;;  %9593 = vst.msk [vmem:[#allocation2 + $0x28] sm:$0xff] %vm450_vm11, %v9561_v44  ;;  %v8176_v35 = vpop.f32.mrf.mxu1  ;;  %v9276_v23 = vshll.u32 %v11068_v6, 16  ;;  %v9282_v30 = vshrl.u32 %v11069_v4, 16  ;;  %v9261_v31 = vsel %vm11499_vm10, %v9252_v16, %v14720_v43  ;;  %v11070_v1 = vld [vmem:[%s11437_s6 + $0xd4] sm:$0x3]  ;;  %v11175_v6 = vld [vmem:[%s11437_s6 + $0xcc] sm:$0xff] }
 0x3e9   : > { %v8276_v59 = vadd.f32 %v8244_v33, %v8176_v35  ;;  %v7457_v48 = vpop.f32.mrf.mxu0  ;;  %v8531_v35 = vrot.slane %v14735_v25, 5  ;;  %v9271_v37 = vsel %vm11499_vm10, %v9262_v52, %v9270_v19  ;;  %v8012_v60 = vshll.u32 %v10914_v34, 16  ;;  %v7524_v52 = vld [vmem:[#allocation2 + $0x60] sm:$0xff] }
 0x3ea   : > { %v9692_v20 = vmax.f32 %v9660_v50, 0.0  ;;  %v8743_v57 = vld [vmem:[#allocation2 + $0x38] sm:$0xff]  ;;  %v7554_v15 = vadd.f32 %v7522_v26, %v7457_v48  ;;  %v8530_v50 = vrot.slane %v8528_v32, 4  ;;  %v8009_v41 = vor.u32 %v8008_v8, %v14752_v46 }
 0x3eb   : > { %v8775_v27 = vadd.f32 %v8743_v57, %v14669_v55  ;;  %8308 = vst.msk [vmem:[#allocation2 + $0x40] sm:$0xff] %vm450_vm11, %v8276_v59  ;;  %10936 = vmatmul.msk.bf16.gmra.mxu1 %vm308_vm5, %v8087_v63  ;;  %10867 = vmatmul.msk.bf16.gmra.mxu0 %vm308_vm5, %v11174_v21  ;;  %v8588_v55 = vpack.c.b16 %v8570_v5, %v8569_v11  ;;  %v8245_v61 = vld [vmem:[#allocation2 + $0x48] sm:$0xff]  ;;  %v9285_v63 = vshll.u32 %v11069_v4, 16  ;;  %v7523_v11 = vld [vmem:[#allocation2 + $0x58] sm:$0xff]  ;;  %v9275_v14 = vrot.slane %v9273_v10, 5 }
 0x3ec   : > { %v14728_v49 = vpop.f32.mrf.mxu3  ;;  %v9724_v56 = vpack.c.bf16 %v9692_v20, %v9692_v20  ;;  %v9530_v0 = vld [vmem:[#allocation2 + $0x30] sm:$0xff]  ;;  %7586 = vst.msk [vmem:[#allocation2 + $0x50] sm:$0xff] %vm450_vm11, %v7554_v15  ;;  %v9278_v20 = vrot.slane %v9276_v23, 6  ;;  %v9284_v57 = vrot.slane %v9282_v30, 5  ;;  %v9292_v43 = vshrl.u32 %v11070_v1, 16 }
 0x3ed   : > { %8807 = vst.msk [vmem:[#allocation2 + $0x38] sm:$0xff] %vm450_vm11, %v8775_v27  ;;  %v9562_v47 = vadd.f32 %v9530_v0, %v14683_v62  ;;  %v7998_v62 = vrot.slane %v7996_v12, 5  ;;  %v9287_v15 = vrot.slane %v9285_v63, 6  ;;  %v9295_v42 = vshll.u32 %v11070_v1, 16  ;;  %v10915_v23 = vld [vmem:[%s11437_s6 + $0xd8] sm:$0xf] }
 0x3ee   : > { %9757 = vst.msk [vmem:[%s14580_s7 + $0x10] sm:$0xf] %vm9752_vm12, %v9724_v56  ;;  %v8088_v27 = vpack.c.b16 %v14745_v38, %v14732_v54  ;;  %v9357_v12 = vunpack.c.l.b16 %v9261_v31  ;;  %v8529_v39 = vsel %vm11441_vm6, %v11002_v36, %v8528_v32  ;;  %v8532_v0 = vsel %vm11441_vm6, %v8530_v50, %v8531_v35  ;;  %v10916_v30 = vld [vmem:[%s11437_s6 + $0xdc] sm:$0xf] }
 0x3ef   : > { %v9625_v3 = vld [vmem:[#allocation2 + $0x28] sm:$0xff]  ;;  %9594 = vst.msk [vmem:[#allocation2 + $0x30] sm:$0xff] %vm450_vm11, %v9562_v47  ;;  %v7999_v26 = vor.u32 %v7998_v62, %v7995_v24  ;;  %v8010_v47 = vrot.slane %v8009_v41, 4  ;;  %v9279_v16 = vor.u32 %v9278_v20, %v9275_v14  ;;  %v14783_v4 = vor.u32 %v9287_v15, %v9284_v57  ;;  %v14786_v62 = vld [vmem:[%s11437_s6 + $0xdc] sm:$0xf] }
 0x3f0   : > { %v14750_v53 = vpop.f32.mrf.mxu2  ;;  %v9661_v28 = vadd.f32 %v14527_v13, %v9625_v3  ;;  %v8178_v44 = vpop.f32.mrf.mxu1  ;;  %v9294_v19 = vrot.slane %v9292_v43, 5  ;;  %v9297_v34 = vrot.slane %v9295_v42, 6  ;;  %v8020_v1 = vshll.u32 %v10915_v23, 16 }
 0x3f1   : > { %11092 = vmatmul.msk.bf16.gmra.mxu3 %vm308_vm5, %v9375_v45  ;;  %v8277_v29 = vadd.f32 %v8245_v61, %v8178_v44  ;;  %v7459_v2 = vpop.f32.mrf.mxu0  ;;  %v8014_v45 = vrot.slane %v8012_v60, 5  ;;  %v8000_v54 = vrot.slane %v7999_v26, 4  ;;  %v8571_v44 = vunpack.c.l.b16 %v8529_v39  ;;  %v11071_v39 = vld [vmem:[%s11437_s6 + $0xd8] sm:$0xe] }
 0x3f2   : > { %v9693_v33 = vmax.f32 %v9661_v28, 0.0  ;;  %v8744_v21 = vld [vmem:[#allocation2 + $0x40] sm:$0xff]  ;;  %v7555_v5 = vadd.f32 %v7523_v11, %v7459_v2  ;;  %v8572_v61 = vunpack.c.l.b16 %v8532_v0  ;;  %v9280_v2 = vrot.slane %v9279_v16, 4  ;;  %v10985_v11 = vld [vmem:[%s11437_s6 + $0xd8] sm:$0xe] }
 0x3f3   : > { %v8776_v59 = vadd.f32 %v8744_v21, %v14701_v40  ;;  %8309 = vst.msk [vmem:[#allocation2 + $0x48] sm:$0xff] %vm450_vm11, %v8277_v29  ;;  %v8246_v25 = vld [vmem:[#allocation2 + $0x50] sm:$0xff]  ;;  %v8015_v50 = vsel %vm11477_vm9, %v8010_v47, %v8014_v45  ;;  %v9290_v35 = vrot.slane %v14783_v4, 4  ;;  %v10987_v21 = vld [vmem:[%s11437_s6 + $0xe0] sm:$0x1]  ;;  %v8017_v60 = vshrl.u32 %v10915_v23, 16 }
 0x3f4   : > { %v9464_v48 = vpop.f32.mrf.mxu3  ;;  %v9725_v7 = vpack.c.bf16 %v9693_v33, %v9693_v33  ;;  %v9531_v51 = vld [vmem:[#allocation2 + $0x38] sm:$0xff]  ;;  %7587 = vst.msk [vmem:[#allocation2 + $0x58] sm:$0xff] %vm450_vm11, %v7555_v5  ;;  %v9298_v33 = vor.u32 %v9297_v34, %v9294_v19  ;;  %v8026_v26 = vshll.u32 %v10916_v30, 16  ;;  %v8030_v41 = vshrl.u32 %v10916_v30, 16 }
 0x3f5   : > { %11023 = vmatmul.msk.bf16.gmra.mxu2 %vm308_vm5, %v8588_v55  ;;  %8808 = vst.msk [vmem:[#allocation2 + $0x40] sm:$0xff] %vm450_vm11, %v8776_v59  ;;  %v9563_v40 = vadd.f32 %v9531_v51, %v14728_v49  ;;  %v9358_v49 = vunpack.c.l.b16 %v9271_v37  ;;  %v8535_v37 = vrot.slane %v14786_v62, 5  ;;  %v7525_v51 = vld [vmem:[#allocation2 + $0x68] sm:$0xff]  ;;  %v14816_v57 = vunpack.c.l.b16 %v8015_v50 }
 0x3f6   : > { %9758 = vst.msk [vmem:[%s14580_s7 + $0x14] sm:$0xf] %vm9752_vm12, %v9725_v7  ;;  %v9626_v18 = vld [vmem:[#allocation2 + $0x30] sm:$0xff]  ;;  %v9289_v15 = vsel %vm11499_vm10, %v9280_v2, %v14783_v4  ;;  %v14829_v16 = vrot.slane %v8026_v26, 5  ;;  %v8032_v4 = vrot.slane %v8030_v41, 4 }
 0x3f7   : > { %v9662_v9 = vadd.f32 %v14527_v13, %v9626_v18  ;;  %9595 = vst.msk [vmem:[#allocation2 + $0x38] sm:$0xff] %vm450_vm11, %v9563_v40  ;;  %v9376_v29 = vpack.c.b16 %v9358_v49, %v9357_v12  ;;  %v11003_v40 = vrot.slane %v10985_v11, 9  ;;  %v8538_v12 = vrot.slane %v10987_v21, 5 }
 0x3f8   : > { %v14778_v56 = vpop.f32.mrf.mxu2  ;;  %v8181_v55 = vpop.f32.mrf.mxu1  ;;  %v8537_v45 = vrot.slane %v8535_v37, 4  ;;  %v9359_v34 = vunpack.c.l.b16 %v9289_v15 }
 0x3f9   : > { %v9694_v36 = vmax.f32 %v9662_v9, 0.0  ;;  %v8278_v32 = vadd.f32 %v8246_v25, %v8181_v55  ;;  %v7462_v38 = vpop.f32.mrf.mxu0  ;;  %v11072_v9 = vld [vmem:[%s11437_s6 + $0xdc] sm:$0xf]  ;;  %v8019_v55 = vrot.slane %v8017_v60, 4  ;;  %v8022_v25 = vrot.slane %v8020_v1, 5 }
 0x3fa   : > { %v8745_v24 = vld [vmem:[#allocation2 + $0x48] sm:$0xff]  ;;  %v7556_v3 = vadd.f32 %v7524_v52, %v7462_v38  ;;  %v9304_v38 = vshll.u32 %v11071_v39, 16  ;;  %v9310_v52 = vshrl.u32 %v11072_v9, 16 }
 0x3fb   : > { %v9726_v8 = vpack.c.bf16 %v9694_v36, %v9694_v36  ;;  %v8777_v10 = vadd.f32 %v8745_v24, %v14750_v53  ;;  %8310 = vst.msk [vmem:[#allocation2 + $0x50] sm:$0xff] %vm450_vm11, %v8278_v32  ;;  %10937 = vmatmul.msk.bf16.gmra.mxu1 %vm308_vm5, %v8088_v27  ;;  %10868 = vmatmul.msk.bf16.gmra.mxu0 %vm308_vm5, %v11175_v6  ;;  %v8247_v7 = vld [vmem:[#allocation2 + $0x58] sm:$0xff]  ;;  %v10917_v36 = vld [vmem:[%s11437_s6 + $0xe0] sm:$0x1]  ;;  %v9301_v32 = vshrl.u32 %v11071_v39, 16 }
 0x3fc   : > { %v14791_v28 = vpop.f32.mrf.mxu3  ;;  %v9532_v63 = vld [vmem:[#allocation2 + $0x40] sm:$0xff]  ;;  %7588 = vst.msk [vmem:[#allocation2 + $0x60] sm:$0xff] %vm450_vm11, %v7556_v3  ;;  %v8005_v53 = vsel %vm11477_vm9, %v8000_v54, %v14752_v46  ;;  %v14823_v27 = vsel %vm11499_vm10, %v9290_v35, %v9298_v33  ;;  %v9313_v3 = vshll.u32 %v11072_v9, 16  ;;  %v8036_v2 = vshll.u32 %v10917_v36, 16 }
 0x3fd   : > { %9759 = vst.msk [vmem:[%s14580_s7 + $0x18] sm:$0xf] %vm9752_vm12, %v9726_v8  ;;  %v9564_v31 = vadd.f32 %v9532_v63, %v9464_v48  ;;  %v8589_v48 = vpack.c.b16 %v8572_v61, %v8571_v44  ;;  %v14814_v20 = vunpack.c.l.b16 %v8005_v53  ;;  %v11073_v24 = vld [vmem:[%s11437_s6 + $0xe0] sm:$0x3]  ;;  %v8536_v44 = vsel %vm11441_vm6, %v11003_v40, %v8535_v37  ;;  %v11176_v63 = vld [vmem:[%s11437_s6 + $0xd8] sm:$0xff]  ;;  %v7526_v37 = vld [vmem:[#allocation2 + $0x70] sm:$0xff] }
 0x3fe   : > { %v9627_v5 = vld [vmem:[#allocation2 + $0x38] sm:$0xff]  ;;  %8809 = vst.msk [vmem:[#allocation2 + $0x48] sm:$0xff] %vm450_vm11, %v8777_v10  ;;  %v9360_v10 = vunpack.c.l.b16 %v14823_v27  ;;  %v8539_v61 = vsel %vm11441_vm6, %v8537_v45, %v8538_v12  ;;  %v8033_v53 = vor.u32 %v8032_v4, %v14829_v16  ;;  %v9306_v50 = vrot.slane %v9304_v38, 6 }
 0x3ff   : > { %v9663_v46 = vadd.f32 %v14527_v13, %v9627_v5  ;;  %9596 = vst.msk [vmem:[#allocation2 + $0x40] sm:$0xff] %vm450_vm11, %v9564_v31  ;;  %v9303_v31 = vrot.slane %v9301_v32, 5  ;;  %v9312_v35 = vrot.slane %v9310_v52, 5  ;;  %v9320_v33 = vshrl.u32 %v11073_v24, 16  ;;  %v7527_v4 = vld [vmem:[#allocation2 + $0x78] sm:$0xff] }
 0x400   : > { %v14811_v59 = vpop.f32.mrf.mxu2  ;;  %v8183_v14 = vpop.f32.mrf.mxu1  ;;  %v9315_v60 = vrot.slane %v9313_v3, 6  ;;  %v9323_v1 = vshll.u32 %v11073_v24, 16  ;;  %v8034_v15 = vrot.slane %v8033_v53, 4  ;;  %v8038_v40 = vrot.slane %v8036_v2, 5 }
 0x401   : > { %11093 = vmatmul.msk.bf16.gmra.mxu3 %vm308_vm5, %v9376_v29  ;;  %v9695_v43 = vmax.f32 %v9663_v46, 0.0  ;;  %v8279_v42 = vadd.f32 %v8247_v7, %v8183_v14  ;;  %v7464_v18 = vpop.f32.mrf.mxu0  ;;  %v8023_v29 = vor.u32 %v8022_v25, %v8019_v55  ;;  %v8573_v7 = vunpack.c.l.b16 %v8536_v44 }
 0x402   : > { %v8746_v49 = vld [vmem:[#allocation2 + $0x50] sm:$0xff]  ;;  %v7557_v0 = vadd.f32 %v7525_v51, %v7464_v18  ;;  %v8574_v51 = vunpack.c.l.b16 %v8539_v61  ;;  %v9322_v18 = vrot.slane %v9320_v33, 5  ;;  %v9325_v27 = vrot.slane %v9323_v1, 6 }
 0x403   : > { %v9727_v6 = vpack.c.bf16 %v9695_v43, %v9695_v43  ;;  %v8778_v54 = vadd.f32 %v8746_v49, %v14778_v56  ;;  %8311 = vst.msk [vmem:[#allocation2 + $0x58] sm:$0xff] %vm450_vm11, %v8279_v42  ;;  %v8089_v56 = vpack.c.b16 %v14816_v57, %v14814_v20  ;;  %v9377_v20 = vpack.c.b16 %v9360_v10, %v9359_v34 }
 0x404   : > { %v9469_v47 = vpop.f32.mrf.mxu3  ;;  %7589 = vst.msk [vmem:[#allocation2 + $0x68] sm:$0xff] %vm450_vm11, %v7557_v0  ;;  %v8024_v57 = vrot.slane %v8023_v29, 4  ;;  %v9307_v42 = vor.u32 %v9306_v50, %v9303_v31  ;;  %v8590_v49 = vpack.c.b16 %v8574_v51, %v8573_v7  ;;  %v9326_v38 = vor.u32 %v9325_v27, %v9322_v18  ;;  %v7528_v31 = vld [vmem:[#allocation2 + $0x80] sm:$0xff] }
 0x405   : > { %11024 = vmatmul.msk.bf16.gmra.mxu2 %vm308_vm5, %v8589_v48  ;;  %9760 = vst.msk [vmem:[%s14580_s7 + $0x1c] sm:$0xf] %vm9752_vm12, %v9727_v6  ;;  %v9533_v19 = vld [vmem:[#allocation2 + $0x48] sm:$0xff]  ;;  %v8039_v6 = vsel %vm11477_vm9, %v8034_v15, %v8038_v40 }
 0x406   : > { %v9628_v62 = vld [vmem:[#allocation2 + $0x40] sm:$0xff]  ;;  %8810 = vst.msk [vmem:[#allocation2 + $0x50] sm:$0xff] %vm450_vm11, %v8778_v54  ;;  %v9565_v8 = vadd.f32 %v9533_v19, %v14791_v28  ;;  %v8029_v25 = vsel %vm11477_vm9, %v8024_v57, %v14829_v16  ;;  %v9308_v36 = vrot.slane %v9307_v42, 4  ;;  %v8074_v3 = vunpack.c.l.b16 %v8039_v6  ;;  %v7530_v6 = vld [vmem:[#allocation2 + $0x90] sm:$0xff] }
 0x407   : > { %v9664_v23 = vadd.f32 %v14527_v13, %v9628_v62  ;;  %v8248_v28 = vld [vmem:[#allocation2 + $0x60] sm:$0xff]  ;;  %v8073_v24 = vunpack.c.l.b16 %v8029_v25 }
 0x408   : > { %v8686_v30 = vpop.f32.mrf.mxu2  ;;  %9597 = vst.msk [vmem:[#allocation2 + $0x48] sm:$0xff] %vm450_vm11, %v9565_v8  ;;  %v8186_v11 = vpop.f32.mrf.mxu1 }
 0x409   : > { %v9696_v21 = vmax.f32 %v9664_v23, 0.0  ;;  %v8280_v5 = vadd.f32 %v8248_v28, %v8186_v11  ;;  %v7467_v17 = vpop.f32.mrf.mxu0  ;;  %v8090_v23 = vpack.c.b16 %v8074_v3, %v8073_v24 }
 0x40a   : > { %v8747_v46 = vld [vmem:[#allocation2 + $0x58] sm:$0xff]  ;;  %v7558_v48 = vadd.f32 %v7526_v37, %v7467_v17 }
 0x40b   : > { %v9728_v26 = vpack.c.bf16 %v9696_v21, %v9696_v21  ;;  %v8779_v41 = vadd.f32 %v8747_v46, %v14811_v59  ;;  %8312 = vst.msk [vmem:[#allocation2 + $0x60] sm:$0xff] %vm450_vm11, %v8280_v5  ;;  %10938 = vmatmul.msk.bf16.gmra.mxu1 %vm308_vm5, %v8089_v56  ;;  %10869 = vmatmul.msk.bf16.gmra.mxu0 %vm308_vm5, %v11176_v63  ;;  %v8249_v55 = vld [vmem:[#allocation2 + $0x68] sm:$0xff] }
 0x40c   : > { %v9471_v14 = vpop.f32.mrf.mxu3  ;;  %7590 = vst.msk [vmem:[#allocation2 + $0x70] sm:$0xff] %vm450_vm11, %v7558_v48  ;;  %v9316_v59 = vor.u32 %v9315_v60, %v9312_v35 }
 0x40d   : > { %9761 = vst.msk [vmem:[%s14580_s7 + $0x20] sm:$0xf] %vm9752_vm12, %v9728_v26  ;;  %v9534_v43 = vld [vmem:[#allocation2 + $0x50] sm:$0xff] }
 0x40e   : > { %8811 = vst.msk [vmem:[#allocation2 + $0x58] sm:$0xff] %vm450_vm11, %v8779_v41  ;;  %v9566_v12 = vadd.f32 %v9534_v43, %v9469_v47  ;;  %v9318_v32 = vrot.slane %v9316_v59, 4  ;;  %v9317_v62 = vsel %vm11499_vm10, %v9308_v36, %v9316_v59 }
 0x40f   : > { %v9629_v39 = vld [vmem:[#allocation2 + $0x48] sm:$0xff]  ;;  %v9361_v2 = vunpack.c.l.b16 %v9317_v62  ;;  %v7531_v62 = vld [vmem:[#allocation2 + $0x98] sm:$0xff] }
 0x410   : > { %v8688_v9 = vpop.f32.mrf.mxu2  ;;  %v9665_v0 = vadd.f32 %v14527_v13, %v9629_v39  ;;  %9598 = vst.msk [vmem:[#allocation2 + $0x50] sm:$0xff] %vm450_vm11, %v9566_v12  ;;  %v8188_v45 = vpop.f32.mrf.mxu1  ;;  %v9327_v8 = vsel %vm11499_vm10, %v9318_v32, %v9326_v38 }
 0x411   : > { %11094 = vmatmul.msk.bf16.gmra.mxu3 %vm308_vm5, %v9377_v20  ;;  %v8281_v54 = vadd.f32 %v8249_v55, %v8188_v45  ;;  %v7469_v47 = vpop.f32.mrf.mxu0  ;;  %v9362_v22 = vunpack.c.l.b16 %v9327_v8  ;;  %v7529_v20 = vld [vmem:[#allocation2 + $0x88] sm:$0xff] }
 0x412   : > { %v9697_v13 = vmax.f32 %v9665_v0, 0.0  ;;  %v8748_v52 = vld [vmem:[#allocation2 + $0x60] sm:$0xff]  ;;  %v7559_v19 = vadd.f32 %v7527_v4, %v7469_v47 }
 0x413   : > { %v8780_v56 = vadd.f32 %v8748_v52, %v8686_v30  ;;  %8313 = vst.msk [vmem:[#allocation2 + $0x68] sm:$0xff] %vm450_vm11, %v8281_v54  ;;  %v14879_v30 = vld [vmem:[%s15064_s2] ss:$0 sm:$0xff]  ;;  %v8250_v53 = vld [vmem:[#allocation2 + $0x70] sm:$0xff]  ;;  %v9378_v60 = vpack.c.b16 %v9362_v22, %v9361_v2 }
 0x414   : > { %v9474_v34 = vpop.f32.mrf.mxu3  ;;  %v9729_v16 = vpack.c.bf16 %v9697_v13, %v9697_v13  ;;  %7591 = vst.msk [vmem:[#allocation2 + $0x78] sm:$0xff] %vm450_vm11, %v7559_v19 }
 0x415   : > { %11025 = vmatmul.msk.bf16.gmra.mxu2 %vm308_vm5, %v8590_v49  ;;  %8812 = vst.msk [vmem:[#allocation2 + $0x60] sm:$0xff] %vm450_vm11, %v8780_v56  ;;  %v9535_v58 = vld [vmem:[#allocation2 + $0x58] sm:$0xff] }
 0x416   : > { %9762 = vst.msk [vmem:[%s14580_s7 + $0x24] sm:$0xf] %vm9752_vm12, %v9729_v16  ;;  %v9567_v10 = vadd.f32 %v9535_v58, %v9471_v14 }
 0x417   : > { %v9630_v44 = vld [vmem:[#allocation2 + $0x50] sm:$0xff] }
 0x418   : > { %v8691_v61 = vpop.f32.mrf.mxu2  ;;  %v9666_v63 = vadd.f32 %v14879_v30, %v9630_v44  ;;  %9599 = vst.msk [vmem:[#allocation2 + $0x58] sm:$0xff] %vm450_vm11, %v9567_v10  ;;  %v8191_v29 = vpop.f32.mrf.mxu1 }
 0x419   : > { %v8282_v11 = vadd.f32 %v8250_v53, %v8191_v29  ;;  %v7472_v28 = vpop.f32.mrf.mxu0 }
 0x41a   : > { %v9698_v50 = vmax.f32 %v9666_v63, 0.0  ;;  %v8749_v35 = vld [vmem:[#allocation2 + $0x68] sm:$0xff]  ;;  %v7560_v33 = vadd.f32 %v7528_v31, %v7472_v28 }
 0x41b   : > { %v8781_v21 = vadd.f32 %v8749_v35, %v8688_v9  ;;  %8314 = vst.msk [vmem:[#allocation2 + $0x70] sm:$0xff] %vm450_vm11, %v8282_v11  ;;  %10939 = vmatmul.msk.bf16.gmra.mxu1 %vm308_vm5, %v8090_v23  ;;  %v8251_v14 = vld [vmem:[#allocation2 + $0x78] sm:$0xff] }
 0x41c   : > { %v9476_v5 = vpop.f32.mrf.mxu3  ;;  %v9730_v17 = vpack.c.bf16 %v9698_v50, %v9698_v50  ;;  %v9536_v37 = vld [vmem:[#allocation2 + $0x60] sm:$0xff]  ;;  %7592 = vst.msk [vmem:[#allocation2 + $0x80] sm:$0xff] %vm450_vm11, %v7560_v33 }
 0x41d   : > { %8813 = vst.msk [vmem:[#allocation2 + $0x68] sm:$0xff] %vm450_vm11, %v8781_v21  ;;  %v9568_v1 = vadd.f32 %v9536_v37, %v9474_v34  ;;  %v7532_v33 = vld [vmem:[#allocation2 + $0xa0] sm:$0xff] }
 0x41e   : > { %9763 = vst.msk [vmem:[%s14580_s7 + $0x28] sm:$0xf] %vm9752_vm12, %v9730_v17 }
 0x41f   : > { %v9631_v46 = vld [vmem:[#allocation2 + $0x58] sm:$0xff]  ;;  %9600 = vst.msk [vmem:[#allocation2 + $0x60] sm:$0xff] %vm450_vm11, %v9568_v1 }
 0x420   : > { %v8693_v48 = vpop.f32.mrf.mxu2  ;;  %v9667_v26 = vadd.f32 %v14879_v30, %v9631_v46  ;;  %v8193_v41 = vpop.f32.mrf.mxu1 }
 0x421   : > { %11095 = vmatmul.msk.bf16.gmra.mxu3 %vm308_vm5, %v9378_v60  ;;  %v8283_v7 = vadd.f32 %v8251_v14, %v8193_v41  ;;  %v7474_v51 = vpop.f32.mrf.mxu0 }
 0x422   : > { %v9699_v57 = vmax.f32 %v9667_v26, 0.0  ;;  %v8750_v15 = vld [vmem:[#allocation2 + $0x70] sm:$0xff]  ;;  %v7561_v40 = vadd.f32 %v7529_v20, %v7474_v51 }
 0x423   : > { %v8782_v43 = vadd.f32 %v8750_v15, %v8691_v61  ;;  %8315 = vst.msk [vmem:[#allocation2 + $0x78] sm:$0xff] %vm450_vm11, %v8283_v7  ;;  %v8252_v0 = vld [vmem:[#allocation2 + $0x80] sm:$0xff] }
 0x424   : > { %v9479_v42 = vpop.f32.mrf.mxu3  ;;  %v9731_v59 = vpack.c.bf16 %v9699_v57, %v9699_v57  ;;  %v9537_v18 = vld [vmem:[#allocation2 + $0x68] sm:$0xff]  ;;  %7593 = vst.msk [vmem:[#allocation2 + $0x88] sm:$0xff] %vm450_vm11, %v7561_v40 }
 0x425   : > { %8814 = vst.msk [vmem:[#allocation2 + $0x70] sm:$0xff] %vm450_vm11, %v8782_v43  ;;  %v9569_v27 = vadd.f32 %v9537_v18, %v9476_v5  ;;  %v7533_v57 = vld [vmem:[#allocation2 + $0xa8] sm:$0xff] }
 0x426   : > { %9764 = vst.msk [vmem:[%s14580_s7 + $0x2c] sm:$0xf] %vm9752_vm12, %v9731_v59  ;;  %v9632_v12 = vld [vmem:[#allocation2 + $0x60] sm:$0xff] }
 0x427   : > { %v9668_v39 = vadd.f32 %v14879_v30, %v9632_v12  ;;  %9601 = vst.msk [vmem:[#allocation2 + $0x68] sm:$0xff] %vm450_vm11, %v9569_v27 }
 0x428   : > { %v8696_v9 = vpop.f32.mrf.mxu2  ;;  %v8196_v49 = vpop.f32.mrf.mxu1 }
 0x429   : > { %v9700_v45 = vmax.f32 %v9668_v39, 0.0  ;;  %v8284_v55 = vadd.f32 %v8252_v0, %v8196_v49  ;;  %v7477_v25 = vpop.f32.mrf.mxu0 }
 0x42a   : > { %v8751_v54 = vld [vmem:[#allocation2 + $0x78] sm:$0xff]  ;;  %v7562_v47 = vadd.f32 %v7530_v6, %v7477_v25  ;;  %v7534_v6 = vld [vmem:[#allocation2 + $0xb0] sm:$0xff] }
 0x42b   : > { %v9732_v4 = vpack.c.bf16 %v9700_v45, %v9700_v45  ;;  %v8783_v36 = vadd.f32 %v8751_v54, %v8693_v48  ;;  %8316 = vst.msk [vmem:[#allocation2 + $0x80] sm:$0xff] %vm450_vm11, %v8284_v55  ;;  %v8253_v24 = vld [vmem:[#allocation2 + $0x88] sm:$0xff] }
 0x42c   : > { %v9481_v32 = vpop.f32.mrf.mxu3  ;;  %v9538_v38 = vld [vmem:[#allocation2 + $0x70] sm:$0xff]  ;;  %7594 = vst.msk [vmem:[#allocation2 + $0x90] sm:$0xff] %vm450_vm11, %v7562_v47 }
 0x42d   : > { %9765 = vst.msk [vmem:[%s14580_s7 + $0x30] sm:$0xf] %vm9752_vm12, %v9732_v4  ;;  %v9570_v13 = vadd.f32 %v9538_v38, %v9479_v42 }
 0x42e   : > { %v9633_v52 = vld [vmem:[#allocation2 + $0x68] sm:$0xff]  ;;  %8815 = vst.msk [vmem:[#allocation2 + $0x78] sm:$0xff] %vm450_vm11, %v8783_v36 }
 0x42f   : > { %v9669_v19 = vadd.f32 %v14879_v30, %v9633_v52  ;;  %9602 = vst.msk [vmem:[#allocation2 + $0x70] sm:$0xff] %vm450_vm11, %v9570_v13 }
 0x430   : > { %v8698_v56 = vpop.f32.mrf.mxu2  ;;  %v8198_v34 = vpop.f32.mrf.mxu1 }
 0x431   : > { %v9701_v3 = vmax.f32 %v9669_v19, 0.0  ;;  %v8285_v16 = vadd.f32 %v8253_v24, %v8198_v34  ;;  %v7479_v58 = vpop.f32.mrf.mxu0 }
 0x432   : > { %v8752_v8 = vld [vmem:[#allocation2 + $0x80] sm:$0xff]  ;;  %v7563_v10 = vadd.f32 %v7531_v62, %v7479_v58  ;;  %v7535_v62 = vld [vmem:[#allocation2 + $0xb8] sm:$0xff] }
 0x433   : > { %v9733_v44 = vpack.c.bf16 %v9701_v3, %v9701_v3  ;;  %v8784_v61 = vadd.f32 %v8752_v8, %v8696_v9  ;;  %8317 = vst.msk [vmem:[#allocation2 + $0x88] sm:$0xff] %vm450_vm11, %v8285_v16  ;;  %v8254_v28 = vld [vmem:[#allocation2 + $0x90] sm:$0xff] }
 0x434   : > { %v9484_v23 = vpop.f32.mrf.mxu3  ;;  %7595 = vst.msk [vmem:[#allocation2 + $0x98] sm:$0xff] %vm450_vm11, %v7563_v10 }
 0x435   : > { %9766 = vst.msk [vmem:[%s14580_s7 + $0x34] sm:$0xf] %vm9752_vm12, %v9733_v44  ;;  %v9539_v63 = vld [vmem:[#allocation2 + $0x78] sm:$0xff] }
 0x436   : > { %v9634_v29 = vld [vmem:[#allocation2 + $0x70] sm:$0xff]  ;;  %8816 = vst.msk [vmem:[#allocation2 + $0x80] sm:$0xff] %vm450_vm11, %v8784_v61  ;;  %v9571_v53 = vadd.f32 %v9539_v63, %v9481_v32 }
 0x437   : > { %v9670_v2 = vadd.f32 %v14879_v30, %v9634_v29 }
 0x438   : > { %v8701_v22 = vpop.f32.mrf.mxu2  ;;  %9603 = vst.msk [vmem:[#allocation2 + $0x78] sm:$0xff] %vm450_vm11, %v9571_v53  ;;  %v8201_v11 = vpop.f32.mrf.mxu1 }
 0x439   : > { %v9702_v31 = vmax.f32 %v9670_v2, 0.0  ;;  %v8286_v50 = vadd.f32 %v8254_v28, %v8201_v11  ;;  %v7482_v35 = vpop.f32.mrf.mxu0 }
 0x43a   : > { %v8753_v21 = vld [vmem:[#allocation2 + $0x88] sm:$0xff]  ;;  %v7564_v5 = vadd.f32 %v7532_v33, %v7482_v35 }
 0x43b   : > { %v9734_v17 = vpack.c.bf16 %v9702_v31, %v9702_v31  ;;  %v8785_v37 = vadd.f32 %v8753_v21, %v8698_v56  ;;  %8318 = vst.msk [vmem:[#allocation2 + $0x90] sm:$0xff] %vm450_vm11, %v8286_v50  ;;  %v8255_v7 = vld [vmem:[#allocation2 + $0x98] sm:$0xff]  ;;  %v7536_v21 = vld [vmem:[#allocation2 + $0xc0] sm:$0xff] }
 0x43c   : > { %v9486_v60 = vpop.f32.mrf.mxu3  ;;  %7596 = vst.msk [vmem:[#allocation2 + $0xa0] sm:$0xff] %vm450_vm11, %v7564_v5 }
 0x43d   : > { %9767 = vst.msk [vmem:[%s14580_s7 + $0x38] sm:$0xf] %vm9752_vm12, %v9734_v17  ;;  %v9540_v1 = vld [vmem:[#allocation2 + $0x80] sm:$0xff] }
 0x43e   : > { %8817 = vst.msk [vmem:[#allocation2 + $0x88] sm:$0xff] %vm450_vm11, %v8785_v37  ;;  %v9572_v46 = vadd.f32 %v9540_v1, %v9484_v23 }
 0x43f   : > { %v9635_v48 = vld [vmem:[#allocation2 + $0x78] sm:$0xff] }
 0x440   : > { %v8703_v26 = vpop.f32.mrf.mxu2  ;;  %v9671_v41 = vadd.f32 %v14879_v30, %v9635_v48  ;;  %9604 = vst.msk [vmem:[#allocation2 + $0x80] sm:$0xff] %vm450_vm11, %v9572_v46  ;;  %v8203_v14 = vpop.f32.mrf.mxu1 }
 0x441   : > { %v8287_v51 = vadd.f32 %v8255_v7, %v8203_v14  ;;  %v7484_v20 = vpop.f32.mrf.mxu0 }
 0x442   : > { %v9703_v15 = vmax.f32 %v9671_v41, 0.0  ;;  %v8754_v40 = vld [vmem:[#allocation2 + $0x90] sm:$0xff]  ;;  %v7565_v43 = vadd.f32 %v7533_v57, %v7484_v20 }
 0x443   : > { %v8786_v42 = vadd.f32 %v8754_v40, %v8701_v22  ;;  %8319 = vst.msk [vmem:[#allocation2 + $0x98] sm:$0xff] %vm450_vm11, %v8287_v51  ;;  %v8256_v45 = vld [vmem:[#allocation2 + $0xa0] sm:$0xff]  ;;  %v7537_v40 = vld [vmem:[#allocation2 + $0xc8] sm:$0xff] }
 0x444   : > { %v9489_v59 = vpop.f32.mrf.mxu3  ;;  %v9735_v18 = vpack.c.bf16 %v9703_v15, %v9703_v15  ;;  %7597 = vst.msk [vmem:[#allocation2 + $0xa8] sm:$0xff] %vm450_vm11, %v7565_v43 }
 0x445   : > { %8818 = vst.msk [vmem:[#allocation2 + $0x90] sm:$0xff] %vm450_vm11, %v8786_v42  ;;  %v9541_v27 = vld [vmem:[#allocation2 + $0x88] sm:$0xff] }
 0x446   : > { %9768 = vst.msk [vmem:[%s14580_s7 + $0x3c] sm:$0xf] %vm9752_vm12, %v9735_v18  ;;  %v9573_v12 = vadd.f32 %v9541_v27, %v9486_v60 }
 0x447   : > { %v9636_v39 = vld [vmem:[#allocation2 + $0x80] sm:$0xff] }
 0x448   : > { %v8706_v9 = vpop.f32.mrf.mxu2  ;;  %v9672_v49 = vadd.f32 %v14879_v30, %v9636_v39  ;;  %9605 = vst.msk [vmem:[#allocation2 + $0x88] sm:$0xff] %vm450_vm11, %v9573_v12  ;;  %v8206_v0 = vpop.f32.mrf.mxu1 }
 0x449   : > { %v8288_v55 = vadd.f32 %v8256_v45, %v8206_v0  ;;  %v7487_v25 = vpop.f32.mrf.mxu0 }
 0x44a   : > { %v9704_v54 = vmax.f32 %v9672_v49, 0.0  ;;  %v8755_v47 = vld [vmem:[#allocation2 + $0x98] sm:$0xff]  ;;  %v7566_v4 = vadd.f32 %v7534_v6, %v7487_v25 }
 0x44b   : > { %v8787_v36 = vadd.f32 %v8755_v47, %v8703_v26  ;;  %8320 = vst.msk [vmem:[#allocation2 + $0xa0] sm:$0xff] %vm450_vm11, %v8288_v55  ;;  %v8257_v3 = vld [vmem:[#allocation2 + $0xa8] sm:$0xff]  ;;  %v7538_v47 = vld [vmem:[#allocation2 + $0xd0] sm:$0xff] }
 0x44c   : > { %v9491_v32 = vpop.f32.mrf.mxu3  ;;  %v9736_v38 = vpack.c.bf16 %v9704_v54, %v9704_v54  ;;  %v9542_v13 = vld [vmem:[#allocation2 + $0x90] sm:$0xff]  ;;  %7598 = vst.msk [vmem:[#allocation2 + $0xb0] sm:$0xff] %vm450_vm11, %v7566_v4 }
 0x44d   : > { %8819 = vst.msk [vmem:[#allocation2 + $0x98] sm:$0xff] %vm450_vm11, %v8787_v36  ;;  %v9574_v52 = vadd.f32 %v9542_v13, %v9489_v59 }
 0x44e   : > { %9769 = vst.msk [vmem:[%s14580_s7 + $0x40] sm:$0xf] %vm9752_vm12, %v9736_v38 }
 0x44f   : > { %v9637_v19 = vld [vmem:[#allocation2 + $0x88] sm:$0xff]  ;;  %9606 = vst.msk [vmem:[#allocation2 + $0x90] sm:$0xff] %vm450_vm11, %v9574_v52 }
 0x450   : > { %v8708_v56 = vpop.f32.mrf.mxu2  ;;  %v9673_v34 = vadd.f32 %v14879_v30, %v9637_v19  ;;  %v8208_v24 = vpop.f32.mrf.mxu1 }
 0x451   : > { %v8289_v16 = vadd.f32 %v8257_v3, %v8208_v24  ;;  %v7489_v58 = vpop.f32.mrf.mxu0 }
 0x452   : > { %v9705_v8 = vmax.f32 %v9673_v34, 0.0  ;;  %v8756_v10 = vld [vmem:[#allocation2 + $0xa0] sm:$0xff]  ;;  %v7567_v44 = vadd.f32 %v7535_v62, %v7489_v58 }
 0x453   : > { %v8788_v61 = vadd.f32 %v8756_v10, %v8706_v9  ;;  %8321 = vst.msk [vmem:[#allocation2 + $0xa8] sm:$0xff] %vm450_vm11, %v8289_v16  ;;  %v8258_v31 = vld [vmem:[#allocation2 + $0xb0] sm:$0xff] }
 0x454   : > { %v9494_v23 = vpop.f32.mrf.mxu3  ;;  %v9737_v63 = vpack.c.bf16 %v9705_v8, %v9705_v8  ;;  %v9543_v29 = vld [vmem:[#allocation2 + $0x98] sm:$0xff]  ;;  %7599 = vst.msk [vmem:[#allocation2 + $0xb8] sm:$0xff] %vm450_vm11, %v7567_v44 }
 0x455   : > { %8820 = vst.msk [vmem:[#allocation2 + $0xa0] sm:$0xff] %vm450_vm11, %v8788_v61  ;;  %v9575_v53 = vadd.f32 %v9543_v29, %v9491_v32  ;;  %v7539_v8 = vld [vmem:[#allocation2 + $0xd8] sm:$0xff] }
 0x456   : > { %9770 = vst.msk [vmem:[%s14580_s7 + $0x44] sm:$0xf] %vm9752_vm12, %v9737_v63  ;;  %v9638_v2 = vld [vmem:[#allocation2 + $0x90] sm:$0xff] }
 0x457   : > { %v9674_v22 = vadd.f32 %v14879_v30, %v9638_v2  ;;  %9607 = vst.msk [vmem:[#allocation2 + $0x98] sm:$0xff] %vm450_vm11, %v9575_v53 }
 0x458   : > { %v8711_v11 = vpop.f32.mrf.mxu2  ;;  %v8211_v28 = vpop.f32.mrf.mxu1 }
 0x459   : > { %v9706_v50 = vmax.f32 %v9674_v22, 0.0  ;;  %v8290_v35 = vadd.f32 %v8258_v31, %v8211_v28  ;;  %v7492_v33 = vpop.f32.mrf.mxu0 }
 0x45a   : > { %v8757_v5 = vld [vmem:[#allocation2 + $0xa8] sm:$0xff]  ;;  %v7568_v17 = vadd.f32 %v7536_v21, %v7492_v33  ;;  %v7540_v21 = vld [vmem:[#allocation2 + $0xe0] sm:$0xff] }
 0x45b   : > { %v9738_v37 = vpack.c.bf16 %v9706_v50, %v9706_v50  ;;  %v8789_v60 = vadd.f32 %v8757_v5, %v8708_v56  ;;  %8322 = vst.msk [vmem:[#allocation2 + $0xb0] sm:$0xff] %vm450_vm11, %v8290_v35  ;;  %v8259_v51 = vld [vmem:[#allocation2 + $0xb8] sm:$0xff] }
 0x45c   : > { %v9496_v1 = vpop.f32.mrf.mxu3  ;;  %v9544_v46 = vld [vmem:[#allocation2 + $0xa0] sm:$0xff]  ;;  %7600 = vst.msk [vmem:[#allocation2 + $0xc0] sm:$0xff] %vm450_vm11, %v7568_v17 }
 0x45d   : > { %9771 = vst.msk [vmem:[%s14580_s7 + $0x48] sm:$0xf] %vm9752_vm12, %v9738_v37  ;;  %v9576_v48 = vadd.f32 %v9544_v46, %v9494_v23 }
 0x45e   : > { %v9639_v26 = vld [vmem:[#allocation2 + $0x98] sm:$0xff]  ;;  %8821 = vst.msk [vmem:[#allocation2 + $0xa8] sm:$0xff] %vm450_vm11, %v8789_v60 }
 0x45f   : > { %v9675_v41 = vadd.f32 %v14879_v30, %v9639_v26  ;;  %9608 = vst.msk [vmem:[#allocation2 + $0xa0] sm:$0xff] %vm450_vm11, %v9576_v48 }
 0x460   : > { %v8713_v14 = vpop.f32.mrf.mxu2  ;;  %v8213_v7 = vpop.f32.mrf.mxu1 }
 0x461   : > { %v9707_v20 = vmax.f32 %v9675_v41, 0.0  ;;  %v8291_v57 = vadd.f32 %v8259_v51, %v8213_v7  ;;  %v7494_v15 = vpop.f32.mrf.mxu0 }
 0x462   : > { %v8758_v43 = vld [vmem:[#allocation2 + $0xb0] sm:$0xff]  ;;  %v7569_v42 = vadd.f32 %v7537_v40, %v7494_v15  ;;  %v7541_v40 = vld [vmem:[#allocation2 + $0xe8] sm:$0xff] }
 0x463   : > { %v9739_v59 = vpack.c.bf16 %v9707_v20, %v9707_v20  ;;  %v8790_v18 = vadd.f32 %v8758_v43, %v8711_v11  ;;  %8323 = vst.msk [vmem:[#allocation2 + $0xb8] sm:$0xff] %vm450_vm11, %v8291_v57  ;;  %v8260_v55 = vld [vmem:[#allocation2 + $0xc0] sm:$0xff] }
 0x464   : > { %v9499_v27 = vpop.f32.mrf.mxu3  ;;  %7601 = vst.msk [vmem:[#allocation2 + $0xc8] sm:$0xff] %vm450_vm11, %v7569_v42 }
 0x465   : > { %9772 = vst.msk [vmem:[%s14580_s7 + $0x4c] sm:$0xf] %vm9752_vm12, %v9739_v59  ;;  %v9545_v12 = vld [vmem:[#allocation2 + $0xa8] sm:$0xff] }
 0x466   : > { %v9640_v39 = vld [vmem:[#allocation2 + $0xa0] sm:$0xff]  ;;  %8822 = vst.msk [vmem:[#allocation2 + $0xb0] sm:$0xff] %vm450_vm11, %v8790_v18  ;;  %v9577_v9 = vadd.f32 %v9545_v12, %v9496_v1 }
 0x467   : > { %v9676_v49 = vadd.f32 %v14879_v30, %v9640_v39 }
 0x468   : > { %v8716_v0 = vpop.f32.mrf.mxu2  ;;  %9609 = vst.msk [vmem:[#allocation2 + $0xa8] sm:$0xff] %vm450_vm11, %v9577_v9  ;;  %v8216_v45 = vpop.f32.mrf.mxu1 }
 0x469   : > { %v9708_v25 = vmax.f32 %v9676_v49, 0.0  ;;  %v8292_v6 = vadd.f32 %v8260_v55, %v8216_v45  ;;  %v7497_v54 = vpop.f32.mrf.mxu0 }
 0x46a   : > { %v8759_v4 = vld [vmem:[#allocation2 + $0xb8] sm:$0xff]  ;;  %v7570_v36 = vadd.f32 %v7538_v47, %v7497_v54  ;;  %v7542_v47 = vld [vmem:[#allocation2 + $0xf0] sm:$0xff] }
 0x46b   : > { %v9740_v32 = vpack.c.bf16 %v9708_v25, %v9708_v25  ;;  %v8791_v38 = vadd.f32 %v8759_v4, %v8713_v14  ;;  %8324 = vst.msk [vmem:[#allocation2 + $0xc0] sm:$0xff] %vm450_vm11, %v8292_v6  ;;  %v8261_v16 = vld [vmem:[#allocation2 + $0xc8] sm:$0xff] }
 0x46c   : > { %v9501_v13 = vpop.f32.mrf.mxu3  ;;  %7602 = vst.msk [vmem:[#allocation2 + $0xd0] sm:$0xff] %vm450_vm11, %v7570_v36 }
 0x46d   : > { %9773 = vst.msk [vmem:[%s14580_s7 + $0x50] sm:$0xf] %vm9752_vm12, %v9740_v32  ;;  %v9546_v52 = vld [vmem:[#allocation2 + $0xb0] sm:$0xff] }
 0x46e   : > { %8823 = vst.msk [vmem:[#allocation2 + $0xb8] sm:$0xff] %vm450_vm11, %v8791_v38  ;;  %v9578_v19 = vadd.f32 %v9546_v52, %v9499_v27 }
 0x46f   : > { %v9641_v56 = vld [vmem:[#allocation2 + $0xa8] sm:$0xff] }
 0x470   : > { %v8718_v34 = vpop.f32.mrf.mxu2  ;;  %v9677_v24 = vadd.f32 %v14879_v30, %v9641_v56  ;;  %9610 = vst.msk [vmem:[#allocation2 + $0xb0] sm:$0xff] %vm450_vm11, %v9578_v19  ;;  %v8218_v3 = vpop.f32.mrf.mxu1 }
 0x471   : > { %v8293_v58 = vadd.f32 %v8261_v16, %v8218_v3  ;;  %v7499_v62 = vpop.f32.mrf.mxu0 }
 0x472   : > { %v9709_v10 = vmax.f32 %v9677_v24, 0.0  ;;  %v8760_v44 = vld [vmem:[#allocation2 + $0xc0] sm:$0xff]  ;;  %v7571_v61 = vadd.f32 %v7539_v8, %v7499_v62 }
 0x473   : > { %v8792_v23 = vadd.f32 %v8760_v44, %v8716_v0  ;;  %8325 = vst.msk [vmem:[#allocation2 + $0xc8] sm:$0xff] %vm450_vm11, %v8293_v58  ;;  %v8262_v50 = vld [vmem:[#allocation2 + $0xd0] sm:$0xff] }
 0x474   : > { %v9504_v63 = vpop.f32.mrf.mxu3  ;;  %v9741_v29 = vpack.c.bf16 %v9709_v10, %v9709_v10  ;;  %7603 = vst.msk [vmem:[#allocation2 + $0xd8] sm:$0xff] %vm450_vm11, %v7571_v61  ;;  %v7543_v10 = vld [vmem:[#allocation2 + $0xf8] sm:$0xff] }
 0x475   : > { %8824 = vst.msk [vmem:[#allocation2 + $0xc0] sm:$0xff] %vm450_vm11, %v8792_v23  ;;  %v9547_v53 = vld [vmem:[#allocation2 + $0xb8] sm:$0xff] }
 0x476   : > { %9774 = vst.msk [vmem:[%s14580_s7 + $0x54] sm:$0xf] %vm9752_vm12, %v9741_v29  ;;  %v9579_v2 = vadd.f32 %v9547_v53, %v9501_v13 }
 0x477   : > { %v9642_v22 = vld [vmem:[#allocation2 + $0xb0] sm:$0xff] }
 0x478   : > { %v8721_v11 = vpop.f32.mrf.mxu2  ;;  %v9678_v28 = vadd.f32 %v14879_v30, %v9642_v22  ;;  %9611 = vst.msk [vmem:[#allocation2 + $0xb8] sm:$0xff] %vm450_vm11, %v9579_v2  ;;  %v8221_v31 = vpop.f32.mrf.mxu1 }
 0x479   : > { %v8294_v35 = vadd.f32 %v8262_v50, %v8221_v31  ;;  %v7502_v33 = vpop.f32.mrf.mxu0 }
 0x47a   : > { %v9710_v5 = vmax.f32 %v9678_v28, 0.0  ;;  %v8761_v17 = vld [vmem:[#allocation2 + $0xc8] sm:$0xff]  ;;  %v7572_v37 = vadd.f32 %v7540_v21, %v7502_v33 }
 0x47b   : > { %v8793_v60 = vadd.f32 %v8761_v17, %v8718_v34  ;;  %8326 = vst.msk [vmem:[#allocation2 + $0xd0] sm:$0xff] %vm450_vm11, %v8294_v35  ;;  %v8263_v51 = vld [vmem:[#allocation2 + $0xd8] sm:$0xff] }
 0x47c   : > { %v9506_v1 = vpop.f32.mrf.mxu3  ;;  %v9742_v46 = vpack.c.bf16 %v9710_v5, %v9710_v5  ;;  %v9548_v48 = vld [vmem:[#allocation2 + $0xc0] sm:$0xff]  ;;  %7604 = vst.msk [vmem:[#allocation2 + $0xe0] sm:$0xff] %vm450_vm11, %v7572_v37 }
 0x47d   : > { %8825 = vst.msk [vmem:[#allocation2 + $0xc8] sm:$0xff] %vm450_vm11, %v8793_v60  ;;  %v9580_v26 = vadd.f32 %v9548_v48, %v9504_v63 }
 0x47e   : > { %9775 = vst.msk [vmem:[%s14580_s7 + $0x58] sm:$0xf] %vm9752_vm12, %v9742_v46 }
 0x47f   : > { %v9643_v41 = vld [vmem:[#allocation2 + $0xb8] sm:$0xff]  ;;  %9612 = vst.msk [vmem:[#allocation2 + $0xc0] sm:$0xff] %vm450_vm11, %v9580_v26 }
 0x480   : > { %v9679_v14 = vadd.f32 %v14879_v30, %v9643_v41  ;;  %v8223_v7 = vpop.f32.mrf.mxu1  ;;  %v8723_v57 = vpop.f32.mrf.mxu2 }
 0x481   : > { %v8295_v20 = vadd.f32 %v8263_v51, %v8223_v7  ;;  %v7504_v15 = vpop.f32.mrf.mxu0 }
 0x482   : > { %v9711_v43 = vmax.f32 %v9679_v14, 0.0  ;;  %v8762_v42 = vld [vmem:[#allocation2 + $0xd0] sm:$0xff]  ;;  %v7573_v59 = vadd.f32 %v7541_v40, %v7504_v15 }
 0x483   : > { %v8794_v18 = vadd.f32 %v8762_v42, %v8721_v11  ;;  %8327 = vst.msk [vmem:[#allocation2 + $0xd8] sm:$0xff] %vm450_vm11, %v8295_v20  ;;  %v8264_v55 = vld [vmem:[#allocation2 + $0xe0] sm:$0xff] }
 0x484   : > { %v9509_v27 = vpop.f32.mrf.mxu3  ;;  %v9743_v12 = vpack.c.bf16 %v9711_v43, %v9711_v43  ;;  %v9549_v39 = vld [vmem:[#allocation2 + $0xc8] sm:$0xff]  ;;  %7605 = vst.msk [vmem:[#allocation2 + $0xe8] sm:$0xff] %vm450_vm11, %v7573_v59 }
 0x485   : > { %8826 = vst.msk [vmem:[#allocation2 + $0xd0] sm:$0xff] %vm450_vm11, %v8794_v18  ;;  %v9581_v9 = vadd.f32 %v9549_v39, %v9506_v1 }
 0x486   : > { %9776 = vst.msk [vmem:[%s14580_s7 + $0x5c] sm:$0xf] %vm9752_vm12, %v9743_v12  ;;  %v9644_v49 = vld [vmem:[#allocation2 + $0xc0] sm:$0xff] }
 0x487   : > { %v9680_v0 = vadd.f32 %v14879_v30, %v9644_v49  ;;  %9613 = vst.msk [vmem:[#allocation2 + $0xc8] sm:$0xff] %vm450_vm11, %v9581_v9 }
 0x488   : > { %v8226_v45 = vpop.f32.mrf.mxu1  ;;  %v8726_v13 = vpop.f32.mrf.mxu2 }
 0x489   : > { %v9712_v25 = vmax.f32 %v9680_v0, 0.0  ;;  %v8296_v6 = vadd.f32 %v8264_v55, %v8226_v45  ;;  %v7507_v54 = vpop.f32.mrf.mxu0 }
 0x48a   : > { %v8763_v4 = vld [vmem:[#allocation2 + $0xd8] sm:$0xff]  ;;  %v7574_v36 = vadd.f32 %v7542_v47, %v7507_v54 }
 0x48b   : > { %v9744_v32 = vpack.c.bf16 %v9712_v25, %v9712_v25  ;;  %v8795_v38 = vadd.f32 %v8763_v4, %v8723_v57  ;;  %8328 = vst.msk [vmem:[#allocation2 + $0xe0] sm:$0xff] %vm450_vm11, %v8296_v6  ;;  %v8265_v16 = vld [vmem:[#allocation2 + $0xe8] sm:$0xff] }
 0x48c   : > { %v9550_v52 = vld [vmem:[#allocation2 + $0xd0] sm:$0xff]  ;;  %v9511_v19 = vpop.f32.mrf.mxu3  ;;  %7606 = vst.msk [vmem:[#allocation2 + $0xf0] sm:$0xff] %vm450_vm11, %v7574_v36 }
 0x48d   : > { %9777 = vst.msk [vmem:[%s14580_s7 + $0x60] sm:$0xf] %vm9752_vm12, %v9744_v32  ;;  %v9582_v56 = vadd.f32 %v9550_v52, %v9509_v27 }
 0x48e   : > { %v9645_v34 = vld [vmem:[#allocation2 + $0xc8] sm:$0xff]  ;;  %8827 = vst.msk [vmem:[#allocation2 + $0xd8] sm:$0xff] %vm450_vm11, %v8795_v38 }
 0x48f   : > { %v9681_v24 = vadd.f32 %v14879_v30, %v9645_v34  ;;  %9614 = vst.msk [vmem:[#allocation2 + $0xd0] sm:$0xff] %vm450_vm11, %v9582_v56 }
 0x490   : > { %v8228_v3 = vpop.f32.mrf.mxu1  ;;  %v8728_v53 = vpop.f32.mrf.mxu2 }
 0x491   : > { %v9713_v58 = vmax.f32 %v9681_v24, 0.0  ;;  %v8297_v62 = vadd.f32 %v8265_v16, %v8228_v3  ;;  %v7509_v8 = vpop.f32.mrf.mxu0 }
 0x492   : > { %v8764_v44 = vld [vmem:[#allocation2 + $0xe0] sm:$0xff]  ;;  %v7575_v61 = vadd.f32 %v7543_v10, %v7509_v8 }
 0x493   : > { %v9745_v23 = vpack.c.bf16 %v9713_v58, %v9713_v58  ;;  %v8796_v63 = vadd.f32 %v8764_v44, %v8726_v13  ;;  %8329 = vst.msk [vmem:[#allocation2 + $0xe8] sm:$0xff] %vm450_vm11, %v8297_v62  ;;  %v8266_v50 = vld [vmem:[#allocation2 + $0xf0] sm:$0xff] }
 0x494   : > { %7607 = vst.msk [vmem:[#allocation2 + $0xf8] sm:$0xff] %vm450_vm11, %v7575_v61  ;;  %v9514_v11 = vpop.f32.mrf.mxu3 }
 0x495   : > { %9778 = vst.msk [vmem:[%s14580_s7 + $0x64] sm:$0xf] %vm9752_vm12, %v9745_v23  ;;  %v9551_v29 = vld [vmem:[#allocation2 + $0xd8] sm:$0xff] }
 0x496   : > { %v9646_v2 = vld [vmem:[#allocation2 + $0xd0] sm:$0xff]  ;;  %8828 = vst.msk [vmem:[#allocation2 + $0xe0] sm:$0xff] %vm450_vm11, %v8796_v63  ;;  %v9583_v22 = vadd.f32 %v9551_v29, %v9511_v19 }
 0x497   : > { %v9682_v28 = vadd.f32 %v14879_v30, %v9646_v2 }
 0x498   : > { %9615 = vst.msk [vmem:[#allocation2 + $0xd8] sm:$0xff] %vm450_vm11, %v9583_v22  ;;  %v8231_v31 = vpop.f32.mrf.mxu1  ;;  %v8731_v46 = vpop.f32.mrf.mxu2 }
 0x499   : > { %v9714_v35 = vmax.f32 %v9682_v28, 0.0  ;;  %v8298_v33 = vadd.f32 %v8266_v50, %v8231_v31 }
 0x49a   : > { %v8765_v21 = vld [vmem:[#allocation2 + $0xe8] sm:$0xff] }
 0x49b   : > { %v9746_v5 = vpack.c.bf16 %v9714_v35, %v9714_v35  ;;  %v8797_v17 = vadd.f32 %v8765_v21, %v8728_v53  ;;  %8330 = vst.msk [vmem:[#allocation2 + $0xf0] sm:$0xff] %vm450_vm11, %v8298_v33  ;;  %v8267_v14 = vld [vmem:[#allocation2 + $0xf8] sm:$0xff] }
 0x49c   : > { %v9516_v26 = vpop.f32.mrf.mxu3 }
 0x49d   : > { %9779 = vst.msk [vmem:[%s14580_s7 + $0x68] sm:$0xf] %vm9752_vm12, %v9746_v5  ;;  %v9552_v37 = vld [vmem:[#allocation2 + $0xe0] sm:$0xff] }
 0x49e   : > { %8829 = vst.msk [vmem:[#allocation2 + $0xe8] sm:$0xff] %vm450_vm11, %v8797_v17  ;;  %v9584_v60 = vadd.f32 %v9552_v37, %v9514_v11 }
 0x49f   : > { %v9647_v1 = vld [vmem:[#allocation2 + $0xd8] sm:$0xff] }
 0x4a0   : > { %v9683_v48 = vadd.f32 %v14879_v30, %v9647_v1  ;;  %9616 = vst.msk [vmem:[#allocation2 + $0xe0] sm:$0xff] %vm450_vm11, %v9584_v60  ;;  %v8233_v41 = vpop.f32.mrf.mxu1  ;;  %v8733_v27 = vpop.f32.mrf.mxu2 }
 0x4a1   : > { %v8299_v7 = vadd.f32 %v8267_v14, %v8233_v41 }
 0x4a2   : > { %v9715_v51 = vmax.f32 %v9683_v48, 0.0  ;;  %v8766_v20 = vld [vmem:[#allocation2 + $0xf0] sm:$0xff] }
 0x4a3   : > { %v8798_v57 = vadd.f32 %v8766_v20, %v8731_v46  ;;  %8331 = vst.msk [vmem:[#allocation2 + $0xf8] sm:$0xff] %vm450_vm11, %v8299_v7 }
 0x4a4   : > { %v9747_v15 = vpack.c.bf16 %v9715_v51, %v9715_v51  ;;  %v9519_v39 = vpop.f32.mrf.mxu3 }
 0x4a5   : > { %8830 = vst.msk [vmem:[#allocation2 + $0xf0] sm:$0xff] %vm450_vm11, %v8798_v57  ;;  %v9553_v40 = vld [vmem:[#allocation2 + $0xe8] sm:$0xff] }
 0x4a6   : > { %9780 = vst.msk [vmem:[%s14580_s7 + $0x6c] sm:$0xf] %vm9752_vm12, %v9747_v15  ;;  %v9585_v43 = vadd.f32 %v9553_v40, %v9516_v26 }
 0x4a7   : > { %v9648_v42 = vld [vmem:[#allocation2 + $0xe0] sm:$0xff] }
 0x4a8   : > { %v9684_v59 = vadd.f32 %v14879_v30, %v9648_v42  ;;  %9617 = vst.msk [vmem:[#allocation2 + $0xe8] sm:$0xff] %vm450_vm11, %v9585_v43 }
 0x4aa   : > { %v9716_v18 = vmax.f32 %v9684_v59, 0.0  ;;  %v8767_v12 = vld [vmem:[#allocation2 + $0xf8] sm:$0xff] }
 0x4ab   : > { %v8799_v9 = vadd.f32 %v8767_v12, %v8733_v27 }
 0x4ac   : > { %v9748_v49 = vpack.c.bf16 %v9716_v18, %v9716_v18  ;;  %v9554_v0 = vld [vmem:[#allocation2 + $0xf0] sm:$0xff]  ;;  %v9521_v47 = vpop.f32.mrf.mxu3 }
 0x4ad   : > { %8831 = vst.msk [vmem:[#allocation2 + $0xf8] sm:$0xff] %vm450_vm11, %v8799_v9  ;;  %v9586_v45 = vadd.f32 %v9554_v0, %v9519_v39 }
 0x4ae   : > { %9781 = vst.msk [vmem:[%s14580_s7 + $0x70] sm:$0xf] %vm9752_vm12, %v9748_v49 }
 0x4af   : > { %v9649_v55 = vld [vmem:[#allocation2 + $0xe8] sm:$0xff]  ;;  %9618 = vst.msk [vmem:[#allocation2 + $0xf0] sm:$0xff] %vm450_vm11, %v9586_v45 }
 0x4b0   : > { %v9685_v25 = vadd.f32 %v14879_v30, %v9649_v55 }
 0x4b2   : > { %v9717_v6 = vmax.f32 %v9685_v25, 0.0 }
 0x4b4   : > { %v9749_v54 = vpack.c.bf16 %v9717_v6, %v9717_v6  ;;  %v9555_v4 = vld [vmem:[#allocation2 + $0xf8] sm:$0xff] }
 0x4b5   : > { %v9587_v36 = vadd.f32 %v9555_v4, %v9521_v47 }
 0x4b6   : > { %9782 = vst.msk [vmem:[%s14580_s7 + $0x74] sm:$0xf] %vm9752_vm12, %v9749_v54  ;;  %v9650_v32 = vld [vmem:[#allocation2 + $0xf0] sm:$0xff] }
 0x4b7   : > { %v9686_v38 = vadd.f32 %v14879_v30, %v9650_v32  ;;  %9619 = vst.msk [vmem:[#allocation2 + $0xf8] sm:$0xff] %vm450_vm11, %v9587_v36 }
 0x4b9   : > { %v9718_v13 = vmax.f32 %v9686_v38, 0.0 }
 0x4bb   : > { %v9750_v52 = vpack.c.bf16 %v9718_v13, %v9718_v13 }
 0x4bd   : > { %9783 = vst.msk [vmem:[%s14580_s7 + $0x78] sm:$0xf] %vm9752_vm12, %v9750_v52 }
 0x4be   : > { %v9651_v19 = vld [vmem:[#allocation2 + $0xf8] sm:$0xff] }
 0x4bf   : > { %v9687_v56 = vadd.f32 %v14879_v30, %v9651_v19 }
 0x4c1   : > { %v9719_v34 = vmax.f32 %v9687_v56, 0.0 }
 0x4c3   : > { %v9751_v24 = vpack.c.bf16 %v9719_v34, %v9719_v34 }
 0x4c5   : > { %9784 = vst.msk [vmem:[%s14580_s7 + $0x7c] sm:$0xf] %vm9752_vm12, %v9751_v24 }
 0x4c6   : > { %11269 = shalt.err (!%p11266_p5)
}
 0x4c7   : > { %s11322_s4 = smov 64   ;;  %s11323_s7 = smov 4  }
 0x4c8   : > { %11183 = dma.vmem_to_hbm [thread:$0]  (%p11384_p4), %s9802_s19, 2048, %s9804_s21, %s9786_s15, %s11322_s4, %s11322_s4, %s11323_s7  }
 0x4c9 PF: > { %p11189_p6 = scmp.ge.s32.totalorder %s11320_s17, 2  ;;  %s9818_s6 = sand.u32 1, %s11300_s12  }
 0x4ca   : > { %s9819_s8 = scalar_lea.sflag [#allocation4], %s9818_s6 }
 0x4cb   : > { %p11186_p7 = pnand %p11189_p6, %p11391_p8 }
 0x4cd   : > { %p11187_p9 = pneg %p11186_p7 }
 0x4cf   : > { %11295 = dma.done.wait (%p11187_p9), %s9819_s8, 2048  }
 0x4d0   : > { %11297 = vsyncadd (%p11187_p9), %s9819_s8, 4294965248  ;;  %s16_s17 = sadd.s32 1, %s11320_s17   ;;  %s15074_s12 = smov %s11304_s13 }
 0x4d1   : > { %p13_p10 = scmp.ge.s32.totalorder %s16_s17, 4   ;;  %s15075_s13 = smov %s11308_s14 }
 0x4d2   : > { %s15076_s14 = smov %s11397_s25  ;;  %s15077_s15 = smov %s11316_s16 }
 0x4d3   : > { %s15078_s16 = smov %s15080_s20  ;;  %15 = sbr.rel (!%p13_p10) target bundleno = 4 (0x4), region = 86 }
 0x4d8   :  { %9825 = vsyncpa [#allocation4], 1 }
 0x4d9   :  { %9827 = vsyncpa [#allocation4 + $0x1], 1 }

</bundles_post_ra>
